<compile_context>
chip_gen: v6e
topology: v6e:2x2x1
jax: 0.10.0
libtpu: 0.0.40
codegen_flags: <defaults>
</compile_context>

<pallas_src>
import functools

import jax
import jax.numpy as jnp
from jax.experimental import pallas as pl
from jax.experimental.pallas import tpu as pltpu


def _ceil_to(x, m):
    return ((x + m - 1) // m) * m


_PM = 2      # max conv padding over all layers (5x5 convs -> pad 2)
_BASE = 8    # slab start row inside the scratch (sublane aligned, >= _PM)


# ----------------------------------------------------------------------------
# Fused Pallas kernel: whole 4-layer segnet for Bt images per grid step
# ----------------------------------------------------------------------------
def _segnet_kernel(x_ref, m1_ref, b1_ref, m2_ref, b2_ref, m3_ref, b3_ref,
                   m4_ref, b4_ref, o_ref, pad_ref, *, H, Bt, slot, layer_cfgs):
    # Slab layout (R = Bt*slot rows, slot = H + 2*_PM):
    #   image i's H data rows live at slab rows [i*slot, i*slot+H), followed
    #   by 2*_PM zero gap rows that provide height padding for BOTH
    #   neighbouring images.  The slab sits at scratch rows [_BASE, _BASE+R);
    #   rows above/below stay zero forever (top pad of image 0 / over-read).
    R = Bt * slot
    m_refs = (m1_ref, m2_ref, m3_ref, m4_ref)
    b_refs = (b1_ref, b2_ref, b3_ref, b4_ref)

    # ONE memset per grid step (not per layer): zeroes gap rows, boundary rows
    # and the unused layer-1 columns.  Interior rows are overwritten below.
    pad_ref[...] = jnp.zeros_like(pad_ref)

    # Place each image's (H, W*C0p) input block into its slot.
    cin0_w = x_ref.shape[-1]
    for i in range(Bt):
        pad_ref[pl.ds(_BASE + i * slot, H), pl.ds(0, cin0_w)] = (
            x_ref[i].astype(pad_ref.dtype))

    # (R, 1) mask: True on data rows, False on gap rows (which must stay zero
    # so they act as the next layer's height padding).
    rin = jax.lax.broadcasted_iota(jnp.int32, (R, 1), 0) % slot
    data_row = rin < H

    n_layers = len(layer_cfgs)
    for li, (cfg, m_ref, b_ref) in enumerate(zip(layer_cfgs, m_refs, b_refs)):
        K, p, cin_w, cout_w, relu = cfg

        # Bias folded into the accumulator init (no separate full-width add).
        acc = jnp.broadcast_to(b_ref[...], (R, cout_w)).astype(jnp.float32)

        # K large matmuls over sublane-shifted views of the slab; width
        # padding is already folded into the band matrices.  LHS is cast to
        # bf16 for the native MXU path, accumulation stays f32.
        for ky in range(K):                                    # static: unrolled
            lhs = pad_ref[pl.ds(_BASE - p + ky, R), pl.ds(0, cin_w)]
            acc = acc + jnp.dot(lhs.astype(jnp.bfloat16), m_ref[ky],
                                preferred_element_type=jnp.float32)

        if relu:
            acc = jnp.maximum(acc, 0.0)

        if li < n_layers - 1:
            # Zero the gap rows and write back as the next layer's slab.
            acc = jnp.where(data_row, acc, 0.0)
            pad_ref[pl.ds(_BASE, R), pl.ds(0, cout_w)] = acc.astype(pad_ref.dtype)
        else:
            # Final layer: extract each image's data rows straight to output.
            for i in range(Bt):
                o_ref[i] = acc[i * slot:i * slot + H, :].astype(o_ref.dtype)


# ----------------------------------------------------------------------------
# Parameter init (PyTorch-shaped) + one-time repack into bf16 band matrices
# ----------------------------------------------------------------------------
_LAYER_DEFS = [("1", 3, 16, 5), ("2", 16, 16, 5), ("3", 16, 16, 5)]


def init_segnet_params(key, out_channel=10):
    """Deterministic init mirroring PyTorch Conv2d (Cout,Cin,K,K) shapes."""
    cfgs = _LAYER_DEFS + [("4", 16, out_channel, 3)]
    params = {}
    for name, cin, cout, k in cfgs:
        key, kw, kb = jax.random.split(key, 3)
        bound = 1.0 / jnp.sqrt(cin * k * k)          # PyTorch default uniform
        w_torch = jax.random.uniform(kw, (cout, cin, k, k), jnp.float32,
                                     -bound, bound)
        b = jax.random.uniform(kb, (cout,), jnp.float32, -bound, bound)
        params[f"w{name}"] = jnp.transpose(w_torch, (2, 3, 1, 0))  # (K,K,Cin,Cout)
        params[f"b{name}"] = b
    return params


def pack_segnet_params(params, W, out_channel=10):
    """One-time repack of conv weights into bf16 lane-dense band matrices.

    For each layer and kernel row ky, M[ky][(w+kx-pad)*Cin + ci, w*Coutp + co]
    = weight[ky, kx, ci, co]; entries with w+kx-pad outside [0, W) are dropped
    (that IS the width zero-padding).  The kernel then computes
        out[r] = sum_ky slab[r + ky - pad] @ M[ky] + bias.
    The Cin*W row axis is zero-padded to a multiple of 128 lanes.
    """
    cfgs = _LAYER_DEFS + [("4", 16, out_channel, 3)]
    packed = {}
    for name, cin, cout, k in cfgs:
        coutp = _ceil_to(cout, 8)                    # W*coutp -> multiple of 128
        cinp_w = _ceil_to(W * cin, 128)
        pad = (k - 1) // 2
        w = params[f"w{name}"].astype(jnp.float32)   # (K, K, Cin, Cout)
        b = params[f"b{name}"].astype(jnp.float32)   # (Cout,)
        w = jnp.pad(w, ((0, 0), (0, 0), (0, 0), (0, coutp - cout)))
        mats = []
        for ky in range(k):
            m_ky = jnp.zeros((W * cin, W * coutp), jnp.float32)
            for kx in range(k):
                # P[w_in, w_out] = 1  iff  w_in == w_out + (kx - pad)
                P = jnp.eye(W, W, k=-(kx - pad), dtype=jnp.float32)
                m_ky = m_ky + jnp.einsum("io,cd->icod", P, w[ky, kx]
                                         ).reshape(W * cin, W * coutp)
            mats.append(m_ky)
        m = jnp.stack(mats)                          # (K, W*Cin, W*Coutp)
        m = jnp.pad(m, ((0, 0), (0, cinp_w - W * cin), (0, 0)))
        packed[f"m{name}"] = m.astype(jnp.bfloat16)  # bf16 MXU weights
        b = jnp.pad(b, (0, coutp - cout))
        packed[f"b{name}"] = jnp.tile(b, W)[None, :].astype(jnp.float32)
    return packed


# ----------------------------------------------------------------------------
# Forward pass: one pallas_call for the whole network
# ----------------------------------------------------------------------------
@functools.partial(jax.jit, static_argnames=("out_channel", "batch_tile"))
def segnet_forward(x_nchw, packed, out_channel=10, batch_tile=8):
    B, C0, H, W = x_nchw.shape
    coutp = _ceil_to(out_channel, 8)
    cin0p_w = _ceil_to(W * C0, 128)
    c16_w = W * 16

    # Bt images per grid step: M = Bt*(H+4) ~ 160 for Bt=8 (raise batch_tile to
    # ~12 on v6e/v7x with large batches for M ~ 256; keep >=2 grid steps).
    Bt = max(1, min(batch_tile, B))
    Bpad = _ceil_to(B, Bt)
    slot = H + 2 * _PM
    R = Bt * slot
    tot_rows = _ceil_to(_BASE + R + _PM, 8)
    cmax_w = max(cin0p_w, c16_w, W * coutp)

    layer_cfgs = (
        (5, 2, cin0p_w, c16_w, True),
        (5, 2, c16_w, c16_w, True),
        (5, 2, c16_w, c16_w, True),
        (3, 1, c16_w, W * coutp, False),
    )

    # NCHW -> lane-dense (B, H, W*C0), pad lanes to 128 and batch to Bpad.
    x = jnp.transpose(x_nchw, (0, 2, 3, 1)).reshape(B, H, W * C0)
    x = x.astype(jnp.float32)
    x = jnp.pad(x, ((0, Bpad - B), (0, 0), (0, cin0p_w - W * C0)))

    kernel = functools.partial(_segnet_kernel, H=H, Bt=Bt, slot=slot,
                               layer_cfgs=layer_cfgs)

    def full_spec(arr):          # whole array resident in VMEM, index-invariant
        return pl.BlockSpec(arr.shape, lambda b: (0,) * arr.ndim)

    out = pl.pallas_call(
        kernel,
        out_shape=jax.ShapeDtypeStruct((Bpad, H, W * coutp), jnp.float32),
        grid=(Bpad // Bt,),
        in_specs=[
            pl.BlockSpec((Bt, H, cin0p_w), lambda b: (b, 0, 0)),
            full_spec(packed["m1"]), full_spec(packed["b1"]),
            full_spec(packed["m2"]), full_spec(packed["b2"]),
            full_spec(packed["m3"]), full_spec(packed["b3"]),
            full_spec(packed["m4"]), full_spec(packed["b4"]),
        ],
        out_specs=pl.BlockSpec((Bt, H, W * coutp), lambda b: (b, 0, 0)),
        scratch_shapes=[pltpu.VMEM((tot_rows, cmax_w), jnp.float32)],
        compiler_params=pltpu.CompilerParams(
            dimension_semantics=("parallel",),   # batch tiles over both v7x TCs
        ),
    )(x, packed["m1"], packed["b1"], packed["m2"], packed["b2"],
      packed["m3"], packed["b3"], packed["m4"], packed["b4"])

    # (Bpad, H, W*coutp) -> drop batch/channel padding -> NCHW
    out = out[:B].reshape(B, H, W, coutp)[..., :out_channel]
    return jnp.transpose(out, (0, 3, 1, 2))


# ----------------------------------------------------------------------------
# Pure-JAX reference (lax.conv) for correctness check
# ----------------------------------------------------------------------------
def _conv_ref(x_nchw, w_kkio, b, pad):
    w_oihw = jnp.transpose(w_kkio, (3, 2, 0, 1))
    y = jax.lax.conv_general_dilated(
        x_nchw, w_oihw, window_strides=(1, 1),
        padding=[(pad, pad), (pad, pad)],
        dimension_numbers=("NCHW", "OIHW", "NCHW"))
    return y + b[None, :, None, None]


def segnet_ref(x_nchw, params):
    y = jnp.maximum(_conv_ref(x_nchw, params["w1"], params["b1"], 2), 0.0)
    y = jnp.maximum(_conv_ref(y, params["w2"], params["b2"], 2), 0.0)
    y = jnp.maximum(_conv_ref(y, params["w3"], params["b3"], 2), 0.0)
    y = _conv_ref(y, params["w4"], params["b4"], 1)
    return y


if __name__ == "__main__":
    key = jax.random.PRNGKey(0)
    key, kp, kx = jax.random.split(key, 3)

    out_channel = 10
    B, C, H, W = 16, 3, 16, 16            # >=2 parallel grid steps at Bt=8
    params = init_segnet_params(kp, out_channel=out_channel)
    x = jax.random.normal(kx, (B, C, H, W), jnp.float32)   # NCHW, like PyTorch

    # One-time weight repack (bf16 band matrices + tiled f32 biases).
    packed = pack_segnet_params(params, W=W, out_channel=out_channel)

    out = segnet_forward(x, packed, out_channel=out_channel, batch_tile=8)
    out = jax.block_until_ready(out)

    ref = segnet_ref(x, params)
    assert out.shape == (B, out_channel, H, W), out.shape
    # bf16 weights / LHS (f32 accumulation): relaxed tolerance vs f32 reference.
    assert jnp.allclose(out, ref, rtol=2e-2, atol=2e-2), \
        float(jnp.max(jnp.abs(out - ref)))

    print("KERNEL_OK")
</pallas_src>

<mosaic_0001>
module attributes {stable_mosaic.version = 11 : i64} {
  func.func @_segnet_kernel(%arg0: i32, %arg1: memref<8x16x128xf32, #tpu.memory_space<vmem>>, %arg2: memref<5x128x256xbf16, #tpu.memory_space<vmem>>, %arg3: memref<1x256xf32, #tpu.memory_space<vmem>>, %arg4: memref<5x256x256xbf16, #tpu.memory_space<vmem>>, %arg5: memref<1x256xf32, #tpu.memory_space<vmem>>, %arg6: memref<5x256x256xbf16, #tpu.memory_space<vmem>>, %arg7: memref<1x256xf32, #tpu.memory_space<vmem>>, %arg8: memref<3x256x256xbf16, #tpu.memory_space<vmem>>, %arg9: memref<1x256xf32, #tpu.memory_space<vmem>>, %arg10: memref<8x16x256xf32, #tpu.memory_space<vmem>>, %arg11: memref<176x256xf32, #tpu.memory_space<vmem>>) attributes {dimension_semantics = [#tpu.dimension_semantics<parallel>], iteration_bounds = array<i64: 2>, scalar_prefetch = 0 : i64, scratch_operands = 1 : i64, tpu.core_type = #tpu.core_type<tc>, window_params = [{transform_indices = @transform_0, window_bounds = array<i64: 8, 16, 128>}, {pipeline_mode = #tpu.pipeline_mode<synchronous>, transform_indices = @transform_1, window_bounds = array<i64: 5, 128, 256>}, {pipeline_mode = #tpu.pipeline_mode<synchronous>, transform_indices = @transform_2, window_bounds = array<i64: 1, 256>}, {pipeline_mode = #tpu.pipeline_mode<synchronous>, transform_indices = @transform_3, window_bounds = array<i64: 5, 256, 256>}, {pipeline_mode = #tpu.pipeline_mode<synchronous>, transform_indices = @transform_4, window_bounds = array<i64: 1, 256>}, {pipeline_mode = #tpu.pipeline_mode<synchronous>, transform_indices = @transform_5, window_bounds = array<i64: 5, 256, 256>}, {pipeline_mode = #tpu.pipeline_mode<synchronous>, transform_indices = @transform_6, window_bounds = array<i64: 1, 256>}, {pipeline_mode = #tpu.pipeline_mode<synchronous>, transform_indices = @transform_7, window_bounds = array<i64: 3, 256, 256>}, {pipeline_mode = #tpu.pipeline_mode<synchronous>, transform_indices = @transform_8, window_bounds = array<i64: 1, 256>}, {transform_indices = @transform_9, window_bounds = array<i64: 8, 16, 256>}]} {
    %cst = arith.constant 0.000000e+00 : f32
    %0 = vector.broadcast %cst : f32 to vector<176x256xf32>
    %c0 = arith.constant 0 : index
    %c0_0 = arith.constant 0 : index
    %1 = vector.load %arg11[%c0, %c0_0] : memref<176x256xf32, #tpu.memory_space<vmem>>, vector<176x256xf32>
    tpu.vector_store %arg11[%c0, %c0_0], %0 {strides = array<i32>} : memref<176x256xf32, #tpu.memory_space<vmem>>, vector<176x256xf32>,
    %c0_1 = arith.constant 0 : index
    %c0_2 = arith.constant 0 : index
    %c0_3 = arith.constant 0 : index
    %2 = vector.load %arg1[%c0_1, %c0_2, %c0_3] : memref<8x16x128xf32, #tpu.memory_space<vmem>>, vector<1x16x128xf32>
    %3 = vector.shape_cast %2 : vector<1x16x128xf32> to vector<16x128xf32>
    %c8 = arith.constant 8 : index
    %c0_4 = arith.constant 0 : index
    %4 = vector.load %arg11[%c8, %c0_4] : memref<176x256xf32, #tpu.memory_space<vmem>>, vector<16x128xf32>
    tpu.vector_store %arg11[%c8, %c0_4], %3 {strides = array<i32>} : memref<176x256xf32, #tpu.memory_space<vmem>>, vector<16x128xf32>,
    %c1 = arith.constant 1 : index
    %c0_5 = arith.constant 0 : index
    %c0_6 = arith.constant 0 : index
    %5 = vector.load %arg1[%c1, %c0_5, %c0_6] : memref<8x16x128xf32, #tpu.memory_space<vmem>>, vector<1x16x128xf32>
    %6 = vector.shape_cast %5 : vector<1x16x128xf32> to vector<16x128xf32>
    %c28 = arith.constant 28 : index
    %c0_7 = arith.constant 0 : index
    %7 = vector.load %arg11[%c28, %c0_7] : memref<176x256xf32, #tpu.memory_space<vmem>>, vector<16x128xf32>
    tpu.vector_store %arg11[%c28, %c0_7], %6 {strides = array<i32>} : memref<176x256xf32, #tpu.memory_space<vmem>>, vector<16x128xf32>,
    %c2 = arith.constant 2 : index
    %c0_8 = arith.constant 0 : index
    %c0_9 = arith.constant 0 : index
    %8 = vector.load %arg1[%c2, %c0_8, %c0_9] : memref<8x16x128xf32, #tpu.memory_space<vmem>>, vector<1x16x128xf32>
    %9 = vector.shape_cast %8 : vector<1x16x128xf32> to vector<16x128xf32>
    %c48 = arith.constant 48 : index
    %c0_10 = arith.constant 0 : index
    %10 = vector.load %arg11[%c48, %c0_10] : memref<176x256xf32, #tpu.memory_space<vmem>>, vector<16x128xf32>
    tpu.vector_store %arg11[%c48, %c0_10], %9 {strides = array<i32>} : memref<176x256xf32, #tpu.memory_space<vmem>>, vector<16x128xf32>,
    %c3 = arith.constant 3 : index
    %c0_11 = arith.constant 0 : index
    %c0_12 = arith.constant 0 : index
    %11 = vector.load %arg1[%c3, %c0_11, %c0_12] : memref<8x16x128xf32, #tpu.memory_space<vmem>>, vector<1x16x128xf32>
    %12 = vector.shape_cast %11 : vector<1x16x128xf32> to vector<16x128xf32>
    %c68 = arith.constant 68 : index
    %c0_13 = arith.constant 0 : index
    %13 = vector.load %arg11[%c68, %c0_13] : memref<176x256xf32, #tpu.memory_space<vmem>>, vector<16x128xf32>
    tpu.vector_store %arg11[%c68, %c0_13], %12 {strides = array<i32>} : memref<176x256xf32, #tpu.memory_space<vmem>>, vector<16x128xf32>,
    %c4 = arith.constant 4 : index
    %c0_14 = arith.constant 0 : index
    %c0_15 = arith.constant 0 : index
    %14 = vector.load %arg1[%c4, %c0_14, %c0_15] : memref<8x16x128xf32, #tpu.memory_space<vmem>>, vector<1x16x128xf32>
    %15 = vector.shape_cast %14 : vector<1x16x128xf32> to vector<16x128xf32>
    %c88 = arith.constant 88 : index
    %c0_16 = arith.constant 0 : index
    %16 = vector.load %arg11[%c88, %c0_16] : memref<176x256xf32, #tpu.memory_space<vmem>>, vector<16x128xf32>
    tpu.vector_store %arg11[%c88, %c0_16], %15 {strides = array<i32>} : memref<176x256xf32, #tpu.memory_space<vmem>>, vector<16x128xf32>,
    %c5 = arith.constant 5 : index
    %c0_17 = arith.constant 0 : index
    %c0_18 = arith.constant 0 : index
    %17 = vector.load %arg1[%c5, %c0_17, %c0_18] : memref<8x16x128xf32, #tpu.memory_space<vmem>>, vector<1x16x128xf32>
    %18 = vector.shape_cast %17 : vector<1x16x128xf32> to vector<16x128xf32>
    %c108 = arith.constant 108 : index
    %c0_19 = arith.constant 0 : index
    %19 = vector.load %arg11[%c108, %c0_19] : memref<176x256xf32, #tpu.memory_space<vmem>>, vector<16x128xf32>
    tpu.vector_store %arg11[%c108, %c0_19], %18 {strides = array<i32>} : memref<176x256xf32, #tpu.memory_space<vmem>>, vector<16x128xf32>,
    %c6 = arith.constant 6 : index
    %c0_20 = arith.constant 0 : index
    %c0_21 = arith.constant 0 : index
    %20 = vector.load %arg1[%c6, %c0_20, %c0_21] : memref<8x16x128xf32, #tpu.memory_space<vmem>>, vector<1x16x128xf32>
    %21 = vector.shape_cast %20 : vector<1x16x128xf32> to vector<16x128xf32>
    %c128 = arith.constant 128 : index
    %c0_22 = arith.constant 0 : index
    %22 = vector.load %arg11[%c128, %c0_22] : memref<176x256xf32, #tpu.memory_space<vmem>>, vector<16x128xf32>
    tpu.vector_store %arg11[%c128, %c0_22], %21 {strides = array<i32>} : memref<176x256xf32, #tpu.memory_space<vmem>>, vector<16x128xf32>,
    %c7 = arith.constant 7 : index
    %c0_23 = arith.constant 0 : index
    %c0_24 = arith.constant 0 : index
    %23 = vector.load %arg1[%c7, %c0_23, %c0_24] : memref<8x16x128xf32, #tpu.memory_space<vmem>>, vector<1x16x128xf32>
    %24 = vector.shape_cast %23 : vector<1x16x128xf32> to vector<16x128xf32>
    %c148 = arith.constant 148 : index
    %c0_25 = arith.constant 0 : index
    %25 = vector.load %arg11[%c148, %c0_25] : memref<176x256xf32, #tpu.memory_space<vmem>>, vector<16x128xf32>
    tpu.vector_store %arg11[%c148, %c0_25], %24 {strides = array<i32>} : memref<176x256xf32, #tpu.memory_space<vmem>>, vector<16x128xf32>,
    %26 = tpu.iota {dimensions = array<i32: 0>} : vector<160x1xi32>
    %c20_i32 = arith.constant 20 : i32
    %c0_i32 = arith.constant 0 : i32
    %27 = arith.cmpi eq, %c20_i32, %c0_i32 : i32
    %c1_i32 = arith.constant 1 : i32
    %28 = arith.select %27, %c1_i32, %c20_i32 : i32
    %29 = vector.broadcast %28 : i32 to vector<160x1xi32>
    %30 = arith.remsi %26, %29 : vector<160x1xi32>
    %c0_i32_26 = arith.constant 0 : i32
    %31 = vector.broadcast %c0_i32_26 : i32 to vector<160x1xi32>
    %32 = arith.cmpi ne, %30, %31 : vector<160x1xi32>
    %c0_i32_27 = arith.constant 0 : i32
    %33 = vector.broadcast %c0_i32_27 : i32 to vector<160x1xi32>
    %34 = arith.cmpi slt, %30, %33 : vector<160x1xi32>
    %c0_i32_28 = arith.constant 0 : i32
    %35 = arith.cmpi slt, %28, %c0_i32_28 : i32
    %36 = vector.broadcast %35 : i1 to vector<160x1xi1>
    %37 = vector.broadcast %36 : vector<160x1xi1> to vector<160x1xi1>
    %38 = arith.xori %34, %37 : vector<160x1xi1>
    %39 = arith.andi %38, %32 : vector<160x1xi1>
    %40 = vector.broadcast %28 : i32 to vector<160x1xi32>
    %41 = arith.addi %30, %40 : vector<160x1xi32>
    %42 = arith.select %39, %41, %30 : vector<160x1xi1>, vector<160x1xi32>
    %c16_i32 = arith.constant 16 : i32
    %43 = vector.broadcast %c16_i32 : i32 to vector<160x1xi32>
    %44 = arith.cmpi slt, %42, %43 : vector<160x1xi32>
    %c0_29 = arith.constant 0 : index
    %c0_30 = arith.constant 0 : index
    %45 = vector.load %arg3[%c0_29, %c0_30] : memref<1x256xf32, #tpu.memory_space<vmem>>, vector<1x256xf32>
    %46 = vector.shape_cast %45 : vector<1x256xf32> to vector<1x256xf32>
    %47 = vector.broadcast %46 : vector<1x256xf32> to vector<160x256xf32>
    %c6_31 = arith.constant 6 : index
    %c0_32 = arith.constant 0 : index
    %48 = vector.load %arg11[%c6_31, %c0_32] : memref<176x256xf32, #tpu.memory_space<vmem>>, vector<160x128xf32>
    %49 = arith.truncf %48 : vector<160x128xf32> to vector<160x128xbf16>
    %c0_33 = arith.constant 0 : index
    %c0_34 = arith.constant 0 : index
    %c0_35 = arith.constant 0 : index
    %50 = vector.load %arg2[%c0_33, %c0_34, %c0_35] : memref<5x128x256xbf16, #tpu.memory_space<vmem>>, vector<1x128x256xbf16>
    %51 = vector.shape_cast %50 : vector<1x128x256xbf16> to vector<128x256xbf16>
    %cst_36 = arith.constant dense<0.000000e+00> : vector<160x256xf32>
    %52 = tpu.matmul %49, %51, %cst_36 {dimension_numbers = #tpu.dot_dimension_numbers<[1], [0], [0], [1], [0, 0, 1, 1], [], []>} : vector<160x128xbf16>, vector<128x256xbf16>, vector<160x256xf32> -> vector<160x256xf32>
    %53 = arith.addf %47, %52 : vector<160x256xf32>
    %c7_37 = arith.constant 7 : index
    %c0_38 = arith.constant 0 : index
    %54 = vector.load %arg11[%c7_37, %c0_38] : memref<176x256xf32, #tpu.memory_space<vmem>>, vector<160x128xf32>
    %55 = arith.truncf %54 : vector<160x128xf32> to vector<160x128xbf16>
    %c1_39 = arith.constant 1 : index
    %c0_40 = arith.constant 0 : index
    %c0_41 = arith.constant 0 : index
    %56 = vector.load %arg2[%c1_39, %c0_40, %c0_41] : memref<5x128x256xbf16, #tpu.memory_space<vmem>>, vector<1x128x256xbf16>
    %57 = vector.shape_cast %56 : vector<1x128x256xbf16> to vector<128x256xbf16>
    %cst_42 = arith.constant dense<0.000000e+00> : vector<160x256xf32>
    %58 = tpu.matmul %55, %57, %cst_42 {dimension_numbers = #tpu.dot_dimension_numbers<[1], [0], [0], [1], [0, 0, 1, 1], [], []>} : vector<160x128xbf16>, vector<128x256xbf16>, vector<160x256xf32> -> vector<160x256xf32>
    %59 = arith.addf %53, %58 : vector<160x256xf32>
    %c8_43 = arith.constant 8 : index
    %c0_44 = arith.constant 0 : index
    %60 = vector.load %arg11[%c8_43, %c0_44] : memref<176x256xf32, #tpu.memory_space<vmem>>, vector<160x128xf32>
    %61 = arith.truncf %60 : vector<160x128xf32> to vector<160x128xbf16>
    %c2_45 = arith.constant 2 : index
    %c0_46 = arith.constant 0 : index
    %c0_47 = arith.constant 0 : index
    %62 = vector.load %arg2[%c2_45, %c0_46, %c0_47] : memref<5x128x256xbf16, #tpu.memory_space<vmem>>, vector<1x128x256xbf16>
    %63 = vector.shape_cast %62 : vector<1x128x256xbf16> to vector<128x256xbf16>
    %cst_48 = arith.constant dense<0.000000e+00> : vector<160x256xf32>
    %64 = tpu.matmul %61, %63, %cst_48 {dimension_numbers = #tpu.dot_dimension_numbers<[1], [0], [0], [1], [0, 0, 1, 1], [], []>} : vector<160x128xbf16>, vector<128x256xbf16>, vector<160x256xf32> -> vector<160x256xf32>
    %65 = arith.addf %59, %64 : vector<160x256xf32>
    %c9 = arith.constant 9 : index
    %c0_49 = arith.constant 0 : index
    %66 = vector.load %arg11[%c9, %c0_49] : memref<176x256xf32, #tpu.memory_space<vmem>>, vector<160x128xf32>
    %67 = arith.truncf %66 : vector<160x128xf32> to vector<160x128xbf16>
    %c3_50 = arith.constant 3 : index
    %c0_51 = arith.constant 0 : index
    %c0_52 = arith.constant 0 : index
    %68 = vector.load %arg2[%c3_50, %c0_51, %c0_52] : memref<5x128x256xbf16, #tpu.memory_space<vmem>>, vector<1x128x256xbf16>
    %69 = vector.shape_cast %68 : vector<1x128x256xbf16> to vector<128x256xbf16>
    %cst_53 = arith.constant dense<0.000000e+00> : vector<160x256xf32>
    %70 = tpu.matmul %67, %69, %cst_53 {dimension_numbers = #tpu.dot_dimension_numbers<[1], [0], [0], [1], [0, 0, 1, 1], [], []>} : vector<160x128xbf16>, vector<128x256xbf16>, vector<160x256xf32> -> vector<160x256xf32>
    %71 = arith.addf %65, %70 : vector<160x256xf32>
    %c10 = arith.constant 10 : index
    %c0_54 = arith.constant 0 : index
    %72 = vector.load %arg11[%c10, %c0_54] : memref<176x256xf32, #tpu.memory_space<vmem>>, vector<160x128xf32>
    %73 = arith.truncf %72 : vector<160x128xf32> to vector<160x128xbf16>
    %c4_55 = arith.constant 4 : index
    %c0_56 = arith.constant 0 : index
    %c0_57 = arith.constant 0 : index
    %74 = vector.load %arg2[%c4_55, %c0_56, %c0_57] : memref<5x128x256xbf16, #tpu.memory_space<vmem>>, vector<1x128x256xbf16>
    %75 = vector.shape_cast %74 : vector<1x128x256xbf16> to vector<128x256xbf16>
    %cst_58 = arith.constant dense<0.000000e+00> : vector<160x256xf32>
    %76 = tpu.matmul %73, %75, %cst_58 {dimension_numbers = #tpu.dot_dimension_numbers<[1], [0], [0], [1], [0, 0, 1, 1], [], []>} : vector<160x128xbf16>, vector<128x256xbf16>, vector<160x256xf32> -> vector<160x256xf32>
    %77 = arith.addf %71, %76 : vector<160x256xf32>
    %cst_59 = arith.constant 0.000000e+00 : f32
    %78 = vector.broadcast %cst_59 : f32 to vector<160x256xf32>
    %79 = arith.maximumf %77, %78 : vector<160x256xf32>
    %cst_60 = arith.constant 0.000000e+00 : f32
    %80 = vector.shape_cast %44 : vector<160x1xi1> to vector<160x1xi1>
    %81 = vector.broadcast %80 : vector<160x1xi1> to vector<160x256xi1>
    %82 = vector.broadcast %cst_60 : f32 to vector<160x256xf32>
    %83 = arith.select %81, %79, %82 : vector<160x256xi1>, vector<160x256xf32>
    %c8_61 = arith.constant 8 : index
    %c0_62 = arith.constant 0 : index
    %84 = vector.load %arg11[%c8_61, %c0_62] : memref<176x256xf32, #tpu.memory_space<vmem>>, vector<160x256xf32>
    tpu.vector_store %arg11[%c8_61, %c0_62], %83 {strides = array<i32>} : memref<176x256xf32, #tpu.memory_space<vmem>>, vector<160x256xf32>,
    %c0_63 = arith.constant 0 : index
    %c0_64 = arith.constant 0 : index
    %85 = vector.load %arg5[%c0_63, %c0_64] : memref<1x256xf32, #tpu.memory_space<vmem>>, vector<1x256xf32>
    %86 = vector.shape_cast %85 : vector<1x256xf32> to vector<1x256xf32>
    %87 = vector.broadcast %86 : vector<1x256xf32> to vector<160x256xf32>
    %c6_65 = arith.constant 6 : index
    %c0_66 = arith.constant 0 : index
    %88 = vector.load %arg11[%c6_65, %c0_66] : memref<176x256xf32, #tpu.memory_space<vmem>>, vector<160x256xf32>
    %89 = arith.truncf %88 : vector<160x256xf32> to vector<160x256xbf16>
    %c0_67 = arith.constant 0 : index
    %c0_68 = arith.constant 0 : index
    %c0_69 = arith.constant 0 : index
    %90 = vector.load %arg4[%c0_67, %c0_68, %c0_69] : memref<5x256x256xbf16, #tpu.memory_space<vmem>>, vector<1x256x256xbf16>
    %91 = vector.shape_cast %90 : vector<1x256x256xbf16> to vector<256x256xbf16>
    %cst_70 = arith.constant dense<0.000000e+00> : vector<160x256xf32>
    %92 = tpu.matmul %89, %91, %cst_70 {dimension_numbers = #tpu.dot_dimension_numbers<[1], [0], [0], [1], [0, 0, 1, 1], [], []>} : vector<160x256xbf16>, vector<256x256xbf16>, vector<160x256xf32> -> vector<160x256xf32>
    %93 = arith.addf %87, %92 : vector<160x256xf32>
    %c7_71 = arith.constant 7 : index
    %c0_72 = arith.constant 0 : index
    %94 = vector.load %arg11[%c7_71, %c0_72] : memref<176x256xf32, #tpu.memory_space<vmem>>, vector<160x256xf32>
    %95 = arith.truncf %94 : vector<160x256xf32> to vector<160x256xbf16>
    %c1_73 = arith.constant 1 : index
    %c0_74 = arith.constant 0 : index
    %c0_75 = arith.constant 0 : index
    %96 = vector.load %arg4[%c1_73, %c0_74, %c0_75] : memref<5x256x256xbf16, #tpu.memory_space<vmem>>, vector<1x256x256xbf16>
    %97 = vector.shape_cast %96 : vector<1x256x256xbf16> to vector<256x256xbf16>
    %cst_76 = arith.constant dense<0.000000e+00> : vector<160x256xf32>
    %98 = tpu.matmul %95, %97, %cst_76 {dimension_numbers = #tpu.dot_dimension_numbers<[1], [0], [0], [1], [0, 0, 1, 1], [], []>} : vector<160x256xbf16>, vector<256x256xbf16>, vector<160x256xf32> -> vector<160x256xf32>
    %99 = arith.addf %93, %98 : vector<160x256xf32>
    %c8_77 = arith.constant 8 : index
    %c0_78 = arith.constant 0 : index
    %100 = vector.load %arg11[%c8_77, %c0_78] : memref<176x256xf32, #tpu.memory_space<vmem>>, vector<160x256xf32>
    %101 = arith.truncf %100 : vector<160x256xf32> to vector<160x256xbf16>
    %c2_79 = arith.constant 2 : index
    %c0_80 = arith.constant 0 : index
    %c0_81 = arith.constant 0 : index
    %102 = vector.load %arg4[%c2_79, %c0_80, %c0_81] : memref<5x256x256xbf16, #tpu.memory_space<vmem>>, vector<1x256x256xbf16>
    %103 = vector.shape_cast %102 : vector<1x256x256xbf16> to vector<256x256xbf16>
    %cst_82 = arith.constant dense<0.000000e+00> : vector<160x256xf32>
    %104 = tpu.matmul %101, %103, %cst_82 {dimension_numbers = #tpu.dot_dimension_numbers<[1], [0], [0], [1], [0, 0, 1, 1], [], []>} : vector<160x256xbf16>, vector<256x256xbf16>, vector<160x256xf32> -> vector<160x256xf32>
    %105 = arith.addf %99, %104 : vector<160x256xf32>
    %c9_83 = arith.constant 9 : index
    %c0_84 = arith.constant 0 : index
    %106 = vector.load %arg11[%c9_83, %c0_84] : memref<176x256xf32, #tpu.memory_space<vmem>>, vector<160x256xf32>
    %107 = arith.truncf %106 : vector<160x256xf32> to vector<160x256xbf16>
    %c3_85 = arith.constant 3 : index
    %c0_86 = arith.constant 0 : index
    %c0_87 = arith.constant 0 : index
    %108 = vector.load %arg4[%c3_85, %c0_86, %c0_87] : memref<5x256x256xbf16, #tpu.memory_space<vmem>>, vector<1x256x256xbf16>
    %109 = vector.shape_cast %108 : vector<1x256x256xbf16> to vector<256x256xbf16>
    %cst_88 = arith.constant dense<0.000000e+00> : vector<160x256xf32>
    %110 = tpu.matmul %107, %109, %cst_88 {dimension_numbers = #tpu.dot_dimension_numbers<[1], [0], [0], [1], [0, 0, 1, 1], [], []>} : vector<160x256xbf16>, vector<256x256xbf16>, vector<160x256xf32> -> vector<160x256xf32>
    %111 = arith.addf %105, %110 : vector<160x256xf32>
    %c10_89 = arith.constant 10 : index
    %c0_90 = arith.constant 0 : index
    %112 = vector.load %arg11[%c10_89, %c0_90] : memref<176x256xf32, #tpu.memory_space<vmem>>, vector<160x256xf32>
    %113 = arith.truncf %112 : vector<160x256xf32> to vector<160x256xbf16>
    %c4_91 = arith.constant 4 : index
    %c0_92 = arith.constant 0 : index
    %c0_93 = arith.constant 0 : index
    %114 = vector.load %arg4[%c4_91, %c0_92, %c0_93] : memref<5x256x256xbf16, #tpu.memory_space<vmem>>, vector<1x256x256xbf16>
    %115 = vector.shape_cast %114 : vector<1x256x256xbf16> to vector<256x256xbf16>
    %cst_94 = arith.constant dense<0.000000e+00> : vector<160x256xf32>
    %116 = tpu.matmul %113, %115, %cst_94 {dimension_numbers = #tpu.dot_dimension_numbers<[1], [0], [0], [1], [0, 0, 1, 1], [], []>} : vector<160x256xbf16>, vector<256x256xbf16>, vector<160x256xf32> -> vector<160x256xf32>
    %117 = arith.addf %111, %116 : vector<160x256xf32>
    %cst_95 = arith.constant 0.000000e+00 : f32
    %118 = vector.broadcast %cst_95 : f32 to vector<160x256xf32>
    %119 = arith.maximumf %117, %118 : vector<160x256xf32>
    %cst_96 = arith.constant 0.000000e+00 : f32
    %120 = vector.shape_cast %44 : vector<160x1xi1> to vector<160x1xi1>
    %121 = vector.broadcast %120 : vector<160x1xi1> to vector<160x256xi1>
    %122 = vector.broadcast %cst_96 : f32 to vector<160x256xf32>
    %123 = arith.select %121, %119, %122 : vector<160x256xi1>, vector<160x256xf32>
    %c8_97 = arith.constant 8 : index
    %c0_98 = arith.constant 0 : index
    %124 = vector.load %arg11[%c8_97, %c0_98] : memref<176x256xf32, #tpu.memory_space<vmem>>, vector<160x256xf32>
    tpu.vector_store %arg11[%c8_97, %c0_98], %123 {strides = array<i32>} : memref<176x256xf32, #tpu.memory_space<vmem>>, vector<160x256xf32>,
    %c0_99 = arith.constant 0 : index
    %c0_100 = arith.constant 0 : index
    %125 = vector.load %arg7[%c0_99, %c0_100] : memref<1x256xf32, #tpu.memory_space<vmem>>, vector<1x256xf32>
    %126 = vector.shape_cast %125 : vector<1x256xf32> to vector<1x256xf32>
    %127 = vector.broadcast %126 : vector<1x256xf32> to vector<160x256xf32>
    %c6_101 = arith.constant 6 : index
    %c0_102 = arith.constant 0 : index
    %128 = vector.load %arg11[%c6_101, %c0_102] : memref<176x256xf32, #tpu.memory_space<vmem>>, vector<160x256xf32>
    %129 = arith.truncf %128 : vector<160x256xf32> to vector<160x256xbf16>
    %c0_103 = arith.constant 0 : index
    %c0_104 = arith.constant 0 : index
    %c0_105 = arith.constant 0 : index
    %130 = vector.load %arg6[%c0_103, %c0_104, %c0_105] : memref<5x256x256xbf16, #tpu.memory_space<vmem>>, vector<1x256x256xbf16>
    %131 = vector.shape_cast %130 : vector<1x256x256xbf16> to vector<256x256xbf16>
    %cst_106 = arith.constant dense<0.000000e+00> : vector<160x256xf32>
    %132 = tpu.matmul %129, %131, %cst_106 {dimension_numbers = #tpu.dot_dimension_numbers<[1], [0], [0], [1], [0, 0, 1, 1], [], []>} : vector<160x256xbf16>, vector<256x256xbf16>, vector<160x256xf32> -> vector<160x256xf32>
    %133 = arith.addf %127, %132 : vector<160x256xf32>
    %c7_107 = arith.constant 7 : index
    %c0_108 = arith.constant 0 : index
    %134 = vector.load %arg11[%c7_107, %c0_108] : memref<176x256xf32, #tpu.memory_space<vmem>>, vector<160x256xf32>
    %135 = arith.truncf %134 : vector<160x256xf32> to vector<160x256xbf16>
    %c1_109 = arith.constant 1 : index
    %c0_110 = arith.constant 0 : index
    %c0_111 = arith.constant 0 : index
    %136 = vector.load %arg6[%c1_109, %c0_110, %c0_111] : memref<5x256x256xbf16, #tpu.memory_space<vmem>>, vector<1x256x256xbf16>
    %137 = vector.shape_cast %136 : vector<1x256x256xbf16> to vector<256x256xbf16>
    %cst_112 = arith.constant dense<0.000000e+00> : vector<160x256xf32>
    %138 = tpu.matmul %135, %137, %cst_112 {dimension_numbers = #tpu.dot_dimension_numbers<[1], [0], [0], [1], [0, 0, 1, 1], [], []>} : vector<160x256xbf16>, vector<256x256xbf16>, vector<160x256xf32> -> vector<160x256xf32>
    %139 = arith.addf %133, %138 : vector<160x256xf32>
    %c8_113 = arith.constant 8 : index
    %c0_114 = arith.constant 0 : index
    %140 = vector.load %arg11[%c8_113, %c0_114] : memref<176x256xf32, #tpu.memory_space<vmem>>, vector<160x256xf32>
    %141 = arith.truncf %140 : vector<160x256xf32> to vector<160x256xbf16>
    %c2_115 = arith.constant 2 : index
    %c0_116 = arith.constant 0 : index
    %c0_117 = arith.constant 0 : index
    %142 = vector.load %arg6[%c2_115, %c0_116, %c0_117] : memref<5x256x256xbf16, #tpu.memory_space<vmem>>, vector<1x256x256xbf16>
    %143 = vector.shape_cast %142 : vector<1x256x256xbf16> to vector<256x256xbf16>
    %cst_118 = arith.constant dense<0.000000e+00> : vector<160x256xf32>
    %144 = tpu.matmul %141, %143, %cst_118 {dimension_numbers = #tpu.dot_dimension_numbers<[1], [0], [0], [1], [0, 0, 1, 1], [], []>} : vector<160x256xbf16>, vector<256x256xbf16>, vector<160x256xf32> -> vector<160x256xf32>
    %145 = arith.addf %139, %144 : vector<160x256xf32>
    %c9_119 = arith.constant 9 : index
    %c0_120 = arith.constant 0 : index
    %146 = vector.load %arg11[%c9_119, %c0_120] : memref<176x256xf32, #tpu.memory_space<vmem>>, vector<160x256xf32>
    %147 = arith.truncf %146 : vector<160x256xf32> to vector<160x256xbf16>
    %c3_121 = arith.constant 3 : index
    %c0_122 = arith.constant 0 : index
    %c0_123 = arith.constant 0 : index
    %148 = vector.load %arg6[%c3_121, %c0_122, %c0_123] : memref<5x256x256xbf16, #tpu.memory_space<vmem>>, vector<1x256x256xbf16>
    %149 = vector.shape_cast %148 : vector<1x256x256xbf16> to vector<256x256xbf16>
    %cst_124 = arith.constant dense<0.000000e+00> : vector<160x256xf32>
    %150 = tpu.matmul %147, %149, %cst_124 {dimension_numbers = #tpu.dot_dimension_numbers<[1], [0], [0], [1], [0, 0, 1, 1], [], []>} : vector<160x256xbf16>, vector<256x256xbf16>, vector<160x256xf32> -> vector<160x256xf32>
    %151 = arith.addf %145, %150 : vector<160x256xf32>
    %c10_125 = arith.constant 10 : index
    %c0_126 = arith.constant 0 : index
    %152 = vector.load %arg11[%c10_125, %c0_126] : memref<176x256xf32, #tpu.memory_space<vmem>>, vector<160x256xf32>
    %153 = arith.truncf %152 : vector<160x256xf32> to vector<160x256xbf16>
    %c4_127 = arith.constant 4 : index
    %c0_128 = arith.constant 0 : index
    %c0_129 = arith.constant 0 : index
    %154 = vector.load %arg6[%c4_127, %c0_128, %c0_129] : memref<5x256x256xbf16, #tpu.memory_space<vmem>>, vector<1x256x256xbf16>
    %155 = vector.shape_cast %154 : vector<1x256x256xbf16> to vector<256x256xbf16>
    %cst_130 = arith.constant dense<0.000000e+00> : vector<160x256xf32>
    %156 = tpu.matmul %153, %155, %cst_130 {dimension_numbers = #tpu.dot_dimension_numbers<[1], [0], [0], [1], [0, 0, 1, 1], [], []>} : vector<160x256xbf16>, vector<256x256xbf16>, vector<160x256xf32> -> vector<160x256xf32>
    %157 = arith.addf %151, %156 : vector<160x256xf32>
    %cst_131 = arith.constant 0.000000e+00 : f32
    %158 = vector.broadcast %cst_131 : f32 to vector<160x256xf32>
    %159 = arith.maximumf %157, %158 : vector<160x256xf32>
    %cst_132 = arith.constant 0.000000e+00 : f32
    %160 = vector.shape_cast %44 : vector<160x1xi1> to vector<160x1xi1>
    %161 = vector.broadcast %160 : vector<160x1xi1> to vector<160x256xi1>
    %162 = vector.broadcast %cst_132 : f32 to vector<160x256xf32>
    %163 = arith.select %161, %159, %162 : vector<160x256xi1>, vector<160x256xf32>
    %c8_133 = arith.constant 8 : index
    %c0_134 = arith.constant 0 : index
    %164 = vector.load %arg11[%c8_133, %c0_134] : memref<176x256xf32, #tpu.memory_space<vmem>>, vector<160x256xf32>
    tpu.vector_store %arg11[%c8_133, %c0_134], %163 {strides = array<i32>} : memref<176x256xf32, #tpu.memory_space<vmem>>, vector<160x256xf32>,
    %c0_135 = arith.constant 0 : index
    %c0_136 = arith.constant 0 : index
    %165 = vector.load %arg9[%c0_135, %c0_136] : memref<1x256xf32, #tpu.memory_space<vmem>>, vector<1x256xf32>
    %166 = vector.shape_cast %165 : vector<1x256xf32> to vector<1x256xf32>
    %167 = vector.broadcast %166 : vector<1x256xf32> to vector<160x256xf32>
    %c7_137 = arith.constant 7 : index
    %c0_138 = arith.constant 0 : index
    %168 = vector.load %arg11[%c7_137, %c0_138] : memref<176x256xf32, #tpu.memory_space<vmem>>, vector<160x256xf32>
    %169 = arith.truncf %168 : vector<160x256xf32> to vector<160x256xbf16>
    %c0_139 = arith.constant 0 : index
    %c0_140 = arith.constant 0 : index
    %c0_141 = arith.constant 0 : index
    %170 = vector.load %arg8[%c0_139, %c0_140, %c0_141] : memref<3x256x256xbf16, #tpu.memory_space<vmem>>, vector<1x256x256xbf16>
    %171 = vector.shape_cast %170 : vector<1x256x256xbf16> to vector<256x256xbf16>
    %cst_142 = arith.constant dense<0.000000e+00> : vector<160x256xf32>
    %172 = tpu.matmul %169, %171, %cst_142 {dimension_numbers = #tpu.dot_dimension_numbers<[1], [0], [0], [1], [0, 0, 1, 1], [], []>} : vector<160x256xbf16>, vector<256x256xbf16>, vector<160x256xf32> -> vector<160x256xf32>
    %173 = arith.addf %167, %172 : vector<160x256xf32>
    %c8_143 = arith.constant 8 : index
    %c0_144 = arith.constant 0 : index
    %174 = vector.load %arg11[%c8_143, %c0_144] : memref<176x256xf32, #tpu.memory_space<vmem>>, vector<160x256xf32>
    %175 = arith.truncf %174 : vector<160x256xf32> to vector<160x256xbf16>
    %c1_145 = arith.constant 1 : index
    %c0_146 = arith.constant 0 : index
    %c0_147 = arith.constant 0 : index
    %176 = vector.load %arg8[%c1_145, %c0_146, %c0_147] : memref<3x256x256xbf16, #tpu.memory_space<vmem>>, vector<1x256x256xbf16>
    %177 = vector.shape_cast %176 : vector<1x256x256xbf16> to vector<256x256xbf16>
    %cst_148 = arith.constant dense<0.000000e+00> : vector<160x256xf32>
    %178 = tpu.matmul %175, %177, %cst_148 {dimension_numbers = #tpu.dot_dimension_numbers<[1], [0], [0], [1], [0, 0, 1, 1], [], []>} : vector<160x256xbf16>, vector<256x256xbf16>, vector<160x256xf32> -> vector<160x256xf32>
    %179 = arith.addf %173, %178 : vector<160x256xf32>
    %c9_149 = arith.constant 9 : index
    %c0_150 = arith.constant 0 : index
    %180 = vector.load %arg11[%c9_149, %c0_150] : memref<176x256xf32, #tpu.memory_space<vmem>>, vector<160x256xf32>
    %181 = arith.truncf %180 : vector<160x256xf32> to vector<160x256xbf16>
    %c2_151 = arith.constant 2 : index
    %c0_152 = arith.constant 0 : index
    %c0_153 = arith.constant 0 : index
    %182 = vector.load %arg8[%c2_151, %c0_152, %c0_153] : memref<3x256x256xbf16, #tpu.memory_space<vmem>>, vector<1x256x256xbf16>
    %183 = vector.shape_cast %182 : vector<1x256x256xbf16> to vector<256x256xbf16>
    %cst_154 = arith.constant dense<0.000000e+00> : vector<160x256xf32>
    %184 = tpu.matmul %181, %183, %cst_154 {dimension_numbers = #tpu.dot_dimension_numbers<[1], [0], [0], [1], [0, 0, 1, 1], [], []>} : vector<160x256xbf16>, vector<256x256xbf16>, vector<160x256xf32> -> vector<160x256xf32>
    %185 = arith.addf %179, %184 : vector<160x256xf32>
    %186 = vector.extract_strided_slice %185 {offsets = [0, 0], sizes = [16, 256], strides = [1, 1]} : vector<160x256xf32> to vector<16x256xf32>
    %c0_155 = arith.constant 0 : index
    %c0_156 = arith.constant 0 : index
    %c0_157 = arith.constant 0 : index
    %187 = vector.load %arg10[%c0_155, %c0_156, %c0_157] : memref<8x16x256xf32, #tpu.memory_space<vmem>>, vector<1x16x256xf32>
    %188 = vector.shape_cast %187 : vector<1x16x256xf32> to vector<16x256xf32>
    %189 = vector.shape_cast %186 : vector<16x256xf32> to vector<1x16x256xf32>
    tpu.vector_store %arg10[%c0_155, %c0_156, %c0_157], %189 {strides = array<i32>} : memref<8x16x256xf32, #tpu.memory_space<vmem>>, vector<1x16x256xf32>,
    %190 = vector.extract_strided_slice %185 {offsets = [20, 0], sizes = [16, 256], strides = [1, 1]} : vector<160x256xf32> to vector<16x256xf32>
    %c1_158 = arith.constant 1 : index
    %c0_159 = arith.constant 0 : index
    %c0_160 = arith.constant 0 : index
    %191 = vector.load %arg10[%c1_158, %c0_159, %c0_160] : memref<8x16x256xf32, #tpu.memory_space<vmem>>, vector<1x16x256xf32>
    %192 = vector.shape_cast %191 : vector<1x16x256xf32> to vector<16x256xf32>
    %193 = vector.shape_cast %190 : vector<16x256xf32> to vector<1x16x256xf32>
    tpu.vector_store %arg10[%c1_158, %c0_159, %c0_160], %193 {strides = array<i32>} : memref<8x16x256xf32, #tpu.memory_space<vmem>>, vector<1x16x256xf32>,
    %194 = vector.extract_strided_slice %185 {offsets = [40, 0], sizes = [16, 256], strides = [1, 1]} : vector<160x256xf32> to vector<16x256xf32>
    %c2_161 = arith.constant 2 : index
    %c0_162 = arith.constant 0 : index
    %c0_163 = arith.constant 0 : index
    %195 = vector.load %arg10[%c2_161, %c0_162, %c0_163] : memref<8x16x256xf32, #tpu.memory_space<vmem>>, vector<1x16x256xf32>
    %196 = vector.shape_cast %195 : vector<1x16x256xf32> to vector<16x256xf32>
    %197 = vector.shape_cast %194 : vector<16x256xf32> to vector<1x16x256xf32>
    tpu.vector_store %arg10[%c2_161, %c0_162, %c0_163], %197 {strides = array<i32>} : memref<8x16x256xf32, #tpu.memory_space<vmem>>, vector<1x16x256xf32>,
    %198 = vector.extract_strided_slice %185 {offsets = [60, 0], sizes = [16, 256], strides = [1, 1]} : vector<160x256xf32> to vector<16x256xf32>
    %c3_164 = arith.constant 3 : index
    %c0_165 = arith.constant 0 : index
    %c0_166 = arith.constant 0 : index
    %199 = vector.load %arg10[%c3_164, %c0_165, %c0_166] : memref<8x16x256xf32, #tpu.memory_space<vmem>>, vector<1x16x256xf32>
    %200 = vector.shape_cast %199 : vector<1x16x256xf32> to vector<16x256xf32>
    %201 = vector.shape_cast %198 : vector<16x256xf32> to vector<1x16x256xf32>
    tpu.vector_store %arg10[%c3_164, %c0_165, %c0_166], %201 {strides = array<i32>} : memref<8x16x256xf32, #tpu.memory_space<vmem>>, vector<1x16x256xf32>,
    %202 = vector.extract_strided_slice %185 {offsets = [80, 0], sizes = [16, 256], strides = [1, 1]} : vector<160x256xf32> to vector<16x256xf32>
    %c4_167 = arith.constant 4 : index
    %c0_168 = arith.constant 0 : index
    %c0_169 = arith.constant 0 : index
    %203 = vector.load %arg10[%c4_167, %c0_168, %c0_169] : memref<8x16x256xf32, #tpu.memory_space<vmem>>, vector<1x16x256xf32>
    %204 = vector.shape_cast %203 : vector<1x16x256xf32> to vector<16x256xf32>
    %205 = vector.shape_cast %202 : vector<16x256xf32> to vector<1x16x256xf32>
    tpu.vector_store %arg10[%c4_167, %c0_168, %c0_169], %205 {strides = array<i32>} : memref<8x16x256xf32, #tpu.memory_space<vmem>>, vector<1x16x256xf32>,
    %206 = vector.extract_strided_slice %185 {offsets = [100, 0], sizes = [16, 256], strides = [1, 1]} : vector<160x256xf32> to vector<16x256xf32>
    %c5_170 = arith.constant 5 : index
    %c0_171 = arith.constant 0 : index
    %c0_172 = arith.constant 0 : index
    %207 = vector.load %arg10[%c5_170, %c0_171, %c0_172] : memref<8x16x256xf32, #tpu.memory_space<vmem>>, vector<1x16x256xf32>
    %208 = vector.shape_cast %207 : vector<1x16x256xf32> to vector<16x256xf32>
    %209 = vector.shape_cast %206 : vector<16x256xf32> to vector<1x16x256xf32>
    tpu.vector_store %arg10[%c5_170, %c0_171, %c0_172], %209 {strides = array<i32>} : memref<8x16x256xf32, #tpu.memory_space<vmem>>, vector<1x16x256xf32>,
    %210 = vector.extract_strided_slice %185 {offsets = [120, 0], sizes = [16, 256], strides = [1, 1]} : vector<160x256xf32> to vector<16x256xf32>
    %c6_173 = arith.constant 6 : index
    %c0_174 = arith.constant 0 : index
    %c0_175 = arith.constant 0 : index
    %211 = vector.load %arg10[%c6_173, %c0_174, %c0_175] : memref<8x16x256xf32, #tpu.memory_space<vmem>>, vector<1x16x256xf32>
    %212 = vector.shape_cast %211 : vector<1x16x256xf32> to vector<16x256xf32>
    %213 = vector.shape_cast %210 : vector<16x256xf32> to vector<1x16x256xf32>
    tpu.vector_store %arg10[%c6_173, %c0_174, %c0_175], %213 {strides = array<i32>} : memref<8x16x256xf32, #tpu.memory_space<vmem>>, vector<1x16x256xf32>,
    %214 = vector.extract_strided_slice %185 {offsets = [140, 0], sizes = [16, 256], strides = [1, 1]} : vector<160x256xf32> to vector<16x256xf32>
    %c7_176 = arith.constant 7 : index
    %c0_177 = arith.constant 0 : index
    %c0_178 = arith.constant 0 : index
    %215 = vector.load %arg10[%c7_176, %c0_177, %c0_178] : memref<8x16x256xf32, #tpu.memory_space<vmem>>, vector<1x16x256xf32>
    %216 = vector.shape_cast %215 : vector<1x16x256xf32> to vector<16x256xf32>
    %217 = vector.shape_cast %214 : vector<16x256xf32> to vector<1x16x256xf32>
    tpu.vector_store %arg10[%c7_176, %c0_177, %c0_178], %217 {strides = array<i32>} : memref<8x16x256xf32, #tpu.memory_space<vmem>>, vector<1x16x256xf32>,
    return
  }
  func.func @transform_0(%arg0: i32) -> (i32, i32, i32) {
    %c0_i32 = arith.constant 0 : i32
    %c0_i32_0 = arith.constant 0 : i32
    %c0_i32_1 = arith.constant 0 : i32
    return %arg0, %c0_i32, %c0_i32_0 : i32, i32, i32
  }
  func.func @transform_1(%arg0: i32) -> (i32, i32, i32) {
    %c0_i32 = arith.constant 0 : i32
    %c0_i32_0 = arith.constant 0 : i32
    %c0_i32_1 = arith.constant 0 : i32
    %c0_i32_2 = arith.constant 0 : i32
    return %c0_i32, %c0_i32_0, %c0_i32_1 : i32, i32, i32
  }
  func.func @transform_2(%arg0: i32) -> (i32, i32) {
    %c0_i32 = arith.constant 0 : i32
    %c0_i32_0 = arith.constant 0 : i32
    %c0_i32_1 = arith.constant 0 : i32
    return %c0_i32, %c0_i32_0 : i32, i32
  }
  func.func @transform_3(%arg0: i32) -> (i32, i32, i32) {
    %c0_i32 = arith.constant 0 : i32
    %c0_i32_0 = arith.constant 0 : i32
    %c0_i32_1 = arith.constant 0 : i32
    %c0_i32_2 = arith.constant 0 : i32
    return %c0_i32, %c0_i32_0, %c0_i32_1 : i32, i32, i32
  }
  func.func @transform_4(%arg0: i32) -> (i32, i32) {
    %c0_i32 = arith.constant 0 : i32
    %c0_i32_0 = arith.constant 0 : i32
    %c0_i32_1 = arith.constant 0 : i32
    return %c0_i32, %c0_i32_0 : i32, i32
  }
  func.func @transform_5(%arg0: i32) -> (i32, i32, i32) {
    %c0_i32 = arith.constant 0 : i32
    %c0_i32_0 = arith.constant 0 : i32
    %c0_i32_1 = arith.constant 0 : i32
    %c0_i32_2 = arith.constant 0 : i32
    return %c0_i32, %c0_i32_0, %c0_i32_1 : i32, i32, i32
  }
  func.func @transform_6(%arg0: i32) -> (i32, i32) {
    %c0_i32 = arith.constant 0 : i32
    %c0_i32_0 = arith.constant 0 : i32
    %c0_i32_1 = arith.constant 0 : i32
    return %c0_i32, %c0_i32_0 : i32, i32
  }
  func.func @transform_7(%arg0: i32) -> (i32, i32, i32) {
    %c0_i32 = arith.constant 0 : i32
    %c0_i32_0 = arith.constant 0 : i32
    %c0_i32_1 = arith.constant 0 : i32
    %c0_i32_2 = arith.constant 0 : i32
    return %c0_i32, %c0_i32_0, %c0_i32_1 : i32, i32, i32
  }
  func.func @transform_8(%arg0: i32) -> (i32, i32) {
    %c0_i32 = arith.constant 0 : i32
    %c0_i32_0 = arith.constant 0 : i32
    %c0_i32_1 = arith.constant 0 : i32
    return %c0_i32, %c0_i32_0 : i32, i32
  }
  func.func @transform_9(%arg0: i32) -> (i32, i32, i32) {
    %c0_i32 = arith.constant 0 : i32
    %c0_i32_0 = arith.constant 0 : i32
    %c0_i32_1 = arith.constant 0 : i32
    return %arg0, %c0_i32, %c0_i32_0 : i32, i32, i32
  }
}

</mosaic_0001>

<bundles_post_ra>
// kernel: segnet_forward.1
= control target key start
LH: loop header
LB: loop body
LE: loop exit
PB: predicated region body
PF: predicated region fallthrough
CT: control target
= control target key end

     0   :  { %14 = vsyncpa [#allocation4], 0  ;;  %s18458_s0 = inlined_call_operand.vmem [shape: f32[16,16,128], index: 0, kind: input, shape index: {}]   ;;  %s18459_s1 = inlined_call_operand.hbm [shape: bf16[5,128,256], index: 1, kind: input, shape index: {}]   ;;  %s18460_s2 = inlined_call_operand.hbm [shape: f32[1,256], index: 2, kind: input, shape index: {}]   ;;  %s18461_s3 = inlined_call_operand.vmem [shape: bf16[5,256,256], index: 3, kind: input, shape index: {}]   ;;  %s18462_s4 = inlined_call_operand.hbm [shape: f32[1,256], index: 4, kind: input, shape index: {}]   ;;  %s18463_s5 = inlined_call_operand.vmem [shape: bf16[5,256,256], index: 5, kind: input, shape index: {}]   ;;  %s18464_s6 = inlined_call_operand.hbm [shape: f32[1,256], index: 6, kind: input, shape index: {}]   ;;  %s18465_s7 = inlined_call_operand.hbm [shape: bf16[3,256,256], index: 7, kind: input, shape index: {}]   ;;  %s18466_s8 = inlined_call_operand.hbm [shape: f32[1,256], index: 8, kind: input, shape index: {}]   ;;  %s18467_s9 = inlined_call_operand.vmem [shape: f32[16,16,256], index: 9, kind: output, shape index: {}]  }
   0x1   :  { %15 = vsyncpa [#allocation6], 0 }
   0x2   :  { %16 = vsyncpa [#allocation9], 0 }
   0x3   :  { %17 = vsyncpa [#allocation12], 0  ;;  %s12188_s30 = smov 0  }
   0x4 LB: > { %s12128_s10 = smov [#allocation5]   ;;  %s10095_s12 = sadd.s32 4294967295, %s12126_s30   ;;  %s12126_s30 = sphi %s12188_s30, %s23_s30  }
   0x5   : > { %s274_s11 = sshll.u32 %s12128_s10, 4  ;;  %p10097_p0 = scmp.ge.s32.totalorder %s12126_s30, 1  ;;  %s275_s11 = int_to_ptr.vmem [resolvable:$true] %s274_s11 }
   0x6   : > { %p248_p1 = scmp.lt.s32.totalorder %s12126_s30, 3  ;;  %p12198_p2 = scmp.eq.s32.totalorder %s10095_s12, 0 }
   0x7   : > { %s12129_s15 = smov [#allocation8]   ;;  %s12130_s17 = smov [#allocation3]  }
   0x8   : > { %s18793_s13 = scalar_select %p12198_p2, 1, 0 }
   0x9   : > { %p12202_p3 = pnand %p10097_p0, %p248_p1  ;;  %s302_s16 = sshll.u32 %s12129_s15, 4  ;;  %s303_s16 = int_to_ptr.vmem [resolvable:$true] %s302_s16 }
   0xa   : > { %s260_s18 = sshll.u32 %s12130_s17, 4  ;;  %s12131_s20 = smov [#allocation7]   ;;  %s12214_s18 = int_to_ptr.vmem [resolvable:$true] %s260_s18 }
   0xb   : > { %s18794_s14 = scalar_select %p12202_p3, 1, 0 }
   0xc   : > { %p10980_p4 = pneg %p12202_p3  ;;  %s12216_s21 = sshll.u32 %s12131_s20, 4  ;;  %s289_s21 = int_to_ptr.vmem [resolvable:$true] %s12216_s21 }
   0xd   : > { %s11959_s23 = scalar_lea.vmem %s275_s11, 32  ;;  %p11967_p10 = scmp.lt.s32.totalorder %s275_s11, %s275_s11 }
   0xe   : > { %p12210_p5 = pnand %p12198_p2, %p10980_p4  ;;  %p11960_p7 = scmp.ne.s32.totalorder %s275_s11, %s11959_s23 }
   0xf   : > { %p11968_p11 = scmp.lt.s32.totalorder %s11959_s23, %s11959_s23 }
  0x10   : > { %p12220_p6 = pneg %p12210_p5 }
  0x11   : > { %p11969_p12 = por %p11968_p11, %p11967_p10 }
  0x12   : > { %p11962_p8 = pnand %p11960_p7, %p12220_p6 }
  0x14   : > { %p11963_p9 = pneg %p11962_p8 }
  0x16   : > { %p11970_p13 = pnand %p11969_p12, %p11963_p9 }
  0x18   : > { %11973 = shalt.err (!%p11970_p13)
}
  0x19   : > { %10986 = dma.hbm_to_vmem [thread:$0]  (!%p12210_p5), %s18460_s2, 32, %s275_s11, [#allocation6]  }
  0x1a   : > { %s11985_s26 = scalar_lea.vmem %s303_s16, 32  ;;  %p11993_p2 = scmp.lt.s32.totalorder %s303_s16, %s303_s16 }
  0x1b   : > { %p11986_p0 = scmp.ne.s32.totalorder %s303_s16, %s11985_s26  ;;  %p11994_p7 = scmp.lt.s32.totalorder %s11985_s26, %s11985_s26 }
  0x1d   : > { %p11988_p1 = pnand %p11986_p0, %p12220_p6  ;;  %p11995_p8 = por %p11994_p7, %p11993_p2 }
  0x1f   : > { %p11989_p4 = pneg %p11988_p1 }
  0x21   : > { %p11996_p3 = pnand %p11995_p8, %p11989_p4 }
  0x23   : > { %11999 = shalt.err (!%p11996_p3)
}
  0x24   : > { %10992 = dma.hbm_to_vmem [thread:$0]  (!%p12210_p5), %s18464_s6, 32, %s303_s16, [#allocation9]  }
  0x25   : > { %s12011_s29 = scalar_lea.vmem %s12214_s18, 10240  ;;  %p12019_p12 = scmp.lt.s32.totalorder %s12214_s18, %s12214_s18 }
  0x26   : > { %p12012_p9 = scmp.ne.s32.totalorder %s12214_s18, %s12011_s29  ;;  %p12020_p2 = scmp.lt.s32.totalorder %s12011_s29, %s12011_s29 }
  0x28   : > { %p12014_p10 = pnand %p12012_p9, %p12220_p6  ;;  %p12021_p13 = por %p12020_p2, %p12019_p12 }
  0x2a   : > { %p12015_p11 = pneg %p12014_p10 }
  0x2c   : > { %p12022_p3 = pnand %p12021_p13, %p12015_p11 }
  0x2e   : > { %12025 = shalt.err (!%p12022_p3)
}
  0x2f   : > { %s12132_s10 = smov 128   ;;  %s12133_s11 = smov 8  }
  0x30   : > { %10983 = dma.hbm_to_vmem [thread:$0]  (!%p12210_p5), %s18459_s1, 10240, %s12214_s18, [#allocation4], %s12132_s10, %s12132_s10, %s12133_s11  }
  0x31   : > { %s12037_s17 = scalar_lea.vmem %s289_s21, 32  ;;  %p12045_p7 = scmp.lt.s32.totalorder %s289_s21, %s289_s21 }
  0x32   : > { %p12038_p0 = scmp.ne.s32.totalorder %s289_s21, %s12037_s17  ;;  %p12046_p8 = scmp.lt.s32.totalorder %s12037_s17, %s12037_s17 }
  0x34   : > { %p12040_p1 = pnand %p12038_p0, %p12220_p6  ;;  %p12047_p9 = por %p12046_p8, %p12045_p7 }
  0x36   : > { %p12041_p4 = pneg %p12040_p1 }
  0x38   : > { %p12048_p10 = pnand %p12047_p9, %p12041_p4 }
  0x3a   : > { %12051 = shalt.err (!%p12048_p10)
}
  0x3b   : > { %10989 = dma.hbm_to_vmem [thread:$0]  (!%p12210_p5), %s18462_s4, 32, %s289_s21, [#allocation6]  }
  0x3c   : > { %s12134_s24 = smov [#allocation10]   ;;  %s12135_s25 = smov [#allocation11]  }
  0x3d   : > { %s312_s18 = sshll.u32 %s12134_s24, 4  ;;  %s326_s26 = sshll.u32 %s12135_s25, 4  ;;  %s313_s18 = int_to_ptr.vmem [resolvable:$true] %s312_s18  ;;  %s327_s26 = int_to_ptr.vmem [resolvable:$true] %s326_s26 }
  0x3e   : > { %s12063_s27 = scalar_lea.vmem %s313_s18, 12288  ;;  %p12071_p13 = scmp.lt.s32.totalorder %s313_s18, %s313_s18 }
  0x3f   : > { %p12064_p11 = scmp.ne.s32.totalorder %s313_s18, %s12063_s27  ;;  %p12072_p3 = scmp.lt.s32.totalorder %s12063_s27, %s12063_s27 }
  0x41   : > { %p12066_p12 = pnand %p12064_p11, %p12220_p6  ;;  %p12073_p0 = por %p12072_p3, %p12071_p13 }
  0x43   : > { %p12067_p2 = pneg %p12066_p12 }
  0x45   : > { %p12074_p1 = pnand %p12073_p0, %p12067_p2 }
  0x47   : > { %12077 = shalt.err (!%p12074_p1)
}
  0x48   : > { %10995 = dma.hbm_to_vmem [thread:$0]  (!%p12210_p5), %s18465_s7, 12288, %s313_s18, [#allocation9], %s12132_s10, %s12132_s10, %s12133_s11  }
  0x49   : > { %s12089_s29 = scalar_lea.vmem %s327_s26, 32  ;;  %p12097_p9 = scmp.lt.s32.totalorder %s327_s26, %s327_s26 }
  0x4a   : > { %p12090_p4 = scmp.ne.s32.totalorder %s327_s26, %s12089_s29  ;;  %p12098_p10 = scmp.lt.s32.totalorder %s12089_s29, %s12089_s29 }
  0x4c   : > { %p12092_p7 = pnand %p12090_p4, %p12220_p6  ;;  %p12099_p11 = por %p12098_p10, %p12097_p9 }
  0x4e   : > { %p12093_p8 = pneg %p12092_p7 }
  0x50   : > { %p12100_p12 = pnand %p12099_p11, %p12093_p8 }
  0x52   : > { %12103 = shalt.err (!%p12100_p12)
}
  0x53   : > { %10998 = dma.hbm_to_vmem [thread:$0]  (!%p12210_p5), %s18466_s8, 32, %s327_s26, [#allocation12]  }
  0x54   : > { %p18797_p2 = scmp.ne.s32.totalorder %s18794_s14, 0 }
  0x56   : > { %349 = sbr.rel (%p18797_p2) target bundleno = 1674 (0x68a), region = 56 }
  0x5b   : > { %p18798_p13 = scmp.ne.s32.totalorder %s18793_s13, 0 }
  0x5d   : > { %12109 = dma.done.wait (%p18798_p13), [#allocation4], 10240  }
  0x5e   : > { %12111 = vsyncadd (%p18798_p13), [#allocation4], 4294957056 }
  0x5f   : > { %12113 = dma.done.wait (%p18798_p13), [#allocation6], 64  }
  0x60   : > { %12115 = vsyncadd (%p18798_p13), [#allocation6], 4294967232 }
  0x61   : > { %12117 = dma.done.wait (%p18798_p13), [#allocation9], 12320  }
  0x62   : > { %12119 = vsyncadd (%p18798_p13), [#allocation9], 4294954976 }
  0x63   : > { %12121 = dma.done.wait (%p18798_p13), [#allocation12], 32  }
  0x64   : > { %12123 = vsyncadd (%p18798_p13), [#allocation12], 4294967264  ;;  %v12136_v0 = vmov 0   ;;  %v12137_v1 = vmov 0.0   ;;  %v11029_v2 = vld [vmem:[#allocation3 + $0x74] ss:$8 sps:$4 sm:$0xff]  }
  0x65   : > { %1118 = vmatprep.mubr.bf16.mxu0 %v12136_v0  ;;  %422 = vst [vmem:[#allocation2 + $0xb0] sm:$0xff] %v12137_v1  ;;  %428 = vst [vmem:[#allocation2 + $0xf8] sm:$0xff] %v12137_v1  ;;  %1501 = vmatprep.mubr.bf16.mxu1 %v12136_v0  ;;  %v11031_v3 = vld [vmem:[#allocation3 + $0x70] ss:$8 sps:$4 sm:$0xff]   ;;  %v11032_v4 = vld [vmem:[#allocation3 + $0xf4] ss:$8 sps:$4 sm:$0xff]  }
  0x66   : > { %423 = vst [vmem:[#allocation2 + $0xd0] sm:$0xff] %v12137_v1  ;;  %432 = vst [vmem:[#allocation2 + $0x138] sm:$0xff] %v12137_v1  ;;  %1086 = vmatprep.subr.bf16.mxu0 %v11029_v2  ;;  %v11034_v5 = vld [vmem:[#allocation3 + $0xf0] ss:$8 sps:$4 sm:$0xff]   ;;  %v11035_v6 = vld [vmem:[#allocation3 + $0x64] ss:$8 sps:$4 sm:$0xff]   ;;  %1469 = vmatprep.subr.bf16.mxu1 %v11032_v4 }
  0x67   : > { %438 = vst [vmem:[#allocation2 + $0x128] sm:$0xff] %v12137_v1  ;;  %442 = vst [vmem:[#allocation2 + $0xa8] sm:$0xff] %v12137_v1  ;;  %1087 = vmatpush1.bf16.msra.mxu0 %v11031_v3  ;;  %v11037_v7 = vld [vmem:[#allocation3 + $0x60] ss:$8 sps:$4 sm:$0xff]   ;;  %v11038_v8 = vld [vmem:[#allocation3 + $0xe4] ss:$8 sps:$4 sm:$0xff]   ;;  %1470 = vmatpush1.bf16.msra.mxu1 %v11034_v5 }
  0x68   : > { %448 = vst [vmem:[#allocation2 + $0x90] sm:$0xff] %v12137_v1  ;;  %452 = vst [vmem:[#allocation2 + $0x50] sm:$0xff] %v12137_v1  ;;  %1088 = vmatprep.subr.bf16.mxu0 %v11035_v6  ;;  %v11040_v9 = vld [vmem:[#allocation3 + $0xe0] ss:$8 sps:$4 sm:$0xff]   ;;  %s10112_s13 = sshll.u32 %s10095_s12, 3  ;;  %1471 = vmatprep.subr.bf16.mxu1 %v11038_v8  ;;  %vm18482_vm0 = vcmask 1043456  }
  0x69   : > { %458 = vst [vmem:[#allocation2 + $0x58] sm:$0xff] %v12137_v1  ;;  %462 = vst [vmem:[#allocation2 + $0x68] sm:$0xff] %v12137_v1  ;;  %v11041_v10 = vld [vmem:[#allocation3 + $0x54] ss:$8 sps:$4 sm:$0xff]   ;;  %v11043_v11 = vld [vmem:[#allocation3 + $0x50] ss:$8 sps:$4 sm:$0xff]  }
  0x6a   : > { %464 = vst [vmem:[#allocation2 + $0xc0] sm:$0xff] %v12137_v1  ;;  %465 = vst [vmem:[#allocation2 + $0x30] sm:$0xff] %v12137_v1  ;;  %v11044_v12 = vld [vmem:[#allocation3 + $0xd4] ss:$8 sps:$4 sm:$0xff]   ;;  %v11047_v13 = vld [vmem:[#allocation3 + $0x44] ss:$8 sps:$4 sm:$0xff]  }
  0x6b   : > { %1089 = vmatpush1.bf16.msra.mxu0 %v11037_v7  ;;  %p408_p5 = scmp.lt.s32.totalorder %s10112_s13, 15  ;;  %1472 = vmatpush1.bf16.msra.mxu1 %v11040_v9  ;;  %v11046_v14 = vld [vmem:[#allocation3 + $0xd0] ss:$8 sps:$4 sm:$0xff]   ;;  %v11050_v15 = vld [vmem:[#allocation3 + $0xc4] ss:$8 sps:$4 sm:$0xff]   ;;  %vm18489_vm1 = vcmask 1044480  }
  0x6c   : > { %1090 = vmatprep.subr.bf16.mxu0 %v11041_v10  ;;  %1473 = vmatprep.subr.bf16.mxu1 %v11044_v12  ;;  %v11049_v16 = vld [vmem:[#allocation3 + $0x40] ss:$8 sps:$4 sm:$0xff]   ;;  %v11053_v17 = vld [vmem:[#allocation3 + $0x34] ss:$8 sps:$4 sm:$0xff]   ;;  %v11055_v20 = vld [vmem:[#allocation3 + $0x30] ss:$8 sps:$4 sm:$0xff]  }
  0x6d   : > { %s19778_s13 = smov (!%p408_p5, %s10112_s13), 15  ;;  %v11052_v18 = vld [vmem:[#allocation3 + $0xc0] ss:$8 sps:$4 sm:$0xff]   ;;  %v11056_v19 = vld [vmem:[#allocation3 + $0xb4] ss:$8 sps:$4 sm:$0xff]   ;;  %vm18486_vm4 = vcmask 1046528  }
  0x6e   : > { %v11059_v21 = vld [vmem:[#allocation3 + $0x24] ss:$8 sps:$4 sm:$0xff]   ;;  %s10914_s12 = sshll.u32 %s19778_s13, 4  ;;  %v11058_v22 = vld [vmem:[#allocation3 + $0xb0] ss:$8 sps:$4 sm:$0xff]   ;;  %s10915_s15 = sshll.u32 %s19778_s13, 5 }
  0x6f   : > { %1091 = vmatpush1.bf16.msra.mxu0 %v11043_v11  ;;  %1474 = vmatpush1.bf16.msra.mxu1 %v11046_v14  ;;  %v11062_v23 = vld [vmem:[#allocation3 + $0xa4] ss:$8 sps:$4 sm:$0xff]   ;;  %v11061_v24 = vld [vmem:[#allocation3 + $0x20] ss:$8 sps:$4 sm:$0xff]   ;;  %s12306_s22 = scalar_lea.vmem %s18458_s0, %s10914_s12  ;;  %v11065_v25 = vld [vmem:[#allocation3 + $0x14] ss:$8 sps:$4 sm:$0xff]   ;;  %s18284_s14 = scalar_lea.vmem %s18467_s9, %s10915_s15 }
  0x70   : > { %1092 = vmatprep.subr.bf16.mxu0 %v11047_v13  ;;  %1475 = vmatprep.subr.bf16.mxu1 %v11050_v15  ;;  %v11064_v26 = vld [vmem:[#allocation3 + $0xa0] ss:$8 sps:$4 sm:$0xff]   ;;  %v11068_v29 = vld [vmem:[#allocation3 + $0x94] ss:$8 sps:$4 sm:$0xff]   ;;  %v11067_v32 = vld [vmem:[#allocation3 + $0x10] ss:$8 sps:$4 sm:$0xff]  }
  0x71   : > { %v12309_v27 = vld [vmem:[%s12306_s22] sm:$0xff]  ;;  %v12312_v28 = vld [vmem:[%s12306_s22 + $0x8] sm:$0xff]  ;;  %v10118_v30 = vld [vmem:[%s12306_s22 + $0x10] sm:$0xff]  ;;  %vm18488_vm2 = vsmask.f32 4352 }
  0x72   : > { %468 = vst [vmem:[#allocation2 + $0x10] sm:$0xff] %v12309_v27  ;;  %v1643_v31 = vpack.c.bf16 %v12312_v28, %v12309_v27  ;;  %v11071_v33 = vld [vmem:[#allocation3 + $0x4] ss:$8 sps:$4 sm:$0xff]   ;;  %v476_v34 = vrot.slane %v10118_v30, 4  ;;  %v1259_v35 = vld [vmem:[#allocation2 + $0xb0] sm:$0x80] }
  0x73   : > { %1093 = vmatpush1.bf16.msra.mxu0 %v11049_v16  ;;  %1476 = vmatpush1.bf16.msra.mxu1 %v11052_v18  ;;  %v10119_v36 = vld [vmem:[%s12306_s22 + $0x18] sm:$0xff]  ;;  %v1261_v38 = vpack.c.bf16 %v12309_v27, %v1259_v35  ;;  %v11074_v40 = vld [vmem:[#allocation3 + $0x84] ss:$8 sps:$4 sm:$0xff]   ;;  %v915_v41 = vld [vmem:[#allocation2 + $0xb0] sm:$0xc0] }
  0x74   : > { %1094 = vmatprep.subr.bf16.mxu0 %v11053_v17  ;;  %1477 = vmatprep.subr.bf16.mxu1 %v11056_v19  ;;  %v11070_v37 = vld [vmem:[#allocation3 + $0x90] ss:$8 sps:$4 sm:$0xff]   ;;  %482 = vst [vmem:[#allocation2 + $0xf8] sm:$0xf0] %v476_v34  ;;  %v477_v39 = vrot.slane %v10119_v36, 4  ;;  %v936_v48 = vpack.c.bf16 %v12309_v27, %v915_v41  ;;  %v12332_v52 = vld [vmem:[%s12306_s22 + $0x40] sm:$0xff] }
  0x75   : > { %v11073_v42 = vld [vmem:[#allocation3] ss:$8 sps:$4 sm:$0xff]   ;;  %v12321_v43 = vld [vmem:[%s12306_s22 + $0x30] sm:$0xff]  ;;  %v12324_v45 = vld [vmem:[%s12306_s22 + $0x38] sm:$0xff]  ;;  %v1282_v49 = vshrl.u32 %v1261_v38, 16  ;;  %v1285_v50 = vshll.u32 %v1261_v38, 16 }
  0x76   : > { %484 = vst [vmem:[#allocation2 + $0x138] sm:$0xf] %v477_v39  ;;  %v11079_v44 = vld [vmem:[#allocation3 + $0x174] ss:$8 sps:$4 sm:$0xff]   ;;  %v495_v46 = vrot.slane %v12321_v43, 4  ;;  %v496_v51 = vrot.slane %v12324_v45, 4  ;;  %v12343_v56 = vsel %vm18482_vm0, %v476_v34, %v477_v39 }
  0x77   : > { %1095 = vmatpush1.bf16.msra.mxu0 %v11055_v20  ;;  %1478 = vmatpush1.bf16.msra.mxu1 %v11058_v22  ;;  %v11076_v47 = vld [vmem:[#allocation3 + $0x80] ss:$8 sps:$4 sm:$0xff]   ;;  %v12338_v54 = vld [vmem:[%s12306_s22 + $0x50] sm:$0xff]  ;;  %v975_v60 = vrot.slane %v936_v48, 3  ;;  %v1284_v61 = vrot.slane %v1282_v49, 3  ;;  %v1287_v62 = vrot.slane %v1285_v50, 4 }
  0x78   : > { %1096 = vmatprep.subr.bf16.mxu0 %v11059_v21  ;;  %1479 = vmatprep.subr.bf16.mxu1 %v11062_v23  ;;  %501 = vst [vmem:[#allocation2 + $0x128] sm:$0xf0] %v495_v46  ;;  %v12335_v53 = vld [vmem:[%s12306_s22 + $0x48] sm:$0xff]  ;;  %503 = vst [vmem:[#allocation2 + $0xa8] sm:$0xf] %v496_v51  ;;  %v514_v57 = vrot.slane %v12338_v54, 4 }
  0x79   : > { %v12350_v58 = vpack.c.bf16 %v12335_v53, %v12332_v52  ;;  %v12355_v63 = vld [vmem:[%s12306_s22 + $0x58] sm:$0xff]  ;;  %v12367_v8 = vld [vmem:[%s12306_s22 + $0x20] sm:$0xff]  ;;  %v12370_v9 = vld [vmem:[%s12306_s22 + $0x28] sm:$0xff]  ;;  %v1288_v13 = vor.u32 %v1287_v62, %v1284_v61  ;;  %vm18487_vm3 = vsmask.f32 7424 }
  0x7a   : > { %v11077_v1 = vld [vmem:[#allocation3 + $0x170] ss:$8 sps:$4 sm:$0xff]   ;;  %520 = vst [vmem:[#allocation2 + $0x90] sm:$0xf0] %v514_v57  ;;  %v515_v3 = vrot.slane %v12355_v63, 4  ;;  %v12379_v18 = vpack.c.bf16 %v12370_v9, %v12367_v8 }
  0x7b   : > { %1097 = vmatpush1.bf16.msra.mxu0 %v11061_v24  ;;  %1480 = vmatpush1.bf16.msra.mxu1 %v11064_v26  ;;  %v12340_v55 = vld [vmem:[#allocation2 + $0xf8] sm:$0xff]  ;;  %v11082_v10 = vld [vmem:[#allocation3 + $0x164] ss:$8 sps:$4 sm:$0xff]   ;;  %v11080_v21 = vld [vmem:[#allocation3 + $0x160] ss:$8 sps:$4 sm:$0xff]  }
  0x7c   : > { %1098 = vmatprep.subr.bf16.mxu0 %v11065_v25  ;;  %1481 = vmatprep.subr.bf16.mxu1 %v11068_v29  ;;  %v937_v59 = vpack.c.bf16 %v12340_v55, %v12312_v28  ;;  %522 = vst [vmem:[#allocation2 + $0x50] sm:$0xf] %v515_v3  ;;  %v11097_v11 = vld [vmem:[#allocation3 + $0x1f4] ss:$8 sps:$4 sm:$0xff]   ;;  %v11095_v25 = vld [vmem:[#allocation3 + $0x1f0] ss:$8 sps:$4 sm:$0xff]  }
  0x7d   : > { %v12357_v2 = vld [vmem:[#allocation2 + $0x138] sm:$0xff]  ;;  %v11100_v29 = vld [vmem:[#allocation3 + $0x1e4] ss:$8 sps:$4 sm:$0xff]   ;;  %v1308_v30 = vshrl.u32 %v12379_v18, 16  ;;  %v11098_v39 = vld [vmem:[#allocation3 + $0x1e0] ss:$8 sps:$4 sm:$0xff]  }
  0x7e   : > { %v976_v4 = vrot.slane %v937_v59, 3  ;;  %v1290_v5 = vshrl.u32 %v937_v59, 16  ;;  %v1293_v6 = vshll.u32 %v937_v59, 16  ;;  %v12364_v7 = vpack.c.bf16 %v12357_v2, %v12343_v56  ;;  %v11085_v22 = vld [vmem:[#allocation3 + $0x154] ss:$8 sps:$4 sm:$0xff]  }
  0x7f   : > { %1099 = vmatpush1.bf16.msra.mxu0 %v11067_v32  ;;  %1482 = vmatpush1.bf16.msra.mxu1 %v11070_v37  ;;  %v1311_v32 = vshll.u32 %v12379_v18, 16  ;;  %v11083_v35 = vld [vmem:[#allocation3 + $0x150] ss:$8 sps:$4 sm:$0xff]   ;;  %v11088_v36 = vld [vmem:[#allocation3 + $0x144] ss:$8 sps:$4 sm:$0xff]   ;;  %v12393_v37 = vsel %vm18482_vm0, %v495_v46, %v496_v51  ;;  %v980_v41 = vrot.slane %v12379_v18, 3 }
  0x80   : > { %1100 = vmatprep.subr.bf16.mxu0 %v11071_v33  ;;  %1483 = vmatprep.subr.bf16.mxu1 %v11074_v40  ;;  %v977_v12 = vsel %vm18489_vm1, %v975_v60, %v976_v4  ;;  %v1292_v14 = vrot.slane %v1290_v5, 3  ;;  %v1295_v15 = vrot.slane %v1293_v6, 4  ;;  %v1299_v16 = vshrl.u32 %v12364_v7, 16  ;;  %v12395_v38 = vld [vmem:[#allocation2 + $0x128] sm:$0xff]  ;;  %v11103_v40 = vld [vmem:[#allocation3 + $0x1d4] ss:$8 sps:$4 sm:$0xff]  }
  0x81   : > { %v1302_v17 = vshll.u32 %v12364_v7, 16  ;;  %v978_v20 = vrot.slane %v12364_v7, 3  ;;  %v12405_v43 = vpack.c.bf16 %v12393_v37, %v12395_v38  ;;  %v11086_v46 = vld [vmem:[#allocation3 + $0x140] ss:$8 sps:$4 sm:$0xff]   ;;  %v11091_v48 = vld [vmem:[#allocation3 + $0x134] ss:$8 sps:$4 sm:$0xff]   ;;  %v12515_v27 = vpack.c.bf16 %v12395_v38, %v12370_v9 }
  0x82   : > { %v1296_v19 = vor.u32 %v1295_v15, %v1292_v14  ;;  %v1301_v23 = vrot.slane %v1299_v16, 3  ;;  %v11101_v49 = vld [vmem:[#allocation3 + $0x1d0] ss:$8 sps:$4 sm:$0xff]   ;;  %v11109_v51 = vld [vmem:[#allocation3 + $0x1c4] ss:$8 sps:$4 sm:$0xff]  }
  0x83   : > { %1101 = vmatpush1.bf16.msra.mxu0 %v11073_v42  ;;  %1484 = vmatpush1.bf16.msra.mxu1 %v11076_v47  ;;  %v1304_v24 = vrot.slane %v1302_v17, 4  ;;  %v979_v33 = vsel %vm18489_vm1, %v976_v4, %v978_v20  ;;  %v1310_v42 = vrot.slane %v1308_v30, 3  ;;  %v12399_v47 = vld [vmem:[%s12306_s22 + $0x70] sm:$0xff]  ;;  %v12408_v50 = vld [vmem:[%s12306_s22 + $0x78] sm:$0xff]  ;;  %v981_v62 = vsel %vm18489_vm1, %v978_v20, %v980_v41  ;;  %v11094_v5 = vld [vmem:[#allocation3 + $0x124] ss:$8 sps:$4 sm:$0xff]  }
  0x84   : > { %1750 = vmatprep.subr.bf16.mxu0 %v11079_v44  ;;  %2147 = vmatprep.subr.bf16.mxu1 %v11097_v11  ;;  %v1297_v26 = vsel %vm18488_vm2, %v1288_v13, %v1296_v19  ;;  %v1313_v44 = vrot.slane %v1311_v32, 4  ;;  %v533_v59 = vrot.slane %v12399_v47, 4  ;;  %v11089_v61 = vld [vmem:[#allocation3 + $0x130] ss:$8 sps:$4 sm:$0xff]   ;;  %v1320_v4 = vshll.u32 %v12405_v43, 16  ;;  %v12418_v7 = vld [vmem:[#allocation2 + $0xa8] sm:$0xff] }
  0x85   : > { %v1305_v34 = vor.u32 %v1304_v24, %v1301_v23  ;;  %v534_v6 = vrot.slane %v12408_v50, 4  ;;  %v11112_v11 = vld [vmem:[#allocation3 + $0x1b4] ss:$8 sps:$4 sm:$0xff]   ;;  %v12427_v16 = vpack.c.bf16 %v12332_v52, %v12418_v7  ;;  %v11092_v17 = vld [vmem:[#allocation3 + $0x120] ss:$8 sps:$4 sm:$0xff]  }
  0x86   : > { %1119 = vmatmul.mubr.bf16.vlgmr.msra.gmra.mxu0 %v977_v12  ;;  %1502 = vmatmul.mubr.bf16.vlgmr.msra.gmra.mxu1 %v1297_v26  ;;  %v1314_v60 = vor.u32 %v1313_v44, %v1310_v42  ;;  %539 = vst [vmem:[#allocation2 + $0x58] sm:$0xf0] %v533_v59  ;;  %v982_v12 = vrot.slane %v12405_v43, 3  ;;  %v1322_v15 = vrot.slane %v1320_v4, 4  ;;  %v11106_v18 = vld [vmem:[#allocation3 + $0x114] ss:$8 sps:$4 sm:$0xff]  }
  0x87   : > { %1751 = vmatpush1.bf16.msra.mxu0 %v11077_v1  ;;  %1128 = vmatprep.mubr.bf16.mxu0 %v12136_v0  ;;  %v1306_v45 = vsel %vm18488_vm2, %v1296_v19, %v1305_v34  ;;  %v1317_v1 = vshrl.u32 %v12405_v43, 16  ;;  %541 = vst [vmem:[#allocation2 + $0x68] sm:$0xf] %v534_v6  ;;  %v11110_v19 = vld [vmem:[#allocation3 + $0x1b0] ss:$8 sps:$4 sm:$0xff]   ;;  %v1326_v23 = vshrl.u32 %v12427_v16, 16 }
  0x88   : > { %1752 = vmatprep.subr.bf16.mxu0 %v11082_v10  ;;  %1511 = vmatprep.mubr.bf16.mxu1 %v12136_v0  ;;  %v11107_v10 = vld [vmem:[#allocation3 + $0x1c0] ss:$8 sps:$4 sm:$0xff]   ;;  %v1315_v13 = vsel %vm18488_vm2, %v1305_v34, %v1314_v60  ;;  %v11118_v20 = vld [vmem:[#allocation3 + $0x1a4] ss:$8 sps:$4 sm:$0xff]   ;;  %v1329_v24 = vshll.u32 %v12427_v16, 16  ;;  %v12433_v52 = vld [vmem:[#allocation2 + $0x90] sm:$0xff] }
  0x89   : > { %2148 = vmatpush1.bf16.msra.mxu1 %v11095_v25  ;;  %v1319_v14 = vrot.slane %v1317_v1, 3  ;;  %v11104_v25 = vld [vmem:[#allocation3 + $0x110] ss:$8 sps:$4 sm:$0xff]   ;;  %v11115_v26 = vld [vmem:[#allocation3 + $0x104] ss:$8 sps:$4 sm:$0xff]   ;;  %v942_v32 = vpack.c.bf16 %v12433_v52, %v12335_v53 }
  0x8a   : > { %2149 = vmatprep.subr.bf16.mxu1 %v11100_v29  ;;  %v11116_v29 = vld [vmem:[#allocation3 + $0x1a0] ss:$8 sps:$4 sm:$0xff]   ;;  %v11121_v30 = vld [vmem:[#allocation3 + $0x194] ss:$8 sps:$4 sm:$0xff]   ;;  %v11124_v42 = vld [vmem:[#allocation3 + $0x184] ss:$8 sps:$4 sm:$0xff]  }
  0x8b   : > { %1753 = vmatpush1.bf16.msra.mxu0 %v11080_v21  ;;  %v983_v21 = vsel %vm18489_vm1, %v980_v41, %v982_v12  ;;  %v11127_v41 = vld [vmem:[#allocation3 + $0x274] ss:$8 sps:$4 sm:$0xff]   ;;  %v1338_v43 = vshll.u32 %v942_v32, 16 }
  0x8c   : > { %1754 = vmatprep.subr.bf16.mxu0 %v11085_v22  ;;  %v1323_v22 = vor.u32 %v1322_v15, %v1319_v14 }
  0x8d   : > { %2150 = vmatpush1.bf16.msra.mxu1 %v11098_v39  ;;  %v1331_v39 = vrot.slane %v1329_v24, 4  ;;  %v1340_v63 = vrot.slane %v1338_v43, 4 }
  0x8e   : > { %1129 = vmatmul.mubr.bf16.gmra.mxu0 %v979_v33  ;;  %2151 = vmatprep.subr.bf16.mxu1 %v11103_v40  ;;  %v11113_v33 = vld [vmem:[#allocation3 + $0x100] ss:$8 sps:$4 sm:$0xff]   ;;  %v1324_v34 = vsel %vm18488_vm2, %v1314_v60, %v1323_v22  ;;  %v11119_v40 = vld [vmem:[#allocation3 + $0x190] ss:$8 sps:$4 sm:$0xff]  }
  0x8f   : > { %1138 = vmatprep.mubr.bf16.mxu0 %v12136_v0  ;;  %1755 = vmatpush1.bf16.msra.mxu0 %v11083_v35  ;;  %v984_v35 = vrot.slane %v12427_v16, 3 }
  0x90   : > { %1756 = vmatprep.subr.bf16.mxu0 %v11088_v36  ;;  %1512 = vmatmul.mubr.bf16.gmra.mxu1 %v1306_v45  ;;  %v1328_v36 = vrot.slane %v1326_v23, 3  ;;  %v1335_v45 = vshrl.u32 %v942_v32, 16 }
  0x91   : > { %1521 = vmatprep.mubr.bf16.mxu1 %v12136_v0  ;;  %2152 = vmatpush1.bf16.msra.mxu1 %v11101_v49  ;;  %v985_v44 = vsel %vm18489_vm1, %v982_v12, %v984_v35  ;;  %v11122_v49 = vld [vmem:[#allocation3 + $0x180] ss:$8 sps:$4 sm:$0xff]  }
  0x92   : > { %2153 = vmatprep.subr.bf16.mxu1 %v11109_v51  ;;  %v1332_v53 = vor.u32 %v1331_v39, %v1328_v36  ;;  %v986_v51 = vrot.slane %v942_v32, 3  ;;  %v1923_v36 = vld [vmem:[#allocation2 + $0x10] sm:$0xfe] }
  0x93   : > { %1757 = vmatpush1.bf16.msra.mxu0 %v11086_v46  ;;  %v12447_v46 = vsel %vm18482_vm0, %v514_v57, %v515_v3  ;;  %v12456_v57 = vld [vmem:[%s12306_s22 + $0x60] sm:$0xff]  ;;  %v12459_v3 = vld [vmem:[%s12306_s22 + $0x68] sm:$0xff] }
  0x94   : > { %1758 = vmatprep.subr.bf16.mxu0 %v11091_v48  ;;  %v12449_v48 = vld [vmem:[#allocation2 + $0x50] sm:$0xff]  ;;  %v1333_v60 = vsel %vm18488_vm2, %v1323_v22, %v1332_v53 }
  0x95   : > { %2154 = vmatpush1.bf16.msra.mxu1 %v11107_v10  ;;  %v943_v54 = vpack.c.bf16 %v12449_v48, %v12447_v46  ;;  %v944_v10 = vpack.c.bf16 %v12459_v3, %v12456_v57 }
  0x96   : > { %1139 = vmatmul.mubr.bf16.gmra.mxu0 %v981_v62  ;;  %2155 = vmatprep.subr.bf16.mxu1 %v11112_v11  ;;  %v987_v62 = vsel %vm18489_vm1, %v984_v35, %v986_v51 }
  0x97   : > { %1148 = vmatprep.mubr.bf16.mxu0 %v12136_v0  ;;  %1759 = vmatpush1.bf16.msra.mxu0 %v11089_v61  ;;  %v1337_v61 = vrot.slane %v1335_v45, 3  ;;  %v1344_v4 = vshrl.u32 %v943_v54, 16  ;;  %v988_v12 = vrot.slane %v943_v54, 3  ;;  %v1353_v15 = vshrl.u32 %v944_v10, 16 }
  0x98   : > { %1760 = vmatprep.subr.bf16.mxu0 %v11094_v5  ;;  %1522 = vmatmul.mubr.bf16.gmra.mxu1 %v1315_v13  ;;  %v1347_v5 = vshll.u32 %v943_v54, 16  ;;  %v1356_v16 = vshll.u32 %v944_v10, 16  ;;  %v990_v24 = vrot.slane %v944_v10, 3  ;;  %v11125_v10 = vld [vmem:[#allocation3 + $0x270] ss:$8 sps:$4 sm:$0xff]  }
  0x99   : > { %1531 = vmatprep.mubr.bf16.mxu1 %v12136_v0  ;;  %2156 = vmatpush1.bf16.msra.mxu1 %v11110_v19  ;;  %v1341_v1 = vor.u32 %v1340_v63, %v1337_v61  ;;  %v1346_v13 = vrot.slane %v1344_v4, 3  ;;  %v12495_v63 = vpack.c.bf16 %v12343_v56, %v12340_v55  ;;  %v12503_v55 = vpack.c.bf16 %v12367_v8, %v12357_v2  ;;  %v11128_v56 = vld [vmem:[#allocation3 + $0x260] ss:$8 sps:$4 sm:$0xff]   ;;  %v11136_v2 = vld [vmem:[#allocation3 + $0x244] ss:$8 sps:$4 sm:$0xff]  }
  0x9a   : > { %2157 = vmatprep.subr.bf16.mxu1 %v11118_v20  ;;  %v1349_v14 = vrot.slane %v1347_v5, 4  ;;  %v12476_v20 = vsel %vm18482_vm0, %v533_v59, %v534_v6  ;;  %v1358_v22 = vrot.slane %v1356_v16, 4  ;;  %v991_v50 = vsel %vm18489_vm1, %v988_v12, %v990_v24  ;;  %v935_v6 = vld [vmem:[#allocation2 + $0x68] sm:$0x3f] }
  0x9b   : > { %1761 = vmatpush1.bf16.msra.mxu0 %v11092_v17  ;;  %v1342_v11 = vsel %vm18488_vm2, %v1332_v53, %v1341_v1  ;;  %v12467_v17 = vld [vmem:[#allocation2 + $0x58] sm:$0xff]  ;;  %v946_v39 = vpack.c.bf16 %v935_v6, %v935_v6  ;;  %v1944_v53 = vpack.c.bf16 %v12312_v28, %v1923_v36  ;;  %v1981_v5 = vshll.u32 %v12495_v63, 16  ;;  %v11134_v28 = vld [vmem:[#allocation3 + $0x240] ss:$8 sps:$4 sm:$0xff]  }
  0x9c   : > { %1762 = vmatprep.subr.bf16.mxu0 %v11106_v18  ;;  %v989_v18 = vsel %vm18489_vm1, %v986_v51, %v988_v12  ;;  %v1350_v19 = vor.u32 %v1349_v14, %v1346_v13  ;;  %v11133_v14 = vld [vmem:[#allocation3 + $0x254] ss:$8 sps:$4 sm:$0xff]   ;;  %v1985_v16 = vshrl.u32 %v12495_v63, 16  ;;  %v2001_v6 = vshrl.u32 %v12515_v27, 16 }
  0x9d   : > { %2158 = vmatpush1.bf16.msra.mxu1 %v11116_v29  ;;  %v1260_v29 = vld [vmem:[#allocation2 + $0x68] sm:$0x7f]  ;;  %v994_v43 = vrot.slane %v946_v39, 3  ;;  %v1976_v54 = vshll.u32 %v1944_v53, 16  ;;  %v1983_v13 = vrot.slane %v1981_v5, 1  ;;  %v2013_v39 = vshll.u32 %v12350_v58, 16 }
  0x9e   : > { %1149 = vmatmul.mubr.bf16.gmra.mxu0 %v983_v21  ;;  %2159 = vmatprep.subr.bf16.mxu1 %v11121_v30  ;;  %v1355_v21 = vrot.slane %v1353_v15, 3  ;;  %v1351_v23 = vsel %vm18488_vm2, %v1341_v1, %v1350_v19  ;;  %v1262_v35 = vpack.c.bf16 %v1260_v29, %v1260_v29  ;;  %v1974_v1 = vshrl.u32 %v1944_v53, 16 }
  0x9f   : > { %1158 = vmatprep.mubr.bf16.mxu0 %v12136_v0  ;;  %1763 = vmatpush1.bf16.msra.mxu0 %v11104_v25  ;;  %v945_v25 = vpack.c.bf16 %v12476_v20, %v12467_v17  ;;  %v1978_v4 = vrot.slane %v1976_v54, 1  ;;  %v1987_v8 = vor.u32 %v1985_v16, %v1983_v13  ;;  %v12525_v29 = vpack.c.bf16 %v12418_v7, %v12393_v37  ;;  %v11148_v37 = vld [vmem:[#allocation3 + $0x204] ss:$8 sps:$4 sm:$0xff]  }
  0xa0   : > { %1764 = vmatprep.subr.bf16.mxu0 %v11115_v26  ;;  %1532 = vmatmul.mubr.bf16.gmra.mxu1 %v1324_v34  ;;  %v1359_v26 = vor.u32 %v1358_v22, %v1355_v21  ;;  %v2017_v53 = vshrl.u32 %v12350_v58, 16 }
  0xa1   : > { %1541 = vmatprep.mubr.bf16.mxu1 %v12136_v0  ;;  %2160 = vmatpush1.bf16.msra.mxu1 %v11119_v40  ;;  %v1362_v47 = vshrl.u32 %v945_v25, 16  ;;  %v1365_v59 = vshll.u32 %v945_v25, 16  ;;  %v992_v32 = vrot.slane %v945_v25, 3  ;;  %v1979_v12 = vor.u32 %v1978_v4, %v1974_v1  ;;  %v11137_v25 = vld [vmem:[#allocation3 + $0x230] ss:$8 sps:$4 sm:$0xff]  }
  0xa2   : > { %2161 = vmatprep.subr.bf16.mxu1 %v11124_v42  ;;  %v1360_v30 = vsel %vm18488_vm2, %v1350_v19, %v1359_v26  ;;  %v1371_v42 = vshrl.u32 %v1262_v35, 16  ;;  %v11131_v19 = vld [vmem:[#allocation3 + $0x250] ss:$8 sps:$4 sm:$0xff]   ;;  %v2009_v36 = vshrl.u32 %v12525_v29, 16 }
  0xa3   : > { %1765 = vmatpush1.bf16.msra.mxu0 %v11113_v33  ;;  %v1364_v33 = vrot.slane %v1362_v47, 3  ;;  %v1367_v34 = vrot.slane %v1365_v59, 4  ;;  %v993_v40 = vsel %vm18489_vm1, %v990_v24, %v992_v32  ;;  %v1984_v15 = vsel %vm18487_vm3, %v1979_v12, %v1983_v13  ;;  %v11145_v47 = vld [vmem:[#allocation3 + $0x214] ss:$8 sps:$4 sm:$0xff]  }
  0xa4   : > { %2464 = vmatprep.subr.bf16.mxu0 %v11127_v41  ;;  %v1997_v24 = vshll.u32 %v12515_v27, 16 }
  0xa5   : > { %2162 = vmatpush1.bf16.msra.mxu1 %v11122_v49  ;;  %v1368_v41 = vor.u32 %v1367_v34, %v1364_v33  ;;  %v1373_v49 = vrot.slane %v1371_v42, 3  ;;  %v11146_v34 = vld [vmem:[#allocation3 + $0x200] ss:$8 sps:$4 sm:$0xff]   ;;  %v12541_v42 = vpack.c.bf16 %v12447_v46, %v12433_v52  ;;  %v12551_v52 = vpack.c.bf16 %v12456_v57, %v12449_v48 }
  0xa6   : > { %1159 = vmatmul.mubr.bf16.gmra.mxu0 %v985_v44  ;;  %v1374_v44 = vshll.u32 %v1262_v35, 16  ;;  %v1999_v38 = vrot.slane %v1997_v24, 1  ;;  %v1942_v48 = vld [vmem:[#allocation2 + $0x68] sm:$0xff] }
  0xa7   : > { %1168 = vmatprep.mubr.bf16.mxu0 %v12136_v0  ;;  %v1369_v45 = vsel %vm18488_vm2, %v1359_v26, %v1368_v41  ;;  %v11142_v26 = vld [vmem:[#allocation3 + $0x224] ss:$8 sps:$4 sm:$0xff]   ;;  %v2033_v1 = vshrl.u32 %v12551_v52, 16 }
  0xa8   : > { %1542 = vmatmul.mubr.bf16.gmra.mxu1 %v1333_v60  ;;  %v1376_v51 = vrot.slane %v1374_v44, 4  ;;  %v995_v60 = vsel %vm18489_vm1, %v992_v32, %v994_v43  ;;  %v11143_v32 = vld [vmem:[#allocation3 + $0x210] ss:$8 sps:$4 sm:$0xff]   ;;  %v2003_v7 = vor.u32 %v2001_v6, %v1999_v38  ;;  %v11152_v6 = vld [vmem:[%s18461_s3 + $0x60] ss:$8 sps:$4 sm:$0xff]  }
  0xa9   : > { %1551 = vmatprep.mubr.bf16.mxu1 %v12136_v0 }
  0xaa   : > { %v1377_v61 = vor.u32 %v1376_v51, %v1373_v49  ;;  %v2025_v51 = vshrl.u32 %v12541_v42, 16 }
  0xae   : > { %1169 = vmatmul.mubr.bf16.gmra.mxu0 %v987_v62  ;;  %v1378_v62 = vsel %vm18488_vm2, %v1368_v41, %v1377_v61  ;;  %v2015_v41 = vrot.slane %v2013_v39, 1 }
  0xaf   : > { %1178 = vmatprep.mubr.bf16.mxu0 %v12136_v0 }
  0xb0   : > { %1552 = vmatmul.mubr.bf16.gmra.mxu1 %v1342_v11  ;;  %v11130_v11 = vld [vmem:[#allocation3 + $0x264] ss:$8 sps:$4 sm:$0xff]   ;;  %v2019_v43 = vor.u32 %v2017_v53, %v2015_v41 }
  0xb1   : > { %1561 = vmatprep.mubr.bf16.mxu1 %v12136_v0  ;;  %v11160_v53 = vld [vmem:[%s18461_s3 + $0x44] ss:$8 sps:$4 sm:$0xff]  }
  0xb6   : > { %1179 = vmatmul.mubr.bf16.gmra.mxu0 %v989_v18  ;;  %v1989_v18 = vshll.u32 %v12503_v55, 16 }
  0xb7   : > { %1188 = vmatprep.mubr.bf16.mxu0 %v12136_v0 }
  0xb8   : > { %1562 = vmatmul.mubr.bf16.gmra.mxu1 %v1351_v23  ;;  %v1991_v21 = vrot.slane %v1989_v18, 1  ;;  %v1993_v23 = vshrl.u32 %v12503_v55, 16 }
  0xb9   : > { %1571 = vmatprep.mubr.bf16.mxu1 %v12136_v0 }
  0xba   : > { %v1992_v22 = vsel %vm18487_vm3, %v1987_v8, %v1991_v21  ;;  %v1995_v9 = vor.u32 %v1993_v23, %v1991_v21  ;;  %v11773_v21 = vld [vmem:[%s12306_s22 + $0x8] sm:$0xff]  ;;  %v2354_v23 = vrot.slane %v12495_v63, 1 }
  0xbc   : > { %v2000_v59 = vsel %vm18487_vm3, %v1995_v9, %v1999_v38  ;;  %v2358_v9 = vrot.slane %v12515_v27, 1 }
  0xbe   : > { %1189 = vmatmul.mubr.bf16.gmra.mxu0 %v991_v50  ;;  %v11140_v50 = vld [vmem:[#allocation3 + $0x220] ss:$8 sps:$4 sm:$0xff]  }
  0xbf   : > { %1198 = vmatprep.mubr.bf16.mxu0 %v12136_v0 }
  0xc0   : > { %1572 = vmatmul.mubr.bf16.gmra.mxu1 %v1360_v30  ;;  %v2005_v30 = vshll.u32 %v12525_v29, 16 }
  0xc1   : > { %1581 = vmatprep.mubr.bf16.mxu1 %v12136_v0 }
  0xc2   : > { %v2007_v33 = vrot.slane %v2005_v30, 1 }
  0xc4   : > { %v2008_v35 = vsel %vm18487_vm3, %v2003_v7, %v2007_v33 }
  0xc6   : > { %1199 = vmatmul.mubr.bf16.gmra.mxu0 %v993_v40  ;;  %v2011_v40 = vor.u32 %v2009_v36, %v2007_v33  ;;  %v11166_v33 = vld [vmem:[%s18461_s3 + $0x174] ss:$8 sps:$4 sm:$0xff]  }
  0xc7   : > { %1208 = vmatprep.mubr.bf16.mxu0 %v12136_v0 }
  0xc8   : > { %1582 = vmatmul.mubr.bf16.gmra.mxu1 %v1369_v45  ;;  %v2016_v44 = vsel %vm18487_vm3, %v2011_v40, %v2015_v41  ;;  %v2021_v45 = vshll.u32 %v12541_v42, 16  ;;  %v11169_v40 = vld [vmem:[%s18461_s3 + $0x164] ss:$8 sps:$4 sm:$0xff]  }
  0xc9   : > { %1591 = vmatprep.mubr.bf16.mxu1 %v12136_v0 }
  0xca   : > { %v2023_v49 = vrot.slane %v2021_v45, 1  ;;  %v11167_v45 = vld [vmem:[%s18461_s3 + $0x160] ss:$8 sps:$4 sm:$0xff]  }
  0xcc   : > { %v2024_v46 = vsel %vm18487_vm3, %v2019_v43, %v2023_v49  ;;  %v2027_v61 = vor.u32 %v2025_v51, %v2023_v49 }
  0xce   : > { %1209 = vmatmul.mubr.bf16.gmra.mxu0 %v995_v60  ;;  %v2029_v60 = vshll.u32 %v12551_v52, 16 }
  0xcf   : > { %1782 = vmatprep.mubr.bf16.mxu0 %v12136_v0 }
  0xd0   : > { %1592 = vmatmul.mubr.bf16.gmra.mxu1 %v1378_v62  ;;  %v2031_v54 = vrot.slane %v2029_v60, 1  ;;  %v12561_v62 = vpack.c.bf16 %v12467_v17, %v12459_v3  ;;  %v1943_v3 = vld [vmem:[#allocation2 + $0xc0] sm:$0x1]  ;;  %v11175_v60 = vld [vmem:[%s18461_s3 + $0x154] ss:$8 sps:$4 sm:$0xff]  }
  0xd1   : > { %2179 = vmatprep.mubr.bf16.mxu1 %v12136_v0 }
  0xd2   : > { %v2032_v57 = vsel %vm18487_vm3, %v2027_v61, %v2031_v54  ;;  %v2037_v4 = vshll.u32 %v12561_v62, 16  ;;  %v2035_v5 = vor.u32 %v2033_v1, %v2031_v54  ;;  %v2041_v12 = vshrl.u32 %v12561_v62, 16  ;;  %v11173_v54 = vld [vmem:[%s18461_s3 + $0x150] ss:$8 sps:$4 sm:$0xff]  }
  0xd6   : > { %1783 = vmatmul.mubr.bf16.vlgmr.msra.gmra.mxu0 %v1643_v31  ;;  %v11139_v31 = vld [vmem:[#allocation3 + $0x234] ss:$8 sps:$4 sm:$0xff]  }
  0xd7   : > { %2465 = vmatpush1.bf16.msra.mxu0 %v11125_v10  ;;  %1792 = vmatprep.mubr.bf16.mxu0 %v12136_v0  ;;  %v2039_v10 = vrot.slane %v2037_v4, 1 }
  0xd8   : > { %2466 = vmatprep.subr.bf16.mxu0 %v11130_v11  ;;  %2180 = vmatmul.mubr.bf16.vlgmr.msra.gmra.mxu1 %v1984_v15  ;;  %v12570_v11 = vpack.c.bf16 %v1942_v48, %v12476_v20  ;;  %v1954_v15 = vpack.c.bf16 %v1943_v3, %v1943_v3  ;;  %v2320_v20 = vld [vmem:[#allocation2 + $0x10] sm:$0xfc] }
  0xd9   : > { %2189 = vmatprep.mubr.bf16.mxu1 %v12136_v0  ;;  %v2040_v17 = vsel %vm18487_vm3, %v2035_v5, %v2039_v10  ;;  %v11161_v5 = vld [vmem:[%s18461_s3 + $0x30] ss:$8 sps:$4 sm:$0xff]  }
  0xda   : > { %v2045_v13 = vshll.u32 %v12570_v11, 16  ;;  %v2049_v18 = vshrl.u32 %v12570_v11, 16 }
  0xdb   : > { %2467 = vmatpush1.bf16.msra.mxu0 %v11128_v56  ;;  %v2043_v56 = vor.u32 %v2041_v12, %v2039_v10  ;;  %v11163_v10 = vld [vmem:[%s18461_s3 + $0x34] ss:$8 sps:$4 sm:$0xff]   ;;  %v11181_v12 = vld [vmem:[%s18461_s3 + $0x144] ss:$8 sps:$4 sm:$0xff]  }
  0xdc   : > { %2468 = vmatprep.subr.bf16.mxu0 %v11133_v14  ;;  %v2047_v14 = vrot.slane %v2045_v13, 1 }
  0xde   : > { %1793 = vmatmul.mubr.bf16.gmra.mxu0 %v12495_v63  ;;  %v2048_v16 = vsel %vm18487_vm3, %v2043_v56, %v2047_v14  ;;  %v2360_v63 = vrot.slane %v12525_v29, 1  ;;  %v11179_v56 = vld [vmem:[%s18461_s3 + $0x140] ss:$8 sps:$4 sm:$0xff]  }
  0xdf   : > { %1802 = vmatprep.mubr.bf16.mxu0 %v12136_v0  ;;  %2469 = vmatpush1.bf16.msra.mxu0 %v11131_v19  ;;  %v2053_v19 = vshll.u32 %v1954_v15, 16 }
  0xe0   : > { %2470 = vmatprep.subr.bf16.mxu0 %v11136_v2  ;;  %2190 = vmatmul.mubr.bf16.gmra.mxu1 %v1992_v22  ;;  %v2051_v2 = vor.u32 %v2049_v18, %v2047_v14  ;;  %v2366_v18 = vrot.slane %v12551_v52, 1 }
  0xe1   : > { %2199 = vmatprep.mubr.bf16.mxu1 %v12136_v0  ;;  %v2055_v8 = vrot.slane %v2053_v19, 1  ;;  %v11170_v19 = vld [vmem:[%s18461_s3 + $0x20] ss:$8 sps:$4 sm:$0xff]  }
  0xe3   : > { %2471 = vmatpush1.bf16.msra.mxu0 %v11134_v28  ;;  %v2322_v28 = vpack.c.bf16 %v11773_v21, %v2320_v20 }
  0xe4   : > { %2472 = vmatprep.subr.bf16.mxu0 %v11139_v31  ;;  %v2056_v31 = vsel %vm18487_vm3, %v2051_v2, %v2055_v8  ;;  %v11172_v2 = vld [vmem:[%s18461_s3 + $0x24] ss:$8 sps:$4 sm:$0xff]  }
  0xe5   : > { %v2353_v22 = vrot.slane %v2322_v28, 1  ;;  %v11187_v28 = vld [vmem:[%s18461_s3 + $0x134] ss:$8 sps:$4 sm:$0xff]  }
  0xe6   : > { %1803 = vmatmul.mubr.bf16.gmra.mxu0 %v12503_v55 }
  0xe7   : > { %1812 = vmatprep.mubr.bf16.mxu0 %v12136_v0  ;;  %2473 = vmatpush1.bf16.msra.mxu0 %v11137_v25  ;;  %v2355_v24 = vsel %vm18486_vm4, %v2353_v22, %v2354_v23  ;;  %v2356_v25 = vrot.slane %v12503_v55, 1  ;;  %v11151_v55 = vld [vmem:[%s18461_s3 + $0x74] ss:$8 sps:$4 sm:$0xff]  }
  0xe8   : > { %2474 = vmatprep.subr.bf16.mxu0 %v11142_v26  ;;  %2200 = vmatmul.mubr.bf16.gmra.mxu1 %v2000_v59 }
  0xe9   : > { %2209 = vmatprep.mubr.bf16.mxu1 %v12136_v0  ;;  %v2357_v26 = vsel %vm18486_vm4, %v2354_v23, %v2356_v25  ;;  %v2359_v38 = vsel %vm18486_vm4, %v2356_v25, %v2358_v9  ;;  %3149 = vmatprep.subr.bf16.mxu1 %v11151_v55  ;;  %v11176_v55 = vld [vmem:[%s18461_s3 + $0x10] ss:$8 sps:$4 sm:$0xff]  }
  0xeb   : > { %2475 = vmatpush1.bf16.msra.mxu0 %v11140_v50  ;;  %v542_v50 = vlaneseq }
  0xec   : > { %2476 = vmatprep.subr.bf16.mxu0 %v11145_v47  ;;  %v11149_v47 = vld [vmem:[%s18461_s3 + $0x70] ss:$8 sps:$4 sm:$0xff]  }
  0xed   : > { %3150 = vmatpush1.bf16.msra.mxu1 %v11149_v47  ;;  %v12604_v59 = vshrl.u32 %v542_v50, 7  ;;  %v11193_v50 = vld [vmem:[%s18461_s3 + $0x124] ss:$8 sps:$4 sm:$0xff]  }
  0xee   : > { %1813 = vmatmul.mubr.bf16.gmra.mxu0 %v12515_v27  ;;  %v2361_v27 = vsel %vm18486_vm4, %v2358_v9, %v2360_v63 }
  0xef   : > { %1822 = vmatprep.mubr.bf16.mxu0 %v12136_v0  ;;  %2477 = vmatpush1.bf16.msra.mxu0 %v11143_v32  ;;  %v12614_v30 = vsub.s32 0, %v12604_v59  ;;  %v2362_v32 = vrot.slane %v12350_v58, 1  ;;  %v12618_v7 = vsub.s32 1, %v12604_v59 }
  0xf0   : > { %2478 = vmatprep.subr.bf16.mxu0 %v11148_v37  ;;  %2210 = vmatmul.mubr.bf16.gmra.mxu1 %v2008_v35  ;;  %v903_v37 = vld [vmem:[#allocation5] sm:$0x3]  ;;  %v11157_v35 = vld [vmem:[%s18461_s3 + $0x54] ss:$8 sps:$4 sm:$0xff]  }
  0xf1   : > { %2219 = vmatprep.mubr.bf16.mxu1 %v12136_v0  ;;  %18799 = vst [vmem:[#allocation17_spill] sm:$0xff] %v12614_v30  ;;  %18800 = vst [vmem:[#allocation18_spill] sm:$0xff] %v12618_v7  ;;  %v12633_v36 = vrot.slane %v903_v37, %v12614_v30  ;;  %v2363_v39 = vsel %vm18486_vm4, %v2360_v63, %v2362_v32  ;;  %v12640_v41 = vrot.slane %v903_v37, %v12618_v7  ;;  %v11178_v63 = vld [vmem:[%s18461_s3 + $0x14] ss:$8 sps:$4 sm:$0xff]  }
  0xf3   : > { %2479 = vmatpush1.bf16.msra.mxu0 %v11146_v34  ;;  %v11155_v34 = vld [vmem:[%s18461_s3 + $0x50] ss:$8 sps:$4 sm:$0xff]  }
  0xf4   : > { %3739 = vmatprep.subr.bf16.mxu0 %v11166_v33  ;;  %v2368_v33 = vrot.slane %v12561_v62, 1 }
  0xf6   : > { %1823 = vmatmul.mubr.bf16.gmra.mxu0 %v12525_v29  ;;  %v11154_v29 = vld [vmem:[%s18461_s3 + $0x64] ss:$8 sps:$4 sm:$0xff]  }
  0xf7   : > { %1832 = vmatprep.mubr.bf16.mxu0 %v12136_v0  ;;  %3151 = vmatprep.subr.bf16.mxu1 %v11154_v29 }
  0xf8   : > { %2220 = vmatmul.mubr.bf16.gmra.mxu1 %v2016_v44  ;;  %v11158_v44 = vld [vmem:[%s18461_s3 + $0x40] ss:$8 sps:$4 sm:$0xff]  }
  0xf9   : > { %2229 = vmatprep.mubr.bf16.mxu1 %v12136_v0  ;;  %3152 = vmatpush1.bf16.msra.mxu1 %v11152_v6 }
  0xfa   : > { %3153 = vmatprep.subr.bf16.mxu1 %v11157_v35 }
  0xfd   : > { %3154 = vmatpush1.bf16.msra.mxu1 %v11155_v34 }
  0xfe   : > { %1833 = vmatmul.mubr.bf16.gmra.mxu0 %v12350_v58  ;;  %v11164_v58 = vld [vmem:[%s18461_s3 + $0x170] ss:$8 sps:$4 sm:$0xff]   ;;  %3155 = vmatprep.subr.bf16.mxu1 %v11160_v53 }
  0xff   : > { %1842 = vmatprep.mubr.bf16.mxu0 %v12136_v0 }
 0x100   : > { %2230 = vmatmul.mubr.bf16.gmra.mxu1 %v2024_v46  ;;  %v2364_v46 = vrot.slane %v12541_v42, 1 }
 0x101   : > { %2239 = vmatprep.mubr.bf16.mxu1 %v12136_v0  ;;  %3156 = vmatpush1.bf16.msra.mxu1 %v11158_v44  ;;  %v11182_v44 = vld [vmem:[%s18461_s3] ss:$8 sps:$4 sm:$0xff]  }
 0x102   : > { %v2365_v4 = vsel %vm18486_vm4, %v2362_v32, %v2364_v46  ;;  %3157 = vmatprep.subr.bf16.mxu1 %v11163_v10 }
 0x105   : > { %3158 = vmatpush1.bf16.msra.mxu1 %v11161_v5 }
 0x106   : > { %1843 = vmatmul.mubr.bf16.gmra.mxu0 %v12541_v42  ;;  %3159 = vmatprep.subr.bf16.mxu1 %v11172_v2  ;;  %v11206_v2 = vld [vmem:[%s18461_s3 + $0x1f0] ss:$8 sps:$4 sm:$0xff]  }
 0x107   : > { %1852 = vmatprep.mubr.bf16.mxu0 %v12136_v0 }
 0x108   : > { %2240 = vmatmul.mubr.bf16.gmra.mxu1 %v2032_v57 }
 0x109   : > { %2249 = vmatprep.mubr.bf16.mxu1 %v12136_v0  ;;  %3160 = vmatpush1.bf16.msra.mxu1 %v11170_v19 }
 0x10a   : > { %3161 = vmatprep.subr.bf16.mxu1 %v11178_v63  ;;  %v11214_v63 = vld [vmem:[%s18461_s3 + $0x1e4] ss:$8 sps:$4 sm:$0xff]  }
 0x10d   : > { %3162 = vmatpush1.bf16.msra.mxu1 %v11176_v55  ;;  %v11203_v55 = vld [vmem:[%s18461_s3 + $0xd0] ss:$8 sps:$4 sm:$0xff]  }
 0x10e   : > { %1853 = vmatmul.mubr.bf16.gmra.mxu0 %v12551_v52  ;;  %v11185_v52 = vld [vmem:[%s18461_s3 + $0x130] ss:$8 sps:$4 sm:$0xff]  }
 0x10f   : > { %1862 = vmatprep.mubr.bf16.mxu0 %v12136_v0 }
 0x110   : > { %2250 = vmatmul.mubr.bf16.gmra.mxu1 %v2040_v17 }
 0x111   : > { %2259 = vmatprep.mubr.bf16.mxu1 %v12136_v0 }
 0x116   : > { %1863 = vmatmul.mubr.bf16.gmra.mxu0 %v12561_v62  ;;  %v11194_v62 = vld [vmem:[%s18461_s3 + $0x110] ss:$8 sps:$4 sm:$0xff]  }
 0x117   : > { %1872 = vmatprep.mubr.bf16.mxu0 %v12136_v0 }
 0x118   : > { %2260 = vmatmul.mubr.bf16.gmra.mxu1 %v2048_v16 }
 0x119   : > { %2269 = vmatprep.mubr.bf16.mxu1 %v12136_v0 }
 0x11e   : > { %1873 = vmatmul.mubr.bf16.gmra.mxu0 %v12570_v11 }
 0x11f   : > { %2496 = vmatprep.mubr.bf16.mxu0 %v12136_v0 }
 0x120   : > { %2270 = vmatmul.mubr.bf16.gmra.mxu1 %v2056_v31 }
 0x126   : > { %2497 = vmatmul.mubr.bf16.vlgmr.msra.gmra.mxu0 %v2355_v24 }
 0x127   : > { %2506 = vmatprep.mubr.bf16.mxu0 %v12136_v0  ;;  %3740 = vmatpush1.bf16.msra.mxu0 %v11164_v58  ;;  %v11184_v58 = vld [vmem:[%s18461_s3 + $0x4] ss:$8 sps:$4 sm:$0xff]  }
 0x128   : > { %3741 = vmatprep.subr.bf16.mxu0 %v11169_v40  ;;  %3163 = vmatprep.subr.bf16.mxu1 %v11184_v58 }
 0x129   : > { %3164 = vmatpush1.bf16.msra.mxu1 %v11182_v44 }
 0x12b   : > { %3742 = vmatpush1.bf16.msra.mxu0 %v11167_v45 }
 0x12c   : > { %3743 = vmatprep.subr.bf16.mxu0 %v11175_v60 }
 0x12e   : > { %2507 = vmatmul.mubr.bf16.gmra.mxu0 %v2357_v26  ;;  %v2367_v26 = vsel %vm18486_vm4, %v2364_v46, %v2366_v18  ;;  %v2369_v46 = vsel %vm18486_vm4, %v2366_v18, %v2368_v33  ;;  %v11208_v18 = vld [vmem:[%s18461_s3 + $0x1f4] ss:$8 sps:$4 sm:$0xff]  }
 0x12f   : > { %2516 = vmatprep.mubr.bf16.mxu0 %v12136_v0  ;;  %3744 = vmatpush1.bf16.msra.mxu0 %v11173_v54  ;;  %v11202_v54 = vld [vmem:[%s18461_s3 + $0x104] ss:$8 sps:$4 sm:$0xff]  }
 0x130   : > { %3745 = vmatprep.subr.bf16.mxu0 %v11181_v12  ;;  %v2370_v12 = vrot.slane %v12570_v11, 1  ;;  %v11197_v11 = vld [vmem:[%s18461_s3 + $0xe0] ss:$8 sps:$4 sm:$0xff]  }
 0x133   : > { %3746 = vmatpush1.bf16.msra.mxu0 %v11179_v56 }
 0x134   : > { %3747 = vmatprep.subr.bf16.mxu0 %v11187_v28 }
 0x136   : > { %2517 = vmatmul.mubr.bf16.gmra.mxu0 %v2359_v38 }
 0x137   : > { %2526 = vmatprep.mubr.bf16.mxu0 %v12136_v0  ;;  %3748 = vmatpush1.bf16.msra.mxu0 %v11185_v52 }
 0x138   : > { %3749 = vmatprep.subr.bf16.mxu0 %v11193_v50 }
 0x13e   : > { %2527 = vmatmul.mubr.bf16.gmra.mxu0 %v2361_v27  ;;  %v11191_v27 = vld [vmem:[%s18461_s3 + $0x120] ss:$8 sps:$4 sm:$0xff]  }
 0x13f   : > { %2536 = vmatprep.mubr.bf16.mxu0 %v12136_v0  ;;  %3750 = vmatpush1.bf16.msra.mxu0 %v11191_v27  ;;  %v11212_v27 = vld [vmem:[%s18461_s3 + $0x1e0] ss:$8 sps:$4 sm:$0xff]  }
 0x146   : > { %v1120_v43 = vpop.f32.mrf.mxu0  ;;  %2537 = vmatmul.mubr.bf16.gmra.mxu0 %v2363_v39  ;;  %v1503_v48 = vpop.f32.mrf.mxu1  ;;  %v11196_v39 = vld [vmem:[%s18461_s3 + $0x114] ss:$8 sps:$4 sm:$0xff]  }
 0x147   : > { %v1219_v49 = vadd.f32 %v1120_v43, %v12633_v36  ;;  %2546 = vmatprep.mubr.bf16.mxu0 %v12136_v0  ;;  %3751 = vmatprep.subr.bf16.mxu0 %v11196_v39 }
 0x148   : > { %v1122_v51 = vpop.f32.mrf.mxu0  ;;  %v1505_v3 = vpop.f32.mrf.mxu1  ;;  %3752 = vmatpush1.bf16.msra.mxu0 %v11194_v62  ;;  %v11209_v62 = vld [vmem:[%s18461_s3 + $0xc0] ss:$8 sps:$4 sm:$0xff]  }
 0x149   : > { %v1220_v61 = vadd.f32 %v1122_v51, %v12640_v41  ;;  %v12661_v1 = vadd.f32 %v1503_v48, %v1219_v49  ;;  %3753 = vmatprep.subr.bf16.mxu0 %v11202_v54 }
 0x14a   : > { %v1124_v57 = vpop.f32.mrf.mxu0  ;;  %v1507_v14 = vpop.f32.mrf.mxu1 }
 0x14b   : > { %v1221_v42 = vadd.f32 %v1124_v57, %v12633_v36  ;;  %v12676_v13 = vadd.f32 %v1505_v3, %v1220_v61  ;;  %v11190_v61 = vld [vmem:[%s18461_s3 + $0xf4] ss:$8 sps:$4 sm:$0xff]   ;;  %v11188_v57 = vld [vmem:[%s18461_s3 + $0xf0] ss:$8 sps:$4 sm:$0xff]  }
 0x14c   : > { %v12671_v17 = vpop.f32.mrf.mxu0  ;;  %v12692_v8 = vpop.f32.mrf.mxu1  ;;  %3165 = vmatprep.subr.bf16.mxu1 %v11190_v61 }
 0x14d   : > { %v12681_v20 = vadd.f32 %v1507_v14, %v1221_v42  ;;  %v11200_v42 = vld [vmem:[%s18461_s3 + $0x100] ss:$8 sps:$4 sm:$0xff]   ;;  %3166 = vmatpush2.bf16.msra.mxu1 %v11188_v57 }
 0x14e   : > { %v1130_v15 = vpop.f32.mrf.mxu0  ;;  %2547 = vmatmul.mubr.bf16.gmra.mxu0 %v2365_v4 }
 0x14f   : > { %v1223_v16 = vadd.f32 %v1130_v15, %v12633_v36  ;;  %2556 = vmatprep.mubr.bf16.mxu0 %v12136_v0  ;;  %v2321_v15 = vld [vmem:[#allocation2 + $0xc0] sm:$0x3]  ;;  %3754 = vmatpush1.bf16.msra.mxu0 %v11200_v42  ;;  %v11217_v42 = vld [vmem:[%s18461_s3 + $0xb4] ss:$8 sps:$4 sm:$0xff]  }
 0x150   : > { %v1132_v21 = vpop.f32.mrf.mxu0  ;;  %v1513_v22 = vpop.f32.mrf.mxu1  ;;  %3755 = vmatprep.subr.bf16.mxu0 %v11208_v18 }
 0x151   : > { %v1224_v31 = vadd.f32 %v1132_v21, %v12640_v41  ;;  %v12701_v24 = vadd.f32 %v1513_v22, %v1223_v16  ;;  %v11199_v16 = vld [vmem:[%s18461_s3 + $0xe4] ss:$8 sps:$4 sm:$0xff]   ;;  %v2371_v22 = vsel %vm18486_vm4, %v2368_v33, %v2370_v12 }
 0x152   : > { %v1134_v23 = vpop.f32.mrf.mxu0  ;;  %v1515_v9 = vpop.f32.mrf.mxu1  ;;  %3167 = vmatprep.subr.bf16.mxu1 %v11199_v16 }
 0x153   : > { %v1225_v25 = vadd.f32 %v1134_v23, %v12633_v36  ;;  %v12713_v47 = vadd.f32 %v1515_v9, %v1224_v31  ;;  %v2323_v23 = vpack.c.bf16 %v2321_v15, %v2321_v15  ;;  %3168 = vmatpush2.bf16.msra.mxu1 %v11197_v11  ;;  %v11205_v9 = vld [vmem:[%s18461_s3 + $0xd4] ss:$8 sps:$4 sm:$0xff]   ;;  %3756 = vmatpush2.bf16.msra.mxu0 %v11206_v2  ;;  %v11226_v2 = vld [vmem:[%s18461_s3 + $0xa4] ss:$8 sps:$4 sm:$0xff]  }
 0x154   : > { %v12705_v38 = vpop.f32.mrf.mxu0  ;;  %v1517_v6 = vpop.f32.mrf.mxu1  ;;  %3169 = vmatprep.subr.bf16.mxu1 %v11205_v9  ;;  %3757 = vmatprep.subr.bf16.mxu0 %v11214_v63 }
 0x155   : > { %v12721_v32 = vadd.f32 %v1517_v6, %v1225_v25 }
 0x156   : > { %v1140_v29 = vpop.f32.mrf.mxu0  ;;  %2557 = vmatmul.mubr.bf16.gmra.mxu0 %v2367_v26  ;;  %v12726_v34 = vpop.f32.mrf.mxu1 }
 0x157   : > { %v1227_v37 = vadd.f32 %v1140_v29, %v12633_v36  ;;  %2566 = vmatprep.mubr.bf16.mxu0 %v12136_v0  ;;  %3170 = vmatpush2.bf16.msra.mxu1 %v11203_v55 }
 0x158   : > { %v1142_v35 = vpop.f32.mrf.mxu0  ;;  %v1523_v53 = vpop.f32.mrf.mxu1  ;;  %3758 = vmatpush2.bf16.msra.mxu0 %v11212_v27 }
 0x159   : > { %v1228_v40 = vadd.f32 %v1142_v35, %v12640_v41  ;;  %v12741_v43 = vadd.f32 %v1523_v53, %v1227_v37  ;;  %v2372_v35 = vrot.slane %v2323_v23, 1 }
 0x15a   : > { %v1144_v45 = vpop.f32.mrf.mxu0  ;;  %v1525_v51 = vpop.f32.mrf.mxu1 }
 0x15b   : > { %v1229_v49 = vadd.f32 %v1144_v45, %v12633_v36  ;;  %v12753_v48 = vadd.f32 %v1525_v51, %v1228_v40  ;;  %v11211_v40 = vld [vmem:[%s18461_s3 + $0xc4] ss:$8 sps:$4 sm:$0xff]   ;;  %v2373_v61 = vsel %vm18486_vm4, %v2370_v12, %v2372_v35  ;;  %v11221_v12 = vld [vmem:[%s18461_s3 + $0x1c0] ss:$8 sps:$4 sm:$0xff]  }
 0x15c   : > { %v12745_v60 = vpop.f32.mrf.mxu0  ;;  %v1527_v4 = vpop.f32.mrf.mxu1  ;;  %3171 = vmatprep.subr.bf16.mxu1 %v11211_v40  ;;  %v11233_v35 = vld [vmem:[%s18461_s3 + $0x1a0] ss:$8 sps:$4 sm:$0xff]  }
 0x15d   : > { %v12761_v10 = vadd.f32 %v1527_v4, %v1229_v49  ;;  %v11220_v49 = vld [vmem:[%s18461_s3 + $0x1d4] ss:$8 sps:$4 sm:$0xff]   ;;  %3172 = vmatpush2.bf16.msra.mxu1 %v11209_v62  ;;  %v11223_v4 = vld [vmem:[%s18461_s3 + $0x1c4] ss:$8 sps:$4 sm:$0xff]  }
 0x15e   : > { %v1150_v5 = vpop.f32.mrf.mxu0  ;;  %2567 = vmatmul.mubr.bf16.gmra.mxu0 %v2369_v46  ;;  %v12766_v56 = vpop.f32.mrf.mxu1  ;;  %3759 = vmatprep.subr.bf16.mxu0 %v11220_v49  ;;  %v11238_v49 = vld [vmem:[%s18461_s3 + $0x84] ss:$8 sps:$4 sm:$0xff]  }
 0x15f   : > { %v1231_v3 = vadd.f32 %v1150_v5, %v12633_v36  ;;  %2576 = vmatprep.mubr.bf16.mxu0 %v12136_v0  ;;  %3173 = vmatprep.subr.bf16.mxu1 %v11217_v42 }
 0x160   : > { %v1152_v14 = vpop.f32.mrf.mxu0  ;;  %v1533_v21 = vpop.f32.mrf.mxu1 }
 0x161   : > { %v1232_v19 = vadd.f32 %v1152_v14, %v12640_v41  ;;  %v12781_v31 = vadd.f32 %v1533_v21, %v1231_v3  ;;  %v11215_v3 = vld [vmem:[%s18461_s3 + $0xb0] ss:$8 sps:$4 sm:$0xff]   ;;  %v11229_v21 = vld [vmem:[%s18461_s3 + $0x1b4] ss:$8 sps:$4 sm:$0xff]  }
 0x162   : > { %v1154_v28 = vpop.f32.mrf.mxu0  ;;  %v1535_v25 = vpop.f32.mrf.mxu1  ;;  %3174 = vmatpush2.bf16.msra.mxu1 %v11215_v3  ;;  %v11241_v3 = vld [vmem:[%s18461_s3 + $0x194] ss:$8 sps:$4 sm:$0xff]  }
 0x163   : > { %v1233_v52 = vadd.f32 %v1154_v28, %v12633_v36  ;;  %v12793_v50 = vadd.f32 %v1535_v25, %v1232_v19  ;;  %3175 = vmatprep.subr.bf16.mxu1 %v11226_v2 }
 0x164   : > { %v12785_v26 = vpop.f32.mrf.mxu0  ;;  %v1537_v6 = vpop.f32.mrf.mxu1 }
 0x165   : > { %v12801_v37 = vadd.f32 %v1537_v6, %v1233_v52  ;;  %v11224_v52 = vld [vmem:[%s18461_s3 + $0xa0] ss:$8 sps:$4 sm:$0xff]   ;;  %v11232_v6 = vld [vmem:[%s18461_s3 + $0x94] ss:$8 sps:$4 sm:$0xff]  }
 0x166   : > { %v1160_v29 = vpop.f32.mrf.mxu0  ;;  %2577 = vmatmul.mubr.bf16.gmra.mxu0 %v2371_v22  ;;  %v12805_v58 = vpop.f32.mrf.mxu1  ;;  %v11227_v22 = vld [vmem:[%s18461_s3 + $0x1b0] ss:$8 sps:$4 sm:$0xff]   ;;  %3176 = vmatpush2.bf16.msra.mxu1 %v11224_v52 }
 0x167   : > { %v1235_v33 = vadd.f32 %v1160_v29, %v12633_v36  ;;  %2586 = vmatprep.mubr.bf16.mxu0 %v12136_v0  ;;  %v11218_v0 = vld [vmem:[%s18461_s3 + $0x1d0] ss:$8 sps:$4 sm:$0xff]   ;;  %3177 = vmatprep.subr.bf16.mxu1 %v11232_v6 }
 0x168   : > { %v1162_v39 = vpop.f32.mrf.mxu0  ;;  %v1543_v53 = vpop.f32.mrf.mxu1  ;;  %3760 = vmatpush2.bf16.msra.mxu0 %v11218_v0 }
 0x169   : > { %v1236_v44 = vadd.f32 %v1162_v39, %v12640_v41  ;;  %v12820_v46 = vadd.f32 %v1543_v53, %v1235_v33  ;;  %3761 = vmatprep.subr.bf16.mxu0 %v11223_v4  ;;  %v11230_v33 = vld [vmem:[%s18461_s3 + $0x90] ss:$8 sps:$4 sm:$0xff]  }
 0x16a   : > { %v1164_v45 = vpop.f32.mrf.mxu0  ;;  %v1545_v54 = vpop.f32.mrf.mxu1  ;;  %3178 = vmatpush2.bf16.msra.mxu1 %v11230_v33 }
 0x16b   : > { %v1237_v51 = vadd.f32 %v1164_v45, %v12633_v36  ;;  %v12832_v5 = vadd.f32 %v1545_v54, %v1236_v44  ;;  %v11235_v44 = vld [vmem:[%s18461_s3 + $0x1a4] ss:$8 sps:$4 sm:$0xff]   ;;  %v11239_v54 = vld [vmem:[%s18461_s3 + $0x190] ss:$8 sps:$4 sm:$0xff]   ;;  %3179 = vmatprep.subr.bf16.mxu1 %v11238_v49 }
 0x16c   : > { %v12824_v57 = vpop.f32.mrf.mxu0  ;;  %v1547_v14 = vpop.f32.mrf.mxu1  ;;  %3762 = vmatpush2.bf16.msra.mxu0 %v11221_v12 }
 0x16d   : > { %v12840_v16 = vadd.f32 %v1547_v14, %v1237_v51  ;;  %3763 = vmatprep.subr.bf16.mxu0 %v11229_v21  ;;  %v11242_v21 = vld [vmem:[%s18461_s3 + $0x180] ss:$8 sps:$4 sm:$0xff]  }
 0x16e   : > { %v1170_v15 = vpop.f32.mrf.mxu0  ;;  %2587 = vmatmul.mubr.bf16.gmra.mxu0 %v2373_v61  ;;  %v12843_v19 = vpop.f32.mrf.mxu1  ;;  %v11236_v61 = vld [vmem:[%s18461_s3 + $0x80] ss:$8 sps:$4 sm:$0xff]  }
 0x16f   : > { %v1239_v18 = vadd.f32 %v1170_v15, %v12633_v36  ;;  %3180 = vmatpush2.bf16.msra.mxu1 %v11236_v61 }
 0x170   : > { %v1172_v11 = vpop.f32.mrf.mxu0  ;;  %v1553_v23 = vpop.f32.mrf.mxu1  ;;  %3764 = vmatpush2.bf16.msra.mxu0 %v11227_v22 }
 0x171   : > { %v1240_v28 = vadd.f32 %v1172_v11, %v12640_v41  ;;  %v12858_v9 = vadd.f32 %v1553_v23, %v1239_v18  ;;  %3765 = vmatprep.subr.bf16.mxu0 %v11235_v44  ;;  %v11244_v11 = vld [vmem:[%s18461_s3 + $0x184] ss:$8 sps:$4 sm:$0xff]  }
 0x172   : > { %v1174_v25 = vpop.f32.mrf.mxu0  ;;  %v1555_v55 = vpop.f32.mrf.mxu1 }
 0x173   : > { %v1241_v63 = vadd.f32 %v1174_v25, %v12633_v36  ;;  %v12866_v29 = vadd.f32 %v1555_v55, %v1240_v28 }
 0x174   : > { %v12861_v27 = vpop.f32.mrf.mxu0  ;;  %v1557_v39 = vpop.f32.mrf.mxu1  ;;  %3766 = vmatpush2.bf16.msra.mxu0 %v11233_v35 }
 0x175   : > { %v12877_v62 = vadd.f32 %v1557_v39, %v1241_v63  ;;  %3767 = vmatprep.subr.bf16.mxu0 %v11241_v3 }
 0x176   : > { %v1180_v40 = vpop.f32.mrf.mxu0  ;;  %v12880_v53 = vpop.f32.mrf.mxu1 }
 0x177   : > { %v1243_v0 = vadd.f32 %v1180_v40, %v12633_v36 }
 0x178   : > { %v1182_v45 = vpop.f32.mrf.mxu0  ;;  %v1563_v42 = vpop.f32.mrf.mxu1  ;;  %3768 = vmatpush2.bf16.msra.mxu0 %v11239_v54 }
 0x179   : > { %v1244_v51 = vadd.f32 %v1182_v45, %v12640_v41  ;;  %v12895_v12 = vadd.f32 %v1563_v42, %v1243_v0  ;;  %3769 = vmatprep.subr.bf16.mxu0 %v11244_v11 }
 0x17a   : > { %v1184_v4 = vpop.f32.mrf.mxu0  ;;  %v1565_v15 = vpop.f32.mrf.mxu1 }
 0x17b   : > { %v1245_v14 = vadd.f32 %v1184_v4, %v12633_v36  ;;  %v12903_v2 = vadd.f32 %v1565_v15, %v1244_v51  ;;  %v11247_v15 = vld [vmem:[%s18461_s3 + $0x274] ss:$8 sps:$4 sm:$0xff]  }
 0x17c   : > { %v12898_v18 = vpop.f32.mrf.mxu0  ;;  %v1567_v28 = vpop.f32.mrf.mxu1  ;;  %3770 = vmatpush2.bf16.msra.mxu0 %v11242_v21  ;;  %4127 = vmatprep.subr.bf16.mxu1 %v11247_v15 }
 0x17d   : > { %v12908_v22 = vadd.f32 %v1567_v28, %v1245_v14 }
 0x17e   : > { %v1190_v52 = vpop.f32.mrf.mxu0  ;;  %v12911_v25 = vpop.f32.mrf.mxu1 }
 0x17f   : > { %v1247_v23 = vadd.f32 %v1190_v52, %v12633_v36 }
 0x180   : > { %v1192_v63 = vpop.f32.mrf.mxu0  ;;  %v1573_v6 = vpop.f32.mrf.mxu1 }
 0x181   : > { %v1248_v55 = vadd.f32 %v1192_v63, %v12640_v41  ;;  %v12914_v35 = vadd.f32 %v1573_v6, %v1247_v23 }
 0x182   : > { %v1194_v33 = vpop.f32.mrf.mxu0  ;;  %v1575_v40 = vpop.f32.mrf.mxu1 }
 0x183   : > { %v1249_v39 = vadd.f32 %v1194_v33, %v12633_v36  ;;  %v12919_v0 = vadd.f32 %v1575_v40, %v1248_v55 }
 0x184   : > { %v12917_v44 = vpop.f32.mrf.mxu0  ;;  %v1577_v45 = vpop.f32.mrf.mxu1 }
 0x185   : > { %v12921_v51 = vadd.f32 %v1577_v45, %v1249_v39 }
 0x186   : > { %v1200_v49 = vpop.f32.mrf.mxu0  ;;  %v12924_v54 = vpop.f32.mrf.mxu1 }
 0x187   : > { %v1251_v61 = vadd.f32 %v1200_v49, %v12633_v36 }
 0x188   : > { %v1202_v42 = vpop.f32.mrf.mxu0  ;;  %v1583_v3 = vpop.f32.mrf.mxu1 }
 0x189   : > { %v1252_v4 = vadd.f32 %v1202_v42, %v12640_v41  ;;  %v12930_v11 = vadd.f32 %v1583_v3, %v1251_v61 }
 0x18a   : > { %v1204_v14 = vpop.f32.mrf.mxu0  ;;  %v1585_v28 = vpop.f32.mrf.mxu1 }
 0x18b   : > { %v1253_v21 = vadd.f32 %v1204_v14, %v12633_v36  ;;  %v12935_v23 = vadd.f32 %v1585_v28, %v1252_v4 }
 0x18c   : > { %v12933_v52 = vpop.f32.mrf.mxu0  ;;  %v1587_v63 = vpop.f32.mrf.mxu1 }
 0x18d   : > { %v12937_v6 = vadd.f32 %v1587_v63, %v1253_v21  ;;  %v11262_v63 = vld [vmem:[%s18461_s3 + $0x374] ss:$8 sps:$4 sm:$0xff]  }
 0x18e   : > { %v1210_v55 = vpop.f32.mrf.mxu0  ;;  %v12940_v39 = vpop.f32.mrf.mxu1  ;;  %4745 = vmatprep.subr.bf16.mxu0 %v11262_v63 }
 0x18f   : > { %18801 = vst [vmem:[#allocation19_spill] sm:$0xff] %v12937_v6  ;;  %v1255_v33 = vadd.f32 %v1210_v55, %v12633_v36 }
 0x190   : > { %v1212_v40 = vpop.f32.mrf.mxu0  ;;  %v1593_v49 = vpop.f32.mrf.mxu1 }
 0x191   : > { %v1256_v45 = vadd.f32 %v1212_v40, %v12640_v41  ;;  %v12943_v42 = vadd.f32 %v1593_v49, %v1255_v33 }
 0x192   : > { %v1214_v61 = vpop.f32.mrf.mxu0  ;;  %v1595_v14 = vpop.f32.mrf.mxu1 }
 0x193   : > { %18802 = vst [vmem:[#allocation20_spill] sm:$0xff] %v12943_v42  ;;  %v1257_v3 = vadd.f32 %v1214_v61, %v12633_v36  ;;  %v12948_v15 = vadd.f32 %v1595_v14, %v1256_v45 }
 0x194   : > { %v12946_v4 = vpop.f32.mrf.mxu0  ;;  %v1597_v21 = vpop.f32.mrf.mxu1 }
 0x195   : > { %18803 = vst [vmem:[#allocation21_spill] sm:$0xff] %v12948_v15  ;;  %v12953_v55 = vadd.f32 %v1597_v21, %v1257_v3 }
 0x196   : > { %v1784_v28 = vpop.f32.mrf.mxu0  ;;  %v12958_v33 = vpop.f32.mrf.mxu1 }
 0x197   : > { %18804 = vst [vmem:[#allocation22_spill] sm:$0xff] %v12953_v55  ;;  %v12956_v40 = vadd.f32 %v1784_v28, %v12661_v1  ;;  %v12973_v1 = vadd.s32 8, %v12604_v59  ;;  %v12990_v55 = vadd.s32 24, %v12604_v59 }
 0x198   : > { %v1786_v49 = vpop.f32.mrf.mxu0  ;;  %v12963_v45 = vpop.f32.mrf.mxu1 }
 0x199   : > { %v12961_v36 = vadd.f32 %v1786_v49, %v12676_v13  ;;  %18806 = vst [vmem:[#allocation24_spill] sm:$0xff] %v12963_v45  ;;  %v12978_v63 = vmul.u32.u64.low 3435973837, %v12604_v59  ;;  %v12979_v13 = vmul.u32.u64.high 3435973837, %v12604_v59, %v12978_v63 }
 0x19a   : > { %v1788_v61 = vpop.f32.mrf.mxu0  ;;  %v12968_v7 = vpop.f32.mrf.mxu1 }
 0x19b   : > { %18805 = vst [vmem:[#allocation23_spill] sm:$0xff] %v12961_v36  ;;  %v12966_v14 = vadd.f32 %v1788_v61, %v12681_v20  ;;  %18808 = vst [vmem:[#allocation26_spill] sm:$0xff] %v12968_v7  ;;  %v12985_v20 = vadd.s32 16, %v12604_v59 }
 0x19c   : > { %v12970_v3 = vpop.f32.mrf.mxu0  ;;  %v12975_v21 = vpop.f32.mrf.mxu1 }
 0x19d   : > { %18807 = vst [vmem:[#allocation25_spill] sm:$0xff] %v12966_v14  ;;  %18809 = vst [vmem:[#allocation27_spill] sm:$0xff] %v12975_v21  ;;  %v12996_v42 = vmul.u32.u64.low 3435973837, %v12973_v1  ;;  %v12997_v21 = vmul.u32.u64.high 3435973837, %v12973_v1, %v12996_v42  ;;  %v13009_v14 = vadd.s32 32, %v12604_v59 }
 0x19e   : > { %v1794_v28 = vpop.f32.mrf.mxu0  ;;  %v12987_v61 = vpop.f32.mrf.mxu1 }
 0x19f   : > { %v12982_v49 = vadd.f32 %v1794_v28, %v12701_v24  ;;  %18811 = vst [vmem:[#allocation29_spill] sm:$0xff] %v12987_v61 }
 0x1a0   : > { %v1796_v30 = vpop.f32.mrf.mxu0  ;;  %v12999_v63 = vpop.f32.mrf.mxu1 }
 0x1a1   : > { %18810 = vst [vmem:[#allocation28_spill] sm:$0xff] %v12982_v49  ;;  %v12993_v15 = vadd.f32 %v1796_v30, %v12713_v47  ;;  %18813 = vst [vmem:[#allocation31_spill] sm:$0xff] %v12999_v63  ;;  %v13005_v49 = vmul.u32.u64.low 3435973837, %v12985_v20  ;;  %v13006_v61 = vmul.u32.u64.high 3435973837, %v12985_v20, %v13005_v49 }
 0x1a2   : > { %v1798_v24 = vpop.f32.mrf.mxu0  ;;  %v13011_v6 = vpop.f32.mrf.mxu1  ;;  %v13016_v47 = vmul.u32.u64.low 3435973837, %v12990_v55  ;;  %v13017_v42 = vmul.u32.u64.high 3435973837, %v12990_v55, %v13016_v47 }
 0x1a3   : > { %18812 = vst [vmem:[#allocation30_spill] sm:$0xff] %v12993_v15  ;;  %v13002_v28 = vadd.f32 %v1798_v24, %v12721_v32  ;;  %18815 = vst [vmem:[#allocation33_spill] sm:$0xff] %v13011_v6  ;;  %v569_v32 = vshrl.u32 %v12979_v13, 4  ;;  %v13023_v24 = vadd.s32 40, %v12604_v59  ;;  %v1222_v13 = vadd.f32 %v12671_v17, %v12640_v41 }
 0x1a4   : > { %v13013_v30 = vpop.f32.mrf.mxu0  ;;  %v13019_v15 = vpop.f32.mrf.mxu1  ;;  %v13056_v17 = vadd.s32 48, %v12604_v59 }
 0x1a5   : > { %18814 = vst [vmem:[#allocation32_spill] sm:$0xff] %v13002_v28  ;;  %18816 = vst [vmem:[#allocation34_spill] sm:$0xff] %v13013_v30  ;;  %v13029_v28 = vmul.u32.u64.low 3435973837, %v13009_v14  ;;  %v13030_v6 = vmul.u32.u64.high 3435973837, %v13009_v14, %v13029_v28 }
 0x1a6   : > { %18817 = vst [vmem:[#allocation35_spill] sm:$0xff] %v13019_v15  ;;  %v1804_v63 = vpop.f32.mrf.mxu0  ;;  %v13032_v30 = vpop.f32.mrf.mxu1  ;;  %v580_v15 = vshrl.u32 %v12997_v21, 4  ;;  %v602_v21 = vshrl.u32 %v13017_v42, 4 }
 0x1a7   : > { %v13026_v49 = vadd.f32 %v1804_v63, %v12741_v43  ;;  %18819 = vst [vmem:[#allocation37_spill] sm:$0xff] %v13032_v30  ;;  %v570_v43 = vmul.u32 20, %v569_v32  ;;  %v591_v30 = vshrl.u32 %v13006_v61, 4  ;;  %v1226_v32 = vadd.f32 %v12705_v38, %v12640_v41 }
 0x1a8   : > { %v1806_v7 = vpop.f32.mrf.mxu0  ;;  %v13040_v36 = vpop.f32.mrf.mxu1 }
 0x1a9   : > { %18818 = vst [vmem:[#allocation36_spill] sm:$0xff] %v13026_v49  ;;  %v13035_v47 = vadd.f32 %v1806_v7, %v12753_v48  ;;  %18821 = vst [vmem:[#allocation39_spill] sm:$0xff] %v13040_v36  ;;  %v13043_v63 = vmul.u32.u64.low 3435973837, %v13023_v24  ;;  %v13044_v49 = vmul.u32.u64.high 3435973837, %v13023_v24, %v13043_v63  ;;  %v13070_v42 = vsub.s32 %v12604_v59, %v570_v43 }
 0x1aa   : > { %v1808_v45 = vpop.f32.mrf.mxu0  ;;  %v13050_v7 = vpop.f32.mrf.mxu1  ;;  %v1230_v63 = vadd.f32 %v12745_v60, %v12640_v41  ;;  %v592_v38 = vmul.u32 20, %v591_v30  ;;  %v613_v36 = vshrl.u32 %v13030_v6, 4  ;;  %v13077_v60 = vadd.s32 56, %v12604_v59 }
 0x1ab   : > { %18820 = vst [vmem:[#allocation38_spill] sm:$0xff] %v13035_v47  ;;  %v13047_v28 = vadd.f32 %v1808_v45, %v12761_v10  ;;  %18823 = vst [vmem:[#allocation41_spill] sm:$0xff] %v13050_v7  ;;  %v581_v47 = vmul.u32 20, %v580_v15  ;;  %v13063_v10 = vadd.f32 %v12692_v8, %v1222_v13  ;;  %v1234_v45 = vadd.f32 %v12785_v26, %v12640_v41 }
 0x1ac   : > { %v13052_v48 = vpop.f32.mrf.mxu0  ;;  %v13067_v61 = vpop.f32.mrf.mxu1  ;;  %v603_v13 = vmul.u32 20, %v602_v21  ;;  %v13086_v43 = vadd.s32 64, %v12604_v59  ;;  %v13092_v30 = vadd.f32 %v12766_v56, %v1230_v63  ;;  %vm783_vm5 = vcmp.ne.s32.totalorder %v13070_v42, 0 }
 0x1ad   : > { %18822 = vst [vmem:[#allocation40_spill] sm:$0xff] %v13047_v28  ;;  %18824 = vst [vmem:[#allocation42_spill] sm:$0xff] %v13067_v61  ;;  %v13082_v26 = vmul.u32.u64.low 3435973837, %v13056_v17  ;;  %v13083_v61 = vmul.u32.u64.high 3435973837, %v13056_v17, %v13082_v26  ;;  %v13101_v21 = vadd.f32 %v12805_v58, %v1234_v45  ;;  %vm803_vm6 = vcmp.lt.s32.totalorder %v13070_v42, 0 }
 0x1ae   : > { %v1814_v28 = vpop.f32.mrf.mxu0  ;;  %v13079_v8 = vpop.f32.mrf.mxu1  ;;  %v13123_v63 = vsub.s32 %v12990_v55, %v603_v13  ;;  %v614_v45 = vmul.u32 20, %v613_v36  ;;  %vm13154_vm9 = vmand %vm803_vm6, %vm783_vm5 }
 0x1af   : > { %v13073_v7 = vadd.f32 %v1814_v28, %v12781_v31  ;;  %18826 = vst [vmem:[#allocation44_spill] sm:$0xff] %v13079_v8  ;;  %v13089_v31 = vadd.f32 %v12726_v34, %v1226_v32  ;;  %v13098_v28 = vsub.s32 %v12973_v1, %v581_v47  ;;  %v624_v34 = vshrl.u32 %v13044_v49, 4 }
 0x1b0   : > { %v1816_v15 = vpop.f32.mrf.mxu0  ;;  %v13115_v1 = vmul.u32.u64.low 3435973837, %v13077_v60  ;;  %v13116_v47 = vmul.u32.u64.high 3435973837, %v13077_v60, %v13115_v1  ;;  %18832 = vst [vmem:[#allocation50_spill] sm:$0xff] %v13123_v63  ;;  %vm786_vm13 = vcmp.ne.s32.totalorder %v13123_v63, 0  ;;  %vm806_vm14 = vcmp.lt.s32.totalorder %v13123_v63, 0 }
 0x1b1   : > { %18825 = vst [vmem:[#allocation43_spill] sm:$0xff] %v13073_v7  ;;  %v13095_v6 = vadd.f32 %v1816_v15, %v12793_v50  ;;  %v13103_v7 = vpop.f32.mrf.mxu1  ;;  %v13112_v50 = vsub.s32 %v12985_v20, %v592_v38  ;;  %v13126_v49 = vmul.u32.u64.low 3435973837, %v13086_v43  ;;  %v13127_v15 = vmul.u32.u64.high 3435973837, %v13086_v43, %v13126_v49  ;;  %vm13222_vm5 = vmand %vm806_vm14, %vm786_vm13 }
 0x1b2   : > { %18828 = vst [vmem:[#allocation46_spill] sm:$0xff] %v13103_v7  ;;  %v1818_v26 = vpop.f32.mrf.mxu0  ;;  %vm784_vm7 = vcmp.ne.s32.totalorder %v13098_v28, 0  ;;  %vm804_vm8 = vcmp.lt.s32.totalorder %v13098_v28, 0  ;;  %v13135_v20 = vadd.s32 72, %v12604_v59  ;;  %v1238_v38 = vadd.f32 %v12824_v57, %v12640_v41 }
 0x1b3   : > { %18827 = vst [vmem:[#allocation45_spill] sm:$0xff] %v13095_v6  ;;  %v13109_v56 = vadd.f32 %v1818_v26, %v12801_v37  ;;  %18830 = vst [vmem:[#allocation48_spill] sm:$0xff] %v13112_v50  ;;  %v13118_v58 = vpop.f32.mrf.mxu1  ;;  %v13130_v37 = vadd.s32 20, %v13070_v42  ;;  %v13140_v36 = vadd.s32 20, %v13098_v28  ;;  %v625_v13 = vmul.u32 20, %v624_v34 }
 0x1b4   : > { %18831 = vst [vmem:[#allocation49_spill] sm:$0xff] %v13118_v58  ;;  %v13120_v32 = vpop.f32.mrf.mxu0  ;;  %v13143_v26 = vadd.s32 80, %v12604_v59  ;;  %vm785_vm10 = vcmp.ne.s32.totalorder %v13112_v50, 0  ;;  %vm805_vm11 = vcmp.lt.s32.totalorder %v13112_v50, 0  ;;  %v13161_v57 = vadd.s32 20, %v13112_v50  ;;  %vm13169_vm12 = vmand %vm804_vm8, %vm784_vm7 }
 0x1b5   : > { %18829 = vst [vmem:[#allocation47_spill] sm:$0xff] %v13109_v56  ;;  %v13145_v1 = vpop.f32.mrf.mxu1  ;;  %v1242_v34 = vadd.f32 %v12861_v27, %v12640_v41  ;;  %v13183_v27 = vmul.u32.u64.low 3435973837, %v13135_v20  ;;  %v13184_v6 = vmul.u32.u64.high 3435973837, %v13135_v20, %v13183_v27  ;;  %vm13194_vm15 = vmand %vm805_vm11, %vm785_vm10  ;;  %v13230_v8 = vadd.f32 %v12843_v19, %v1238_v38  ;;  %v18941_v56 = vld [vmem:[#allocation21_spill] sm:$0xff] }
 0x1b6   : > { %v1824_v55 = vpop.f32.mrf.mxu0  ;;  %18833 = vst [vmem:[#allocation51_spill] sm:$0xff] %v13145_v1  ;;  %18837 = vst [vmem:[#allocation53_spill] sm:$0xff] %v13161_v57  ;;  %v635_v1 = vshrl.u32 %v13083_v61, 4 }
 0x1b7   : > { %v13148_v49 = vadd.f32 %v1824_v55, %v12820_v46 }
 0x1b8   : > { %v1826_v46 = vpop.f32.mrf.mxu0 }
 0x1b9   : > { %18834 = vst [vmem:[#allocation52_spill] sm:$0xff] %v13148_v49  ;;  %v13175_v49 = vsub.s32 %v13009_v14, %v614_v45  ;;  %v13179_v58 = vadd.f32 %v1826_v46, %v12832_v5  ;;  %v18842_v14 = vmov 0  ;;  %v13199_v5 = vsub.s32 %v13023_v24, %v625_v13  ;;  %v13205_v46 = vpop.f32.mrf.mxu1 }
 0x1ba   : > { %v1828_v7 = vpop.f32.mrf.mxu0  ;;  %v18843_v14 = vsel %vm13194_vm15, 4294967295, %v18842_v14  ;;  %v13202_v61 = vmul.u32.u64.low 3435973837, %v13143_v26  ;;  %v13203_v45 = vmul.u32.u64.high 3435973837, %v13143_v26, %v13202_v61  ;;  %18846 = vst [vmem:[#allocation58_spill] sm:$0xff] %v13205_v46  ;;  %v646_v24 = vshrl.u32 %v13116_v47, 4 }
 0x1bb   : > { %18840 = vst [vmem:[#allocation54_spill] sm:$0xff] %v13175_v49  ;;  %18841 = vst [vmem:[#allocation55_spill] sm:$0xff] %v13179_v58  ;;  %v13208_v27 = vadd.f32 %v1828_v7, %v12840_v16  ;;  %v13215_v58 = vadd.s32 20, %v13123_v63  ;;  %v18850_v61 = vmov 0  ;;  %vm787_vm6 = vcmp.ne.s32.totalorder %v13175_v49, 0  ;;  %v13249_v19 = vpop.f32.mrf.mxu1 }
 0x1bc   : > { %18844 = vst [vmem:[#allocation56_spill] sm:$0xff] %v18843_v14  ;;  %18845 = vst [vmem:[#allocation57_spill] sm:$0xff] %v13199_v5  ;;  %v13218_v13 = vpop.f32.mrf.mxu0  ;;  %v18851_v61 = vsel %vm13222_vm5, 4294967295, %v18850_v61  ;;  %vm807_vm7 = vcmp.lt.s32.totalorder %v13175_v49, 0  ;;  %v636_v16 = vmul.u32 20, %v635_v1  ;;  %v657_v7 = vshrl.u32 %v13127_v15, 4 }
 0x1bd   : > { %18847 = vst [vmem:[#allocation59_spill] sm:$0xff] %v13208_v27  ;;  %18848 = vst [vmem:[#allocation60_spill] sm:$0xff] %v13215_v58  ;;  %v13233_v47 = vadd.f32 %v12880_v53, %v1242_v34  ;;  %v13240_v46 = vadd.s32 88, %v12604_v59  ;;  %v13245_v15 = vadd.s32 20, %v13175_v49  ;;  %vm788_vm8 = vcmp.ne.s32.totalorder %v13199_v5, 0 }
 0x1be   : > { %18849 = vst [vmem:[#allocation61_spill] sm:$0xff] %v13218_v13  ;;  %18852 = vst [vmem:[#allocation62_spill] sm:$0xff] %v18851_v61  ;;  %v1246_v13 = vadd.f32 %v12898_v18, %v12640_v41  ;;  %v1834_v1 = vpop.f32.mrf.mxu0  ;;  %vm808_vm10 = vcmp.lt.s32.totalorder %v13199_v5, 0  ;;  %v18856_v18 = vmov 0  ;;  %v647_v34 = vmul.u32 20, %v646_v24 }
 0x1bf   : > { %18853 = vst [vmem:[#allocation63_spill] sm:$0xff] %v13245_v15  ;;  %18854 = vst [vmem:[#allocation64_spill] sm:$0xff] %v13249_v19  ;;  %v13252_v53 = vadd.f32 %v1834_v1, %v12858_v9  ;;  %v13267_v27 = vadd.s32 96, %v12604_v59  ;;  %v13270_v9 = vadd.s32 20, %v13199_v5  ;;  %v13273_v1 = vsub.s32 %v13056_v17, %v636_v16 }
 0x1c0   : > { %vm13262_vm11 = vmand %vm807_vm7, %vm787_vm6  ;;  %v1836_v19 = vpop.f32.mrf.mxu0  ;;  %v658_v38 = vmul.u32 20, %v657_v7  ;;  %v13276_v63 = vadd.s32 104, %v12604_v59  ;;  %v18861_v24 = vmov 0  ;;  %v668_v61 = vshrl.u32 %v13184_v6, 4 }
 0x1c1   : > { %18855 = vst [vmem:[#allocation65_spill] sm:$0xff] %v13252_v53  ;;  %v18857_v18 = vsel %vm13262_vm11, 4294967295, %v18856_v18  ;;  %18859 = vst [vmem:[#allocation67_spill] sm:$0xff] %v13270_v9  ;;  %v13279_v58 = vadd.f32 %v1836_v19, %v12866_v29  ;;  %v13289_v53 = vmul.u32.u64.low 3435973837, %v13240_v46  ;;  %v13290_v50 = vmul.u32.u64.high 3435973837, %v13240_v46, %v13289_v53 }
 0x1c2   : > { %18858 = vst [vmem:[#allocation66_spill] sm:$0xff] %v18857_v18  ;;  %vm13283_vm13 = vmand %vm808_vm10, %vm788_vm8  ;;  %v13293_v17 = vadd.f32 %v12911_v25, %v1246_v13  ;;  %v1838_v16 = vpop.f32.mrf.mxu0  ;;  %v679_v7 = vshrl.u32 %v13203_v45, 4  ;;  %v13301_v19 = vadd.s32 112, %v12604_v59  ;;  %v13309_v53 = vsub.s32 %v13077_v60, %v647_v34 }
 0x1c3   : > { %18860 = vst [vmem:[#allocation68_spill] sm:$0xff] %v13279_v58  ;;  %v18862_v24 = vsel %vm13283_vm13, 4294967295, %v18861_v24  ;;  %v13303_v58 = vpop.f32.mrf.mxu1  ;;  %v13306_v6 = vadd.f32 %v1838_v16, %v12877_v62  ;;  %v13312_v25 = vmul.u32.u64.low 3435973837, %v13267_v27  ;;  %v13313_v13 = vmul.u32.u64.high 3435973837, %v13267_v27, %v13312_v25 }
 0x1c4   : > { %18863 = vst [vmem:[#allocation69_spill] sm:$0xff] %v18862_v24  ;;  %18864 = vst [vmem:[#allocation70_spill] sm:$0xff] %v13293_v17  ;;  %v13315_v17 = vpop.f32.mrf.mxu0  ;;  %v13322_v29 = vsub.s32 %v13086_v43, %v658_v38  ;;  %v13325_v62 = vmul.u32.u64.low 3435973837, %v13276_v63  ;;  %v13326_v16 = vmul.u32.u64.high 3435973837, %v13276_v63, %v13325_v62  ;;  %vm789_vm14 = vcmp.ne.s32.totalorder %v13273_v1, 0 }
 0x1c5   : > { %18865 = vst [vmem:[#allocation71_spill] sm:$0xff] %v13303_v58  ;;  %18866 = vst [vmem:[#allocation72_spill] sm:$0xff] %v13306_v6  ;;  %vm809_vm6 = vcmp.lt.s32.totalorder %v13273_v1, 0  ;;  %v13331_v60 = vadd.s32 20, %v13273_v1  ;;  %v669_v34 = vmul.u32 20, %v668_v61  ;;  %v1250_v25 = vadd.f32 %v12917_v44, %v12640_v41  ;;  %v13339_v5 = vpop.f32.mrf.mxu1 }
 0x1c6   : > { %18867 = vst [vmem:[#allocation73_spill] sm:$0xff] %v13315_v17  ;;  %v1844_v24 = vpop.f32.mrf.mxu0  ;;  %v680_v45 = vmul.u32 20, %v679_v7  ;;  %v13336_v43 = vmul.u32.u64.low 3435973837, %v13301_v19  ;;  %v13337_v38 = vmul.u32.u64.high 3435973837, %v13301_v19, %v13336_v43  ;;  %18868 = vst [vmem:[#allocation74_spill] sm:$0xff] %v13339_v5  ;;  %vm790_vm7 = vcmp.ne.s32.totalorder %v13309_v53, 0 }
 0x1c7   : > { %v13342_v62 = vadd.f32 %v1844_v24, %v12895_v12  ;;  %vm810_vm8 = vcmp.lt.s32.totalorder %v13309_v53, 0  ;;  %v13347_v61 = vadd.s32 120, %v12604_v59  ;;  %v13350_v44 = vadd.s32 20, %v13309_v53  ;;  %vm13407_vm3 = vmand %vm809_vm6, %vm789_vm14 }
 0x1c8   : > { %v1846_v9 = vpop.f32.mrf.mxu0  ;;  %vm791_vm10 = vcmp.ne.s32.totalorder %v13322_v29, 0  ;;  %vm811_vm0 = vcmp.lt.s32.totalorder %v13322_v29, 0  ;;  %v13355_v7 = vadd.s32 128, %v12604_v59  ;;  %v13361_v24 = vsub.s32 %v13135_v20, %v669_v34  ;;  %v13378_v20 = vpop.f32.mrf.mxu1  ;;  %vm13426_vm14 = vmand %vm810_vm8, %vm790_vm7 }
 0x1c9   : > { %18869 = vst [vmem:[#allocation75_spill] sm:$0xff] %v13342_v62  ;;  %v13358_v12 = vadd.f32 %v1846_v9, %v12903_v2  ;;  %v690_v43 = vshrl.u32 %v13290_v50, 4  ;;  %v13365_v49 = vadd.s32 136, %v12604_v59  ;;  %v1254_v15 = vadd.f32 %v12933_v52, %v12640_v41  ;;  %18872 = vst [vmem:[#allocation78_spill] sm:$0xff] %v13378_v20 }
 0x1ca   : > { %v1848_v18 = vpop.f32.mrf.mxu0  ;;  %v13370_v62 = vadd.s32 20, %v13322_v29  ;;  %v13373_v6 = vsub.s32 %v13143_v26, %v680_v45  ;;  %v13376_v2 = vadd.s32 144, %v12604_v59  ;;  %v701_v9 = vshrl.u32 %v13313_v13, 4  ;;  %vm13436_vm2 = vmand %vm811_vm0, %vm791_vm10 }
 0x1cb   : > { %18870 = vst [vmem:[#allocation76_spill] sm:$0xff] %v13358_v12  ;;  %v13381_v50 = vadd.f32 %v1848_v18, %v12908_v22  ;;  %v13385_v34 = vmul.u32.u64.low 3435973837, %v13347_v61  ;;  %v13386_v52 = vmul.u32.u64.high 3435973837, %v13347_v61, %v13385_v34  ;;  %v712_v5 = vshrl.u32 %v13326_v16, 4 }
 0x1cc   : > { %18871 = vst [vmem:[#allocation77_spill] sm:$0xff] %v13373_v6  ;;  %v13388_v12 = vpop.f32.mrf.mxu0  ;;  %v13392_v26 = vmul.u32.u64.low 3435973837, %v13355_v7  ;;  %v13393_v45 = vmul.u32.u64.high 3435973837, %v13355_v7, %v13392_v26  ;;  %v13396_v58 = vadd.s32 152, %v12604_v59  ;;  %vm792_vm4 = vcmp.ne.s32.totalorder %v13361_v24, 0 }
 0x1cd   : > { %18873 = vst [vmem:[#allocation79_spill] sm:$0xff] %v13381_v50  ;;  %18874 = vst [vmem:[#allocation80_spill] sm:$0xff] %v13388_v12  ;;  %v691_v22 = vmul.u32 20, %v690_v43  ;;  %v13400_v18 = vmul.u32.u64.low 3435973837, %v13365_v49  ;;  %v13401_v13 = vmul.u32.u64.high 3435973837, %v13365_v49, %v13400_v18  ;;  %v723_v59 = vshrl.u32 %v13337_v38, 4  ;;  %v13417_v26 = vpop.f32.mrf.mxu1 }
 0x1ce   : > { %v1854_v50 = vpop.f32.mrf.mxu0  ;;  %v13414_v34 = vmul.u32.u64.low 3435973837, %v13376_v2  ;;  %v13415_v43 = vmul.u32.u64.high 3435973837, %v13376_v2, %v13414_v34  ;;  %18877 = vst [vmem:[#allocation81_spill] sm:$0xff] %v13417_v26  ;;  %vm793_vm6 = vcmp.ne.s32.totalorder %v13373_v6, 0  ;;  %vm813_vm1 = vcmp.lt.s32.totalorder %v13373_v6, 0 }
 0x1cf   : > { %v13420_v18 = vadd.f32 %v1854_v50, %v12914_v35  ;;  %v702_v38 = vmul.u32 20, %v701_v9  ;;  %v18881_v35 = vmov 0  ;;  %v13441_v50 = vadd.s32 20, %v13361_v24 }
 0x1d0   : > { %v1856_v20 = vpop.f32.mrf.mxu0  ;;  %v18882_v35 = vsel %vm13436_vm2, 4294967295, %v18881_v35  ;;  %v713_v34 = vmul.u32 20, %v712_v5  ;;  %v1258_v9 = vadd.f32 %v12946_v4, %v12640_v41  ;;  %vm18884_vm0 = vcmp.lt.s32.totalorder %v13361_v24, 0 }
 0x1d1   : > { %18878 = vst [vmem:[#allocation82_spill] sm:$0xff] %v13420_v18  ;;  %v13444_v18 = vmul.u32.u64.low 3435973837, %v13396_v58  ;;  %v13445_v26 = vmul.u32.u64.high 3435973837, %v13396_v58, %v13444_v18  ;;  %v13450_v57 = vadd.f32 %v1856_v20, %v12919_v0  ;;  %vm13456_vm7 = vmand %vm18884_vm0, %vm792_vm4  ;;  %v18885_v14 = vmov 0 }
 0x1d2   : > { %v18886_v14 = vsel %vm13456_vm7, 4294967295, %v18885_v14  ;;  %v13461_v5 = vadd.s32 20, %v13373_v6  ;;  %v13464_v17 = vsub.s32 %v13240_v46, %v691_v22  ;;  %v13467_v18 = vadd.f32 %v12924_v54, %v1250_v25  ;;  %v1858_v41 = vpop.f32.mrf.mxu0  ;;  %vm13481_vm4 = vmand %vm813_vm1, %vm793_vm6  ;;  %v13485_v25 = vpop.f32.mrf.mxu1  ;;  %v18909_v22 = vld [vmem:[#allocation26_spill] sm:$0xff] }
 0x1d3   : > { %18883 = vst [vmem:[#allocation83_spill] sm:$0xff] %v13450_v57  ;;  %v18889_v46 = vmov 0  ;;  %v724_v54 = vmul.u32 20, %v723_v59  ;;  %v13488_v20 = vadd.f32 %v1858_v41, %v12921_v51  ;;  %v13495_v4 = vsub.s32 %v13267_v27, %v702_v38  ;;  %v18908_v51 = vld [vmem:[#allocation23_spill] sm:$0xff] }
 0x1d4   : > { %18887 = vst [vmem:[#allocation84_spill] sm:$0xff] %v13464_v17  ;;  %18888 = vst [vmem:[#allocation85_spill] sm:$0xff] %v13467_v18  ;;  %v18890_v46 = vsel %vm13481_vm4, 4294967295, %v18889_v46  ;;  %v734_v0 = vshrl.u32 %v13386_v52, 4  ;;  %v13499_v18 = vadd.f32 %v12940_v39, %v1254_v15  ;;  %v13501_v57 = vpop.f32.mrf.mxu0  ;;  %v13508_v59 = vsub.s32 %v13276_v63, %v713_v34  ;;  %v13528_v38 = vpop.f32.mrf.mxu1 }
 0x1d5   : > { %18891 = vst [vmem:[#allocation86_spill] sm:$0xff] %v13495_v4  ;;  %v745_v41 = vshrl.u32 %v13393_v45, 4  ;;  %v13512_v27 = vadd.f32 %v12958_v33, %v1258_v9  ;;  %vm794_vm1 = vcmp.ne.s32.totalorder %v13464_v17, 0  ;;  %v756_v15 = vshrl.u32 %v13401_v13, 4 }
 0x1d6   : > { %18892 = vst [vmem:[#allocation87_spill] sm:$0xff] %v13499_v18  ;;  %18893 = vst [vmem:[#allocation88_spill] sm:$0xff] %v13508_v59  ;;  %v1864_v52 = vpop.f32.mrf.mxu0  ;;  %v13522_v63 = vadd.s32 20, %v13464_v17  ;;  %v13525_v45 = vsub.s32 %v13301_v19, %v724_v54  ;;  %v767_v33 = vshrl.u32 %v13415_v43, 4  ;;  %vm795_vm10 = vcmp.ne.s32.totalorder %v13495_v4, 0  ;;  %v18910_v18 = vld [vmem:[#allocation19_spill] sm:$0xff] }
 0x1d7   : > { %18894 = vst [vmem:[#allocation89_spill] sm:$0xff] %v13512_v27  ;;  %v13531_v34 = vadd.f32 %v1864_v52, %v12930_v11  ;;  %vm815_vm6 = vcmp.lt.s32.totalorder %v13495_v4, 0  ;;  %v735_v13 = vmul.u32 20, %v734_v0  ;;  %v746_v39 = vmul.u32 20, %v745_v41  ;;  %v13571_v27 = vpop.f32.mrf.mxu1 }
 0x1d8   : > { %18895 = vst [vmem:[#allocation90_spill] sm:$0xff] %v13522_v63  ;;  %18896 = vst [vmem:[#allocation91_spill] sm:$0xff] %v13525_v45  ;;  %v1866_v9 = vpop.f32.mrf.mxu0  ;;  %v778_v19 = vshrl.u32 %v13445_v26, 4  ;;  %v1886_v43 = vadd.f32 %v12970_v3, %v13063_v10  ;;  %vm18899_vm4 = vcmp.lt.s32.totalorder %v13464_v17, 0  ;;  %v18900_v11 = vmov 0  ;;  %v18907_v10 = vld [vmem:[#allocation24_spill] sm:$0xff] }
 0x1d9   : > { %18897 = vst [vmem:[#allocation92_spill] sm:$0xff] %v13531_v34  ;;  %v13541_v54 = vadd.f32 %v1866_v9, %v12935_v23  ;;  %vm13547_vm7 = vmand %vm18899_vm4, %vm794_vm1  ;;  %v13552_v0 = vadd.s32 20, %v13495_v4  ;;  %v757_v41 = vmul.u32 20, %v756_v15  ;;  %v18903_v26 = vmov 0  ;;  %v18951_v4 = vld [vmem:[#allocation22_spill] sm:$0xff] }
 0x1da   : > { %v18901_v11 = vsel %vm13547_vm7, 4294967295, %v18900_v11  ;;  %v1868_v52 = vpop.f32.mrf.mxu0  ;;  %vm13554_vm8 = vmand %vm815_vm6, %vm795_vm10  ;;  %v13559_v23 = vadd.s32 20, %v13508_v59  ;;  %vm797_vm0 = vcmp.ne.s32.totalorder %v13525_v45, 0  ;;  %vm817_vm2 = vcmp.lt.s32.totalorder %v13525_v45, 0 }
 0x1db   : > { %18898 = vst [vmem:[#allocation93_spill] sm:$0xff] %v13541_v54  ;;  %18902 = vst [vmem:[#allocation94_spill] sm:$0xff] %v13552_v0  ;;  %v18904_v26 = vsel %vm13554_vm8, 4294967295, %v18903_v26  ;;  %v768_v3 = vmul.u32 20, %v767_v33  ;;  %v13565_v9 = vadd.f32 %v18907_v10, %v12956_v40  ;;  %v13569_v15 = vadd.f32 %v18909_v22, %v18908_v51  ;;  %v18921_v10 = vld [vmem:[#allocation25_spill] sm:$0xff] }
 0x1dc   : > { %18905 = vst [vmem:[#allocation95_spill] sm:$0xff] %v18904_v26  ;;  %18906 = vst [vmem:[#allocation96_spill] sm:$0xff] %v13559_v23  ;;  %v13574_v54 = vadd.f32 %v1868_v52, %v18910_v18  ;;  %vm18912_vm4 = vcmp.ne.s32.totalorder %v13508_v59, 0  ;;  %vm18913_vm1 = vcmp.lt.s32.totalorder %v13508_v59, 0  ;;  %v18914_v34 = vmov 0  ;;  %v13587_v33 = vpop.f32.mrf.mxu0  ;;  %v13638_v26 = vpop.f32.mrf.mxu1  ;;  %v18984_v59 = vld [vmem:[#allocation45_spill] sm:$0xff] }
 0x1dd   : > { %vm13580_vm10 = vmand %vm18913_vm1, %vm18912_vm4  ;;  %v13585_v40 = vsub.s32 %v13347_v61, %v735_v13  ;;  %18918 = vst [vmem:[#allocation19_spill] sm:$0xff] %v13587_v33  ;;  %v13594_v18 = vadd.s32 20, %v13525_v45  ;;  %v13597_v51 = vsub.s32 %v13355_v7, %v746_v39  ;;  %v779_v52 = vmul.u32 20, %v778_v19  ;;  %v18923_v61 = vld [vmem:[#allocation29_spill] sm:$0xff]  ;;  %v18928_v19 = vld [vmem:[#allocation28_spill] sm:$0xff] }
 0x1de   : > { %18911 = vst [vmem:[#allocation24_spill] sm:$0xff] %v13574_v54  ;;  %v18915_v34 = vsel %vm13580_vm10, 4294967295, %v18914_v34  ;;  %v18922_v54 = vld [vmem:[#allocation27_spill] sm:$0xff]  ;;  %v13604_v13 = vadd.f32 %v18923_v61, %v1886_v43  ;;  %vm13614_vm6 = vmand %vm817_vm2, %vm797_vm0  ;;  %v18924_v7 = vmov 0  ;;  %v13619_v39 = vsub.s32 %v13365_v49, %v757_v41  ;;  %v18931_v61 = vld [vmem:[#allocation33_spill] sm:$0xff]  ;;  %v1874_v33 = vpop.f32.mrf.mxu0 }
 0x1df   : > { %18916 = vst [vmem:[#allocation23_spill] sm:$0xff] %v18915_v34  ;;  %18917 = vst [vmem:[#allocation26_spill] sm:$0xff] %v13585_v40  ;;  %v13601_v6 = vadd.f32 %v18922_v54, %v18921_v10  ;;  %v18925_v7 = vsel %vm13614_vm6, 4294967295, %v18924_v7  ;;  %v18929_v54 = vld [vmem:[#allocation31_spill] sm:$0xff]  ;;  %v18930_v10 = vld [vmem:[#allocation30_spill] sm:$0xff]  ;;  %v13634_v0 = vsub.s32 %v13376_v2, %v768_v3  ;;  %vm798_vm2 = vcmp.ne.s32.totalorder %v13585_v40, 0 }
 0x1e0   : > { %18919 = vst [vmem:[#allocation97_spill] sm:$0xff] %v13594_v18  ;;  %18920 = vst [vmem:[#allocation98_spill] sm:$0xff] %v13597_v51  ;;  %v13623_v43 = vadd.f32 %v18929_v54, %v18928_v19  ;;  %v13627_v22 = vadd.f32 %v18931_v61, %v18930_v10  ;;  %v18933_v49 = vld [vmem:[#allocation34_spill] sm:$0xff]  ;;  %v18934_v19 = vld [vmem:[#allocation20_spill] sm:$0xff]  ;;  %vm818_vm0 = vcmp.lt.s32.totalorder %v13585_v40, 0  ;;  %v1876_v10 = vpop.f32.mrf.mxu0  ;;  %v18936_v61 = vsel %vm13154_vm9, %v13130_v37, %v13070_v42 }
 0x1e1   : > { %18926 = vst [vmem:[#allocation25_spill] sm:$0xff] %v18925_v7  ;;  %18927 = vst [vmem:[#allocation27_spill] sm:$0xff] %v13619_v39  ;;  %v1890_v41 = vadd.f32 %v18933_v49, %v13089_v31  ;;  %v13641_v54 = vadd.f32 %v1874_v33, %v18934_v19  ;;  %vm13650_vm4 = vcmp.lt.s32.totalorder %v18936_v61, 16  ;;  %v18937_v2 = vmov 0  ;;  %v18985_v23 = vld [vmem:[#allocation49_spill] sm:$0xff]  ;;  %v18987_v34 = vld [vmem:[#allocation51_spill] sm:$0xff] }
 0x1e2   : > { %18932 = vst [vmem:[#allocation29_spill] sm:$0xff] %v13634_v0  ;;  %v18938_v2 = vsel %vm13650_vm4, 4294967295, %v18937_v2  ;;  %v13661_v3 = vsub.s32 %v13396_v58, %v779_v52  ;;  %v13664_v33 = vadd.f32 %v1876_v10, %v18941_v56  ;;  %v13667_v42 = vadd.s32 20, %v13585_v40  ;;  %v1878_v49 = vpop.f32.mrf.mxu0  ;;  %vm13673_vm1 = vmand %vm818_vm0, %vm798_vm2  ;;  %v18948_v52 = vld [vmem:[#allocation32_spill] sm:$0xff]  ;;  %v18949_v10 = vld [vmem:[#allocation35_spill] sm:$0xff] }
 0x1e3   : > { %18935 = vst [vmem:[#allocation28_spill] sm:$0xff] %v13641_v54  ;;  %18939 = vst [vmem:[#allocation31_spill] sm:$0xff] %v18938_v2  ;;  %vm800_vm9 = vcmp.ne.s32.totalorder %v13619_v39, 0  ;;  %vm820_vm8 = vcmp.lt.s32.totalorder %v13619_v39, 0  ;;  %v1894_v37 = vadd.f32 %v13052_v48, %v13092_v30  ;;  %v18944_v19 = vmov 0  ;;  %v18950_v56 = vld [vmem:[#allocation37_spill] sm:$0xff]  ;;  %v2243_v30 = vpop.f32.mrf.mxu1 }
 0x1e4   : > { %18940 = vst [vmem:[#allocation30_spill] sm:$0xff] %v13661_v3  ;;  %18942 = vst [vmem:[#allocation33_spill] sm:$0xff] %v13664_v33  ;;  %v18945_v19 = vsel %vm13673_vm1, 4294967295, %v18944_v19  ;;  %v13678_v58 = vadd.s32 20, %v13597_v51  ;;  %v13684_v61 = vadd.f32 %v18949_v10, %v18948_v52  ;;  %v13687_v31 = vadd.f32 %v18950_v56, %v1890_v41  ;;  %v13702_v52 = vpop.f32.mrf.mxu0  ;;  %v18970_v10 = vld [vmem:[#allocation38_spill] sm:$0xff]  ;;  %v18971_v56 = vld [vmem:[#allocation41_spill] sm:$0xff] }
 0x1e5   : > { %18943 = vst [vmem:[#allocation34_spill] sm:$0xff] %v13667_v42  ;;  %18946 = vst [vmem:[#allocation20_spill] sm:$0xff] %v18945_v19  ;;  %v1898_v48 = vadd.f32 %v13120_v32, %v13101_v21  ;;  %v13692_v33 = vadd.f32 %v1878_v49, %v18951_v4  ;;  %vm18953_vm2 = vcmp.ne.s32.totalorder %v13597_v51, 0  ;;  %vm18954_vm0 = vcmp.lt.s32.totalorder %v13597_v51, 0  ;;  %v18982_v42 = vld [vmem:[#allocation43_spill] sm:$0xff]  ;;  %v18983_v19 = vld [vmem:[#allocation46_spill] sm:$0xff] }
 0x1e6   : > { %18947 = vst [vmem:[#allocation21_spill] sm:$0xff] %v13678_v58  ;;  %vm13698_vm10 = vmand %vm18954_vm0, %vm18953_vm2  ;;  %v18955_v54 = vmov 0  ;;  %v18959_v41 = vsel %vm13169_vm12, %v13140_v36, %v13098_v28  ;;  %v18960_v21 = vmov 0  ;;  %v18963_v32 = vmov 0  ;;  %v18968_v28 = vld [vmem:[#allocation36_spill] sm:$0xff]  ;;  %v18969_v36 = vld [vmem:[#allocation39_spill] sm:$0xff] }
 0x1e7   : > { %18952 = vst [vmem:[#allocation32_spill] sm:$0xff] %v13692_v33  ;;  %v18956_v54 = vsel %vm13698_vm10, 4294967295, %v18955_v54  ;;  %18958 = vst [vmem:[#allocation37_spill] sm:$0xff] %v13702_v52  ;;  %vm13709_vm6 = vcmp.lt.s32.totalorder %v18959_v41, 16  ;;  %v13722_v4 = vadd.s32 20, %v13619_v39  ;;  %v13725_v55 = vadd.s32 20, %v13634_v0 }
 0x1e8   : > { %18957 = vst [vmem:[#allocation35_spill] sm:$0xff] %v18956_v54  ;;  %v18961_v21 = vsel %vm13709_vm6, 4294967295, %v18960_v21  ;;  %vm13717_vm7 = vmand %vm820_vm8, %vm800_vm9  ;;  %vm802_vm12 = vcmp.ne.s32.totalorder %v13661_v3, 0  ;;  %vm822_vm2 = vcmp.lt.s32.totalorder %v13661_v3, 0  ;;  %v13731_v49 = vadd.f32 %v18969_v36, %v18968_v28  ;;  %v18972_v33 = vld [vmem:[#allocation40_spill] sm:$0xff]  ;;  %v18973_v52 = vld [vmem:[#allocation42_spill] sm:$0xff] }
 0x1e9   : > { %18962 = vst [vmem:[#allocation22_spill] sm:$0xff] %v18961_v21  ;;  %v18964_v32 = vsel %vm13717_vm7, 4294967295, %v18963_v32  ;;  %18966 = vst [vmem:[#allocation100_spill] sm:$0xff] %v13722_v4  ;;  %v13735_v41 = vadd.f32 %v18971_v56, %v18970_v10  ;;  %v13739_v45 = vadd.f32 %v18973_v52, %v18972_v33  ;;  %vm18974_vm8 = vcmp.ne.s32.totalorder %v13634_v0, 0  ;;  %v18979_v36 = vld [vmem:[#allocation44_spill] sm:$0xff]  ;;  %v18980_v56 = vld [vmem:[#allocation61_spill] sm:$0xff]  ;;  %v2498_v52 = vpop.f32.mrf.mxu0 }
 0x1ea   : > { %18965 = vst [vmem:[#allocation99_spill] sm:$0xff] %v18964_v32  ;;  %18967 = vst [vmem:[#allocation101_spill] sm:$0xff] %v13725_v55  ;;  %vm18975_vm9 = vcmp.lt.s32.totalorder %v13634_v0, 0  ;;  %v18976_v28 = vmov 0  ;;  %v13754_v10 = vadd.f32 %v18979_v36, %v1894_v37  ;;  %v1902_v33 = vadd.f32 %v18980_v56, %v13230_v8  ;;  %v18986_v36 = vld [vmem:[#allocation47_spill] sm:$0xff]  ;;  %v2245_v56 = vpop.f32.mrf.mxu1  ;;  %v18995_v51 = vld [vmem:[#allocation53_spill] sm:$0xff] }
 0x1eb   : > { %vm13749_vm0 = vmand %vm18975_vm9, %vm18974_vm8  ;;  %v13763_v40 = vadd.s32 20, %v13661_v3  ;;  %v13767_v7 = vadd.f32 %v18983_v19, %v18982_v42  ;;  %v13771_v37 = vadd.f32 %v18985_v23, %v18984_v59  ;;  %v13775_v8 = vadd.f32 %v18987_v34, %v18986_v36  ;;  %v18992_v42 = vld [vmem:[#allocation58_spill] sm:$0xff]  ;;  %v18993_v59 = vld [vmem:[#allocation73_spill] sm:$0xff]  ;;  %v2500_v34 = vpop.f32.mrf.mxu0 }
 0x1ec   : > { %v18977_v28 = vsel %vm13749_vm0, 4294967295, %v18976_v28  ;;  %v13778_v17 = vadd.f32 %v2498_v52, %v13565_v9  ;;  %vm13784_vm8 = vmand %vm822_vm2, %vm802_vm12  ;;  %v18989_v18 = vmov 0  ;;  %v13789_v19 = vadd.f32 %v18992_v42, %v1898_v48  ;;  %v18996_v9 = vld [vmem:[#allocation48_spill] sm:$0xff]  ;;  %v19003_v36 = vld [vmem:[#allocation55_spill] sm:$0xff] }
 0x1ed   : > { %18978 = vst [vmem:[#allocation36_spill] sm:$0xff] %v18977_v28  ;;  %18981 = vst [vmem:[#allocation39_spill] sm:$0xff] %v13763_v40  ;;  %v18990_v18 = vsel %vm13784_vm8, 4294967295, %v18989_v18  ;;  %v1906_v23 = vadd.f32 %v18993_v59, %v13233_v47  ;;  %v18997_v52 = vsel %vm13194_vm15, %v18995_v51, %v18996_v9  ;;  %v18998_v58 = vmov 0  ;;  %v19001_v48 = vld [vmem:[#allocation52_spill] sm:$0xff]  ;;  %v19004_v51 = vld [vmem:[#allocation71_spill] sm:$0xff]  ;;  %v2502_v55 = vpop.f32.mrf.mxu0 }
 0x1ee   : > { %18988 = vst [vmem:[#allocation38_spill] sm:$0xff] %v13778_v17  ;;  %18991 = vst [vmem:[#allocation41_spill] sm:$0xff] %v18990_v18  ;;  %vm13798_vm9 = vcmp.lt.s32.totalorder %v18997_v52, 16  ;;  %v19002_v42 = vld [vmem:[#allocation64_spill] sm:$0xff]  ;;  %v13816_v9 = vadd.f32 %v19004_v51, %v19003_v36  ;;  %v18526_v52 = vmax.f32 %v13778_v17, 0.0  ;;  %v13820_v63 = vadd.f32 %v2500_v34, %v13569_v15  ;;  %v19006_v54 = vld [vmem:[#allocation59_spill] sm:$0xff]  ;;  %v2247_v51 = vpop.f32.mrf.mxu1 }
 0x1ef   : > { %v18999_v58 = vsel %vm13798_vm9, 4294967295, %v18998_v58  ;;  %v13812_v59 = vadd.f32 %v19002_v42, %v19001_v48  ;;  %v3322_v32 = vld [vmem:[#allocation2 + $0xb0] sm:$0x80]  ;;  %v19009_v0 = vld [vmem:[#allocation65_spill] sm:$0xff]  ;;  %v19011_v15 = vld [vmem:[#allocation68_spill] sm:$0xff]  ;;  %v13854_v36 = vadd.f32 %v13571_v27, %v1906_v23  ;;  %v2504_v17 = vpop.f32.mrf.mxu0  ;;  %vm19053_vm12 = vcmask 1044480  }
 0x1f0   : > { %19000 = vst [vmem:[#allocation40_spill] sm:$0xff] %v18999_v58  ;;  %19005 = vst [vmem:[#allocation42_spill] sm:$0xff] %v13820_v63  ;;  %v19007_v39 = vld [vmem:[#allocation74_spill] sm:$0xff]  ;;  %v19010_v48 = vld [vmem:[#allocation81_spill] sm:$0xff]  ;;  %v13839_v34 = vadd.f32 %v13485_v25, %v19011_v15  ;;  %v19027_v27 = vmax.f32 %v13820_v63, 0.0  ;;  %v13877_v40 = vadd.f32 %v2504_v17, %v13604_v13 }
 0x1f1   : > { %v13824_v4 = vadd.f32 %v19007_v39, %v19006_v54  ;;  %v19008_v28 = vld [vmem:[#allocation78_spill] sm:$0xff]  ;;  %v13831_v42 = vadd.f32 %v19010_v48, %v19009_v0  ;;  %v2717_v39 = vsel %vm13650_vm4, %v18526_v52, 0.0  ;;  %v13847_v0 = vadd.f32 %v2502_v55, %v13601_v6  ;;  %19015 = vst [vmem:[#allocation43_spill] sm:$0xff] %v13854_v36  ;;  %v19017_v15 = vld [vmem:[#allocation80_spill] sm:$0xff] }
 0x1f2   : > { %v13827_v47 = vadd.f32 %v19008_v28, %v1902_v33  ;;  %v3323_v28 = vld [vmem:[#allocation2 + $0xd0] sm:$0x80]  ;;  %v19013_v33 = vld [vmem:[#allocation72_spill] sm:$0xff]  ;;  %2757 = vst [vmem:[#allocation2 + $0x10] sm:$0xff] %v2717_v39  ;;  %v19022_v6 = vmov 0  ;;  %v3326_v55 = vpack.c.bf16 %v2717_v39, %v3322_v32  ;;  %v2718_v23 = vsel %vm13650_vm4, %v19027_v27, 0.0 }
 0x1f3   : > { %19012 = vst [vmem:[#allocation44_spill] sm:$0xff] %v13847_v0  ;;  %v13851_v48 = vadd.f32 %v13528_v38, %v19013_v33  ;;  %v19016_v25 = vld [vmem:[#allocation70_spill] sm:$0xff]  ;;  %v19019_v52 = vld [vmem:[#allocation60_spill] sm:$0xff]  ;;  %v19025_v38 = vld [vmem:[#allocation75_spill] sm:$0xff]  ;;  %v18533_v17 = vmax.f32 %v13877_v40, 0.0 }
 0x1f4   : > { %v1910_v3 = vadd.f32 %v19017_v15, %v19016_v25  ;;  %v19020_v54 = vld [vmem:[#allocation50_spill] sm:$0xff]  ;;  %v13869_v33 = vadd.f32 %v13638_v26, %v19025_v38  ;;  %v18532_v25 = vmax.f32 %v13847_v0, 0.0  ;;  %v19030_v32 = vld [vmem:[#allocation79_spill] sm:$0xff]  ;;  %2758 = vst [vmem:[#allocation2 + $0x48] sm:$0xff] %v2718_v23  ;;  %v2508_v26 = vpop.f32.mrf.mxu0  ;;  %v3327_v38 = vpack.c.bf16 %v2718_v23, %v3323_v28  ;;  %v11362_v58 = vld [vmem:[%s18461_s3 + $0x400] ss:$8 sps:$4 sm:$0xff]  }
 0x1f5   : > { %19014 = vst [vmem:[#allocation61_spill] sm:$0xff] %v13851_v48  ;;  %v19021_v18 = vsel %vm13222_vm5, %v19019_v52, %v19020_v54  ;;  %v2810_v52 = vld [vmem:[#allocation2 + $0xd0] sm:$0xc0]  ;;  %v19028_v54 = vld [vmem:[#allocation76_spill] sm:$0xff]  ;;  %v13883_v36 = vadd.f32 %v2245_v56, %v19030_v32  ;;  %v3364_v63 = vshrl.u32 %v3326_v55, 16  ;;  %v2601_v13 = vadd.f32 %v2508_v26, %v13623_v43  ;;  %v19033_v32 = vld [vmem:[#allocation63_spill] sm:$0xff] }
 0x1f6   : > { %vm13863_vm15 = vcmp.lt.s32.totalorder %v19021_v18, 16  ;;  %19026 = vst [vmem:[#allocation45_spill] sm:$0xff] %v13869_v33  ;;  %v2809_v18 = vld [vmem:[#allocation2 + $0xb0] sm:$0xc0]  ;;  %v13880_v15 = vadd.f32 %v2243_v30, %v19028_v54  ;;  %v2251_v33 = vpop.f32.mrf.mxu1  ;;  %v2719_v27 = vsel %vm13709_vm6, %v18532_v25, 0.0  ;;  %v3367_v2 = vshll.u32 %v3326_v55, 16  ;;  %v2510_v56 = vpop.f32.mrf.mxu0 }
 0x1f7   : > { %v19023_v6 = vsel %vm13863_vm15, 4294967295, %v19022_v6  ;;  %19031 = vst [vmem:[#allocation47_spill] sm:$0xff] %v13883_v36  ;;  %v13891_v30 = vadd.f32 %v2247_v51, %v1910_v3  ;;  %2759 = vst [vmem:[#allocation2 + $0x120] sm:$0xff] %v2719_v27  ;;  %v19034_v28 = vld [vmem:[#allocation54_spill] sm:$0xff]  ;;  %v2852_v0 = vpack.c.bf16 %v2718_v23, %v2810_v52  ;;  %v2851_v25 = vpack.c.bf16 %v2717_v39, %v2809_v18 }
 0x1f8   : > { %19024 = vst [vmem:[#allocation46_spill] sm:$0xff] %v19023_v6  ;;  %19029 = vst [vmem:[#allocation49_spill] sm:$0xff] %v13880_v15  ;;  %v19035_v36 = vsel %vm13262_vm11, %v19033_v32, %v19034_v28  ;;  %v19036_v15 = vmov 0  ;;  %v3381_v48 = vshrl.u32 %v3327_v38, 16  ;;  %v2720_v43 = vsel %vm13709_vm6, %v18533_v17, 0.0  ;;  %v19040_v26 = vld [vmem:[#allocation82_spill] sm:$0xff] }
 0x1f9   : > { %vm13898_vm5 = vcmp.lt.s32.totalorder %v19035_v36, 16  ;;  %v2641_v3 = vmax.f32 %v2601_v13, 0.0  ;;  %v13907_v51 = vadd.f32 %v2510_v56, %v13627_v22  ;;  %v3384_v55 = vshll.u32 %v3327_v38, 16  ;;  %2760 = vst [vmem:[#allocation2 + $0x38] sm:$0xff] %v2720_v43  ;;  %v2512_v36 = vpop.f32.mrf.mxu0  ;;  %v19042_v38 = vld [vmem:[#allocation67_spill] sm:$0xff] }
 0x1fa   : > { %v19037_v15 = vsel %vm13898_vm5, 4294967295, %v19036_v15  ;;  %v13910_v54 = vadd.f32 %v2251_v33, %v19040_v26  ;;  %v13912_v32 = vrot.slane %v3364_v63, 3  ;;  %v2603_v52 = vadd.f32 %v2512_v36, %v13684_v61  ;;  %v19043_v33 = vld [vmem:[#allocation57_spill] sm:$0xff] }
 0x1fb   : > { %19038 = vst [vmem:[#allocation51_spill] sm:$0xff] %v19037_v15  ;;  %19039 = vst [vmem:[#allocation58_spill] sm:$0xff] %v13907_v51  ;;  %v2721_v39 = vsel %vm13798_vm9, %v2641_v3, 0.0  ;;  %v18534_v23 = vmax.f32 %v13907_v51, 0.0  ;;  %v13918_v18 = vrot.slane %v3367_v2, 4  ;;  %v2514_v22 = vpop.f32.mrf.mxu0  ;;  %v19044_v56 = vsel %vm13283_vm13, %v19042_v38, %v19043_v33 }
 0x1fc   : > { %2761 = vst [vmem:[#allocation2 + $0xf8] sm:$0xff] %v2721_v39  ;;  %vm13925_vm11 = vcmp.lt.s32.totalorder %v19044_v56, 16  ;;  %v19045_v28 = vmov 0  ;;  %v2930_v63 = vrot.slane %v2852_v0, 3  ;;  %v13929_v26 = vpack.c.bf16 %v2721_v39, %v2719_v27 }
 0x1fd   : > { %v19046_v28 = vsel %vm13925_vm11, 4294967295, %v19045_v28  ;;  %v2927_v3 = vrot.slane %v2851_v25, 3  ;;  %v3383_v17 = vrot.slane %v3381_v48, 3  ;;  %v2722_v2 = vsel %vm13798_vm9, %v18534_v23, 0.0  ;;  %v2518_v38 = vpop.f32.mrf.mxu0 }
 0x1fe   : > { %19047 = vst [vmem:[#allocation73_spill] sm:$0xff] %v19046_v28  ;;  %v2643_v61 = vmax.f32 %v2603_v52, 0.0  ;;  %v13936_v36 = vadd.f32 %v2514_v22, %v13687_v31  ;;  %v3386_v13 = vrot.slane %v3384_v55, 4  ;;  %2762 = vst [vmem:[#allocation2 + $0x100] sm:$0xff] %v2722_v2  ;;  %v13938_v33 = vpack.c.bf16 %v2722_v2, %v2720_v43 }
 0x1ff   : > { %v18535_v0 = vrot.slane %v13929_v26, 3  ;;  %v3372_v27 = vshrl.u32 %v13929_v26, 16  ;;  %v3375_v48 = vshll.u32 %v13929_v26, 16  ;;  %v2605_v52 = vadd.f32 %v2518_v38, %v13731_v49  ;;  %v2520_v55 = vpop.f32.mrf.mxu0 }
 0x200   : > { %19048 = vst [vmem:[#allocation56_spill] sm:$0xff] %v13936_v36  ;;  %v2723_v25 = vsel %vm13863_vm15, %v2643_v61, 0.0  ;;  %v18537_v39 = vmax.f32 %v13936_v36, 0.0  ;;  %v3370_v31 = vor.u32 %v13918_v18, %v13912_v32  ;;  %v19049_v43 = vsel %vm13407_vm3, %v13331_v60, %v13273_v1  ;;  %v2253_v18 = vpop.f32.mrf.mxu1  ;;  %v11245_v61 = vld [vmem:[%s18461_s3 + $0x270] ss:$8 sps:$4 sm:$0xff]   ;;  %vm19054_vm3 = vmmov %vm19053_vm12 }
 0x201   : > { %2763 = vst [vmem:[#allocation2 + $0x80] sm:$0xff] %v2723_v25  ;;  %vm13954_vm13 = vcmp.lt.s32.totalorder %v19049_v43, 16  ;;  %v19050_v22 = vmov 0  ;;  %v2931_v56 = vrot.slane %v13938_v33, 3  ;;  %v2929_v49 = vsel %vm19053_vm12, %v2927_v3, %v18535_v0  ;;  %v2522_v3 = vpop.f32.mrf.mxu0 }
 0x202   : > { %v19051_v22 = vsel %vm13954_vm13, 4294967295, %v19050_v22  ;;  %v3389_v2 = vshrl.u32 %v13938_v33, 16  ;;  %v3392_v32 = vshll.u32 %v13938_v33, 16  ;;  %v2724_v1 = vsel %vm13863_vm15, %v18537_v39, 0.0 }
 0x203   : > { %19052 = vst [vmem:[#allocation53_spill] sm:$0xff] %v19051_v22  ;;  %v2645_v60 = vmax.f32 %v2605_v52, 0.0  ;;  %v13969_v16 = vadd.f32 %v2520_v55, %v13735_v41  ;;  %v3374_v38 = vrot.slane %v3372_v27, 3  ;;  %2764 = vst [vmem:[#allocation2 + $0x108] sm:$0xff] %v2724_v1  ;;  %v2932_v43 = vsel %vm19054_vm3, %v2930_v63, %v2931_v56  ;;  %v11250_v52 = vld [vmem:[%s18461_s3 + $0x264] ss:$8 sps:$4 sm:$0xff]   ;;  %v2524_v51 = vpop.f32.mrf.mxu0 }
 0x204   : > { %v3391_v23 = vrot.slane %v3389_v2, 3  ;;  %v3394_v0 = vrot.slane %v3392_v32, 4  ;;  %v3377_v36 = vrot.slane %v3375_v48, 4  ;;  %v2607_v27 = vadd.f32 %v2522_v3, %v13739_v45  ;;  %3181 = vmatprep.mubr.bf16.mxu1 %v2932_v43  ;;  %v19059_v45 = vld [vmem:[#allocation83_spill] sm:$0xff]  ;;  %v19062_v43 = vld [vmem:[#allocation85_spill] sm:$0xff] }
 0x205   : > { %v2725_v41 = vsel %vm13898_vm5, %v2645_v60, 0.0  ;;  %v18557_v55 = vmax.f32 %v13969_v16, 0.0  ;;  %v3387_v39 = vor.u32 %v3386_v13, %v3383_v17  ;;  %v19055_v63 = vsel %vm13426_vm14, %v13350_v44, %v13309_v53  ;;  %3182 = vmatmul.mubr.bf16.vlgmr.msra.gmra.mxu1 %v2929_v49  ;;  %v2255_v13 = vpop.f32.mrf.mxu1 }
 0x206   : > { %2765 = vst [vmem:[#allocation2 + $0x138] sm:$0xff] %v2725_v41  ;;  %vm13989_vm2 = vcmp.lt.s32.totalorder %v19055_v63, 16  ;;  %v19056_v48 = vmov 0  ;;  %v13993_v2 = vor.u32 %v3394_v0, %v3391_v23  ;;  %v13995_v32 = vor.u32 %v3377_v36, %v3374_v38  ;;  %4128 = vmatpush1.bf16.msra.mxu1 %v11245_v61  ;;  %v11248_v23 = vld [vmem:[%s18461_s3 + $0x260] ss:$8 sps:$4 sm:$0xff]   ;;  %v2528_v0 = vpop.f32.mrf.mxu0 }
 0x207   : > { %v19057_v48 = vsel %vm13989_vm2, 4294967295, %v19056_v48  ;;  %v13997_v60 = vpack.c.bf16 %v2725_v41, %v2723_v25  ;;  %v14000_v17 = vadd.f32 %v2253_v18, %v19059_v45  ;;  %v2726_v53 = vsel %vm13898_vm5, %v18557_v55, 0.0  ;;  %v11260_v36 = vld [vmem:[%s18461_s3 + $0x370] ss:$8 sps:$4 sm:$0xff]   ;;  %4129 = vmatprep.subr.bf16.mxu1 %v11250_v52  ;;  %v11253_v18 = vld [vmem:[%s18461_s3 + $0x254] ss:$8 sps:$4 sm:$0xff]  }
 0x208   : > { %19058 = vst [vmem:[#allocation48_spill] sm:$0xff] %v19057_v48  ;;  %v2647_v44 = vmax.f32 %v2607_v27, 0.0  ;;  %v14007_v12 = vadd.f32 %v2524_v51, %v13754_v10  ;;  %2766 = vst [vmem:[#allocation2 + $0xf0] sm:$0xff] %v2726_v53  ;;  %vm19060_vm14 = vsmask.f32 4352  ;;  %v14019_v10 = vpack.c.bf16 %v2726_v53, %v2724_v1  ;;  %v2530_v41 = vpop.f32.mrf.mxu0 }
 0x209   : > { %v3396_v25 = vsel %vm19060_vm14, %v3387_v39, %v13993_v2  ;;  %vm19061_vm12 = vmmov %vm19060_vm14  ;;  %v2933_v51 = vrot.slane %v13997_v60, 3  ;;  %v11265_v61 = vld [vmem:[%s18461_s3 + $0x364] ss:$8 sps:$4 sm:$0xff]   ;;  %v11251_v1 = vld [vmem:[%s18461_s3 + $0x250] ss:$8 sps:$4 sm:$0xff]   ;;  %v3398_v3 = vshrl.u32 %v13997_v60, 16  ;;  %v1914_v52 = vadd.f32 %v13501_v57, %v19062_v43 }
 0x20a   : > { %v3379_v49 = vsel %vm19061_vm12, %v3370_v31, %v13995_v32  ;;  %v2727_v38 = vsel %vm13925_vm11, %v2647_v44, 0.0  ;;  %v18556_v39 = vmax.f32 %v14007_v12, 0.0  ;;  %v2609_v31 = vadd.f32 %v2528_v0, %v13767_v7  ;;  %3771 = vmatprep.mubr.bf16.mxu0 %v3396_v25  ;;  %v11256_v57 = vld [vmem:[%s18461_s3 + $0x244] ss:$8 sps:$4 sm:$0xff]   ;;  %v2257_v44 = vpop.f32.mrf.mxu1  ;;  %4130 = vmatpush1.bf16.msra.mxu1 %v11248_v23  ;;  %v11263_v25 = vld [vmem:[%s18461_s3 + $0x360] ss:$8 sps:$4 sm:$0xff]  }
 0x20b   : > { %2767 = vst [vmem:[#allocation2 + $0x18] sm:$0xff] %v2727_v38  ;;  %vm19063_vm3 = vnez %v18882_v35  ;;  %v19065_v63 = vmov 0  ;;  %3772 = vmatmul.mubr.bf16.vlgmr.msra.gmra.mxu0 %v3379_v49  ;;  %v2935_v7 = vrot.slane %v14019_v10, 3  ;;  %v3407_v45 = vshrl.u32 %v14019_v10, 16  ;;  %v2532_v49 = vpop.f32.mrf.mxu0  ;;  %4131 = vmatprep.subr.bf16.mxu1 %v11253_v18  ;;  %v11271_v23 = vld [vmem:[%s18461_s3 + $0x354] ss:$8 sps:$4 sm:$0xff]  }
 0x20c   : > { %v19064_v27 = vsel %vm19063_vm3, %v13370_v62, %v13322_v29  ;;  %v3410_v53 = vshll.u32 %v14019_v10, 16  ;;  %v2728_v29 = vsel %vm13925_vm11, %v18556_v39, 0.0  ;;  %v2649_v62 = vmax.f32 %v2609_v31, 0.0  ;;  %4746 = vmatpush1.bf16.msra.mxu0 %v11260_v36  ;;  %v19111_v39 = vld [vmem:[#allocation23_spill] sm:$0xff] }
 0x20d   : > { %vm14043_vm14 = vcmp.lt.s32.totalorder %v19064_v27, 16  ;;  %v14058_v35 = vadd.f32 %v2530_v41, %v13771_v37  ;;  %v3400_v0 = vrot.slane %v3398_v3, 3  ;;  %2768 = vst [vmem:[#allocation2 + $0xc8] sm:$0xff] %v2728_v29  ;;  %vm19068_vm12 = vcmask 1044480   ;;  %4747 = vmatprep.subr.bf16.mxu0 %v11265_v61  ;;  %v2534_v61 = vpop.f32.mrf.mxu0 }
 0x20e   : > { %v19066_v63 = vsel %vm14043_vm14, 4294967295, %v19065_v63  ;;  %v2936_v43 = vsel %vm19068_vm12, %v2931_v56, %v2935_v7  ;;  %v3409_v31 = vrot.slane %v3407_v45, 3  ;;  %v3412_v27 = vrot.slane %v3410_v53, 4  ;;  %vm19070_vm3 = vmmov %vm19068_vm12  ;;  %4132 = vmatpush1.bf16.msra.mxu1 %v11251_v1  ;;  %v11259_v1 = vld [vmem:[%s18461_s3 + $0x234] ss:$8 sps:$4 sm:$0xff]  }
 0x20f   : > { %19067 = vst [vmem:[#allocation52_spill] sm:$0xff] %v19066_v63  ;;  %v3401_v37 = vshll.u32 %v13997_v60, 16  ;;  %v2729_v36 = vsel %vm13954_vm13, %v2649_v62, 0.0  ;;  %v18554_v3 = vmax.f32 %v14058_v35, 0.0  ;;  %v2611_v41 = vadd.f32 %v2532_v49, %v13775_v8  ;;  %3191 = vmatprep.mubr.bf16.mxu1 %v2936_v43  ;;  %4133 = vmatprep.subr.bf16.mxu1 %v11256_v57 }
 0x210   : > { %v19069_v33 = vrot.slane %v13929_v26, 3  ;;  %v14082_v18 = vadd.f32 %v2255_v13, %v13488_v20  ;;  %2769 = vst [vmem:[#allocation2 + $0x70] sm:$0xff] %v2729_v36  ;;  %vm19071_vm12 = vnez %v18886_v14  ;;  %v19073_v53 = vmov 0  ;;  %v2261_v20 = vpop.f32.mrf.mxu1  ;;  %4748 = vmatpush1.bf16.msra.mxu0 %v11263_v25  ;;  %v11269_v25 = vld [vmem:[%s18461_s3 + $0x350] ss:$8 sps:$4 sm:$0xff]  }
 0x211   : > { %v19072_v45 = vsel %vm19071_vm12, %v13441_v50, %v13361_v24  ;;  %v14093_v8 = vor.u32 %v3412_v27, %v3409_v31  ;;  %v3403_v26 = vrot.slane %v3401_v37, 4  ;;  %v14095_v62 = vpack.c.bf16 %v2729_v36, %v2727_v38  ;;  %v11254_v50 = vld [vmem:[%s18461_s3 + $0x240] ss:$8 sps:$4 sm:$0xff]   ;;  %v2538_v38 = vpop.f32.mrf.mxu0  ;;  %4749 = vmatprep.subr.bf16.mxu0 %v11271_v23 }
 0x212   : > { %v2934_v56 = vsel %vm19070_vm3, %v19069_v33, %v2933_v51  ;;  %vm14089_vm11 = vcmp.lt.s32.totalorder %v19072_v45, 16  ;;  %v14097_v49 = vadd.f32 %v2257_v44, %v1914_v52  ;;  %v2730_v14 = vsel %vm13954_vm13, %v18554_v3, 0.0  ;;  %v19078_v37 = vld [vmem:[#allocation77_spill] sm:$0xff]  ;;  %4134 = vmatpush1.bf16.msra.mxu1 %v11254_v50 }
 0x213   : > { %v19074_v53 = vsel %vm14089_vm11, 4294967295, %v19073_v53  ;;  %3192 = vmatmul.mubr.bf16.gmra.mxu1 %v2934_v56  ;;  %v2651_v13 = vmax.f32 %v2611_v41, 0.0  ;;  %v14104_v24 = vadd.f32 %v2534_v61, %v13789_v19  ;;  %2770 = vst [vmem:[#allocation2 + $0x20] sm:$0xff] %v2730_v14  ;;  %vm19076_vm3 = vsmask.f32 4352  ;;  %v2540_v27 = vpop.f32.mrf.mxu0  ;;  %v2263_v56 = vpop.f32.mrf.mxu1  ;;  %4135 = vmatprep.subr.bf16.mxu1 %v11259_v1 }
 0x214   : > { %19075 = vst [vmem:[#allocation64_spill] sm:$0xff] %v19074_v53  ;;  %v3414_v52 = vsel %vm19076_vm3, %v13993_v2, %v14093_v8  ;;  %v14112_v44 = vor.u32 %v3403_v26, %v3400_v0  ;;  %v14114_v43 = vpack.c.bf16 %v2730_v14, %v2728_v29  ;;  %v2937_v19 = vrot.slane %v14095_v62, 3  ;;  %v11277_v0 = vld [vmem:[%s18461_s3 + $0x344] ss:$8 sps:$4 sm:$0xff]   ;;  %4750 = vmatpush1.bf16.msra.mxu0 %v11269_v25  ;;  %v11275_v50 = vld [vmem:[%s18461_s3 + $0x340] ss:$8 sps:$4 sm:$0xff]  }
 0x215   : > { %v2731_v31 = vsel %vm13989_vm2, %v2651_v13, 0.0  ;;  %v18553_v2 = vmax.f32 %v14104_v24, 0.0  ;;  %v14127_v29 = vadd.f32 %v2538_v38, %v13812_v59  ;;  %3781 = vmatprep.mubr.bf16.mxu0 %v3414_v52  ;;  %v3416_v57 = vshrl.u32 %v14095_v62, 16  ;;  %v2542_v26 = vpop.f32.mrf.mxu0  ;;  %4751 = vmatprep.subr.bf16.mxu0 %v11277_v0  ;;  %v11283_v1 = vld [vmem:[%s18461_s3 + $0x334] ss:$8 sps:$4 sm:$0xff]   ;;  %v19085_v25 = vld [vmem:[#allocation92_spill] sm:$0xff] }
 0x216   : > { %2771 = vst [vmem:[#allocation2 + $0x128] sm:$0xff] %v2731_v31  ;;  %vm19077_vm12 = vnez %v18890_v46  ;;  %v19080_v36 = vmov 0  ;;  %vm19083_vm13 = vsmask.f32 4352  ;;  %v2939_v41 = vrot.slane %v14114_v43, 3 }
 0x217   : > { %v19079_v23 = vsel %vm19077_vm12, %v13461_v5, %v19078_v37  ;;  %v3405_v59 = vsel %vm19083_vm13, %v13995_v32, %v14112_v44  ;;  %vm19084_vm5 = vcmask 1044480   ;;  %v3425_v46 = vshrl.u32 %v14114_v43, 16  ;;  %v11257_v5 = vld [vmem:[%s18461_s3 + $0x230] ss:$8 sps:$4 sm:$0xff]   ;;  %v19086_v37 = vld [vmem:[#allocation93_spill] sm:$0xff] }
 0x218   : > { %vm14138_vm3 = vcmp.lt.s32.totalorder %v19079_v23, 16  ;;  %v2938_v33 = vsel %vm19084_vm5, %v2933_v51, %v2937_v19  ;;  %v2732_v32 = vsel %vm13989_vm2, %v18553_v2, 0.0  ;;  %v18550_v61 = vmax.f32 %v14127_v29, 0.0  ;;  %3782 = vmatmul.mubr.bf16.gmra.mxu0 %v3405_v59  ;;  %v11268_v51 = vld [vmem:[%s18461_s3 + $0x224] ss:$8 sps:$4 sm:$0xff]   ;;  %v2544_v59 = vpop.f32.mrf.mxu0  ;;  %4136 = vmatpush1.bf16.msra.mxu1 %v11257_v5 }
 0x219   : > { %v19081_v36 = vsel %vm14138_vm3, 4294967295, %v19080_v36  ;;  %v14161_v45 = vadd.f32 %v2540_v27, %v13816_v9  ;;  %v3428_v60 = vshll.u32 %v14114_v43, 16  ;;  %2772 = vst [vmem:[#allocation2 + $0x110] sm:$0xff] %v2732_v32  ;;  %v2940_v14 = vsel %vm19084_vm5, %v2935_v7, %v2939_v41  ;;  %4137 = vmatprep.subr.bf16.mxu1 %v11268_v51  ;;  %4752 = vmatpush1.bf16.msra.mxu0 %v11275_v50  ;;  %v11281_v5 = vld [vmem:[%s18461_s3 + $0x330] ss:$8 sps:$4 sm:$0xff]   ;;  %v19106_v43 = vld [vmem:[#allocation61_spill] sm:$0xff] }
 0x21a   : > { %19082 = vst [vmem:[#allocation55_spill] sm:$0xff] %v19081_v36  ;;  %v3427_v13 = vrot.slane %v3425_v46, 3  ;;  %v3418_v38 = vrot.slane %v3416_v57, 3  ;;  %v3419_v9 = vshll.u32 %v14095_v62, 16  ;;  %v2733_v52 = vsel %vm14043_vm14, %v18550_v61, 0.0  ;;  %3201 = vmatprep.mubr.bf16.mxu1 %v2940_v14  ;;  %v19088_v46 = vld [vmem:[#allocation90_spill] sm:$0xff]  ;;  %4753 = vmatprep.subr.bf16.mxu0 %v11283_v1 }
 0x21b   : > { %v18552_v27 = vmax.f32 %v14161_v45, 0.0  ;;  %v14182_v10 = vadd.f32 %v2542_v26, %v13824_v4  ;;  %v3430_v7 = vrot.slane %v3428_v60, 4  ;;  %v14188_v57 = vadd.f32 %v2261_v20, %v19085_v25  ;;  %2773 = vst [vmem:[#allocation2 + $0x8] sm:$0xff] %v2733_v52  ;;  %v19089_v4 = vld [vmem:[#allocation84_spill] sm:$0xff]  ;;  %3202 = vmatmul.mubr.bf16.gmra.mxu1 %v2938_v33 }
 0x21c   : > { %v14191_v23 = vadd.f32 %v2263_v56, %v19086_v37  ;;  %vm19087_vm13 = vnez %v18901_v11  ;;  %v19091_v60 = vmov 0  ;;  %v3421_v0 = vrot.slane %v3419_v9, 4  ;;  %v11266_v33 = vld [vmem:[%s18461_s3 + $0x220] ss:$8 sps:$4 sm:$0xff]   ;;  %v11289_v50 = vld [vmem:[%s18461_s3 + $0x324] ss:$8 sps:$4 sm:$0xff]  }
 0x21d   : > { %v19090_v26 = vsel %vm19087_vm13, %v19088_v46, %v19089_v4  ;;  %v14202_v14 = vpack.c.bf16 %v2733_v52, %v2731_v31  ;;  %v2734_v20 = vsel %vm14043_vm14, %v18552_v27, 0.0  ;;  %v18549_v56 = vmax.f32 %v14182_v10, 0.0  ;;  %v2548_v31 = vpop.f32.mrf.mxu0  ;;  %v19098_v4 = vld [vmem:[#allocation94_spill] sm:$0xff]  ;;  %4138 = vmatpush1.bf16.msra.mxu1 %v11266_v33  ;;  %v11280_v33 = vld [vmem:[%s18461_s3 + $0x204] ss:$8 sps:$4 sm:$0xff]   ;;  %4754 = vmatpush1.bf16.msra.mxu0 %v11281_v5 }
 0x21e   : > { %vm14198_vm12 = vcmp.lt.s32.totalorder %v19090_v26, 16  ;;  %v14210_v11 = vadd.f32 %v2544_v59, %v13827_v47  ;;  %v14212_v25 = vor.u32 %v3430_v7, %v3427_v13  ;;  %2774 = vst [vmem:[#allocation2 + $0x98] sm:$0xff] %v2734_v20  ;;  %v14217_v9 = vor.u32 %v3421_v0, %v3418_v38  ;;  %v11274_v47 = vld [vmem:[%s18461_s3 + $0x214] ss:$8 sps:$4 sm:$0xff]   ;;  %4755 = vmatprep.subr.bf16.mxu0 %v11289_v50  ;;  %v19110_v2 = vld [vmem:[#allocation24_spill] sm:$0xff] }
 0x21f   : > { %v19092_v60 = vsel %vm14198_vm12, 4294967295, %v19091_v60  ;;  %v14219_v52 = vpack.c.bf16 %v2734_v20, %v2732_v32  ;;  %v2941_v37 = vrot.slane %v14202_v14, 3  ;;  %v3434_v46 = vshrl.u32 %v14202_v14, 16  ;;  %v2550_v7 = vpop.f32.mrf.mxu0  ;;  %v19096_v59 = vld [vmem:[#allocation95_spill] sm:$0xff]  ;;  %v19099_v26 = vld [vmem:[#allocation86_spill] sm:$0xff]  ;;  %4139 = vmatprep.subr.bf16.mxu1 %v11274_v47 }
 0x220   : > { %19093 = vst [vmem:[#allocation71_spill] sm:$0xff] %v19092_v60  ;;  %v2735_v32 = vsel %vm14089_vm11, %v18549_v56, 0.0  ;;  %v18551_v13 = vmax.f32 %v14210_v11, 0.0  ;;  %v14235_v51 = vadd.f32 %v2548_v31, %v13831_v42  ;;  %vm19095_vm5 = vsmask.f32 4352  ;;  %v19108_v47 = vld [vmem:[#allocation87_spill] sm:$0xff] }
 0x221   : > { %v3432_v38 = vsel %vm19095_vm5, %v14093_v8, %v14212_v25  ;;  %2775 = vst [vmem:[#allocation2 + $0xa8] sm:$0xff] %v2735_v32  ;;  %vm19097_vm13 = vnez %v19096_v59  ;;  %v19101_v20 = vmov 0  ;;  %v3423_v42 = vsel %vm19095_vm5, %v14112_v44, %v14217_v9  ;;  %v11272_v59 = vld [vmem:[%s18461_s3 + $0x210] ss:$8 sps:$4 sm:$0xff]  }
 0x222   : > { %19094 = vst [vmem:[#allocation59_spill] sm:$0xff] %v14235_v51  ;;  %v19100_v0 = vsel %vm19097_vm13, %v19098_v4, %v19099_v26  ;;  %3791 = vmatprep.mubr.bf16.mxu0 %v3432_v38  ;;  %v18562_v8 = vrot.slane %v14219_v52, 3  ;;  %vm19104_vm2 = vcmask 1044480   ;;  %v3443_v31 = vshrl.u32 %v14219_v52, 16  ;;  %v2265_v4 = vpop.f32.mrf.mxu1  ;;  %4140 = vmatpush1.bf16.msra.mxu1 %v11272_v59  ;;  %v11290_v59 = vld [vmem:[%s18461_s3 + $0x310] ss:$8 sps:$4 sm:$0xff]  }
 0x223   : > { %vm14248_vm14 = vcmp.lt.s32.totalorder %v19100_v0, 16  ;;  %v2942_v1 = vsel %vm19104_vm2, %v2937_v19, %v2941_v37  ;;  %v2736_v44 = vsel %vm14089_vm11, %v18551_v13, 0.0  ;;  %v18555_v38 = vmax.f32 %v14235_v51, 0.0  ;;  %3792 = vmatmul.mubr.bf16.gmra.mxu0 %v3423_v42  ;;  %v11287_v19 = vld [vmem:[%s18461_s3 + $0x320] ss:$8 sps:$4 sm:$0xff]   ;;  %v2552_v0 = vpop.f32.mrf.mxu0  ;;  %4141 = vmatprep.subr.bf16.mxu1 %v11280_v33 }
 0x224   : > { %v19102_v20 = vsel %vm14248_vm14, 4294967295, %v19101_v20  ;;  %v14271_v26 = vadd.f32 %v2550_v7, %v13839_v34  ;;  %v3446_v62 = vshll.u32 %v14219_v52, 16  ;;  %2776 = vst [vmem:[#allocation2 + $0x158] sm:$0xff] %v2736_v44  ;;  %v2944_v56 = vsel %vm19104_vm2, %v2939_v41, %v18562_v8  ;;  %4756 = vmatpush1.bf16.msra.mxu0 %v11287_v19  ;;  %v11298_v19 = vld [vmem:[%s18461_s3 + $0x304] ss:$8 sps:$4 sm:$0xff]  }
 0x225   : > { %19103 = vst [vmem:[#allocation74_spill] sm:$0xff] %v19102_v20  ;;  %v3445_v61 = vrot.slane %v3443_v31, 3  ;;  %v3436_v13 = vrot.slane %v3434_v46, 3  ;;  %v3437_v34 = vshll.u32 %v14202_v14, 16  ;;  %v2737_v7 = vsel %vm14138_vm3, %v18555_v38, 0.0  ;;  %3211 = vmatprep.mubr.bf16.mxu1 %v2944_v56  ;;  %v19109_v31 = vld [vmem:[#allocation19_spill] sm:$0xff]  ;;  %v2554_v38 = vpop.f32.mrf.mxu0 }
 0x226   : > { %19105 = vst [vmem:[#allocation78_spill] sm:$0xff] %v14271_v26  ;;  %v18559_v42 = vmax.f32 %v14271_v26, 0.0  ;;  %v14292_v27 = vadd.f32 %v2552_v0, %v19106_v43  ;;  %v3448_v41 = vrot.slane %v3446_v62, 4  ;;  %v11292_v46 = vld [vmem:[%s18461_s3 + $0x314] ss:$8 sps:$4 sm:$0xff]   ;;  %v14299_v5 = vadd.f32 %v19109_v31, %v19108_v47  ;;  %2777 = vst [vmem:[#allocation2 + $0xd8] sm:$0xff] %v2737_v7  ;;  %3212 = vmatmul.mubr.bf16.gmra.mxu1 %v2942_v1  ;;  %v2267_v47 = vpop.f32.mrf.mxu1 }
 0x227   : > { %v14302_v3 = vadd.f32 %v2265_v4, %v19110_v2  ;;  %vm19112_vm13 = vnez %v19111_v39  ;;  %v19113_v0 = vld [vmem:[#allocation96_spill] sm:$0xff]  ;;  %v19116_v50 = vmov 0  ;;  %v3439_v62 = vrot.slane %v3437_v34, 4  ;;  %v19119_v39 = vld [vmem:[#allocation43_spill] sm:$0xff]  ;;  %4757 = vmatprep.subr.bf16.mxu0 %v11292_v46 }
 0x228   : > { %19107 = vst [vmem:[#allocation65_spill] sm:$0xff] %v14292_v27  ;;  %v19114_v43 = vld [vmem:[#allocation88_spill] sm:$0xff]  ;;  %v14313_v55 = vpack.c.bf16 %v2737_v7, %v2735_v32  ;;  %v2738_v2 = vsel %vm14138_vm3, %v18559_v42, 0.0  ;;  %v18558_v4 = vmax.f32 %v14292_v27, 0.0  ;;  %v14321_v31 = vadd.f32 %v2554_v38, %v19119_v39  ;;  %v2558_v32 = vpop.f32.mrf.mxu0  ;;  %v19121_v38 = vld [vmem:[#allocation45_spill] sm:$0xff]  ;;  %4758 = vmatpush1.bf16.msra.mxu0 %v11290_v59 }
 0x229   : > { %v19115_v56 = vsel %vm19112_vm13, %v19113_v0, %v19114_v43  ;;  %v14323_v0 = vor.u32 %v3448_v41, %v3445_v61  ;;  %v11278_v1 = vld [vmem:[%s18461_s3 + $0x200] ss:$8 sps:$4 sm:$0xff]   ;;  %2778 = vst [vmem:[#allocation2 + $0xe8] sm:$0xff] %v2738_v2  ;;  %v14328_v34 = vor.u32 %v3439_v62, %v3436_v13  ;;  %v14330_v7 = vpack.c.bf16 %v2738_v2, %v2736_v44  ;;  %v11286_v61 = vld [vmem:[%s18461_s3 + $0x2f4] ss:$8 sps:$4 sm:$0xff]  }
 0x22a   : > { %vm14309_vm5 = vcmp.lt.s32.totalorder %v19115_v56, 16  ;;  %19120 = vst [vmem:[#allocation68_spill] sm:$0xff] %v14321_v31  ;;  %v18565_v43 = vrot.slane %v14313_v55, 3  ;;  %v3452_v56 = vshrl.u32 %v14313_v55, 16  ;;  %v2739_v13 = vsel %vm14198_vm12, %v18558_v4, 0.0  ;;  %v2560_v62 = vpop.f32.mrf.mxu0  ;;  %v19124_v2 = vld [vmem:[#allocation25_spill] sm:$0xff]  ;;  %4142 = vmatpush1.bf16.msra.mxu1 %v11278_v1  ;;  %4759 = vmatprep.subr.bf16.mxu0 %v11298_v19 }
 0x22b   : > { %v19117_v50 = vsel %vm14309_vm5, 4294967295, %v19116_v50  ;;  %v18567_v44 = vmax.f32 %v14321_v31, 0.0  ;;  %v14346_v33 = vadd.f32 %v2558_v32, %v19121_v38  ;;  %vm19123_vm2 = vsmask.f32 4352  ;;  %2779 = vst [vmem:[#allocation2 + $0x150] sm:$0xff] %v2739_v13  ;;  %v19126_v39 = vld [vmem:[#allocation97_spill] sm:$0xff]  ;;  %4143 = vmatprep.subr.bf16.mxu1 %v11286_v61 }
 0x22c   : > { %19118 = vst [vmem:[#allocation81_spill] sm:$0xff] %v19117_v50  ;;  %v3450_v41 = vsel %vm19123_vm2, %v14212_v25, %v14323_v0  ;;  %vm19125_vm13 = vnez %v19124_v2  ;;  %v19127_v4 = vld [vmem:[#allocation91_spill] sm:$0xff]  ;;  %v19129_v8 = vmov 0  ;;  %v3441_v25 = vsel %vm19123_vm2, %v14217_v9, %v14328_v34  ;;  %v19133_v2 = vld [vmem:[#allocation49_spill] sm:$0xff]  ;;  %v19138_v59 = vld [vmem:[#allocation28_spill] sm:$0xff] }
 0x22d   : > { %19122 = vst [vmem:[#allocation72_spill] sm:$0xff] %v14346_v33  ;;  %v19128_v42 = vsel %vm19125_vm13, %v19126_v39, %v19127_v4  ;;  %3801 = vmatprep.mubr.bf16.mxu0 %v3450_v41  ;;  %v18571_v46 = vrot.slane %v14330_v7, 3  ;;  %vm19132_vm11 = vcmask 1044480   ;;  %v3461_v38 = vshrl.u32 %v14330_v7, 16  ;;  %v2271_v4 = vpop.f32.mrf.mxu1  ;;  %v11295_v1 = vld [vmem:[%s18461_s3 + $0x2e4] ss:$8 sps:$4 sm:$0xff]  }
 0x22e   : > { %vm14359_vm3 = vcmp.lt.s32.totalorder %v19128_v42, 16  ;;  %v2946_v32 = vsel %vm19132_vm11, %v2941_v37, %v18565_v43  ;;  %v11284_v42 = vld [vmem:[%s18461_s3 + $0x2f0] ss:$8 sps:$4 sm:$0xff]   ;;  %v2740_v9 = vsel %vm14198_vm12, %v18567_v44, 0.0  ;;  %v14382_v39 = vadd.f32 %v2560_v62, %v19133_v2  ;;  %3802 = vmatmul.mubr.bf16.gmra.mxu0 %v3441_v25  ;;  %v11296_v37 = vld [vmem:[%s18461_s3 + $0x300] ss:$8 sps:$4 sm:$0xff]   ;;  %v2562_v43 = vpop.f32.mrf.mxu0 }
 0x22f   : > { %v19130_v8 = vsel %vm14359_vm3, 4294967295, %v19129_v8  ;;  %v3464_v14 = vshll.u32 %v14330_v7, 16  ;;  %2780 = vst [vmem:[#allocation2 + $0x78] sm:$0xff] %v2740_v9  ;;  %v19134_v27 = vrot.slane %v14219_v52, 3  ;;  %v3463_v41 = vrot.slane %v3461_v38, 3  ;;  %v19136_v52 = vld [vmem:[#allocation47_spill] sm:$0xff]  ;;  %4144 = vmatpush2.bf16.msra.mxu1 %v11284_v42  ;;  %4760 = vmatpush1.bf16.msra.mxu0 %v11296_v37 }
 0x230   : > { %19131 = vst [vmem:[#allocation70_spill] sm:$0xff] %v19130_v8  ;;  %v3454_v51 = vrot.slane %v3452_v56, 3  ;;  %v3455_v62 = vshll.u32 %v14313_v55, 16  ;;  %v19135_v25 = vmax.f32 %v14346_v33, 0.0  ;;  %v14403_v26 = vadd.f32 %v2562_v43, %v19136_v52  ;;  %v11304_v56 = vld [vmem:[%s18461_s3 + $0x3f4] ss:$8 sps:$4 sm:$0xff]   ;;  %4145 = vmatprep.subr.bf16.mxu1 %v11295_v1 }
 0x231   : > { %v2948_v44 = vsel %vm19132_vm11, %v19134_v27, %v18571_v46  ;;  %v3466_v27 = vrot.slane %v3464_v14, 4  ;;  %v14409_v61 = vadd.f32 %v2267_v47, %v14299_v5  ;;  %v14412_v38 = vadd.f32 %v2271_v4, %v19138_v59  ;;  %v19140_v31 = vld [vmem:[#allocation34_spill] sm:$0xff]  ;;  %4761 = vmatprep.subr.bf16.mxu0 %v11304_v56  ;;  %v11310_v1 = vld [vmem:[%s18461_s3 + $0x3e4] ss:$8 sps:$4 sm:$0xff]  }
 0x232   : > { %v2741_v2 = vsel %vm14248_vm14, %v19135_v25, 0.0  ;;  %19137 = vst [vmem:[#allocation80_spill] sm:$0xff] %v14403_v26  ;;  %3221 = vmatprep.mubr.bf16.mxu1 %v2948_v44  ;;  %v2564_v25 = vpop.f32.mrf.mxu0  ;;  %v19141_v43 = vld [vmem:[#allocation26_spill] sm:$0xff]  ;;  %v19143_v44 = vmov 0  ;;  %v3457_v19 = vrot.slane %v3455_v62, 4  ;;  %v19146_v5 = vmax.f32 %v14382_v39, 0.0 }
 0x233   : > { %2781 = vst [vmem:[#allocation2 + $0x90] sm:$0xff] %v2741_v2  ;;  %v19142_v52 = vsel %vm13673_vm1, %v19140_v31, %v19141_v43  ;;  %3222 = vmatmul.mubr.bf16.gmra.mxu1 %v2946_v32  ;;  %v14423_v14 = vpack.c.bf16 %v2741_v2, %v2739_v13  ;;  %v18572_v4 = vmax.f32 %v14403_v26, 0.0  ;;  %v14431_v46 = vadd.f32 %v2564_v25, %v13891_v30  ;;  %v11293_v31 = vld [vmem:[%s18461_s3 + $0x2e0] ss:$8 sps:$4 sm:$0xff]   ;;  %v11301_v30 = vld [vmem:[%s18461_s3 + $0x2d4] ss:$8 sps:$4 sm:$0xff]   ;;  %vm19149_vm1 = vmmov %vm19123_vm2 }
 0x234   : > { %vm14419_vm13 = vcmp.lt.s32.totalorder %v19142_v52, 16  ;;  %v2742_v47 = vsel %vm14248_vm14, %v19146_v5, 0.0  ;;  %v14433_v59 = vor.u32 %v3466_v27, %v3463_v41  ;;  %v2568_v13 = vpop.f32.mrf.mxu0  ;;  %v14438_v32 = vor.u32 %v3457_v19, %v3454_v51  ;;  %v11302_v42 = vld [vmem:[%s18461_s3 + $0x3f0] ss:$8 sps:$4 sm:$0xff]   ;;  %v19151_v52 = vld [vmem:[#allocation21_spill] sm:$0xff]  ;;  %vm19157_vm11 = vmmov %vm19149_vm1  ;;  %4146 = vmatpush2.bf16.msra.mxu1 %v11293_v31 }
 0x235   : > { %v19144_v44 = vsel %vm14419_vm13, 4294967295, %v19143_v44  ;;  %19147 = vst [vmem:[#allocation60_spill] sm:$0xff] %v14431_v46  ;;  %2782 = vst [vmem:[#allocation2] sm:$0xff] %v2742_v47  ;;  %v14440_v62 = vpack.c.bf16 %v2742_v47, %v2740_v9  ;;  %v18573_v2 = vrot.slane %v14423_v14, 3  ;;  %v3470_v43 = vshrl.u32 %v14423_v14, 16  ;;  %v19152_v19 = vld [vmem:[#allocation98_spill] sm:$0xff]  ;;  %4147 = vmatprep.subr.bf16.mxu1 %v11301_v30  ;;  %4762 = vmatpush2.bf16.msra.mxu0 %v11302_v42 }
 0x236   : > { %19145 = vst [vmem:[#allocation62_spill] sm:$0xff] %v19144_v44  ;;  %v2743_v51 = vsel %vm14309_vm5, %v18572_v4, 0.0  ;;  %v18574_v9 = vmax.f32 %v14431_v46, 0.0  ;;  %v14456_v41 = vadd.f32 %v2568_v13, %v13910_v54  ;;  %v3468_v37 = vsel %vm19149_vm1, %v14323_v0, %v14433_v59  ;;  %v2570_v27 = vpop.f32.mrf.mxu0  ;;  %v11308_v31 = vld [vmem:[%s18461_s3 + $0x3e0] ss:$8 sps:$4 sm:$0xff]   ;;  %4763 = vmatprep.subr.bf16.mxu0 %v11310_v1 }
 0x237   : > { %2783 = vst [vmem:[#allocation2 + $0x118] sm:$0xff] %v2743_v51  ;;  %v19153_v5 = vsel %vm13698_vm10, %v19151_v52, %v19152_v19  ;;  %v19154_v47 = vmov 0  ;;  %3811 = vmatprep.mubr.bf16.mxu0 %v3468_v37  ;;  %v3459_v54 = vsel %vm19157_vm11, %v14328_v34, %v14438_v32  ;;  %v18577_v0 = vrot.slane %v14440_v62, 3  ;;  %v11299_v52 = vld [vmem:[%s18461_s3 + $0x2d0] ss:$8 sps:$4 sm:$0xff]   ;;  %v2273_v19 = vpop.f32.mrf.mxu1  ;;  %v19165_v30 = vld [vmem:[#allocation33_spill] sm:$0xff] }
 0x238   : > { %19148 = vst [vmem:[#allocation50_spill] sm:$0xff] %v14456_v41  ;;  %vm14469_vm2 = vcmp.lt.s32.totalorder %v19153_v5, 16  ;;  %v19158_v56 = vrot.slane %v14313_v55, 3  ;;  %vm19159_vm1 = vcmask 1044480   ;;  %v3479_v25 = vshrl.u32 %v14440_v62, 16  ;;  %3812 = vmatmul.mubr.bf16.gmra.mxu0 %v3459_v54  ;;  %v2572_v4 = vpop.f32.mrf.mxu0  ;;  %4148 = vmatpush2.bf16.msra.mxu1 %v11299_v52 }
 0x239   : > { %v19155_v47 = vsel %vm14469_vm2, 4294967295, %v19154_v47  ;;  %v2744_v34 = vsel %vm14309_vm5, %v18574_v9, 0.0  ;;  %v14492_v5 = vadd.f32 %v2570_v27, %v14000_v17  ;;  %v3482_v55 = vshll.u32 %v14440_v62, 16  ;;  %vm19162_vm10 = vmmov %vm19159_vm1  ;;  %4764 = vmatpush2.bf16.msra.mxu0 %v11308_v31  ;;  %v11314_v52 = vld [vmem:[%s18461_s3 + $0x3d0] ss:$8 sps:$4 sm:$0xff]  }
 0x23a   : > { %19156 = vst [vmem:[#allocation75_spill] sm:$0xff] %v19155_v47  ;;  %v2950_v13 = vsel %vm19159_vm1, %v19158_v56, %v18573_v2  ;;  %v11307_v56 = vld [vmem:[%s18461_s3 + $0x2c4] ss:$8 sps:$4 sm:$0xff]   ;;  %2784 = vst [vmem:[#allocation2 + $0x130] sm:$0xff] %v2744_v34  ;;  %v19161_v2 = vrot.slane %v14330_v7, 3  ;;  %v3481_v37 = vrot.slane %v3479_v25, 3  ;;  %v14513_v7 = vadd.f32 %v2572_v4, %v14082_v18 }
 0x23b   : > { %19160 = vst [vmem:[#allocation76_spill] sm:$0xff] %v14492_v5  ;;  %v3472_v26 = vrot.slane %v3470_v43, 3  ;;  %v3473_v17 = vshll.u32 %v14423_v14, 16  ;;  %v19163_v27 = vmax.f32 %v14456_v41, 0.0  ;;  %v11316_v43 = vld [vmem:[%s18461_s3 + $0x3d4] ss:$8 sps:$4 sm:$0xff]   ;;  %v14519_v42 = vadd.f32 %v2273_v19, %v19165_v30  ;;  %v2275_v19 = vpop.f32.mrf.mxu1  ;;  %4149 = vmatprep.subr.bf16.mxu1 %v11307_v56 }
 0x23c   : > { %v2952_v9 = vsel %vm19162_vm10, %v19161_v2, %v18577_v0  ;;  %19164 = vst [vmem:[#allocation79_spill] sm:$0xff] %v14513_v7  ;;  %v3484_v2 = vrot.slane %v3482_v55, 4  ;;  %v19166_v25 = vld [vmem:[#allocation89_spill] sm:$0xff]  ;;  %v19169_v18 = vld [vmem:[#allocation100_spill] sm:$0xff]  ;;  %v19170_v4 = vld [vmem:[#allocation27_spill] sm:$0xff]  ;;  %v19172_v1 = vmov 0  ;;  %4765 = vmatprep.subr.bf16.mxu0 %v11316_v43 }
 0x23d   : > { %v2745_v54 = vsel %vm14359_vm3, %v19163_v27, 0.0  ;;  %3231 = vmatprep.mubr.bf16.mxu1 %v2952_v9  ;;  %v19167_v0 = vld [vmem:[#allocation37_spill] sm:$0xff]  ;;  %v2574_v27 = vpop.f32.mrf.mxu0  ;;  %v19171_v9 = vsel %vm13717_vm7, %v19169_v18, %v19170_v4  ;;  %v3475_v55 = vrot.slane %v3473_v17, 4  ;;  %v19175_v30 = vmax.f32 %v14492_v5, 0.0  ;;  %4766 = vmatpush2.bf16.msra.mxu0 %v11314_v52 }
 0x23e   : > { %v14523_v41 = vadd.f32 %v19167_v0, %v19166_v25  ;;  %2785 = vst [vmem:[#allocation2 + $0x50] sm:$0xff] %v2745_v54  ;;  %vm14530_vm11 = vcmp.lt.s32.totalorder %v19171_v9, 16  ;;  %3232 = vmatmul.mubr.bf16.gmra.mxu1 %v2950_v13  ;;  %v14534_v46 = vpack.c.bf16 %v2745_v54, %v2743_v51  ;;  %v18580_v25 = vmax.f32 %v14513_v7, 0.0  ;;  %v11305_v13 = vld [vmem:[%s18461_s3 + $0x2c0] ss:$8 sps:$4 sm:$0xff]  }
 0x23f   : > { %v19173_v1 = vsel %vm14530_vm11, 4294967295, %v19172_v1  ;;  %v2746_v0 = vsel %vm14359_vm3, %v19175_v30, 0.0  ;;  %v14542_v33 = vadd.f32 %v2574_v27, %v14097_v49  ;;  %v14544_v18 = vor.u32 %v3484_v2, %v3481_v37  ;;  %v2578_v51 = vpop.f32.mrf.mxu0  ;;  %v11313_v49 = vld [vmem:[%s18461_s3 + $0x2b4] ss:$8 sps:$4 sm:$0xff]   ;;  %v11319_v31 = vld [vmem:[%s18461_s3 + $0x3c4] ss:$8 sps:$4 sm:$0xff]   ;;  %4150 = vmatpush2.bf16.msra.mxu1 %v11305_v13 }
 0x240   : > { %19174 = vst [vmem:[#allocation66_spill] sm:$0xff] %v19173_v1  ;;  %2786 = vst [vmem:[#allocation2 + $0xb8] sm:$0xff] %v2746_v0  ;;  %v14549_v17 = vor.u32 %v3475_v55, %v3472_v26  ;;  %v14551_v54 = vpack.c.bf16 %v2746_v0, %v2744_v34  ;;  %v18581_v4 = vrot.slane %v14534_v46, 3  ;;  %v3488_v9 = vshrl.u32 %v14534_v46, 16  ;;  %v19179_v55 = vld [vmem:[#allocation101_spill] sm:$0xff]  ;;  %4151 = vmatprep.subr.bf16.mxu1 %v11313_v49  ;;  %v19192_v49 = vld [vmem:[#allocation32_spill] sm:$0xff] }
 0x241   : > { %19176 = vst [vmem:[#allocation63_spill] sm:$0xff] %v14542_v33  ;;  %v2747_v26 = vsel %vm14419_vm13, %v18580_v25, 0.0  ;;  %v18583_v34 = vmax.f32 %v14542_v33, 0.0  ;;  %v14567_v37 = vadd.f32 %v2578_v51, %v14188_v57  ;;  %vm19177_vm7 = vsmask.f32 4352  ;;  %v2580_v2 = vpop.f32.mrf.mxu0  ;;  %v19180_v30 = vld [vmem:[#allocation29_spill] sm:$0xff]  ;;  %4767 = vmatprep.subr.bf16.mxu0 %v11319_v31 }
 0x242   : > { %v3486_v56 = vsel %vm19177_vm7, %v14433_v59, %v14544_v18  ;;  %2787 = vst [vmem:[#allocation2 + $0xe0] sm:$0xff] %v2747_v26  ;;  %v19181_v0 = vsel %vm13749_vm0, %v19179_v55, %v19180_v30  ;;  %v19182_v25 = vmov 0  ;;  %vm19185_vm10 = vmmov %vm19177_vm7  ;;  %v18586_v59 = vrot.slane %v14551_v54, 3  ;;  %v11311_v55 = vld [vmem:[%s18461_s3 + $0x2b0] ss:$8 sps:$4 sm:$0xff]   ;;  %v2277_v30 = vpop.f32.mrf.mxu1 }
 0x243   : > { %vm14580_vm1 = vcmp.lt.s32.totalorder %v19181_v0, 16  ;;  %3821 = vmatprep.mubr.bf16.mxu0 %v3486_v56  ;;  %v3477_v57 = vsel %vm19185_vm10, %v14438_v32, %v14549_v17  ;;  %v19186_v43 = vrot.slane %v14423_v14, 3  ;;  %vm19187_vm7 = vcmask 1044480   ;;  %v11322_v13 = vld [vmem:[%s18461_s3 + $0x2a4] ss:$8 sps:$4 sm:$0xff]   ;;  %4152 = vmatpush2.bf16.msra.mxu1 %v11311_v55 }
 0x244   : > { %v19183_v25 = vsel %vm14580_vm1, 4294967295, %v19182_v25  ;;  %v3497_v27 = vshrl.u32 %v14551_v54, 16  ;;  %v2748_v32 = vsel %vm14419_vm13, %v18583_v34, 0.0  ;;  %v14603_v0 = vadd.f32 %v2580_v2, %v14191_v23  ;;  %3822 = vmatmul.mubr.bf16.gmra.mxu0 %v3477_v57  ;;  %vm19189_vm0 = vmmov %vm19187_vm7  ;;  %4153 = vmatprep.subr.bf16.mxu1 %v11322_v13  ;;  %v11484_v44 = vld [vmem:[%s18463_s5 + $0x184] ss:$8 sps:$4 sm:$0xff]  }
 0x245   : > { %19184 = vst [vmem:[#allocation54_spill] sm:$0xff] %v19183_v25  ;;  %v2954_v51 = vsel %vm19187_vm7, %v19186_v43, %v18581_v4  ;;  %v3500_v14 = vshll.u32 %v14551_v54, 16  ;;  %v11317_v43 = vld [vmem:[%s18461_s3 + $0x3c0] ss:$8 sps:$4 sm:$0xff]   ;;  %2788 = vst [vmem:[#allocation2 + $0xa0] sm:$0xff] %v2748_v32  ;;  %v2582_v4 = vpop.f32.mrf.mxu0  ;;  %v19188_v7 = vrot.slane %v14440_v62, 3  ;;  %v2318_v52 = vadd.f32 %v2275_v19, %v19192_v49 }
 0x246   : > { %v3499_v56 = vrot.slane %v3497_v27, 3  ;;  %v3490_v33 = vrot.slane %v3488_v9, 3  ;;  %v3491_v23 = vshll.u32 %v14534_v46, 16  ;;  %v19190_v2 = vmax.f32 %v14567_v37, 0.0  ;;  %v11325_v9 = vld [vmem:[%s18461_s3 + $0x3b4] ss:$8 sps:$4 sm:$0xff]   ;;  %4768 = vmatpush2.bf16.msra.mxu0 %v11317_v43  ;;  %vm19195_vm7 = vmmov %vm19185_vm10 }
 0x247   : > { %v2956_v34 = vsel %vm19189_vm0, %v19188_v7, %v18586_v59  ;;  %v14624_v62 = vadd.f32 %v2582_v4, %v14302_v3  ;;  %v3502_v7 = vrot.slane %v3500_v14, 4  ;;  %v14631_v27 = vadd.f32 %v2277_v30, %v14523_v41  ;;  %v2584_v59 = vpop.f32.mrf.mxu0  ;;  %v11320_v41 = vld [vmem:[%s18461_s3 + $0x2a0] ss:$8 sps:$4 sm:$0xff]   ;;  %4769 = vmatprep.subr.bf16.mxu0 %v11325_v9  ;;  %v11331_v43 = vld [vmem:[%s18461_s3 + $0x3a4] ss:$8 sps:$4 sm:$0xff]   ;;  %v4304_v25 = vld [vmem:[#allocation2 + $0xf8] sm:$0xff] }
 0x248   : > { %v2749_v57 = vsel %vm14469_vm2, %v19190_v2, 0.0  ;;  %3241 = vmatprep.mubr.bf16.mxu1 %v2956_v34  ;;  %v3493_v2 = vrot.slane %v3491_v23, 4  ;;  %v19193_v3 = vmax.f32 %v14603_v0, 0.0  ;;  %v14641_v31 = vadd.f32 %v2584_v59, %v14409_v61  ;;  %v11323_v61 = vld [vmem:[%s18461_s3 + $0x3b0] ss:$8 sps:$4 sm:$0xff]   ;;  %4154 = vmatpush2.bf16.msra.mxu1 %v11320_v41 }
 0x249   : > { %19191 = vst [vmem:[#allocation82_spill] sm:$0xff] %v14624_v62  ;;  %2789 = vst [vmem:[#allocation2 + $0x88] sm:$0xff] %v2749_v57  ;;  %3242 = vmatmul.mubr.bf16.gmra.mxu1 %v2954_v51  ;;  %v14633_v5 = vpack.c.bf16 %v2749_v57, %v2747_v26  ;;  %v18587_v34 = vmax.f32 %v14624_v62, 0.0  ;;  %v14643_v19 = vor.u32 %v3502_v7, %v3499_v56  ;;  %v2588_v26 = vpop.f32.mrf.mxu0  ;;  %v11328_v59 = vld [vmem:[%s18461_s3 + $0x294] ss:$8 sps:$4 sm:$0xff]  }
 0x24a   : > { %v2750_v4 = vsel %vm14469_vm2, %v19193_v3, 0.0  ;;  %v14648_v51 = vor.u32 %v3493_v2, %v3490_v33  ;;  %v18588_v55 = vmax.f32 %v14641_v31, 0.0  ;;  %v11326_v49 = vld [vmem:[%s18461_s3 + $0x290] ss:$8 sps:$4 sm:$0xff]   ;;  %4770 = vmatpush2.bf16.msra.mxu0 %v11323_v61  ;;  %4155 = vmatprep.subr.bf16.mxu1 %v11328_v59  ;;  %v11334_v41 = vld [vmem:[%s18461_s3 + $0x284] ss:$8 sps:$4 sm:$0xff]  }
 0x24b   : > { %2790 = vst [vmem:[#allocation2 + $0x60] sm:$0xff] %v2750_v4  ;;  %v14650_v30 = vpack.c.bf16 %v2750_v4, %v2748_v32  ;;  %v18590_v14 = vrot.slane %v14633_v5, 3  ;;  %v3506_v23 = vshrl.u32 %v14633_v5, 16  ;;  %v2751_v33 = vsel %vm14530_vm11, %v18587_v34, 0.0  ;;  %v2590_v13 = vpop.f32.mrf.mxu0  ;;  %v11329_v4 = vld [vmem:[%s18461_s3 + $0x3a0] ss:$8 sps:$4 sm:$0xff]   ;;  %4771 = vmatprep.subr.bf16.mxu0 %v11331_v43 }
 0x24c   : > { %v14666_v32 = vadd.f32 %v2588_v26, %v14412_v38  ;;  %v3504_v56 = vsel %vm19185_vm10, %v14544_v18, %v14643_v19  ;;  %2791 = vst [vmem:[#allocation2 + $0x58] sm:$0xff] %v2751_v33  ;;  %v3495_v57 = vsel %vm19195_vm7, %v14549_v17, %v14648_v51  ;;  %v19196_v38 = vrot.slane %v14534_v46, 3  ;;  %vm19199_vm10 = vmmov %vm19189_vm0  ;;  %v19202_v59 = vld [vmem:[#allocation39_spill] sm:$0xff]  ;;  %4156 = vmatpush2.bf16.msra.mxu1 %v11326_v49 }
 0x24d   : > { %3831 = vmatprep.mubr.bf16.mxu0 %v3504_v56  ;;  %v18589_v7 = vrot.slane %v14650_v30, 3  ;;  %v3515_v9 = vshrl.u32 %v14650_v30, 16  ;;  %v2752_v2 = vsel %vm14530_vm11, %v18588_v55, 0.0  ;;  %v14693_v3 = vadd.f32 %v2590_v13, %v14519_v42  ;;  %v2592_v26 = vpop.f32.mrf.mxu0  ;;  %4157 = vmatprep.subr.bf16.mxu1 %v11334_v41 }
 0x24e   : > { %19194 = vst [vmem:[#allocation69_spill] sm:$0xff] %v14666_v32  ;;  %v2958_v18 = vsel %vm19189_vm0, %v19196_v38, %v18590_v14  ;;  %v18591_v17 = vmax.f32 %v14666_v32, 0.0  ;;  %3832 = vmatmul.mubr.bf16.gmra.mxu0 %v3495_v57  ;;  %v3518_v46 = vshll.u32 %v14650_v30, 16  ;;  %2792 = vst [vmem:[#allocation2 + $0x148] sm:$0xff] %v2752_v2  ;;  %v19198_v56 = vrot.slane %v14551_v54, 3 }
 0x24f   : > { %19197 = vst [vmem:[#allocation67_spill] sm:$0xff] %v14693_v3  ;;  %v3517_v34 = vrot.slane %v3515_v9, 3  ;;  %v3508_v55 = vrot.slane %v3506_v23, 3  ;;  %v3509_v42 = vshll.u32 %v14633_v5, 16  ;;  %v18593_v57 = vmax.f32 %v14693_v3, 0.0  ;;  %4772 = vmatpush2.bf16.msra.mxu0 %v11329_v4 }
 0x250   : > { %v2960_v38 = vsel %vm19199_vm10, %v19198_v56, %v18589_v7  ;;  %v2753_v13 = vsel %vm14580_vm1, %v18591_v17, 0.0  ;;  %v14713_v54 = vadd.f32 %v2592_v26, %v2318_v52  ;;  %v3520_v9 = vrot.slane %v3518_v46, 4  ;;  %v11337_v23 = vld [vmem:[%s18461_s3 + $0x394] ss:$8 sps:$4 sm:$0xff]   ;;  %v2594_v17 = vpop.f32.mrf.mxu0  ;;  %v11340_v4 = vld [vmem:[%s18461_s3 + $0x384] ss:$8 sps:$4 sm:$0xff]  }
 0x251   : > { %3251 = vmatprep.mubr.bf16.mxu1 %v2960_v38  ;;  %2793 = vst [vmem:[#allocation2 + $0x28] sm:$0xff] %v2753_v13  ;;  %v19203_v56 = vld [vmem:[#allocation30_spill] sm:$0xff]  ;;  %v19205_v14 = vmov 0  ;;  %v3511_v52 = vrot.slane %v3509_v42, 4  ;;  %v14727_v26 = vpack.c.bf16 %v2753_v13, %v2751_v33  ;;  %v14733_v43 = vsel %vm14580_vm1, %v18593_v57, 0.0  ;;  %4773 = vmatprep.subr.bf16.mxu0 %v11337_v23 }
 0x252   : > { %19200 = vst [vmem:[#allocation57_spill] sm:$0xff] %v14713_v54  ;;  %v19204_v7 = vsel %vm13784_vm8, %v19202_v59, %v19203_v56  ;;  %3252 = vmatmul.mubr.bf16.gmra.mxu1 %v2958_v18  ;;  %v18592_v46 = vmax.f32 %v14713_v54, 0.0  ;;  %v14737_v38 = vadd.f32 %v2594_v17, %v14631_v27  ;;  %v11332_v18 = vld [vmem:[%s18461_s3 + $0x280] ss:$8 sps:$4 sm:$0xff]   ;;  %v14743_v33 = vpack.c.bf16 %v14733_v43, %v2752_v2  ;;  %v11335_v27 = vld [vmem:[%s18461_s3 + $0x390] ss:$8 sps:$4 sm:$0xff]  }
 0x253   : > { %vm14723_vm7 = vcmp.lt.s32.totalorder %v19204_v7, 16  ;;  %v3521_v7 = vor.u32 %v3520_v9, %v3517_v34  ;;  %v3512_v42 = vor.u32 %v3511_v52, %v3508_v55  ;;  %v18595_v13 = vrot.slane %v14727_v26, 3  ;;  %v11343_v34 = vld [vmem:[%s18461_s3 + $0x474] ss:$8 sps:$4 sm:$0xff]   ;;  %4158 = vmatpush2.bf16.msra.mxu1 %v11332_v18  ;;  %4774 = vmatpush2.bf16.msra.mxu0 %v11335_v27  ;;  %v11338_v57 = vld [vmem:[%s18461_s3 + $0x380] ss:$8 sps:$4 sm:$0xff]  }
 0x254   : > { %v19206_v14 = vsel %vm14723_vm7, 4294967295, %v19205_v14  ;;  %19208 = vst [vmem:[#allocation85_spill] sm:$0xff] %v14737_v38  ;;  %v3524_v61 = vshrl.u32 %v14727_v26, 16  ;;  %v14757_v55 = vsel %vm14723_vm7, %v18592_v46, 0.0  ;;  %v18594_v49 = vmax.f32 %v14737_v38, 0.0  ;;  %5203 = vmatprep.subr.bf16.mxu1 %v11343_v34  ;;  %4775 = vmatprep.subr.bf16.mxu0 %v11340_v4  ;;  %v4305_v34 = vld [vmem:[#allocation2 + $0x100] sm:$0xff] }
 0x255   : > { %19207 = vst [vmem:[#allocation83_spill] sm:$0xff] %v19206_v14  ;;  %vm19209_vm8 = vsmask.f32 4352  ;;  %v3527_v17 = vshll.u32 %v14727_v26, 16  ;;  %2795 = vst [vmem:[#allocation2 + $0x68] sm:$0xff] %v14757_v55  ;;  %v2963_v9 = vrot.slane %v14743_v33, 3 }
 0x256   : > { %v3522_v2 = vsel %vm19209_vm8, %v14643_v19, %v3521_v7  ;;  %vm19210_vm0 = vmmov %vm19209_vm8  ;;  %v19211_v59 = vrot.slane %v14633_v5, 3  ;;  %v3533_v23 = vshrl.u32 %v14743_v33, 16  ;;  %v14780_v56 = vsel %vm14723_vm7, %v18594_v49, 0.0  ;;  %v14797_v54 = vld [vmem:[#allocation2 + $0x120] sm:$0xff] }
 0x257   : > { %3841 = vmatprep.mubr.bf16.mxu0 %v3522_v2  ;;  %v3513_v41 = vsel %vm19210_vm0, %v14648_v51, %v3512_v42  ;;  %v3536_v52 = vshll.u32 %v14743_v33, 16  ;;  %v3526_v51 = vrot.slane %v3524_v61, 3  ;;  %v3529_v2 = vrot.slane %v3527_v17, 4  ;;  %2796 = vst [vmem:[#allocation2 + $0x140] sm:$0xff] %v14780_v56  ;;  %vm19213_vm8 = vmmov %vm19199_vm10  ;;  %v14790_v33 = vld [vmem:[#allocation2 + $0x38] sm:$0xff]  ;;  %v4307_v17 = vld [vmem:[#allocation2 + $0x108] sm:$0xff]  ;;  %4776 = vmatpush2.bf16.msra.mxu0 %v11338_v57 }
 0x258   : > { %v2962_v19 = vsel %vm19199_vm10, %v19211_v59, %v18595_v13  ;;  %3842 = vmatmul.mubr.bf16.gmra.mxu0 %v3513_v41  ;;  %v19212_v5 = vrot.slane %v14650_v30, 3  ;;  %v3535_v46 = vrot.slane %v3533_v23, 3  ;;  %19214 = vst [vmem:[#allocation77_spill] sm:$0xff] %v14790_v33  ;;  %v4301_v30 = vld [vmem:[#allocation2 + $0x48] sm:$0xfe]  ;;  %vm19215_vm10 = vmmov %vm19210_vm0 }
 0x259   : > { %v3538_v41 = vrot.slane %v3536_v52, 4  ;;  %v3530_v49 = vor.u32 %v3529_v2, %v3526_v51  ;;  %v4343_v23 = vpack.c.bf16 %v14790_v33, %v4301_v30  ;;  %v14795_v2 = vpack.c.bf16 %v4307_v17, %v4305_v34  ;;  %19216 = vst [vmem:[#allocation92_spill] sm:$0xff] %v14797_v54  ;;  %v4311_v34 = vld [vmem:[#allocation2 + $0xc8] sm:$0xff] }
 0x25a   : > { %v2964_v59 = vsel %vm19213_vm8, %v19212_v5, %v2963_v9 }
 0x25b   : > { %3261 = vmatprep.mubr.bf16.mxu1 %v2964_v59  ;;  %v3539_v18 = vor.u32 %v3538_v41, %v3535_v46  ;;  %v3531_v61 = vsel %vm19210_vm0, %v3512_v42, %v3530_v49  ;;  %v4412_v41 = vshll.u32 %v4343_v23, 16  ;;  %vm19218_vm0 = vmmov %vm19213_vm8 }
 0x25c   : > { %3262 = vmatmul.mubr.bf16.gmra.mxu1 %v2962_v19  ;;  %v2849_v5 = vld [vmem:[#allocation2 + $0x68] sm:$0x3f] }
 0x25d   : > { %v3540_v27 = vsel %vm19215_vm10, %v3521_v7, %v3539_v18  ;;  %v3324_v13 = vld [vmem:[#allocation2 + $0x68] sm:$0x7f]  ;;  %v2871_v52 = vpack.c.bf16 %v2849_v5, %v2849_v5  ;;  %v4300_v7 = vld [vmem:[#allocation2 + $0x10] sm:$0xfe]  ;;  %v4414_v14 = vrot.slane %v4412_v41, 1  ;;  %vm14813_vm10 = vmpackc.low %vm13709_vm6, %vm13650_vm4 }
 0x25e   : > { %3851 = vmatprep.mubr.bf16.mxu0 %v3540_v27  ;;  %v3328_v51 = vpack.c.bf16 %v3324_v13, %v3324_v13  ;;  %v2850_v4 = vld [vmem:[#allocation2 + $0x140] sm:$0x3f]  ;;  %v4417_v27 = vshll.u32 %v14795_v2, 16  ;;  %vm19228_vm6 = vsmask.f32 7424 }
 0x25f   : > { %v3325_v46 = vld [vmem:[#allocation2 + $0x140] sm:$0x7f]  ;;  %v2872_v19 = vpack.c.bf16 %v2850_v4, %v2850_v4  ;;  %v2965_v57 = vrot.slane %v2871_v52, 3  ;;  %v19217_v52 = vrot.slane %v14727_v26, 3  ;;  %v19223_v26 = vld [vmem:[#allocation42_spill] sm:$0xff] }
 0x260   : > { %3852 = vmatmul.mubr.bf16.gmra.mxu0 %v3531_v61  ;;  %v3329_v42 = vpack.c.bf16 %v3325_v46, %v3325_v46  ;;  %v3542_v59 = vshrl.u32 %v3328_v51, 16  ;;  %v3545_v30 = vshll.u32 %v3328_v51, 16  ;;  %v4306_v13 = vld [vmem:[#allocation2 + $0x80] sm:$0xff]  ;;  %v4342_v61 = vpack.c.bf16 %v14797_v54, %v4300_v7 }
 0x261   : > { %v2967_v32 = vrot.slane %v2872_v19, 3  ;;  %v2966_v51 = vsel %vm19218_vm0, %v19217_v52, %v2965_v57  ;;  %v14805_v62 = vpack.c.bf16 %v4306_v13, %v4304_v25  ;;  %v4419_v7 = vrot.slane %v4417_v27, 1 }
 0x262   : > { %v3551_v33 = vshrl.u32 %v3329_v42, 16  ;;  %v3554_v38 = vshll.u32 %v3329_v42, 16  ;;  %v3544_v17 = vrot.slane %v3542_v59, 3  ;;  %v3547_v5 = vrot.slane %v3545_v30, 4  ;;  %v4309_v59 = vld [vmem:[#allocation2 + $0xf0] sm:$0xff] }
 0x263   : > { %v2968_v4 = vsel %vm19213_vm8, %v2963_v9, %v2967_v32  ;;  %v4410_v42 = vshrl.u32 %v4343_v23, 16  ;;  %v14807_v54 = vpack.c.bf16 %v4311_v34, %v4309_v59  ;;  %v19224_v9 = vmax.f32 %v19223_v26, 0.0 }
 0x264   : > { %v3553_v46 = vrot.slane %v3551_v33, 3  ;;  %v3556_v3 = vrot.slane %v3554_v38, 4  ;;  %3271 = vmatprep.mubr.bf16.mxu1 %v2968_v4  ;;  %v3548_v19 = vor.u32 %v3547_v5, %v3544_v17  ;;  %v19220_v38 = vmov 0  ;;  %v4310_v5 = vld [vmem:[#allocation2 + $0x18] sm:$0xff]  ;;  %v4315_v4 = vld [vmem:[#allocation2 + $0x110] sm:$0xff] }
 0x265   : > { %3272 = vmatmul.mubr.bf16.gmra.mxu1 %v2966_v51  ;;  %v19221_v38 = vsel %vm14813_vm10, 4294967295, %v19220_v38  ;;  %v19225_v33 = vmax.f32 %v13877_v40, 0.0  ;;  %vm19226_vm8 = vsmask.f32 4352  ;;  %v4415_v41 = vor.u32 %v4414_v14, %v4410_v42  ;;  %v11341_v40 = vld [vmem:[%s18461_s3 + $0x470] ss:$8 sps:$4 sm:$0xff]  }
 0x266   : > { %v3557_v30 = vor.u32 %v3556_v3, %v3553_v46  ;;  %19222 = vst [vmem:[#allocation93_spill] sm:$0xff] %v19221_v38  ;;  %v4400_v3 = vshll.u32 %v4342_v61, 16  ;;  %vm19227_vm0 = vmmov %vm19226_vm8  ;;  %v4405_v27 = vshll.u32 %v14805_v62, 16  ;;  %v4433_v17 = vshll.u32 %v14807_v54, 16  ;;  %v11346_v14 = vld [vmem:[%s18461_s3 + $0x464] ss:$8 sps:$4 sm:$0xff]  }
 0x267   : > { %v11787_v25 = vpack.c.bf16 %v19225_v33, %v19224_v9  ;;  %v3549_v57 = vsel %vm19227_vm0, %v3530_v49, %v3548_v19  ;;  %v4420_v13 = vsel %vm19228_vm6, %v4415_v41, %v4419_v7  ;;  %v4308_v49 = vld [vmem:[#allocation2 + $0x138] sm:$0xff]  ;;  %v4313_v51 = vld [vmem:[#allocation2 + $0x20] sm:$0xff]  ;;  %v4314_v19 = vld [vmem:[#allocation2 + $0x128] sm:$0xff]  ;;  %v4429_v33 = vshrl.u32 %v14795_v2, 16 }
 0x268   : > { %v3558_v23 = vsel %vm19226_vm8, %v3539_v18, %v3557_v30  ;;  %v4402_v34 = vrot.slane %v4400_v3, 1  ;;  %v4398_v18 = vshrl.u32 %v4342_v61, 16  ;;  %v4407_v46 = vrot.slane %v4405_v27, 1  ;;  %v19229_v42 = vld [vmem:[#allocation38_spill] sm:$0xff]  ;;  %v19231_v30 = vld [vmem:[#allocation44_spill] sm:$0xff]  ;;  %vm14849_vm6 = vmpackc.low %vm13863_vm15, %vm13798_vm9 }
 0x269   : > { %11788 = vmatprep.mubr.msk.bf16.mxu1 %vm14813_vm10, %v11787_v25  ;;  %3861 = vmatprep.mubr.bf16.mxu0 %v3558_v23  ;;  %v14834_v52 = vpack.c.bf16 %v4310_v5, %v4308_v49  ;;  %v19230_v59 = vmax.f32 %v19229_v42, 0.0  ;;  %v19232_v26 = vmax.f32 %v19231_v30, 0.0  ;;  %v4435_v25 = vrot.slane %v4433_v17, 1  ;;  %v4319_v23 = vld [vmem:[#allocation2 + $0x158] sm:$0xff]  ;;  %v19236_v41 = vld [vmem:[#allocation58_spill] sm:$0xff]  ;;  %v19238_v27 = vld [vmem:[#allocation56_spill] sm:$0xff] }
 0x26a   : > { %3862 = vmatmul.mubr.bf16.gmra.mxu0 %v3549_v57  ;;  %v14843_v3 = vpack.c.bf16 %v4315_v4, %v4313_v51  ;;  %v19233_v61 = vmov 0  ;;  %v19237_v57 = vmax.f32 %v19236_v41, 0.0  ;;  %v4403_v17 = vor.u32 %v4402_v34, %v4398_v18  ;;  %v11344_v4 = vld [vmem:[%s18461_s3 + $0x460] ss:$8 sps:$4 sm:$0xff]   ;;  %v4312_v49 = vld [vmem:[#allocation2 + $0x70] sm:$0xff]  ;;  %v4317_v30 = vld [vmem:[#allocation2 + $0x98] sm:$0xff] }
 0x26b   : > { %4777 = vmatprep.mubr.bf16.mxu0 %v4420_v13  ;;  %v11790_v9 = vpack.c.bf16 %v19232_v26, %v19230_v59  ;;  %v19234_v61 = vsel %vm14849_vm6, 4294967295, %v19233_v61  ;;  %v19239_v13 = vmax.f32 %v19238_v27, 0.0  ;;  %v4431_v51 = vor.u32 %v4429_v33, %v4419_v7  ;;  %v11349_v42 = vld [vmem:[%s18461_s3 + $0x454] ss:$8 sps:$4 sm:$0xff]   ;;  %v4318_v7 = vld [vmem:[#allocation2 + $0xa8] sm:$0xff]  ;;  %v11775_v33 = vld [vmem:[#allocation2 + $0x80] sm:$0xff] }
 0x26c   : > { %19235 = vst [vmem:[#allocation90_spill] sm:$0xff] %v19234_v61  ;;  %v14865_v59 = vpack.c.bf16 %v4314_v19, %v4312_v49  ;;  %vm19240_vm8 = vsmask.f32 7424  ;;  %v4449_v18 = vshll.u32 %v14843_v3, 16  ;;  %v11774_v19 = vld [vmem:[#allocation2 + $0xf8] sm:$0xff]  ;;  %v14886_v49 = vpack.c.bf16 %v14780_v56, %v14733_v43 }
 0x26d   : > { %11791 = vmatmul.mubr.msk.bf16.vlgmr.msra.gmra.mxu1 %vm14813_vm10, %v11790_v9  ;;  %v11793_v5 = vpack.c.bf16 %v19239_v13, %v19237_v57  ;;  %v4408_v26 = vsel %vm19240_vm8, %v4403_v17, %v4407_v46  ;;  %v4425_v9 = vshll.u32 %v14834_v52, 16  ;;  %vm19241_vm0 = vmmov %vm19240_vm8  ;;  %v3916_v41 = vpack.c.bf16 %v11775_v33, %v11774_v19  ;;  %v4316_v13 = vld [vmem:[#allocation2 + $0x8] sm:$0xff] }
 0x26e   : > { %5204 = vmatpush1.bf16.msra.mxu1 %v11341_v40  ;;  %v14869_v40 = vpack.c.bf16 %v4319_v23, %v4317_v30  ;;  %v4436_v34 = vsel %vm19241_vm0, %v4431_v51, %v4435_v25  ;;  %v4421_v57 = vshrl.u32 %v14805_v62, 16  ;;  %v11352_v23 = vld [vmem:[%s18461_s3 + $0x444] ss:$8 sps:$4 sm:$0xff]   ;;  %v4441_v27 = vshll.u32 %v14865_v59, 16  ;;  %v11350_v56 = vld [vmem:[%s18461_s3 + $0x440] ss:$8 sps:$4 sm:$0xff]  }
 0x26f   : > { %11794 = vmatprep.mubr.msk.bf16.mxu1 %vm14849_vm6, %v11793_v5  ;;  %5205 = vmatprep.subr.bf16.mxu1 %v11346_v14  ;;  %v11347_v14 = vld [vmem:[%s18461_s3 + $0x450] ss:$8 sps:$4 sm:$0xff]   ;;  %v4427_v5 = vrot.slane %v4425_v9, 1  ;;  %v4445_v51 = vshrl.u32 %v14807_v54, 16  ;;  %vm19242_vm8 = vnez %v19037_v15  ;;  %vm19243_vm0 = vnez %v19046_v28 }
 0x270   : > { %v4465_v17 = vshll.u32 %v14869_v40, 16  ;;  %vm14893_vm6 = vmpackc.low %vm19243_vm0, %vm19242_vm8  ;;  %v19244_v30 = vmov 0  ;;  %v19248_v9 = vmax.f32 %v14007_v12, 0.0  ;;  %v4423_v43 = vor.u32 %v4421_v57, %v4407_v46  ;;  %v4321_v57 = vld [vmem:[#allocation2 + $0xe8] sm:$0xff] }
 0x271   : > { %v19245_v30 = vsel %vm14893_vm6, 4294967295, %v19244_v30  ;;  %v4437_v19 = vshrl.u32 %v14834_v52, 16  ;;  %v14907_v33 = vrot.slane %v4441_v27, 1  ;;  %vm19249_vm10 = vsmask.f32 7424 }
 0x272   : > { %4778 = vmatmul.mubr.bf16.vlgmr.msra.gmra.mxu0 %v4408_v26  ;;  %5206 = vmatpush1.bf16.msra.mxu1 %v11344_v4  ;;  %v14882_v4 = vpack.c.bf16 %v4318_v7, %v4316_v13  ;;  %19246 = vst [vmem:[#allocation84_spill] sm:$0xff] %v19245_v30  ;;  %v19247_v26 = vmax.f32 %v13969_v16, 0.0  ;;  %v4447_v7 = vor.u32 %v4445_v51, %v4435_v25  ;;  %v11355_v16 = vld [vmem:[%s18461_s3 + $0x434] ss:$8 sps:$4 sm:$0xff]   ;;  %v14914_v46 = vrot.slane %v4465_v17, 1 }
 0x273   : > { %4787 = vmatprep.mubr.bf16.mxu0 %v4436_v34  ;;  %5207 = vmatprep.subr.bf16.mxu1 %v11349_v42  ;;  %v4451_v42 = vrot.slane %v4449_v18, 1  ;;  %v4323_v18 = vld [vmem:[#allocation2 + $0x78] sm:$0xff]  ;;  %v4428_v12 = vsel %vm19249_vm10, %v4423_v43, %v4427_v5  ;;  %v19258_v15 = vmax.f32 %v14104_v24, 0.0 }
 0x274   : > { %v11796_v34 = vpack.c.bf16 %v19248_v9, %v19247_v26  ;;  %v11353_v27 = vld [vmem:[%s18461_s3 + $0x430] ss:$8 sps:$4 sm:$0xff]   ;;  %v14921_v13 = vpack.c.bf16 %v4323_v18, %v4321_v57  ;;  %v11356_v18 = vld [vmem:[%s18461_s3 + $0x420] ss:$8 sps:$4 sm:$0xff]  }
 0x275   : > { %4170 = vmatmul.mubr.bf16.gmra.mxu1 %v3916_v41  ;;  %v4457_v41 = vshll.u32 %v14882_v4, 16  ;;  %v4322_v26 = vld [vmem:[#allocation2 + $0x150] sm:$0xff]  ;;  %v4326_v17 = vld [vmem:[#allocation2 + $0x118] sm:$0xff]  ;;  %v4335_v57 = vld [vmem:[#allocation2 + $0x148] sm:$0xff] }
 0x276   : > { %11797 = vmatprep.mubr.msk.bf16.mxu1 %vm14893_vm6, %v11796_v34  ;;  %5208 = vmatpush1.bf16.msra.mxu1 %v11347_v14  ;;  %v4461_v14 = vshrl.u32 %v14843_v3, 16  ;;  %vm19250_vm6 = vmmov %vm19249_vm10  ;;  %v4327_v9 = vld [vmem:[#allocation2 + $0x130] sm:$0xff]  ;;  %v11776_v34 = vld [vmem:[#allocation2 + $0x138] sm:$0xff]  ;;  %v4481_v61 = vshll.u32 %v14921_v13, 16 }
 0x277   : > { %5209 = vmatprep.subr.bf16.mxu1 %v11352_v23  ;;  %v4452_v25 = vsel %vm19250_vm6, %v4447_v7, %v4451_v42  ;;  %v4439_v23 = vor.u32 %v4437_v19, %v4427_v5  ;;  %v11777_v43 = vld [vmem:[#allocation2 + $0x18] sm:$0xff]  ;;  %vm19251_vm10 = vmmov %vm19250_vm6  ;;  %v14925_v5 = vld [vmem:[#allocation2 + $0x70] sm:$0xff] }
 0x278   : > { %v4463_v51 = vor.u32 %v4461_v14, %v4451_v42  ;;  %v3918_v30 = vpack.c.bf16 %v11777_v43, %v11776_v34  ;;  %v14927_v7 = vld [vmem:[#allocation2 + $0x128] sm:$0xff]  ;;  %v4324_v19 = vld [vmem:[#allocation2 + $0x90] sm:$0xff]  ;;  %v4331_v34 = vld [vmem:[#allocation2 + $0xa0] sm:$0xff] }
 0x279   : > { %v11358_v42 = vld [vmem:[%s18461_s3 + $0x424] ss:$8 sps:$4 sm:$0xff]  }
 0x27a   : > { %4788 = vmatmul.mubr.bf16.gmra.mxu0 %v4428_v12  ;;  %5210 = vmatpush1.bf16.msra.mxu1 %v11350_v56  ;;  %v4444_v12 = vsel %vm19251_vm10, %v4439_v23, %v14907_v33  ;;  %v4320_v56 = vld [vmem:[#allocation2 + $0xd8] sm:$0xff]  ;;  %v4468_v14 = vsel %vm19250_vm6, %v4463_v51, %v14914_v46  ;;  %v4325_v23 = vld [vmem:[#allocation2] sm:$0xff]  ;;  %v14948_v51 = vpack.c.bf16 %v4326_v17, %v4324_v19 }
 0x27b   : > { %4797 = vmatprep.mubr.bf16.mxu0 %v4452_v25  ;;  %5211 = vmatprep.subr.bf16.mxu1 %v11355_v16  ;;  %v14937_v25 = vrot.slane %v4457_v41, 1  ;;  %v4330_v43 = vld [vmem:[#allocation2 + $0xe0] sm:$0xff]  ;;  %v14944_v38 = vpack.c.bf16 %v4322_v26, %v4320_v56  ;;  %v14946_v28 = vpack.c.bf16 %v4327_v9, %v4325_v23  ;;  %v4328_v41 = vld [vmem:[#allocation2 + $0x50] sm:$0xff]  ;;  %vm19252_vm10 = vnez %v19051_v22  ;;  %v4329_v9 = vld [vmem:[#allocation2 + $0xb8] sm:$0xff] }
 0x27c   : > { %vm19253_vm6 = vnez %v19057_v48  ;;  %v19257_v16 = vmax.f32 %v14058_v35, 0.0  ;;  %v4334_v17 = vld [vmem:[#allocation2 + $0x58] sm:$0xff]  ;;  %v4987_v23 = vrot.slane %v14834_v52, 1  ;;  %v4993_v48 = vrot.slane %v14843_v3, 1  ;;  %v4332_v52 = vld [vmem:[#allocation2 + $0x88] sm:$0xff] }
 0x27d   : > { %4180 = vmatmul.mubr.bf16.gmra.mxu1 %v3918_v30  ;;  %vm14954_vm0 = vmpackc.low %vm19253_vm6, %vm19252_vm10  ;;  %v19254_v30 = vmov 0  ;;  %v11361_v35 = vld [vmem:[%s18461_s3 + $0x414] ss:$8 sps:$4 sm:$0xff]   ;;  %v14973_v24 = vpack.c.bf16 %v4330_v43, %v4328_v41  ;;  %v4997_v56 = vrot.slane %v14869_v40, 1  ;;  %v19259_v3 = vrot.slane %v14805_v62, 1 }
 0x27e   : > { %v19255_v30 = vsel %vm14954_vm0, 4294967295, %v19254_v30  ;;  %v11799_v26 = vpack.c.bf16 %v19258_v15, %v19257_v16  ;;  %5212 = vmatpush1.bf16.msra.mxu1 %v11353_v27  ;;  %v14971_v15 = vpack.c.bf16 %v4331_v34, %v4329_v9  ;;  %v4333_v27 = vld [vmem:[#allocation2 + $0x60] sm:$0xff]  ;;  %v4336_v16 = vld [vmem:[#allocation2 + $0x28] sm:$0xff]  ;;  %v4995_v43 = vrot.slane %v14882_v4, 1 }
 0x27f   : > { %19256 = vst [vmem:[#allocation95_spill] sm:$0xff] %v19255_v30  ;;  %5213 = vmatprep.subr.bf16.mxu1 %v11358_v42  ;;  %v14977_v19 = vpack.c.bf16 %v4335_v57, %v4333_v27  ;;  %v19261_v30 = vrot.slane %v14807_v54, 1  ;;  %v14990_v41 = vpack.c.bf16 %v4334_v17, %v4332_v52  ;;  %v5001_v27 = vrot.slane %v14921_v13, 1 }
 0x280   : > { %11800 = vmatprep.mubr.msk.bf16.mxu1 %vm14954_vm0, %v11799_v26  ;;  %v4991_v26 = vrot.slane %v14865_v59, 1  ;;  %vm19260_vm0 = vcmask 1046528   ;;  %v4999_v17 = vrot.slane %v14944_v38, 1  ;;  %v5003_v52 = vrot.slane %v14948_v51, 1 }
 0x281   : > { %v14982_v42 = vsel %vm19260_vm0, %v19259_v3, %v4987_v23  ;;  %vm19262_vm6 = vmmov %vm19260_vm0  ;;  %v15003_v3 = vpack.c.bf16 %v14757_v55, %v4336_v16  ;;  %v5009_v55 = vrot.slane %v14971_v15, 1  ;;  %v19268_v22 = vpack.c.bf16 %v14927_v7, %v14925_v5 }
 0x282   : > { %v14987_v34 = vsel %vm19262_vm6, %v19261_v30, %v4993_v48  ;;  %4798 = vmatmul.mubr.bf16.gmra.mxu0 %v4444_v12  ;;  %vm19263_vm10 = vmmov %vm19260_vm0  ;;  %5214 = vmatpush1.bf16.msra.mxu1 %v11356_v18  ;;  %v11359_v30 = vld [vmem:[%s18461_s3 + $0x410] ss:$8 sps:$4 sm:$0xff]   ;;  %v15006_v12 = vsel %vm19260_vm0, %v4991_v26, %v4995_v43  ;;  %v11364_v18 = vld [vmem:[%s18461_s3 + $0x404] ss:$8 sps:$4 sm:$0xff]   ;;  %v19276_v5 = vmax.f32 %v14210_v11, 0.0 }
 0x283   : > { %v14993_v9 = vsel %vm19263_vm10, %v4987_v23, %v4991_v26  ;;  %vm19264_vm8 = vmmov %vm19260_vm0  ;;  %4807 = vmatprep.mubr.bf16.mxu0 %v4468_v14  ;;  %v5005_v23 = vrot.slane %v14946_v28, 1  ;;  %5215 = vmatprep.subr.bf16.mxu1 %v11361_v35  ;;  %v5013_v35 = vrot.slane %v14977_v19, 1  ;;  %v5015_v11 = vrot.slane %v15003_v3, 1 }
 0x284   : > { %v14996_v57 = vsel %vm19264_vm8, %v4993_v48, %v4997_v56  ;;  %v4483_v48 = vrot.slane %v4481_v61, 1  ;;  %vm19265_vm8 = vmmov %vm19260_vm0  ;;  %v5007_v61 = vrot.slane %v14973_v24, 1 }
 0x285   : > { %v15014_v14 = vsel %vm19265_vm8, %v4997_v56, %v5001_v27  ;;  %vm19266_vm10 = vmmov %vm19260_vm0  ;;  %4190 = vmatmul.mubr.bf16.gmra.mxu1 %v19268_v22  ;;  %v15030_v56 = vsel %vm19260_vm0, %v4999_v17, %v5003_v52  ;;  %v19275_v22 = vmax.f32 %v14161_v45, 0.0 }
 0x286   : > { %v15019_v16 = vsel %vm19266_vm10, %v4995_v43, %v4999_v17  ;;  %vm19267_vm6 = vmmov %vm19260_vm0  ;;  %v5011_v43 = vrot.slane %v14990_v41, 1  ;;  %vm19270_vm10 = vnez %v19066_v63  ;;  %v19277_v17 = vshrl.u32 %v14865_v59, 16  ;;  %5216 = vmatpush1.bf16.msra.mxu1 %v11359_v30  ;;  %v11367_v59 = vld [vmem:[%s18461_s3 + $0x4f4] ss:$8 sps:$4 sm:$0xff]  }
 0x287   : > { %v15022_v26 = vsel %vm19267_vm6, %v5001_v27, %v5005_v23  ;;  %vm19269_vm8 = vmmov %vm19260_vm0  ;;  %vm19271_vm6 = vnez %v19074_v53  ;;  %v19272_v27 = vmov 0  ;;  %v11802_v7 = vpack.c.bf16 %v19276_v5, %v19275_v22  ;;  %5217 = vmatprep.subr.bf16.mxu1 %v11364_v18 }
 0x288   : > { %v15033_v6 = vsel %vm19269_vm8, %v5005_v23, %v5009_v55  ;;  %vm15041_vm15 = vmpackc.low %vm19271_vm6, %vm19270_vm10  ;;  %v4455_v23 = vor.u32 %v19277_v17, %v14907_v33  ;;  %v15058_v53 = vsel %vm19260_vm0, %v5003_v52, %v5007_v61  ;;  %v19279_v22 = vshrl.u32 %v14869_v40, 16 }
 0x289   : > { %v19273_v27 = vsel %vm15041_vm15, 4294967295, %v19272_v27  ;;  %11803 = vmatprep.mubr.msk.bf16.mxu1 %vm15041_vm15, %v11802_v7  ;;  %vm19278_vm8 = vmmov %vm19260_vm0  ;;  %v19281_v30 = vrot.slane %v14886_v49, 1  ;;  %v4473_v7 = vshll.u32 %v14944_v38, 16  ;;  %v4497_v18 = vshll.u32 %v14946_v28, 16 }
 0x28a   : > { %19274 = vst [vmem:[#allocation94_spill] sm:$0xff] %v19273_v27  ;;  %v15061_v45 = vsel %vm19278_vm8, %v5009_v55, %v5013_v35  ;;  %v4479_v5 = vor.u32 %v19279_v22, %v14914_v46  ;;  %vm19280_vm6 = vmmov %vm19260_vm0  ;;  %vm19282_vm8 = vsmask.f32 7424  ;;  %5218 = vmatpush1.bf16.msra.mxu1 %v11362_v58  ;;  %v4469_v17 = vshrl.u32 %v14882_v4, 16  ;;  %v19291_v4 = vld [vmem:[#allocation78_spill] sm:$0xff] }
 0x28b   : > { %v15071_v33 = vsel %vm19280_vm6, %v5007_v61, %v5011_v43  ;;  %v15076_v52 = vsel %vm19260_vm0, %v5013_v35, %v19281_v30  ;;  %v4460_v55 = vsel %vm19282_vm8, %v4455_v23, %v14937_v25  ;;  %vm19283_vm10 = vmmov %vm19260_vm0  ;;  %v11365_v61 = vld [vmem:[%s18461_s3 + $0x4f0] ss:$8 sps:$4 sm:$0xff]   ;;  %5219 = vmatprep.subr.bf16.mxu1 %v11367_v59  ;;  %v11370_v35 = vld [vmem:[%s18461_s3 + $0x4e4] ss:$8 sps:$4 sm:$0xff]   ;;  %v19285_v23 = vmax.f32 %v14127_v29, 0.0 }
 0x28c   : > { %v15084_v40 = vsel %vm19283_vm10, %v5011_v43, %v5015_v11  ;;  %4808 = vmatmul.mubr.bf16.gmra.mxu0 %v4460_v55  ;;  %vm19284_vm9 = vmmov %vm19282_vm8  ;;  %v4475_v43 = vrot.slane %v4473_v7, 1  ;;  %v19286_v22 = vmax.f32 %v14182_v10, 0.0  ;;  %v4493_v58 = vshrl.u32 %v14921_v13, 16  ;;  %v19293_v29 = vld [vmem:[#allocation68_spill] sm:$0xff] }
 0x28d   : > { %v4484_v46 = vsel %vm19284_vm9, %v4479_v5, %v4483_v48  ;;  %v4499_v30 = vrot.slane %v4497_v18, 1  ;;  %vm19287_vm9 = vnez %v19081_v36  ;;  %v19288_v59 = vmov 0  ;;  %v11368_v13 = vld [vmem:[%s18461_s3 + $0x4e0] ss:$8 sps:$4 sm:$0xff]   ;;  %vm19295_vm6 = vmmov %vm19282_vm8 }
 0x28e   : > { %4817 = vmatprep.mubr.bf16.mxu0 %v4484_v46  ;;  %v11805_v5 = vpack.c.bf16 %v19286_v22, %v19285_v23  ;;  %vm15106_vm10 = vmpackc.low %vm14198_vm12, %vm19287_vm9  ;;  %v19292_v55 = vmax.f32 %v19291_v4, 0.0  ;;  %v19294_v7 = vmax.f32 %v19293_v29, 0.0  ;;  %v4471_v46 = vor.u32 %v4469_v17, %v14937_v25  ;;  %5220 = vmatpush2.bf16.msra.mxu1 %v11365_v61  ;;  %v11373_v23 = vld [vmem:[%s18461_s3 + $0x4d4] ss:$8 sps:$4 sm:$0xff]   ;;  %v11376_v61 = vld [vmem:[%s18461_s3 + $0x4c4] ss:$8 sps:$4 sm:$0xff]  }
 0x28f   : > { %v19289_v59 = vsel %vm15106_vm10, 4294967295, %v19288_v59  ;;  %v4495_v18 = vor.u32 %v4493_v58, %v4483_v48  ;;  %5221 = vmatprep.subr.bf16.mxu1 %v11370_v35  ;;  %vm19296_vm0 = vmmov %vm19295_vm6  ;;  %v4513_v25 = vshll.u32 %v14971_v15, 16  ;;  %v11371_v48 = vld [vmem:[%s18461_s3 + $0x4d0] ss:$8 sps:$4 sm:$0xff]   ;;  %v4485_v35 = vshrl.u32 %v14944_v38, 16  ;;  %v19299_v29 = vld [vmem:[#allocation65_spill] sm:$0xff] }
 0x290   : > { %11806 = vmatmul.mubr.msk.bf16.gmra.mxu1 %vm15041_vm15, %v11805_v5  ;;  %19290 = vst [vmem:[#allocation86_spill] sm:$0xff] %v19289_v59  ;;  %v11808_v10 = vpack.c.bf16 %v19294_v7, %v19292_v55  ;;  %v4476_v22 = vsel %vm19295_vm6, %v4471_v46, %v4475_v43  ;;  %v4489_v5 = vshll.u32 %v14948_v51, 16  ;;  %v19297_v58 = vld [vmem:[#allocation59_spill] sm:$0xff]  ;;  %v19300_v7 = vmax.f32 %v19299_v29, 0.0  ;;  %vm15145_vm8 = vmpackc.low %vm14309_vm5, %vm14248_vm14 }
 0x291   : > { %v4500_v4 = vsel %vm19296_vm0, %v4495_v18, %v4499_v30  ;;  %v19298_v55 = vmax.f32 %v19297_v58, 0.0  ;;  %v4509_v46 = vshrl.u32 %v14946_v28, 16  ;;  %v19301_v18 = vmov 0  ;;  %v11374_v28 = vld [vmem:[%s18461_s3 + $0x4c0] ss:$8 sps:$4 sm:$0xff]   ;;  %vm19307_vm6 = vmmov %vm19296_vm0 }
 0x292   : > { %11809 = vmatprep.mubr.msk.bf16.mxu1 %vm15106_vm10, %v11808_v10  ;;  %5222 = vmatpush2.bf16.msra.mxu1 %v11368_v13  ;;  %v4491_v17 = vrot.slane %v4489_v5, 1  ;;  %v4515_v13 = vrot.slane %v4513_v25, 1  ;;  %v19302_v18 = vsel %vm15145_vm8, 4294967295, %v19301_v18  ;;  %v19304_v38 = vmax.f32 %v14382_v39, 0.0  ;;  %v11379_v58 = vld [vmem:[%s18461_s3 + $0x4b4] ss:$8 sps:$4 sm:$0xff]  }
 0x293   : > { %5223 = vmatprep.subr.bf16.mxu1 %v11373_v23  ;;  %v11811_v10 = vpack.c.bf16 %v19300_v7, %v19298_v55  ;;  %19303 = vst [vmem:[#allocation61_spill] sm:$0xff] %v19302_v18  ;;  %v19305_v23 = vld [vmem:[#allocation60_spill] sm:$0xff]  ;;  %v4511_v25 = vor.u32 %v4509_v46, %v4499_v30  ;;  %v4505_v55 = vshll.u32 %v14973_v24, 16  ;;  %v11377_v30 = vld [vmem:[%s18461_s3 + $0x4b0] ss:$8 sps:$4 sm:$0xff]  }
 0x294   : > { %4818 = vmatmul.mubr.bf16.gmra.mxu0 %v4476_v22  ;;  %v19306_v22 = vmax.f32 %v19305_v23, 0.0  ;;  %v19308_v7 = vld [vmem:[#allocation72_spill] sm:$0xff]  ;;  %v11469_v18 = vld [vmem:[%s18463_s5 + $0x1b4] ss:$8 sps:$4 sm:$0xff]  }
 0x295   : > { %4827 = vmatprep.mubr.bf16.mxu0 %v4500_v4  ;;  %v4487_v4 = vor.u32 %v4485_v35, %v4475_v43  ;;  %v4516_v29 = vsel %vm19296_vm0, %v4511_v25, %v4515_v13  ;;  %v4529_v43 = vshll.u32 %v14977_v19, 16  ;;  %v4507_v35 = vrot.slane %v4505_v55, 1  ;;  %v19310_v46 = vld [vmem:[#allocation80_spill] sm:$0xff]  ;;  %v19317_v25 = vld [vmem:[#allocation63_spill] sm:$0xff] }
 0x296   : > { %v11814_v5 = vpack.c.bf16 %v19306_v22, %v19304_v38  ;;  %5224 = vmatpush2.bf16.msra.mxu1 %v11371_v48  ;;  %v11382_v48 = vld [vmem:[%s18461_s3 + $0x4a4] ss:$8 sps:$4 sm:$0xff]   ;;  %v19311_v38 = vmax.f32 %v19310_v46, 0.0  ;;  %v4525_v22 = vshrl.u32 %v14971_v15, 16  ;;  %v11380_v15 = vld [vmem:[%s18461_s3 + $0x4a0] ss:$8 sps:$4 sm:$0xff]  }
 0x297   : > { %5225 = vmatprep.subr.bf16.mxu1 %v11376_v61  ;;  %v4492_v39 = vsel %vm19307_vm6, %v4487_v4, %v4491_v17  ;;  %v4501_v61 = vshrl.u32 %v14948_v51, 16  ;;  %vm15183_vm6 = vmpackc.low %vm14419_vm13, %vm14359_vm3  ;;  %v19312_v4 = vmov 0  ;;  %v19315_v51 = vld [vmem:[#allocation76_spill] sm:$0xff] }
 0x298   : > { %11812 = vmatmul.mubr.msk.bf16.gmra.mxu1 %vm15106_vm10, %v11811_v10  ;;  %v19309_v10 = vmax.f32 %v19308_v7, 0.0  ;;  %v19313_v4 = vsel %vm15183_vm6, 4294967295, %v19312_v4 }
 0x299   : > { %11815 = vmatprep.mubr.msk.bf16.mxu1 %vm15145_vm8, %v11814_v5  ;;  %v4531_v5 = vrot.slane %v4529_v43, 1  ;;  %19314 = vst [vmem:[#allocation87_spill] sm:$0xff] %v19313_v4  ;;  %v4503_v55 = vor.u32 %v4501_v61, %v4491_v17  ;;  %v11385_v43 = vld [vmem:[%s18461_s3 + $0x494] ss:$8 sps:$4 sm:$0xff]   ;;  %v4341_v17 = vld [vmem:[#allocation2 + $0x30] sm:$0x1] }
 0x29a   : > { %5226 = vmatpush2.bf16.msra.mxu1 %v11374_v28  ;;  %v11817_v23 = vpack.c.bf16 %v19311_v38, %v19309_v10  ;;  %v19316_v28 = vmax.f32 %v19315_v51, 0.0  ;;  %v4521_v10 = vshll.u32 %v14990_v41, 16  ;;  %v11388_v61 = vld [vmem:[%s18461_s3 + $0x484] ss:$8 sps:$4 sm:$0xff]   ;;  %v4517_v38 = vshrl.u32 %v14973_v24, 16 }
 0x29b   : > { %5227 = vmatprep.subr.bf16.mxu1 %v11379_v58  ;;  %v19318_v58 = vmax.f32 %v19317_v25, 0.0  ;;  %v4508_v7 = vsel %vm19296_vm0, %v4503_v55, %v4507_v35  ;;  %v19324_v55 = vmov 0  ;;  %v19327_v24 = vmax.f32 %v14603_v0, 0.0  ;;  %v11461_v4 = vld [vmem:[%s18463_s5 + $0x1c0] ss:$8 sps:$4 sm:$0xff]  }
 0x29c   : > { %4828 = vmatmul.mubr.bf16.gmra.mxu0 %v4492_v39 }
 0x29d   : > { %4837 = vmatprep.mubr.bf16.mxu0 %v4516_v29  ;;  %v11820_v39 = vpack.c.bf16 %v19318_v58, %v19316_v28  ;;  %v4527_v29 = vor.u32 %v4525_v22, %v4515_v13  ;;  %v4541_v13 = vshrl.u32 %v14977_v19, 16  ;;  %v19320_v22 = vld [vmem:[#allocation50_spill] sm:$0xff]  ;;  %v19322_v28 = vld [vmem:[#allocation79_spill] sm:$0xff]  ;;  %v4363_v19 = vpack.c.bf16 %v4341_v17, %v4341_v17  ;;  %v4340_v17 = vld [vmem:[#allocation2 + $0xc0] sm:$0x1] }
 0x29e   : > { %5228 = vmatpush2.bf16.msra.mxu1 %v11377_v30  ;;  %v11383_v30 = vld [vmem:[%s18461_s3 + $0x490] ss:$8 sps:$4 sm:$0xff]   ;;  %v19321_v51 = vmax.f32 %v19320_v22, 0.0  ;;  %v19323_v25 = vmax.f32 %v19322_v28, 0.0 }
 0x29f   : > { %5229 = vmatprep.subr.bf16.mxu1 %v11382_v48  ;;  %v4545_v48 = vshll.u32 %v14886_v49, 16 }
 0x2a0   : > { %11818 = vmatmul.mubr.msk.bf16.gmra.mxu1 %vm15145_vm8, %v11817_v23  ;;  %vm19319_vm8 = vmmov %vm19296_vm0  ;;  %v4523_v23 = vrot.slane %v4521_v10, 1  ;;  %v11823_v58 = vpack.c.bf16 %v19323_v25, %v19321_v51 }
 0x2a1   : > { %11821 = vmatprep.mubr.msk.bf16.mxu1 %vm15183_vm6, %v11820_v39  ;;  %v4532_v46 = vsel %vm19319_vm8, %v4527_v29, %v4531_v5  ;;  %v4543_v39 = vor.u32 %v4541_v13, %v4531_v5  ;;  %vm15221_vm8 = vmpackc.low %vm14530_vm11, %vm14469_vm2  ;;  %v11386_v5 = vld [vmem:[%s18461_s3 + $0x480] ss:$8 sps:$4 sm:$0xff]  }
 0x2a2   : > { %5230 = vmatpush2.bf16.msra.mxu1 %v11380_v15  ;;  %v19325_v55 = vsel %vm15221_vm8, 4294967295, %v19324_v55  ;;  %v19328_v15 = vmax.f32 %v14641_v31, 0.0  ;;  %v4561_v31 = vshll.u32 %v4363_v19, 16  ;;  %v19335_v19 = vmov 0 }
 0x2a3   : > { %5231 = vmatprep.subr.bf16.mxu1 %v11385_v43  ;;  %19326 = vst [vmem:[#allocation19_spill] sm:$0xff] %v19325_v55  ;;  %v4519_v43 = vor.u32 %v4517_v38, %v4507_v35  ;;  %v4557_v35 = vshrl.u32 %v14886_v49, 16  ;;  %v4362_v38 = vpack.c.bf16 %v4340_v17, %v4340_v17  ;;  %v4985_v17 = vrot.slane %v14795_v2, 1 }
 0x2a4   : > { %4838 = vmatmul.mubr.bf16.gmra.mxu0 %v4508_v7  ;;  %v11826_v29 = vpack.c.bf16 %v19328_v15, %v19327_v24  ;;  %v4547_v7 = vrot.slane %v4545_v48, 1  ;;  %v19330_v48 = vmax.f32 %v14567_v37, 0.0  ;;  %v4563_v25 = vrot.slane %v4561_v31, 1  ;;  %v19340_v15 = vld [vmem:[#allocation85_spill] sm:$0xff] }
 0x2a5   : > { %4847 = vmatprep.mubr.bf16.mxu0 %v4532_v46  ;;  %v4524_v10 = vsel %vm19296_vm0, %v4519_v43, %v4523_v23  ;;  %v4537_v46 = vshll.u32 %v15003_v3, 16  ;;  %v19341_v37 = vmax.f32 %v19340_v15, 0.0  ;;  %v4918_v15 = vld [vmem:[#allocation2 + $0x10] sm:$0xfc] }
 0x2a6   : > { %5232 = vmatpush2.bf16.msra.mxu1 %v11383_v30  ;;  %v4533_v30 = vshrl.u32 %v14990_v41, 16  ;;  %v4559_v28 = vor.u32 %v4557_v35, %v4547_v7  ;;  %v19338_v41 = vld [vmem:[#allocation67_spill] sm:$0xff]  ;;  %v4549_v35 = vshrl.u32 %v15003_v3, 16 }
 0x2a7   : > { %5233 = vmatprep.subr.bf16.mxu1 %v11388_v61  ;;  %v4539_v13 = vrot.slane %v4537_v46, 1  ;;  %v19331_v61 = vld [vmem:[#allocation82_spill] sm:$0xff]  ;;  %v19339_v24 = vmax.f32 %v19338_v41, 0.0 }
 0x2a8   : > { %11824 = vmatmul.mubr.msk.bf16.gmra.mxu1 %vm15183_vm6, %v11823_v58  ;;  %vm19329_vm6 = vmmov %vm19296_vm0  ;;  %v19332_v22 = vmax.f32 %v19331_v61, 0.0  ;;  %v4535_v43 = vor.u32 %v4533_v30, %v4523_v23  ;;  %v19346_v23 = vld [vmem:[#allocation57_spill] sm:$0xff] }
 0x2a9   : > { %11827 = vmatprep.mubr.msk.bf16.mxu1 %vm15221_vm8, %v11826_v29  ;;  %v4548_v0 = vsel %vm19329_vm6, %v4543_v39, %v4547_v7  ;;  %vm15249_vm6 = vmpackc.low %vm14723_vm7, %vm14580_vm1  ;;  %v11832_v29 = vpack.c.bf16 %v19341_v37, %v19339_v24  ;;  %v19342_v7 = vld [vmem:[#allocation77_spill] sm:$0xff]  ;;  %v4551_v61 = vor.u32 %v4549_v35, %v4539_v13  ;;  %v19347_v30 = vmax.f32 %v19346_v23, 0.0 }
 0x2aa   : > { %5234 = vmatpush2.bf16.msra.mxu1 %v11386_v5  ;;  %v11829_v51 = vpack.c.bf16 %v19332_v22, %v19330_v48  ;;  %v19336_v19 = vsel %vm15249_vm6, 4294967295, %v19335_v19  ;;  %v4919_v5 = vld [vmem:[#allocation2 + $0x48] sm:$0xfc]  ;;  %v4540_v46 = vsel %vm19296_vm0, %v4535_v43, %v4539_v13  ;;  %v19350_v13 = vrot.slane %v14805_v62, 1  ;;  %v11391_v62 = vld [vmem:[%s18463_s5 + $0x74] ss:$8 sps:$4 sm:$0xff]  }
 0x2ab   : > { %19337 = vst [vmem:[#allocation24_spill] sm:$0xff] %v19336_v19  ;;  %v19352_v43 = vrot.slane %v14807_v54, 1  ;;  %5848 = vmatprep.subr.bf16.mxu0 %v11391_v62  ;;  %v11392_v54 = vld [vmem:[%s18463_s5 + $0x60] ss:$8 sps:$4 sm:$0xff]  }
 0x2ac   : > { %4848 = vmatmul.mubr.bf16.gmra.mxu0 %v4524_v10  ;;  %v4923_v10 = vpack.c.bf16 %v19342_v7, %v4919_v5  ;;  %v11389_v7 = vld [vmem:[%s18463_s5 + $0x70] ss:$8 sps:$4 sm:$0xff]  }
 0x2ad   : > { %4857 = vmatprep.mubr.bf16.mxu0 %v4548_v0  ;;  %v4553_v0 = vshll.u32 %v4362_v38, 16  ;;  %5849 = vmatpush1.bf16.msra.mxu0 %v11389_v7  ;;  %v11410_v7 = vld [vmem:[%s18463_s5 + $0x20] ss:$8 sps:$4 sm:$0xff]  }
 0x2ae   : > { %v4984_v48 = vrot.slane %v4923_v10, 1  ;;  %v19354_v10 = vld [vmem:[#allocation17_spill] sm:$0xff] }
 0x2af   : > { %v4555_v22 = vrot.slane %v4553_v0, 1 }
 0x2b0   : > { %11830 = vmatmul.mubr.msk.bf16.gmra.mxu1 %vm15221_vm8, %v11829_v51  ;;  %vm19343_vm8 = vmmov %vm19296_vm0  ;;  %v19344_v51 = vld [vmem:[#allocation69_spill] sm:$0xff]  ;;  %vm19348_vm0 = vcmask 1046528  }
 0x2b1   : > { %11833 = vmatprep.mubr.msk.bf16.mxu1 %vm15249_vm6, %v11832_v29  ;;  %v4564_v31 = vsel %vm19343_vm8, %v4559_v28, %v4563_v25  ;;  %v19345_v41 = vmax.f32 %v19344_v51, 0.0  ;;  %v4986_v38 = vsel %vm19348_vm0, %v4984_v48, %v4985_v17  ;;  %v19349_v28 = vld [vmem:[#allocation92_spill] sm:$0xff]  ;;  %v4556_v25 = vsel %vm19343_vm8, %v4551_v61, %v4555_v22  ;;  %vm19351_vm10 = vmmov %vm19348_vm0 }
 0x2b2   : > { %v4922_v2 = vpack.c.bf16 %v19349_v28, %v4918_v15  ;;  %vm19353_vm15 = vmmov %vm19348_vm0  ;;  %v11403_v15 = vld [vmem:[%s18463_s5 + $0x34] ss:$8 sps:$4 sm:$0xff]  }
 0x2b3   : > { %v11835_v24 = vpack.c.bf16 %v19347_v30, %v19345_v41  ;;  %v4990_v5 = vsel %vm19353_vm15, %v4985_v17, %v19352_v43  ;;  %v11407_v43 = vld [vmem:[%s18463_s5 + $0x160] ss:$8 sps:$4 sm:$0xff]   ;;  %vm19357_vm15 = vmmov %vm19348_vm0 }
 0x2b4   : > { %4858 = vmatmul.mubr.bf16.gmra.mxu0 %v4540_v46  ;;  %v4981_v37 = vrot.slane %v4922_v2, 1 }
 0x2b5   : > { %4867 = vmatprep.mubr.bf16.mxu0 %v4564_v31  ;;  %v19355_v31 = vld [vmem:[#allocation18_spill] sm:$0xff] }
 0x2b6   : > { %v4983_v29 = vsel %vm19351_vm10, %v4981_v37, %v19350_v13  ;;  %vm19358_vm10 = vmmov %vm19348_vm0 }
 0x2b8   : > { %11836 = vmatmul.mubr.msk.bf16.gmra.mxu1 %vm15249_vm6, %v11835_v24 }
 0x2b9   : > { %5235 = vmatprep.mubr.bf16.mxu1 %v4986_v38 }
 0x2bc   : > { %4868 = vmatmul.mubr.bf16.gmra.mxu0 %v4556_v25  ;;  %v11406_v25 = vld [vmem:[%s18463_s5 + $0x174] ss:$8 sps:$4 sm:$0xff]  }
 0x2bd   : > { %6438 = vmatprep.subr.bf16.mxu1 %v11406_v25 }
 0x2c0   : > { %5236 = vmatmul.mubr.bf16.vlgmr.msra.gmra.mxu1 %v4983_v29 }
 0x2c1   : > { %5245 = vmatprep.mubr.bf16.mxu1 %v4990_v5  ;;  %v11409_v5 = vld [vmem:[%s18463_s5 + $0x164] ss:$8 sps:$4 sm:$0xff]  }
 0x2c5   : > { %v3183_v0 = vpop.f32.mrf.mxu1 }
 0x2c7   : > { %v3185_v35 = vpop.f32.mrf.mxu1 }
 0x2c8   : > { %5246 = vmatmul.mubr.bf16.gmra.mxu1 %v14982_v42  ;;  %v11394_v42 = vld [vmem:[%s18463_s5 + $0x64] ss:$8 sps:$4 sm:$0xff]  }
 0x2c9   : > { %5255 = vmatprep.mubr.bf16.mxu1 %v14987_v34  ;;  %5850 = vmatprep.subr.bf16.mxu0 %v11394_v42  ;;  %v2797_v34 = vld [vmem:[#allocation7] sm:$0x3]  ;;  %v3187_v61 = vpop.f32.mrf.mxu1  ;;  %v11412_v42 = vld [vmem:[%s18463_s5 + $0x24] ss:$8 sps:$4 sm:$0xff]  }
 0x2ca   : > { %5851 = vmatpush1.bf16.msra.mxu0 %v11392_v54  ;;  %v15304_v46 = vrot.slane %v2797_v34, %v19354_v10  ;;  %v15307_v17 = vrot.slane %v2797_v34, %v19355_v31 }
 0x2cb   : > { %v3773_v22 = vpop.f32.mrf.mxu0  ;;  %v15321_v23 = vpop.f32.mrf.mxu1 }
 0x2cc   : > { %v3282_v48 = vadd.f32 %v3183_v0, %v15304_v46  ;;  %v3283_v51 = vadd.f32 %v3185_v35, %v15307_v17  ;;  %v3284_v24 = vadd.f32 %v3187_v61, %v15304_v46 }
 0x2cd   : > { %v3775_v30 = vpop.f32.mrf.mxu0 }
 0x2ce   : > { %v15319_v41 = vadd.f32 %v3773_v22, %v3282_v48  ;;  %v15324_v38 = vadd.f32 %v3775_v30, %v3283_v51  ;;  %v11416_v22 = vld [vmem:[%s18463_s5 + $0x10] ss:$8 sps:$4 sm:$0xff]   ;;  %v11418_v51 = vld [vmem:[%s18463_s5 + $0x14] ss:$8 sps:$4 sm:$0xff]  }
 0x2cf   : > { %v3777_v2 = vpop.f32.mrf.mxu0 }
 0x2d0   : > { %5256 = vmatmul.mubr.bf16.gmra.mxu1 %v14993_v9  ;;  %v11395_v9 = vld [vmem:[%s18463_s5 + $0x50] ss:$8 sps:$4 sm:$0xff]   ;;  %v15338_v37 = vadd.f32 %v3777_v2, %v3284_v24 }
 0x2d1   : > { %5265 = vmatprep.mubr.bf16.mxu1 %v14996_v57  ;;  %v11397_v57 = vld [vmem:[%s18463_s5 + $0x54] ss:$8 sps:$4 sm:$0xff]   ;;  %v15340_v29 = vpop.f32.mrf.mxu0 }
 0x2d2   : > { %5852 = vmatprep.subr.bf16.mxu0 %v11397_v57 }
 0x2d3   : > { %5853 = vmatpush1.bf16.msra.mxu0 %v11395_v9  ;;  %v3193_v28 = vpop.f32.mrf.mxu1 }
 0x2d4   : > { %v3286_v62 = vadd.f32 %v3193_v28, %v15304_v46 }
 0x2d5   : > { %v3195_v13 = vpop.f32.mrf.mxu1 }
 0x2d6   : > { %v3287_v9 = vadd.f32 %v3195_v13, %v15307_v17  ;;  %v11422_v13 = vld [vmem:[%s18463_s5] ss:$8 sps:$4 sm:$0xff]  }
 0x2d7   : > { %v3197_v54 = vpop.f32.mrf.mxu1 }
 0x2d8   : > { %5266 = vmatmul.mubr.bf16.gmra.mxu1 %v15006_v12  ;;  %v11398_v12 = vld [vmem:[%s18463_s5 + $0x40] ss:$8 sps:$4 sm:$0xff]   ;;  %v3783_v34 = vpop.f32.mrf.mxu0 }
 0x2d9   : > { %5275 = vmatprep.mubr.bf16.mxu1 %v15014_v14  ;;  %v11400_v14 = vld [vmem:[%s18463_s5 + $0x44] ss:$8 sps:$4 sm:$0xff]   ;;  %v15358_v57 = vadd.f32 %v3783_v34, %v3286_v62  ;;  %v15360_v0 = vpop.f32.mrf.mxu1 }
 0x2da   : > { %5854 = vmatprep.subr.bf16.mxu0 %v11400_v14  ;;  %v3288_v14 = vadd.f32 %v3197_v54, %v15304_v46  ;;  %v11427_v54 = vld [vmem:[%s18463_s5 + $0x134] ss:$8 sps:$4 sm:$0xff]  }
 0x2db   : > { %5855 = vmatpush1.bf16.msra.mxu0 %v11398_v12  ;;  %v3785_v12 = vpop.f32.mrf.mxu0  ;;  %v3203_v48 = vpop.f32.mrf.mxu1 }
 0x2dc   : > { %5856 = vmatprep.subr.bf16.mxu0 %v11403_v15  ;;  %v15369_v35 = vadd.f32 %v3785_v12, %v3287_v9  ;;  %v11419_v15 = vld [vmem:[%s18463_s5 + $0x140] ss:$8 sps:$4 sm:$0xff]   ;;  %v3290_v28 = vadd.f32 %v3203_v48, %v15304_v46 }
 0x2dd   : > { %v3787_v61 = vpop.f32.mrf.mxu0  ;;  %v3205_v24 = vpop.f32.mrf.mxu1 }
 0x2de   : > { %v15377_v30 = vadd.f32 %v3787_v61, %v3288_v14  ;;  %v11428_v61 = vld [vmem:[%s18463_s5 + $0xf0] ss:$8 sps:$4 sm:$0xff]  }
 0x2df   : > { %v3207_v2 = vpop.f32.mrf.mxu1 }
 0x2e0   : > { %5276 = vmatmul.mubr.bf16.gmra.mxu1 %v15019_v16  ;;  %v11401_v16 = vld [vmem:[%s18463_s5 + $0x30] ss:$8 sps:$4 sm:$0xff]  }
 0x2e1   : > { %5285 = vmatprep.mubr.bf16.mxu1 %v15022_v26  ;;  %v11404_v26 = vld [vmem:[%s18463_s5 + $0x170] ss:$8 sps:$4 sm:$0xff]   ;;  %5857 = vmatpush1.bf16.msra.mxu0 %v11401_v16  ;;  %v15379_v16 = vpop.f32.mrf.mxu0  ;;  %v15399_v62 = vpop.f32.mrf.mxu1 }
 0x2e2   : > { %6439 = vmatpush1.bf16.msra.mxu1 %v11404_v26  ;;  %5858 = vmatprep.subr.bf16.mxu0 %v11412_v42  ;;  %v11421_v26 = vld [vmem:[%s18463_s5 + $0x144] ss:$8 sps:$4 sm:$0xff]   ;;  %v3292_v42 = vadd.f32 %v3207_v2, %v15304_v46 }
 0x2e3   : > { %6440 = vmatprep.subr.bf16.mxu1 %v11409_v5  ;;  %v3793_v25 = vpop.f32.mrf.mxu0  ;;  %v3291_v5 = vadd.f32 %v3205_v24, %v15307_v17 }
 0x2e5   : > { %5859 = vmatpush1.bf16.msra.mxu0 %v11410_v7  ;;  %v15397_v7 = vadd.f32 %v3793_v25, %v3290_v28  ;;  %v11433_v28 = vld [vmem:[%s18463_s5 + $0x124] ss:$8 sps:$4 sm:$0xff]  }
 0x2e6   : > { %6441 = vmatpush1.bf16.msra.mxu1 %v11407_v43  ;;  %5860 = vmatprep.subr.bf16.mxu0 %v11418_v51  ;;  %v11424_v43 = vld [vmem:[%s18463_s5 + $0x4] ss:$8 sps:$4 sm:$0xff]   ;;  %v3213_v9 = vpop.f32.mrf.mxu1  ;;  %v11431_v51 = vld [vmem:[%s18463_s5 + $0x120] ss:$8 sps:$4 sm:$0xff]  }
 0x2e7   : > { %v3294_v24 = vadd.f32 %v3213_v9, %v15304_v46 }
 0x2e8   : > { %5286 = vmatmul.mubr.bf16.gmra.mxu1 %v15030_v56  ;;  %v11413_v56 = vld [vmem:[%s18463_s5 + $0x150] ss:$8 sps:$4 sm:$0xff]   ;;  %v3215_v14 = vpop.f32.mrf.mxu1 }
 0x2e9   : > { %5295 = vmatprep.mubr.bf16.mxu1 %v15033_v6  ;;  %v11415_v6 = vld [vmem:[%s18463_s5 + $0x154] ss:$8 sps:$4 sm:$0xff]   ;;  %5861 = vmatpush1.bf16.msra.mxu0 %v11416_v22  ;;  %v3295_v25 = vadd.f32 %v3215_v14, %v15307_v17 }
 0x2ea   : > { %6442 = vmatprep.subr.bf16.mxu1 %v11415_v6  ;;  %5862 = vmatprep.subr.bf16.mxu0 %v11424_v43  ;;  %v11430_v22 = vld [vmem:[%s18463_s5 + $0xf4] ss:$8 sps:$4 sm:$0xff]  }
 0x2eb   : > { %6443 = vmatpush1.bf16.msra.mxu1 %v11413_v56  ;;  %v4921_v56 = vld [vmem:[#allocation2 + $0x30] sm:$0x3] }
 0x2ec   : > { %6444 = vmatprep.subr.bf16.mxu1 %v11421_v26  ;;  %v4925_v26 = vpack.c.bf16 %v4921_v56, %v4921_v56  ;;  %v11439_v56 = vld [vmem:[%s18463_s5 + $0xe4] ss:$8 sps:$4 sm:$0xff]  }
 0x2ed   : > { %5863 = vmatpush1.bf16.msra.mxu0 %v11422_v13 }
 0x2ee   : > { %5864 = vmatprep.subr.bf16.mxu0 %v11430_v22  ;;  %v5021_v9 = vrot.slane %v4925_v26, 1  ;;  %v11442_v26 = vld [vmem:[%s18463_s5 + $0x104] ss:$8 sps:$4 sm:$0xff]  }
 0x2ef   : > { %6445 = vmatpush1.bf16.msra.mxu1 %v11419_v15  ;;  %v3217_v15 = vpop.f32.mrf.mxu1 }
 0x2f0   : > { %5296 = vmatmul.mubr.bf16.gmra.mxu1 %v15058_v53  ;;  %v3795_v53 = vpop.f32.mrf.mxu0  ;;  %6446 = vmatprep.subr.bf16.mxu1 %v11427_v54 }
 0x2f1   : > { %5305 = vmatprep.mubr.bf16.mxu1 %v15061_v45  ;;  %v11425_v45 = vld [vmem:[%s18463_s5 + $0x130] ss:$8 sps:$4 sm:$0xff]   ;;  %v15408_v34 = vadd.f32 %v3795_v53, %v3291_v5  ;;  %v15432_v43 = vpop.f32.mrf.mxu1  ;;  %5865 = vmatpush2.bf16.msra.mxu0 %v11428_v61  ;;  %v11437_v53 = vld [vmem:[%s18463_s5 + $0xe0] ss:$8 sps:$4 sm:$0xff]  }
 0x2f2   : > { %v3797_v12 = vpop.f32.mrf.mxu0  ;;  %5866 = vmatprep.subr.bf16.mxu0 %v11439_v56 }
 0x2f3   : > { %v15410_v6 = vadd.f32 %v3797_v12, %v3292_v42  ;;  %6447 = vmatpush1.bf16.msra.mxu1 %v11425_v45  ;;  %v3296_v45 = vadd.f32 %v3217_v15, %v15304_v46  ;;  %v3223_v42 = vpop.f32.mrf.mxu1  ;;  %v4920_v12 = vld [vmem:[#allocation2 + $0xc0] sm:$0x3] }
 0x2f4   : > { %v15412_v48 = vpop.f32.mrf.mxu0  ;;  %6448 = vmatprep.subr.bf16.mxu1 %v11433_v28  ;;  %v11440_v15 = vld [vmem:[%s18463_s5 + $0x100] ss:$8 sps:$4 sm:$0xff]   ;;  %v3298_v28 = vadd.f32 %v3223_v42, %v15304_v46 }
 0x2f5   : > { %v3225_v22 = vpop.f32.mrf.mxu1  ;;  %5867 = vmatpush2.bf16.msra.mxu0 %v11437_v53 }
 0x2f6   : > { %v3803_v2 = vpop.f32.mrf.mxu0 }
 0x2f7   : > { %v15430_v13 = vadd.f32 %v3803_v2, %v3294_v24  ;;  %6449 = vmatpush1.bf16.msra.mxu1 %v11431_v51  ;;  %v4924_v24 = vpack.c.bf16 %v4920_v12, %v4920_v12  ;;  %v19356_v2 = vrot.slane %v14886_v49, 1 }
 0x2f8   : > { %5306 = vmatmul.mubr.bf16.gmra.mxu1 %v15071_v33  ;;  %v3805_v5 = vpop.f32.mrf.mxu0  ;;  %v11434_v33 = vld [vmem:[%s18463_s5 + $0x110] ss:$8 sps:$4 sm:$0xff]  }
 0x2f9   : > { %5315 = vmatprep.mubr.bf16.mxu1 %v15076_v52  ;;  %v11436_v52 = vld [vmem:[%s18463_s5 + $0x114] ss:$8 sps:$4 sm:$0xff]   ;;  %v15444_v54 = vadd.f32 %v3805_v5, %v3295_v25  ;;  %v5022_v25 = vsel %vm19357_vm15, %v19356_v2, %v5021_v9  ;;  %v3227_v5 = vpop.f32.mrf.mxu1  ;;  %v5019_v56 = vrot.slane %v4924_v24, 1 }
 0x2fa   : > { %v3807_v14 = vpop.f32.mrf.mxu0  ;;  %6450 = vmatprep.subr.bf16.mxu1 %v11436_v52  ;;  %v3299_v52 = vadd.f32 %v3225_v22, %v15307_v17  ;;  %v3300_v42 = vadd.f32 %v3227_v5, %v15304_v46  ;;  %v11443_v22 = vld [vmem:[%s18463_s5 + $0xd0] ss:$8 sps:$4 sm:$0xff]  }
 0x2fb   : > { %v15449_v61 = vadd.f32 %v3807_v14, %v3296_v45  ;;  %6451 = vmatpush1.bf16.msra.mxu1 %v11434_v33  ;;  %v15467_v45 = vpop.f32.mrf.mxu1  ;;  %v5020_v24 = vsel %vm19358_vm10, %v5015_v11, %v5019_v56  ;;  %v11446_v5 = vld [vmem:[%s18463_s5 + $0x1f0] ss:$8 sps:$4 sm:$0xff]   ;;  %v11449_v56 = vld [vmem:[%s18463_s5 + $0xc0] ss:$8 sps:$4 sm:$0xff]   ;;  %vm19421_vm10 = vcmask 1044480  }
 0x2fc   : > { %v15451_v51 = vpop.f32.mrf.mxu0  ;;  %6452 = vmatprep.subr.bf16.mxu1 %v11442_v26  ;;  %v11445_v26 = vld [vmem:[%s18463_s5 + $0xd4] ss:$8 sps:$4 sm:$0xff]  }
 0x2fd   : > { %5868 = vmatprep.subr.bf16.mxu0 %v11445_v26  ;;  %v11452_v26 = vld [vmem:[%s18463_s5 + $0x1e0] ss:$8 sps:$4 sm:$0xff]  }
 0x2fe   : > { %v3813_v33 = vpop.f32.mrf.mxu0  ;;  %v3233_v49 = vpop.f32.mrf.mxu1  ;;  %5869 = vmatpush2.bf16.msra.mxu0 %v11443_v22 }
 0x2ff   : > { %v15465_v53 = vadd.f32 %v3813_v33, %v3298_v28  ;;  %6453 = vmatpush1.bf16.msra.mxu1 %v11440_v15  ;;  %v3302_v28 = vadd.f32 %v3233_v49, %v15304_v46  ;;  %v11448_v33 = vld [vmem:[%s18463_s5 + $0x1f4] ss:$8 sps:$4 sm:$0xff]  }
 0x300   : > { %5316 = vmatmul.mubr.bf16.gmra.mxu1 %v15084_v40  ;;  %v3815_v12 = vpop.f32.mrf.mxu0  ;;  %v3235_v2 = vpop.f32.mrf.mxu1  ;;  %6454 = vmatprep.subr.bf16.mxu1 %v11448_v33 }
 0x301   : > { %5325 = vmatprep.mubr.bf16.mxu1 %v5022_v25  ;;  %v15470_v40 = vadd.f32 %v3815_v12, %v3299_v52  ;;  %v3303_v3 = vadd.f32 %v3235_v2, %v15307_v17 }
 0x302   : > { %v3817_v14 = vpop.f32.mrf.mxu0  ;;  %v3237_v25 = vpop.f32.mrf.mxu1 }
 0x303   : > { %v15472_v9 = vadd.f32 %v3817_v14, %v3300_v42  ;;  %v11451_v42 = vld [vmem:[%s18463_s5 + $0xc4] ss:$8 sps:$4 sm:$0xff]   ;;  %6455 = vmatpush2.bf16.msra.mxu1 %v11446_v5  ;;  %v3304_v14 = vadd.f32 %v3237_v25, %v15304_v46 }
 0x304   : > { %v15483_v15 = vpop.f32.mrf.mxu0  ;;  %v15495_v12 = vpop.f32.mrf.mxu1  ;;  %5870 = vmatprep.subr.bf16.mxu0 %v11451_v42  ;;  %v11455_v42 = vld [vmem:[%s18463_s5 + $0xb0] ss:$8 sps:$4 sm:$0xff]  }
 0x305   : > { %5871 = vmatpush2.bf16.msra.mxu0 %v11449_v56  ;;  %v11458_v56 = vld [vmem:[%s18463_s5 + $0x1d0] ss:$8 sps:$4 sm:$0xff]  }
 0x306   : > { %v3823_v52 = vpop.f32.mrf.mxu0 }
 0x307   : > { %v15493_v11 = vadd.f32 %v3823_v52, %v3302_v28 }
 0x308   : > { %5326 = vmatmul.mubr.bf16.gmra.mxu1 %v5020_v24  ;;  %v3825_v49 = vpop.f32.mrf.mxu0  ;;  %v11454_v24 = vld [vmem:[%s18463_s5 + $0x1e4] ss:$8 sps:$4 sm:$0xff]  }
 0x309   : > { %v15504_v22 = vadd.f32 %v3825_v49, %v3303_v3  ;;  %v3243_v2 = vpop.f32.mrf.mxu1  ;;  %6456 = vmatprep.subr.bf16.mxu1 %v11454_v24  ;;  %v11457_v49 = vld [vmem:[%s18463_s5 + $0xb4] ss:$8 sps:$4 sm:$0xff]  }
 0x30a   : > { %v3827_v28 = vpop.f32.mrf.mxu0  ;;  %6457 = vmatpush2.bf16.msra.mxu1 %v11452_v26  ;;  %v3306_v25 = vadd.f32 %v3243_v2, %v15304_v46  ;;  %v11460_v26 = vld [vmem:[%s18463_s5 + $0x1d4] ss:$8 sps:$4 sm:$0xff]   ;;  %5872 = vmatprep.subr.bf16.mxu0 %v11457_v49 }
 0x30b   : > { %v15512_v33 = vadd.f32 %v3827_v28, %v3304_v14  ;;  %v3245_v52 = vpop.f32.mrf.mxu1  ;;  %6458 = vmatprep.subr.bf16.mxu1 %v11460_v26  ;;  %5873 = vmatpush2.bf16.msra.mxu0 %v11455_v42 }
 0x30c   : > { %v15514_v5 = vpop.f32.mrf.mxu0  ;;  %v3307_v2 = vadd.f32 %v3245_v52, %v15307_v17  ;;  %v11463_v52 = vld [vmem:[%s18463_s5 + $0x1c4] ss:$8 sps:$4 sm:$0xff]  }
 0x30d   : > { %v3247_v3 = vpop.f32.mrf.mxu1 }
 0x30e   : > { %v3833_v14 = vpop.f32.mrf.mxu0  ;;  %v3308_v10 = vadd.f32 %v3247_v3, %v15304_v46  ;;  %6459 = vmatpush2.bf16.msra.mxu1 %v11458_v56 }
 0x30f   : > { %v15530_v24 = vadd.f32 %v3833_v14, %v3306_v25  ;;  %v15532_v28 = vpop.f32.mrf.mxu1  ;;  %v11464_v25 = vld [vmem:[%s18463_s5 + $0xa0] ss:$8 sps:$4 sm:$0xff]   ;;  %6460 = vmatprep.subr.bf16.mxu1 %v11463_v52 }
 0x310   : > { %v3835_v31 = vpop.f32.mrf.mxu0 }
 0x311   : > { %v15535_v19 = vadd.f32 %v3835_v31, %v3307_v2  ;;  %v11466_v31 = vld [vmem:[%s18463_s5 + $0xa4] ss:$8 sps:$4 sm:$0xff]   ;;  %v11467_v2 = vld [vmem:[%s18463_s5 + $0x1b0] ss:$8 sps:$4 sm:$0xff]  }
 0x312   : > { %v3253_v55 = vpop.f32.mrf.mxu1  ;;  %v3837_v49 = vpop.f32.mrf.mxu0  ;;  %5874 = vmatprep.subr.bf16.mxu0 %v11466_v31  ;;  %6461 = vmatpush2.bf16.msra.mxu1 %v11461_v4  ;;  %v11470_v4 = vld [vmem:[%s18463_s5 + $0x90] ss:$8 sps:$4 sm:$0xff]  }
 0x313   : > { %v15549_v3 = vadd.f32 %v3837_v49, %v3308_v10  ;;  %v3310_v14 = vadd.f32 %v3253_v55, %v15304_v46  ;;  %5875 = vmatpush2.bf16.msra.mxu0 %v11464_v25  ;;  %6462 = vmatprep.subr.bf16.mxu1 %v11469_v18  ;;  %v11472_v55 = vld [vmem:[%s18463_s5 + $0x94] ss:$8 sps:$4 sm:$0xff]   ;;  %v11473_v18 = vld [vmem:[%s18463_s5 + $0x1a0] ss:$8 sps:$4 sm:$0xff]  }
 0x314   : > { %v3255_v42 = vpop.f32.mrf.mxu1  ;;  %v15551_v56 = vpop.f32.mrf.mxu0  ;;  %5876 = vmatprep.subr.bf16.mxu0 %v11472_v55 }
 0x315   : > { %v3311_v49 = vadd.f32 %v3255_v42, %v15307_v17  ;;  %v11475_v42 = vld [vmem:[%s18463_s5 + $0x1a4] ss:$8 sps:$4 sm:$0xff]  }
 0x316   : > { %v3257_v26 = vpop.f32.mrf.mxu1  ;;  %6463 = vmatpush2.bf16.msra.mxu1 %v11467_v2  ;;  %v11478_v2 = vld [vmem:[%s18463_s5 + $0x84] ss:$8 sps:$4 sm:$0xff]  }
 0x317   : > { %v3312_v31 = vadd.f32 %v3257_v26, %v15304_v46  ;;  %5877 = vmatpush2.bf16.msra.mxu0 %v11470_v4  ;;  %6464 = vmatprep.subr.bf16.mxu1 %v11475_v42  ;;  %v11476_v26 = vld [vmem:[%s18463_s5 + $0x80] ss:$8 sps:$4 sm:$0xff]   ;;  %v11479_v4 = vld [vmem:[%s18463_s5 + $0x190] ss:$8 sps:$4 sm:$0xff]  }
 0x318   : > { %v3843_v10 = vpop.f32.mrf.mxu0  ;;  %v15563_v59 = vpop.f32.mrf.mxu1  ;;  %5878 = vmatprep.subr.bf16.mxu0 %v11478_v2  ;;  %v11482_v2 = vld [vmem:[%s18463_s5 + $0x180] ss:$8 sps:$4 sm:$0xff]  }
 0x319   : > { %v15561_v52 = vadd.f32 %v3843_v10, %v3310_v14 }
 0x31a   : > { %v3845_v25 = vpop.f32.mrf.mxu0  ;;  %6465 = vmatpush2.bf16.msra.mxu1 %v11473_v18 }
 0x31b   : > { %v15572_v27 = vadd.f32 %v3845_v25, %v3311_v49  ;;  %v11481_v25 = vld [vmem:[%s18463_s5 + $0x194] ss:$8 sps:$4 sm:$0xff]   ;;  %5879 = vmatpush2.bf16.msra.mxu0 %v11476_v26 }
 0x31c   : > { %v3263_v39 = vpop.f32.mrf.mxu1  ;;  %v3847_v14 = vpop.f32.mrf.mxu0  ;;  %6466 = vmatprep.subr.bf16.mxu1 %v11481_v25 }
 0x31d   : > { %v15580_v10 = vadd.f32 %v3847_v14, %v3312_v31  ;;  %v3314_v55 = vadd.f32 %v3263_v39, %v15304_v46 }
 0x31e   : > { %v3265_v58 = vpop.f32.mrf.mxu1  ;;  %v15588_v49 = vpop.f32.mrf.mxu0  ;;  %6467 = vmatpush2.bf16.msra.mxu1 %v11479_v4 }
 0x31f   : > { %v3315_v14 = vadd.f32 %v3265_v58, %v15307_v17  ;;  %v11487_v58 = vld [vmem:[%s18463_s5 + $0x274] ss:$8 sps:$4 sm:$0xff]   ;;  %6468 = vmatprep.subr.bf16.mxu1 %v11484_v44 }
 0x320   : > { %v3267_v31 = vpop.f32.mrf.mxu1  ;;  %v3853_v42 = vpop.f32.mrf.mxu0  ;;  %6826 = vmatprep.subr.bf16.mxu0 %v11487_v58 }
 0x321   : > { %v15598_v1 = vadd.f32 %v3853_v42, %v3314_v55  ;;  %v3316_v39 = vadd.f32 %v3267_v31, %v15304_v46 }
 0x322   : > { %v3855_v47 = vpop.f32.mrf.mxu0  ;;  %v15612_v55 = vpop.f32.mrf.mxu1  ;;  %6469 = vmatpush2.bf16.msra.mxu1 %v11482_v2 }
 0x323   : > { %v15601_v18 = vadd.f32 %v3855_v47, %v3315_v14 }
 0x324   : > { %v3857_v26 = vpop.f32.mrf.mxu0 }
 0x325   : > { %v15614_v25 = vadd.f32 %v3857_v26, %v3316_v39  ;;  %v3273_v47 = vpop.f32.mrf.mxu1 }
 0x326   : > { %v15616_v31 = vpop.f32.mrf.mxu0  ;;  %v3318_v42 = vadd.f32 %v3273_v47, %v15304_v46 }
 0x327   : > { %v3275_v4 = vpop.f32.mrf.mxu1 }
 0x328   : > { %v3319_v50 = vadd.f32 %v3275_v4, %v15307_v17 }
 0x329   : > { %v3277_v14 = vpop.f32.mrf.mxu1 }
 0x32a   : > { %v3863_v8 = vpop.f32.mrf.mxu0  ;;  %v3320_v39 = vadd.f32 %v3277_v14, %v15304_v46 }
 0x32b   : > { %v15620_v20 = vadd.f32 %v3863_v8, %v3318_v42  ;;  %v15622_v60 = vpop.f32.mrf.mxu1 }
 0x32c   : > { %v3865_v36 = vpop.f32.mrf.mxu0 }
 0x32d   : > { %v15625_v44 = vadd.f32 %v3865_v36, %v3319_v50  ;;  %v4161_v2 = vpop.f32.mrf.mxu1 }
 0x32e   : > { %v3867_v26 = vpop.f32.mrf.mxu0  ;;  %v15630_v63 = vadd.f32 %v4161_v2, %v15319_v41 }
 0x32f   : > { %v15627_v58 = vadd.f32 %v3867_v26, %v3320_v39  ;;  %v4163_v21 = vpop.f32.mrf.mxu1 }
 0x330   : > { %v15632_v47 = vpop.f32.mrf.mxu0  ;;  %v15635_v8 = vadd.f32 %v4163_v21, %v15324_v38  ;;  %v11502_v21 = vld [vmem:[%s18463_s5 + $0x374] ss:$8 sps:$4 sm:$0xff]  }
 0x331   : > { %v4165_v4 = vpop.f32.mrf.mxu1  ;;  %7444 = vmatprep.subr.bf16.mxu1 %v11502_v21 }
 0x332   : > { %v15637_v42 = vpop.f32.mrf.mxu0  ;;  %v15640_v46 = vadd.f32 %v4165_v4, %v15338_v37 }
 0x333   : > { %v15642_v36 = vpop.f32.mrf.mxu1 }
 0x334   : > { %19359 = vst [vmem:[#allocation23_spill] sm:$0xff] %v15640_v46  ;;  %v15644_v50 = vpop.f32.mrf.mxu0 }
 0x335   : > { %v4171_v14 = vpop.f32.mrf.mxu1 }
 0x336   : > { %v15646_v39 = vpop.f32.mrf.mxu0  ;;  %v15649_v41 = vadd.f32 %v4171_v14, %v15358_v57 }
 0x337   : > { %19360 = vst [vmem:[#allocation96_spill] sm:$0xff] %v15646_v39  ;;  %v4173_v38 = vpop.f32.mrf.mxu1 }
 0x338   : > { %19361 = vst [vmem:[#allocation88_spill] sm:$0xff] %v15649_v41  ;;  %v15654_v26 = vpop.f32.mrf.mxu0  ;;  %v15657_v37 = vadd.f32 %v4173_v38, %v15369_v35 }
 0x339   : > { %19362 = vst [vmem:[#allocation43_spill] sm:$0xff] %v15654_v26  ;;  %v4175_v2 = vpop.f32.mrf.mxu1 }
 0x33a   : > { %19363 = vst [vmem:[#allocation45_spill] sm:$0xff] %v15657_v37  ;;  %v15659_v4 = vpop.f32.mrf.mxu0  ;;  %v15662_v32 = vadd.f32 %v4175_v2, %v15377_v30 }
 0x33b   : > { %v15664_v39 = vpop.f32.mrf.mxu1 }
 0x33c   : > { %19364 = vst [vmem:[#allocation25_spill] sm:$0xff] %v15662_v32  ;;  %v15666_v57 = vpop.f32.mrf.mxu0 }
 0x33d   : > { %19365 = vst [vmem:[#allocation97_spill] sm:$0xff] %v15666_v57  ;;  %v4181_v14 = vpop.f32.mrf.mxu1 }
 0x33e   : > { %v15668_v41 = vpop.f32.mrf.mxu0  ;;  %v15671_v46 = vadd.f32 %v4181_v14, %v15397_v7 }
 0x33f   : > { %19366 = vst [vmem:[#allocation91_spill] sm:$0xff] %v15668_v41  ;;  %v4183_v26 = vpop.f32.mrf.mxu1 }
 0x340   : > { %19367 = vst [vmem:[#allocation49_spill] sm:$0xff] %v15671_v46  ;;  %v15673_v35 = vpop.f32.mrf.mxu0  ;;  %v15676_v21 = vadd.f32 %v4183_v26, %v15408_v34 }
 0x341   : > { %v4185_v38 = vpop.f32.mrf.mxu1 }
 0x342   : > { %19368 = vst [vmem:[#allocation47_spill] sm:$0xff] %v15676_v21  ;;  %v15678_v37 = vpop.f32.mrf.mxu0  ;;  %v15681_v30 = vadd.f32 %v4185_v38, %v15410_v6 }
 0x343   : > { %v15683_v2 = vpop.f32.mrf.mxu1 }
 0x344   : > { %19369 = vst [vmem:[#allocation28_spill] sm:$0xff] %v15681_v30  ;;  %v15685_v32 = vpop.f32.mrf.mxu0 }
 0x345   : > { %19370 = vst [vmem:[#allocation20_spill] sm:$0xff] %v15685_v32  ;;  %v4191_v41 = vpop.f32.mrf.mxu1 }
 0x346   : > { %v15687_v57 = vpop.f32.mrf.mxu0  ;;  %v15690_v7 = vadd.f32 %v4191_v41, %v15430_v13 }
 0x347   : > { %v4193_v14 = vpop.f32.mrf.mxu1 }
 0x348   : > { %19371 = vst [vmem:[#allocation34_spill] sm:$0xff] %v15690_v7  ;;  %v15692_v46 = vpop.f32.mrf.mxu0  ;;  %v15695_v34 = vadd.f32 %v4193_v14, %v15444_v54 }
 0x349   : > { %v4195_v26 = vpop.f32.mrf.mxu1 }
 0x34a   : > { %19372 = vst [vmem:[#allocation26_spill] sm:$0xff] %v15695_v34  ;;  %v15698_v6 = vadd.f32 %v4195_v26, %v15449_v61 }
 0x34b   : > { %v15702_v30 = vpop.f32.mrf.mxu1 }
 0x34c   : > { %19373 = vst [vmem:[#allocation35_spill] sm:$0xff] %v15698_v6  ;;  %v15700_v38 = vpop.f32.mrf.mxu0 }
 0x34e   : > { %v15704_v21 = vpop.f32.mrf.mxu0 }
 0x34f   : > { %19374 = vst [vmem:[#allocation21_spill] sm:$0xff] %v15704_v21 }
 0x350   : > { %v4201_v32 = vpop.f32.mrf.mxu1  ;;  %v15712_v14 = vpop.f32.mrf.mxu0 }
 0x351   : > { %v15707_v13 = vadd.f32 %v4201_v32, %v15465_v53 }
 0x352   : > { %v4203_v41 = vpop.f32.mrf.mxu1  ;;  %v15719_v34 = vpop.f32.mrf.mxu0 }
 0x353   : > { %19375 = vst [vmem:[#allocation98_spill] sm:$0xff] %v15707_v13  ;;  %v15710_v7 = vadd.f32 %v4203_v41, %v15470_v40 }
 0x354   : > { %v4205_v54 = vpop.f32.mrf.mxu1  ;;  %v15727_v41 = vpop.f32.mrf.mxu0 }
 0x355   : > { %19376 = vst [vmem:[#allocation33_spill] sm:$0xff] %v15710_v7  ;;  %v15715_v61 = vadd.f32 %v4205_v54, %v15472_v9 }
 0x356   : > { %v15717_v26 = vpop.f32.mrf.mxu1 }
 0x357   : > { %19377 = vst [vmem:[#allocation89_spill] sm:$0xff] %v15715_v61  ;;  %v15734_v61 = vpop.f32.mrf.mxu0 }
 0x358   : > { %v4211_v6 = vpop.f32.mrf.mxu1 }
 0x359   : > { %v15722_v21 = vadd.f32 %v4211_v6, %v15493_v11 }
 0x35a   : > { %v4213_v32 = vpop.f32.mrf.mxu1 }
 0x35b   : > { %19378 = vst [vmem:[#allocation37_spill] sm:$0xff] %v15722_v21  ;;  %v15725_v53 = vadd.f32 %v4213_v32, %v15504_v22  ;;  %v15742_v32 = vpop.f32.mrf.mxu0 }
 0x35c   : > { %v4215_v40 = vpop.f32.mrf.mxu1 }
 0x35d   : > { %19379 = vst [vmem:[#allocation99_spill] sm:$0xff] %v15725_v53  ;;  %v15730_v7 = vadd.f32 %v4215_v40, %v15512_v33 }
 0x35e   : > { %v15732_v9 = vpop.f32.mrf.mxu1 }
 0x35f   : > { %19380 = vst [vmem:[#allocation100_spill] sm:$0xff] %v15730_v7  ;;  %v15749_v7 = vpop.f32.mrf.mxu0 }
 0x360   : > { %v4221_v54 = vpop.f32.mrf.mxu1 }
 0x361   : > { %v15737_v13 = vadd.f32 %v4221_v54, %v15530_v24 }
 0x362   : > { %v4223_v11 = vpop.f32.mrf.mxu1 }
 0x363   : > { %v15740_v6 = vadd.f32 %v4223_v11, %v15535_v19  ;;  %v15757_v11 = vpop.f32.mrf.mxu0 }
 0x364   : > { %v4225_v22 = vpop.f32.mrf.mxu1 }
 0x365   : > { %19381 = vst [vmem:[#allocation27_spill] sm:$0xff] %v15740_v6  ;;  %v15745_v53 = vadd.f32 %v4225_v22, %v15549_v3 }
 0x366   : > { %v15747_v33 = vpop.f32.mrf.mxu1 }
 0x367   : > { %19382 = vst [vmem:[#allocation36_spill] sm:$0xff] %v15745_v53  ;;  %19383 = vst [vmem:[#allocation101_spill] sm:$0xff] %v15747_v33  ;;  %v15764_v53 = vpop.f32.mrf.mxu0 }
 0x368   : > { %v4231_v40 = vpop.f32.mrf.mxu1 }
 0x369   : > { %v15752_v21 = vadd.f32 %v4231_v40, %v15561_v52 }
 0x36a   : > { %v4233_v24 = vpop.f32.mrf.mxu1 }
 0x36b   : > { %v15755_v54 = vadd.f32 %v4233_v24, %v15572_v27  ;;  %v15772_v24 = vpop.f32.mrf.mxu0 }
 0x36c   : > { %v4235_v19 = vpop.f32.mrf.mxu1 }
 0x36d   : > { %19384 = vst [vmem:[#allocation29_spill] sm:$0xff] %v15755_v54  ;;  %v15760_v6 = vadd.f32 %v4235_v19, %v15580_v10  ;;  %v3285_v10 = vadd.f32 %v15321_v23, %v15307_v17 }
 0x36e   : > { %v15762_v3 = vpop.f32.mrf.mxu1 }
 0x36f   : > { %19385 = vst [vmem:[#allocation32_spill] sm:$0xff] %v15760_v6  ;;  %v3289_v6 = vadd.f32 %v15360_v0, %v15307_v17  ;;  %v3301_v0 = vadd.f32 %v15467_v45, %v15307_v17 }
 0x370   : > { %v4241_v22 = vpop.f32.mrf.mxu1 }
 0x371   : > { %v15767_v33 = vadd.f32 %v4241_v22, %v15598_v1  ;;  %v3293_v1 = vadd.f32 %v15399_v62, %v15307_v17  ;;  %v3305_v62 = vadd.f32 %v15495_v12, %v15307_v17  ;;  %v3891_v12 = vadd.f32 %v15483_v15, %v3301_v0 }
 0x372   : > { %v4243_v52 = vpop.f32.mrf.mxu1  ;;  %v4878_v15 = vadd.f32 %v15637_v42, %v15630_v63  ;;  %v19393_v42 = vld [vmem:[#allocation25_spill] sm:$0xff] }
 0x373   : > { %v15770_v40 = vadd.f32 %v4243_v52, %v15601_v18  ;;  %v3875_v18 = vadd.f32 %v15340_v29, %v3285_v10  ;;  %v3879_v52 = vadd.f32 %v15379_v16, %v3289_v6  ;;  %v3309_v29 = vadd.f32 %v15532_v28, %v15307_v17 }
 0x374   : > { %v4245_v27 = vpop.f32.mrf.mxu1  ;;  %v3313_v16 = vadd.f32 %v15563_v59, %v15307_v17  ;;  %v3317_v6 = vadd.f32 %v15612_v55, %v15307_v17  ;;  %v3895_v10 = vadd.f32 %v15514_v5, %v3305_v62  ;;  %v4879_v5 = vadd.f32 %v15644_v50, %v15635_v8  ;;  %v19392_v62 = vld [vmem:[#allocation97_spill] sm:$0xff]  ;;  %v19394_v8 = vld [vmem:[#allocation91_spill] sm:$0xff] }
 0x375   : > { %19386 = vst [vmem:[#allocation41_spill] sm:$0xff] %v15770_v40  ;;  %v15775_v54 = vadd.f32 %v4245_v27, %v15614_v25  ;;  %v3883_v40 = vadd.f32 %v15412_v48, %v3293_v1  ;;  %v3297_v25 = vadd.f32 %v15432_v43, %v15307_v17  ;;  %v15790_v27 = vpop.f32.mrf.mxu0  ;;  %v3899_v28 = vadd.f32 %v15551_v56, %v3309_v29  ;;  %v19387_v56 = vld [vmem:[#allocation23_spill] sm:$0xff] }
 0x376   : > { %v15779_v19 = vpop.f32.mrf.mxu1  ;;  %v15815_v59 = vadd.f32 %v15588_v49, %v3313_v16  ;;  %v19388_v49 = vld [vmem:[#allocation96_spill] sm:$0xff]  ;;  %v15846_v50 = vadd.f32 %v19394_v8, %v19393_v42  ;;  %v6021_v42 = vld [vmem:[#allocation2 + $0xb0] sm:$0x80]  ;;  %v19404_v8 = vld [vmem:[#allocation33_spill] sm:$0xff] }
 0x377   : > { %v3887_v43 = vadd.f32 %v15451_v51, %v3297_v25  ;;  %v15818_v51 = vadd.f32 %v15616_v31, %v3317_v6  ;;  %v4267_v31 = vadd.f32 %v15664_v39, %v3879_v52  ;;  %v4271_v63 = vadd.f32 %v15683_v2, %v3883_v40  ;;  %v19395_v39 = vld [vmem:[#allocation49_spill] sm:$0xff]  ;;  %v19397_v6 = vld [vmem:[#allocation20_spill] sm:$0xff] }
 0x378   : > { %v4251_v22 = vpop.f32.mrf.mxu1  ;;  %v15853_v52 = vadd.f32 %v15678_v37, %v19395_v39  ;;  %v15894_v39 = vadd.f32 %v15734_v61, %v19404_v8  ;;  %v19411_v8 = vld [vmem:[#allocation27_spill] sm:$0xff] }
 0x379   : > { %v15793_v23 = vadd.f32 %v4251_v22, %v15620_v20  ;;  %v3321_v20 = vadd.f32 %v15622_v60, %v15307_v17  ;;  %v4263_v60 = vadd.f32 %v15642_v36, %v3875_v18  ;;  %v4839_v17 = vpop.f32.mrf.mxu0  ;;  %v4880_v22 = vadd.f32 %v19388_v49, %v19387_v56  ;;  %v19390_v36 = vld [vmem:[#allocation88_spill] sm:$0xff]  ;;  %v19399_v49 = vld [vmem:[#allocation34_spill] sm:$0xff] }
 0x37a   : > { %v4253_v48 = vpop.f32.mrf.mxu1  ;;  %v4882_v18 = vadd.f32 %v15659_v4, %v19390_v36  ;;  %v15849_v16 = vadd.f32 %v15673_v35, %v4267_v31  ;;  %v15864_v2 = vadd.f32 %v15692_v46, %v4271_v63  ;;  %v4275_v40 = vadd.f32 %v15702_v30, %v3887_v43  ;;  %v19400_v31 = vld [vmem:[#allocation26_spill] sm:$0xff] }
 0x37b   : > { %v15809_v45 = vadd.f32 %v4253_v48, %v15625_v44  ;;  %v15821_v55 = vadd.f32 %v15632_v47, %v3321_v20  ;;  %v19389_v47 = vld [vmem:[#allocation43_spill] sm:$0xff]  ;;  %v4841_v35 = vpop.f32.mrf.mxu0  ;;  %v15871_v37 = vadd.f32 %v15700_v38, %v19399_v49  ;;  %v4279_v46 = vadd.f32 %v15717_v26, %v3891_v12  ;;  %v19403_v43 = vld [vmem:[#allocation98_spill] sm:$0xff] }
 0x37c   : > { %v4255_v1 = vpop.f32.mrf.mxu1  ;;  %v4881_v0 = vadd.f32 %v19389_v47, %v4263_v60  ;;  %v19396_v48 = vld [vmem:[#allocation47_spill] sm:$0xff]  ;;  %v19401_v47 = vld [vmem:[#allocation21_spill] sm:$0xff]  ;;  %v15883_v30 = vadd.f32 %v15719_v34, %v4275_v40  ;;  %v4283_v12 = vadd.f32 %v15732_v9, %v3895_v10  ;;  %v6022_v40 = vld [vmem:[#allocation2 + $0xd0] sm:$0x80] }
 0x37d   : > { %v15825_v44 = vadd.f32 %v4255_v1, %v15627_v58  ;;  %v19391_v58 = vld [vmem:[#allocation45_spill] sm:$0xff]  ;;  %v15857_v4 = vadd.f32 %v19397_v6, %v19396_v48  ;;  %v19398_v1 = vld [vmem:[#allocation28_spill] sm:$0xff]  ;;  %v15875_v36 = vadd.f32 %v19401_v47, %v19400_v31  ;;  %v15901_v34 = vadd.f32 %v15749_v7, %v4279_v46  ;;  %v19408_v7 = vld [vmem:[#allocation99_spill] sm:$0xff] }
 0x37e   : > { %v15834_v25 = vpop.f32.mrf.mxu1  ;;  %v15841_v29 = vadd.f32 %v19392_v62, %v19391_v58  ;;  %v15861_v60 = vadd.f32 %v15687_v57, %v19398_v1  ;;  %v19402_v58 = vld [vmem:[#allocation35_spill] sm:$0xff]  ;;  %v19406_v48 = vld [vmem:[#allocation37_spill] sm:$0xff]  ;;  %v15917_v49 = vadd.f32 %v15764_v53, %v19408_v7  ;;  %v19409_v9 = vld [vmem:[#allocation100_spill] sm:$0xff] }
 0x37f   : > { %v15879_v57 = vadd.f32 %v15712_v14, %v19402_v58  ;;  %v19405_v14 = vld [vmem:[#allocation89_spill] sm:$0xff]  ;;  %v15906_v6 = vadd.f32 %v15757_v11, %v19406_v48  ;;  %v15921_v10 = vadd.f32 %v15772_v24, %v19409_v9  ;;  %v15924_v11 = vadd.f32 %v15790_v27, %v4283_v12  ;;  %v5509_v24 = vld [vmem:[#allocation2 + $0xd0] sm:$0xc0] }
 0x380   : > { %v5237_v20 = vpop.f32.mrf.mxu1  ;;  %v15898_v26 = vadd.f32 %v15742_v32, %v19405_v14  ;;  %v15927_v58 = vadd.f32 %v4839_v17, %v15737_v13  ;;  %v15938_v14 = vadd.f32 %v4841_v35, %v19411_v8 }
 0x381   : > { %v15867_v56 = vadd.f32 %v5237_v20, %v4878_v15  ;;  %v15887_v15 = vadd.f32 %v15727_v41, %v19403_v43  ;;  %v19410_v43 = vld [vmem:[#allocation101_spill] sm:$0xff] }
 0x382   : > { %v5239_v62 = vpop.f32.mrf.mxu1  ;;  %v4287_v27 = vadd.f32 %v19410_v43, %v3899_v28 }
 0x383   : > { %v18685_v38 = vmax.f32 %v15867_v56, 0.0  ;;  %v15890_v63 = vadd.f32 %v5239_v62, %v4879_v5  ;;  %v4843_v5 = vpop.f32.mrf.mxu0  ;;  %v5508_v62 = vld [vmem:[#allocation2 + $0xb0] sm:$0xc0] }
 0x384   : > { %v5241_v41 = vpop.f32.mrf.mxu1 }
 0x385   : > { %v5416_v61 = vsel %vm13650_vm4, %v18685_v38, 0.0  ;;  %v18686_v1 = vmax.f32 %v15890_v63, 0.0  ;;  %v15913_v32 = vadd.f32 %v5241_v41, %v4880_v22  ;;  %v4845_v12 = vpop.f32.mrf.mxu0  ;;  %v19412_v41 = vld [vmem:[#allocation22_spill] sm:$0xff] }
 0x386   : > { %5456 = vst [vmem:[#allocation2 + $0x10] sm:$0xff] %v5416_v61  ;;  %v5243_v31 = vpop.f32.mrf.mxu1  ;;  %v6025_v47 = vpack.c.bf16 %v5416_v61, %v6021_v42  ;;  %vm19413_vm0 = vnez %v19412_v41  ;;  %v5550_v43 = vpack.c.bf16 %v5416_v61, %v5508_v62 }
 0x387   : > { %v5417_v22 = vsel %vm13650_vm4, %v18686_v1, 0.0  ;;  %v18687_v53 = vmax.f32 %v15913_v32, 0.0  ;;  %v15934_v46 = vadd.f32 %v5243_v31, %v4881_v0  ;;  %v19414_v31 = vld [vmem:[#allocation36_spill] sm:$0xff] }
 0x388   : > { %5457 = vst [vmem:[#allocation2 + $0x48] sm:$0xff] %v5417_v22  ;;  %v5247_v42 = vpop.f32.mrf.mxu1  ;;  %v6026_v13 = vpack.c.bf16 %v5417_v22, %v6022_v40  ;;  %v6063_v17 = vshrl.u32 %v6025_v47, 16  ;;  %v6066_v9 = vshll.u32 %v6025_v47, 16  ;;  %v15946_v38 = vadd.f32 %v4843_v5, %v19414_v31 }
 0x389   : > { %v5418_v48 = vsel %vm19413_vm0, %v18687_v53, 0.0  ;;  %v18690_v0 = vmax.f32 %v15934_v46, 0.0  ;;  %v5340_v7 = vadd.f32 %v5247_v42, %v4882_v18  ;;  %v5551_v35 = vpack.c.bf16 %v5417_v22, %v5509_v24  ;;  %v19416_v42 = vld [vmem:[#allocation40_spill] sm:$0xff] }
 0x38a   : > { %5458 = vst [vmem:[#allocation2 + $0x120] sm:$0xff] %v5418_v48  ;;  %v5249_v28 = vpop.f32.mrf.mxu1  ;;  %v6080_v8 = vshrl.u32 %v6026_v13, 16  ;;  %v6083_v20 = vshll.u32 %v6026_v13, 16  ;;  %v15955_v18 = vadd.f32 %v4845_v12, %v4287_v27  ;;  %v15957_v47 = vrot.slane %v6063_v17, 3 }
 0x38b   : > { %v5419_v40 = vsel %vm19413_vm0, %v18690_v0, 0.0  ;;  %v5380_v1 = vmax.f32 %v5340_v7, 0.0  ;;  %v15953_v53 = vadd.f32 %v5249_v28, %v15841_v29  ;;  %vm19417_vm8 = vnez %v19416_v42 }
 0x38c   : > { %5459 = vst [vmem:[#allocation2 + $0x38] sm:$0xff] %v5419_v40  ;;  %v5251_v5 = vpop.f32.mrf.mxu1  ;;  %v15963_v62 = vrot.slane %v6066_v9, 4  ;;  %v5629_v29 = vrot.slane %v5551_v35, 3  ;;  %v5626_v27 = vrot.slane %v5550_v43, 3  ;;  %v6082_v13 = vrot.slane %v6080_v8, 3  ;;  %v19419_v8 = vld [vmem:[#allocation46_spill] sm:$0xff] }
 0x38d   : > { %19415 = vst [vmem:[#allocation39_spill] sm:$0xff] %v15953_v53  ;;  %v5420_v61 = vsel %vm19417_vm8, %v5380_v1, 0.0  ;;  %v18689_v22 = vmax.f32 %v15953_v53, 0.0  ;;  %v5342_v24 = vadd.f32 %v5251_v5, %v15846_v50  ;;  %v6085_v28 = vrot.slane %v6083_v20, 4 }
 0x38e   : > { %5460 = vst [vmem:[#allocation2 + $0xf8] sm:$0xff] %v5420_v61  ;;  %v5253_v7 = vpop.f32.mrf.mxu1  ;;  %v15965_v31 = vpack.c.bf16 %v5420_v61, %v5418_v48  ;;  %vm19420_vm15 = vnez %v19419_v8  ;;  %vm19450_vm0 = vcmask 1044480  }
 0x38f   : > { %v5421_v17 = vsel %vm19417_vm8, %v18689_v22, 0.0  ;;  %v5382_v12 = vmax.f32 %v5342_v24, 0.0  ;;  %v15972_v1 = vadd.f32 %v5253_v7, %v15849_v16  ;;  %v6069_v16 = vor.u32 %v15963_v62, %v15957_v47  ;;  %v11485_v62 = vld [vmem:[%s18463_s5 + $0x270] ss:$8 sps:$4 sm:$0xff]  }
 0x390   : > { %5461 = vst [vmem:[#allocation2 + $0x100] sm:$0xff] %v5421_v17  ;;  %v5257_v50 = vpop.f32.mrf.mxu1  ;;  %v15974_v9 = vpack.c.bf16 %v5421_v17, %v5419_v40  ;;  %v18691_v35 = vrot.slane %v15965_v31, 3  ;;  %v6071_v48 = vshrl.u32 %v15965_v31, 16  ;;  %v6074_v43 = vshll.u32 %v15965_v31, 16 }
 0x391   : > { %19418 = vst [vmem:[#allocation30_spill] sm:$0xff] %v15972_v1  ;;  %v5422_v5 = vsel %vm19420_vm15, %v5382_v12, 0.0  ;;  %v18696_v61 = vmax.f32 %v15972_v1, 0.0  ;;  %v5344_v24 = vadd.f32 %v5257_v50, %v15853_v52  ;;  %v4849_v12 = vpop.f32.mrf.mxu0  ;;  %v6086_v8 = vor.u32 %v6085_v28, %v6082_v13  ;;  %v11493_v28 = vld [vmem:[%s18463_s5 + $0x254] ss:$8 sps:$4 sm:$0xff]  }
 0x392   : > { %5462 = vst [vmem:[#allocation2 + $0x80] sm:$0xff] %v5422_v5  ;;  %v5259_v20 = vpop.f32.mrf.mxu1  ;;  %v18699_v40 = vrot.slane %v15974_v9, 3  ;;  %v5628_v7 = vsel %vm19421_vm10, %v5626_v27, %v18691_v35  ;;  %v6088_v17 = vshrl.u32 %v15974_v9, 16  ;;  %v6091_v22 = vshll.u32 %v15974_v9, 16 }
 0x393   : > { %v5423_v52 = vsel %vm19420_vm15, %v18696_v61, 0.0  ;;  %v5384_v50 = vmax.f32 %v5344_v24, 0.0  ;;  %v15996_v47 = vadd.f32 %v5259_v20, %v15857_v4  ;;  %v6073_v0 = vrot.slane %v6071_v48, 3  ;;  %v11490_v24 = vld [vmem:[%s18463_s5 + $0x264] ss:$8 sps:$4 sm:$0xff]   ;;  %v19422_v4 = vld [vmem:[#allocation51_spill] sm:$0xff] }
 0x394   : > { %5463 = vst [vmem:[#allocation2 + $0x108] sm:$0xff] %v5423_v52  ;;  %v5261_v27 = vpop.f32.mrf.mxu1  ;;  %v5631_v35 = vsel %vm19421_vm10, %v5629_v29, %v18699_v40  ;;  %v6090_v42 = vrot.slane %v6088_v17, 3  ;;  %v6093_v41 = vrot.slane %v6091_v22, 4  ;;  %v6076_v1 = vrot.slane %v6074_v43, 4  ;;  %v4851_v40 = vpop.f32.mrf.mxu0 }
 0x395   : > { %vm19423_vm15 = vnez %v19422_v4  ;;  %v18702_v61 = vmax.f32 %v15996_v47, 0.0  ;;  %v5346_v48 = vadd.f32 %v5261_v27, %v15861_v60  ;;  %5880 = vmatprep.mubr.bf16.mxu0 %v5631_v35  ;;  %v16018_v17 = vadd.f32 %v4849_v12, %v15752_v21  ;;  %v11500_v21 = vld [vmem:[%s18463_s5 + $0x370] ss:$8 sps:$4 sm:$0xff]  }
 0x396   : > { %v5424_v20 = vsel %vm19423_vm15, %v5384_v50, 0.0  ;;  %v5263_v53 = vpop.f32.mrf.mxu1  ;;  %5881 = vmatmul.mubr.bf16.vlgmr.msra.gmra.mxu0 %v5628_v7  ;;  %v16011_v29 = vor.u32 %v6093_v41, %v6090_v42  ;;  %v16013_v22 = vor.u32 %v6076_v1, %v6073_v0  ;;  %v11488_v41 = vld [vmem:[%s18463_s5 + $0x260] ss:$8 sps:$4 sm:$0xff]   ;;  %vm19424_vm10 = vsmask.f32 4352 }
 0x397   : > { %5464 = vst [vmem:[#allocation2 + $0x138] sm:$0xff] %v5424_v20  ;;  %v16015_v43 = vpack.c.bf16 %v5424_v20, %v5422_v5  ;;  %v5425_v60 = vsel %vm19423_vm15, %v18702_v61, 0.0  ;;  %v5386_v35 = vmax.f32 %v5346_v48, 0.0  ;;  %v16025_v13 = vadd.f32 %v5263_v53, %v15864_v2  ;;  %6827 = vmatpush1.bf16.msra.mxu0 %v11485_v62  ;;  %vm19425_vm15 = vmmov %vm19424_vm10  ;;  %v11505_v5 = vld [vmem:[%s18463_s5 + $0x364] ss:$8 sps:$4 sm:$0xff]  }
 0x398   : > { %5465 = vst [vmem:[#allocation2 + $0xf0] sm:$0xff] %v5425_v60  ;;  %v5267_v0 = vpop.f32.mrf.mxu1  ;;  %v6095_v42 = vsel %vm19424_vm10, %v6086_v8, %v16011_v29  ;;  %v6078_v1 = vsel %vm19425_vm15, %v6069_v16, %v16013_v22  ;;  %6828 = vmatprep.subr.bf16.mxu0 %v11490_v24  ;;  %v16037_v2 = vpack.c.bf16 %v5425_v60, %v5423_v52  ;;  %v19426_v7 = vld [vmem:[#allocation73_spill] sm:$0xff]  ;;  %v11491_v52 = vld [vmem:[%s18463_s5 + $0x250] ss:$8 sps:$4 sm:$0xff]   ;;  %v4853_v60 = vpop.f32.mrf.mxu0  ;;  %v19428_v61 = vrot.slane %v15974_v9, 3 }
 0x399   : > { %vm19427_vm8 = vnez %v19426_v7  ;;  %v18703_v8 = vmax.f32 %v16025_v13, 0.0  ;;  %v5348_v16 = vadd.f32 %v5267_v0, %v15871_v37  ;;  %6470 = vmatprep.mubr.bf16.mxu1 %v6095_v42  ;;  %v6097_v50 = vshrl.u32 %v16015_v43, 16  ;;  %v11496_v48 = vld [vmem:[%s18463_s5 + $0x244] ss:$8 sps:$4 sm:$0xff]   ;;  %v11503_v42 = vld [vmem:[%s18463_s5 + $0x360] ss:$8 sps:$4 sm:$0xff]  }
 0x39a   : > { %v5426_v12 = vsel %vm19427_vm8, %v5386_v35, 0.0  ;;  %v16056_v62 = vadd.f32 %v15762_v3, %v15815_v59  ;;  %v5269_v27 = vpop.f32.mrf.mxu1  ;;  %6471 = vmatmul.mubr.bf16.vlgmr.msra.gmra.mxu1 %v6078_v1  ;;  %v18705_v24 = vrot.slane %v16037_v2, 3  ;;  %v6106_v20 = vshrl.u32 %v16037_v2, 16 }
 0x39b   : > { %5466 = vst [vmem:[#allocation2 + $0x18] sm:$0xff] %v5426_v12  ;;  %v6109_v37 = vshll.u32 %v16037_v2, 16  ;;  %v5427_v3 = vsel %vm19427_vm8, %v18703_v8, 0.0  ;;  %v5388_v59 = vmax.f32 %v5348_v16, 0.0  ;;  %v16069_v35 = vadd.f32 %v5269_v27, %v15875_v36  ;;  %6829 = vmatpush1.bf16.msra.mxu0 %v11488_v41  ;;  %7445 = vmatpush1.bf16.msra.mxu1 %v11500_v21  ;;  %v11511_v41 = vld [vmem:[%s18463_s5 + $0x354] ss:$8 sps:$4 sm:$0xff]  }
 0x39c   : > { %v6099_v0 = vrot.slane %v6097_v50, 3  ;;  %5467 = vst [vmem:[#allocation2 + $0xc8] sm:$0xff] %v5427_v3  ;;  %v5271_v1 = vpop.f32.mrf.mxu1  ;;  %vm19429_vm15 = vcmask 1044480   ;;  %6830 = vmatprep.subr.bf16.mxu0 %v11493_v28  ;;  %v6108_v16 = vrot.slane %v6106_v20, 3  ;;  %v6100_v36 = vshll.u32 %v16015_v43, 16  ;;  %7446 = vmatprep.subr.bf16.mxu1 %v11505_v5  ;;  %v19430_v21 = vld [vmem:[#allocation53_spill] sm:$0xff] }
 0x39d   : > { %v5635_v53 = vsel %vm19429_vm15, %v19428_v61, %v18705_v24  ;;  %v6111_v8 = vrot.slane %v6109_v37, 4  ;;  %vm19431_vm10 = vnez %v19430_v21  ;;  %v5350_v7 = vadd.f32 %v5271_v1, %v15879_v57  ;;  %v19434_v20 = vld [vmem:[#allocation29_spill] sm:$0xff]  ;;  %v19435_v27 = vld [vmem:[#allocation32_spill] sm:$0xff] }
 0x39e   : > { %v5428_v50 = vsel %vm19431_vm10, %v5388_v59, 0.0  ;;  %5890 = vmatprep.mubr.bf16.mxu0 %v5635_v53  ;;  %v19432_v9 = vrot.slane %v16015_v43, 3  ;;  %v19433_v61 = vrot.slane %v15965_v31, 3  ;;  %v16093_v5 = vadd.f32 %v4851_v40, %v19434_v20  ;;  %v5273_v37 = vpop.f32.mrf.mxu1  ;;  %v4855_v53 = vpop.f32.mrf.mxu0 }
 0x39f   : > { %5468 = vst [vmem:[#allocation2 + $0x70] sm:$0xff] %v5428_v50  ;;  %v16095_v24 = vor.u32 %v6111_v8, %v6108_v16  ;;  %v6102_v59 = vrot.slane %v6100_v36, 4  ;;  %v16097_v4 = vpack.c.bf16 %v5428_v50, %v5426_v12  ;;  %v16100_v57 = vadd.f32 %v4853_v60, %v19435_v27  ;;  %6831 = vmatpush1.bf16.msra.mxu0 %v11491_v52  ;;  %v11494_v8 = vld [vmem:[%s18463_s5 + $0x240] ss:$8 sps:$4 sm:$0xff]   ;;  %v11509_v52 = vld [vmem:[%s18463_s5 + $0x350] ss:$8 sps:$4 sm:$0xff]  }
 0x3a0   : > { %v5633_v28 = vsel %vm19429_vm15, %v19433_v61, %v19432_v9  ;;  %v19436_v1 = vmax.f32 %v16069_v35, 0.0  ;;  %v5390_v9 = vmax.f32 %v5350_v7, 0.0  ;;  %v16107_v40 = vadd.f32 %v5273_v37, %v15883_v30  ;;  %7447 = vmatpush1.bf16.msra.mxu1 %v11503_v42  ;;  %v5277_v12 = vpop.f32.mrf.mxu1  ;;  %6832 = vmatprep.subr.bf16.mxu0 %v11496_v48  ;;  %v11499_v7 = vld [vmem:[%s18463_s5 + $0x234] ss:$8 sps:$4 sm:$0xff]   ;;  %v19438_v42 = vld [vmem:[#allocation48_spill] sm:$0xff] }
 0x3a1   : > { %5891 = vmatmul.mubr.bf16.gmra.mxu0 %v5633_v28  ;;  %vm19437_vm15 = vsmask.f32 4352  ;;  %v16115_v16 = vor.u32 %v6102_v59, %v6099_v0  ;;  %v18710_v30 = vrot.slane %v16097_v4, 3  ;;  %7448 = vmatprep.subr.bf16.mxu1 %v11511_v41  ;;  %v6115_v48 = vshrl.u32 %v16097_v4, 16  ;;  %v11517_v0 = vld [vmem:[%s18463_s5 + $0x344] ss:$8 sps:$4 sm:$0xff]   ;;  %v4859_v59 = vpop.f32.mrf.mxu0 }
 0x3a2   : > { %v5429_v31 = vsel %vm19431_vm10, %v19436_v1, 0.0  ;;  %v6113_v60 = vsel %vm19437_vm15, %v16011_v29, %v16095_v24  ;;  %vm19439_vm10 = vnez %v19438_v42  ;;  %v18709_v29 = vmax.f32 %v16107_v40, 0.0  ;;  %v5279_v27 = vpop.f32.mrf.mxu1  ;;  %v11497_v37 = vld [vmem:[%s18463_s5 + $0x230] ss:$8 sps:$4 sm:$0xff]  }
 0x3a3   : > { %5469 = vst [vmem:[#allocation2 + $0x20] sm:$0xff] %v5429_v31  ;;  %v16117_v36 = vpack.c.bf16 %v5429_v31, %v5427_v3  ;;  %v5430_v50 = vsel %vm19439_vm10, %v5390_v9, 0.0  ;;  %v16130_v3 = vadd.f32 %v5277_v12, %v15887_v15  ;;  %6480 = vmatprep.mubr.bf16.mxu1 %v6113_v60  ;;  %v6104_v41 = vsel %vm19437_vm15, %v16013_v22, %v16115_v16  ;;  %v11508_v9 = vld [vmem:[%s18463_s5 + $0x224] ss:$8 sps:$4 sm:$0xff]  }
 0x3a4   : > { %5470 = vst [vmem:[#allocation2 + $0x128] sm:$0xff] %v5430_v50  ;;  %v19440_v15 = vrot.slane %v16015_v43, 3  ;;  %vm19441_vm8 = vcmask 1044480   ;;  %v5431_v22 = vsel %vm19439_vm10, %v18709_v29, 0.0  ;;  %v16155_v31 = vadd.f32 %v5279_v27, %v15894_v39  ;;  %6481 = vmatmul.mubr.bf16.gmra.mxu1 %v6104_v41  ;;  %6833 = vmatpush1.bf16.msra.mxu0 %v11494_v8  ;;  %v5281_v12 = vpop.f32.mrf.mxu1  ;;  %v11515_v8 = vld [vmem:[%s18463_s5 + $0x340] ss:$8 sps:$4 sm:$0xff]  }
 0x3a5   : > { %v18713_v61 = vrot.slane %v16117_v36, 3  ;;  %v6124_v20 = vshrl.u32 %v16117_v36, 16  ;;  %v18712_v1 = vmax.f32 %v16130_v3, 0.0  ;;  %v6127_v43 = vshll.u32 %v16117_v36, 16  ;;  %5471 = vst [vmem:[#allocation2 + $0x110] sm:$0xff] %v5431_v22  ;;  %6834 = vmatprep.subr.bf16.mxu0 %v11499_v7  ;;  %7449 = vmatpush1.bf16.msra.mxu1 %v11509_v52  ;;  %v19443_v27 = vld [vmem:[#allocation52_spill] sm:$0xff] }
 0x3a6   : > { %v5637_v28 = vsel %vm19441_vm8, %v19440_v15, %v18710_v30  ;;  %v19442_v60 = vrot.slane %v16037_v2, 3  ;;  %v6117_v30 = vrot.slane %v6115_v48, 3  ;;  %v6118_v39 = vshll.u32 %v16097_v4, 16  ;;  %7450 = vmatprep.subr.bf16.mxu1 %v11517_v0  ;;  %v11523_v7 = vld [vmem:[%s18463_s5 + $0x334] ss:$8 sps:$4 sm:$0xff]  }
 0x3a7   : > { %v6126_v29 = vrot.slane %v6124_v20, 3  ;;  %vm19444_vm15 = vnez %v19443_v27  ;;  %v18719_v42 = vmax.f32 %v16155_v31, 0.0  ;;  %v16176_v2 = vadd.f32 %v5281_v12, %v15898_v26 }
 0x3a8   : > { %v5639_v15 = vsel %vm19441_vm8, %v19442_v60, %v18713_v61  ;;  %v5432_v41 = vsel %vm19444_vm15, %v18712_v1, 0.0  ;;  %v6129_v48 = vrot.slane %v6127_v43, 4  ;;  %v16182_v52 = vadd.f32 %v4855_v53, %v16056_v62  ;;  %v5283_v60 = vpop.f32.mrf.mxu1  ;;  %6835 = vmatpush1.bf16.msra.mxu0 %v11497_v37 }
 0x3a9   : > { %5900 = vmatprep.mubr.bf16.mxu0 %v5639_v15  ;;  %v16185_v20 = vadd.f32 %v4859_v59, %v15767_v33  ;;  %5472 = vst [vmem:[#allocation2 + $0x8] sm:$0xff] %v5432_v41  ;;  %v6120_v1 = vrot.slane %v6118_v39, 4  ;;  %v16187_v61 = vpack.c.bf16 %v5432_v41, %v5430_v50  ;;  %v5433_v26 = vsel %vm19444_vm15, %v18719_v42, 0.0  ;;  %v11506_v33 = vld [vmem:[%s18463_s5 + $0x220] ss:$8 sps:$4 sm:$0xff]   ;;  %6836 = vmatprep.subr.bf16.mxu0 %v11508_v9 }
 0x3aa   : > { %5901 = vmatmul.mubr.bf16.gmra.mxu0 %v5637_v28  ;;  %v18717_v0 = vmax.f32 %v16176_v2, 0.0  ;;  %v16195_v43 = vadd.f32 %v5283_v60, %v15901_v34  ;;  %v16197_v62 = vor.u32 %v6129_v48, %v6126_v29  ;;  %5473 = vst [vmem:[#allocation2 + $0x98] sm:$0xff] %v5433_v26  ;;  %v5287_v53 = vpop.f32.mrf.mxu1  ;;  %v16204_v28 = vpack.c.bf16 %v5433_v26, %v5431_v22  ;;  %v11514_v34 = vld [vmem:[%s18463_s5 + $0x214] ss:$8 sps:$4 sm:$0xff]   ;;  %v11521_v29 = vld [vmem:[%s18463_s5 + $0x330] ss:$8 sps:$4 sm:$0xff]   ;;  %v4861_v60 = vpop.f32.mrf.mxu0 }
 0x3ab   : > { %v16202_v50 = vor.u32 %v6120_v1, %v6117_v30  ;;  %v18720_v59 = vrot.slane %v16187_v61, 3  ;;  %v6133_v12 = vshrl.u32 %v16187_v61, 16  ;;  %7451 = vmatpush1.bf16.msra.mxu1 %v11515_v8  ;;  %v19445_v30 = vld [vmem:[#allocation64_spill] sm:$0xff]  ;;  %v16220_v1 = vadd.f32 %v5287_v53, %v15906_v6 }
 0x3ac   : > { %vm19446_vm8 = vnez %v19445_v30  ;;  %v18718_v22 = vmax.f32 %v16195_v43, 0.0  ;;  %vm19447_vm15 = vsmask.f32 4352  ;;  %7452 = vmatprep.subr.bf16.mxu1 %v11523_v7  ;;  %v11529_v15 = vld [vmem:[%s18463_s5 + $0x324] ss:$8 sps:$4 sm:$0xff]   ;;  %v5289_v39 = vpop.f32.mrf.mxu1  ;;  %v18723_v41 = vrot.slane %v16204_v28, 3  ;;  %6837 = vmatpush1.bf16.msra.mxu0 %v11506_v33 }
 0x3ad   : > { %v5434_v37 = vsel %vm19446_vm8, %v18717_v0, 0.0  ;;  %v6131_v9 = vsel %vm19447_vm15, %v16095_v24, %v16197_v62  ;;  %vm19448_vm10 = vmmov %vm19447_vm15  ;;  %v19449_v6 = vrot.slane %v16097_v4, 3  ;;  %v6142_v48 = vshrl.u32 %v16204_v28, 16  ;;  %v11512_v7 = vld [vmem:[%s18463_s5 + $0x210] ss:$8 sps:$4 sm:$0xff]   ;;  %6838 = vmatprep.subr.bf16.mxu0 %v11514_v34 }
 0x3ae   : > { %5474 = vst [vmem:[#allocation2 + $0xa8] sm:$0xff] %v5434_v37  ;;  %6490 = vmatprep.mubr.bf16.mxu1 %v6131_v9  ;;  %v6122_v8 = vsel %vm19448_vm10, %v16115_v16, %v16202_v50  ;;  %v5435_v16 = vsel %vm19446_vm8, %v18718_v22, 0.0  ;;  %v18722_v26 = vmax.f32 %v16220_v1, 0.0  ;;  %v16247_v53 = vadd.f32 %v5289_v39, %v15917_v49  ;;  %v11520_v9 = vld [vmem:[%s18463_s5 + $0x204] ss:$8 sps:$4 sm:$0xff]   ;;  %vm19455_vm15 = vmmov %vm19448_vm10 }
 0x3af   : > { %v5641_v24 = vsel %vm19450_vm0, %v19449_v6, %v18720_v59  ;;  %6491 = vmatmul.mubr.bf16.gmra.mxu1 %v6122_v8  ;;  %v6145_v4 = vshll.u32 %v16204_v28, 16  ;;  %5475 = vst [vmem:[#allocation2 + $0x158] sm:$0xff] %v5435_v16  ;;  %v5291_v6 = vpop.f32.mrf.mxu1  ;;  %v19451_v0 = vrot.slane %v16117_v36, 3  ;;  %v6144_v42 = vrot.slane %v6142_v48, 3  ;;  %v11527_v33 = vld [vmem:[%s18463_s5 + $0x320] ss:$8 sps:$4 sm:$0xff]  }
 0x3b0   : > { %v6135_v59 = vrot.slane %v6133_v12, 3  ;;  %v6136_v49 = vshll.u32 %v16187_v61, 16  ;;  %7453 = vmatpush1.bf16.msra.mxu1 %v11521_v29  ;;  %v5436_v8 = vsel %vm19287_vm9, %v18722_v26, 0.0  ;;  %v18725_v30 = vmax.f32 %v16247_v53, 0.0  ;;  %v11532_v12 = vld [vmem:[%s18463_s5 + $0x314] ss:$8 sps:$4 sm:$0xff]   ;;  %6839 = vmatpush1.bf16.msra.mxu0 %v11512_v7 }
 0x3b1   : > { %v5643_v22 = vsel %vm19450_vm0, %v19451_v0, %v18723_v41  ;;  %v16268_v36 = vadd.f32 %v5291_v6, %v15921_v10  ;;  %v6147_v0 = vrot.slane %v6145_v4, 4  ;;  %7454 = vmatprep.subr.bf16.mxu1 %v11529_v15  ;;  %v16275_v34 = vadd.f32 %v15779_v19, %v15818_v51  ;;  %v19453_v29 = vld [vmem:[#allocation41_spill] sm:$0xff]  ;;  %5476 = vst [vmem:[#allocation2 + $0xd8] sm:$0xff] %v5436_v8  ;;  %v5293_v26 = vpop.f32.mrf.mxu1 }
 0x3b2   : > { %5910 = vmatprep.mubr.bf16.mxu0 %v5643_v22  ;;  %v16278_v48 = vadd.f32 %v4861_v60, %v19453_v29  ;;  %v6138_v41 = vrot.slane %v6136_v49, 4  ;;  %v16280_v10 = vpack.c.bf16 %v5436_v8, %v5434_v37  ;;  %v4863_v22 = vpop.f32.mrf.mxu0  ;;  %v5437_v15 = vsel %vm19287_vm9, %v18725_v30, 0.0  ;;  %6840 = vmatprep.subr.bf16.mxu0 %v11520_v9  ;;  %v11538_v9 = vld [vmem:[%s18463_s5 + $0x304] ss:$8 sps:$4 sm:$0xff]  }
 0x3b3   : > { %5911 = vmatmul.mubr.bf16.gmra.mxu0 %v5641_v24  ;;  %v18724_v4 = vmax.f32 %v16268_v36, 0.0  ;;  %v16288_v19 = vadd.f32 %v5293_v26, %v15924_v11  ;;  %v16290_v51 = vor.u32 %v6147_v0, %v6144_v42  ;;  %v11518_v24 = vld [vmem:[%s18463_s5 + $0x200] ss:$8 sps:$4 sm:$0xff]   ;;  %5477 = vst [vmem:[#allocation2 + $0xe8] sm:$0xff] %v5437_v15  ;;  %v5297_v37 = vpop.f32.mrf.mxu1  ;;  %v16297_v6 = vpack.c.bf16 %v5437_v15, %v5435_v16  ;;  %v11526_v11 = vld [vmem:[%s18463_s5 + $0x2f4] ss:$8 sps:$4 sm:$0xff]  }
 0x3b4   : > { %v16295_v60 = vor.u32 %v6138_v41, %v6135_v59  ;;  %v18726_v49 = vrot.slane %v16280_v10, 3  ;;  %v6151_v8 = vshrl.u32 %v16280_v10, 16  ;;  %7455 = vmatpush1.bf16.msra.mxu1 %v11527_v33  ;;  %v11530_v42 = vld [vmem:[%s18463_s5 + $0x310] ss:$8 sps:$4 sm:$0xff]   ;;  %v16313_v16 = vadd.f32 %v5297_v37, %v15927_v58  ;;  %v4865_v37 = vpop.f32.mrf.mxu0  ;;  %6841 = vmatpush1.bf16.msra.mxu0 %v11518_v24  ;;  %v11536_v24 = vld [vmem:[%s18463_s5 + $0x300] ss:$8 sps:$4 sm:$0xff]  }
 0x3b5   : > { %v5438_v41 = vsel %vm14198_vm12, %v18724_v4, 0.0  ;;  %v18727_v7 = vmax.f32 %v16288_v19, 0.0  ;;  %v6149_v26 = vsel %vm19448_vm10, %v16197_v62, %v16290_v51  ;;  %7456 = vmatprep.subr.bf16.mxu1 %v11532_v12  ;;  %v5299_v33 = vpop.f32.mrf.mxu1  ;;  %v18731_v29 = vrot.slane %v16297_v6, 3  ;;  %v11524_v15 = vld [vmem:[%s18463_s5 + $0x2f0] ss:$8 sps:$4 sm:$0xff]   ;;  %vm19458_vm10 = vmmov %vm19450_vm0  ;;  %6842 = vmatprep.subr.bf16.mxu0 %v11526_v11 }
 0x3b6   : > { %5478 = vst [vmem:[#allocation2 + $0x150] sm:$0xff] %v5438_v41  ;;  %6500 = vmatprep.mubr.bf16.mxu1 %v6149_v26  ;;  %v6140_v0 = vsel %vm19455_vm15, %v16202_v50, %v16295_v60  ;;  %v19456_v58 = vrot.slane %v16187_v61, 3  ;;  %v6160_v12 = vshrl.u32 %v16297_v6, 16  ;;  %v16340_v4 = vadd.f32 %v5299_v33, %v15938_v14 }
 0x3b7   : > { %v5439_v50 = vsel %vm14198_vm12, %v18727_v7, 0.0  ;;  %6501 = vmatmul.mubr.bf16.gmra.mxu1 %v6140_v0  ;;  %v6163_v61 = vshll.u32 %v16297_v6, 16  ;;  %v5301_v30 = vpop.f32.mrf.mxu1  ;;  %v6153_v59 = vrot.slane %v6151_v8, 3  ;;  %v6154_v14 = vshll.u32 %v16280_v10, 16  ;;  %v11544_v8 = vld [vmem:[%s18463_s5 + $0x3f4] ss:$8 sps:$4 sm:$0xff]  }
 0x3b8   : > { %v5645_v62 = vsel %vm19450_vm0, %v19456_v58, %v18726_v49  ;;  %v11535_v58 = vld [vmem:[%s18463_s5 + $0x2e4] ss:$8 sps:$4 sm:$0xff]   ;;  %5479 = vst [vmem:[#allocation2 + $0x78] sm:$0xff] %v5439_v50  ;;  %v19457_v49 = vrot.slane %v16204_v28, 3  ;;  %v6162_v26 = vrot.slane %v6160_v12, 3  ;;  %7457 = vmatpush1.bf16.msra.mxu1 %v11530_v42  ;;  %v19459_v33 = vmax.f32 %v16313_v16, 0.0  ;;  %6843 = vmatpush2.bf16.msra.mxu0 %v11524_v15  ;;  %vm19462_vm0 = vmmov %vm19455_vm15 }
 0x3b9   : > { %v18734_v27 = vmax.f32 %v16340_v4, 0.0  ;;  %v16361_v28 = vadd.f32 %v5301_v30, %v15946_v38  ;;  %7458 = vmatprep.subr.bf16.mxu1 %v11538_v9  ;;  %v16367_v11 = vadd.f32 %v4863_v22, %v15775_v54  ;;  %v16370_v42 = vadd.f32 %v4865_v37, %v16275_v34  ;;  %v5303_v12 = vpop.f32.mrf.mxu1  ;;  %v11533_v34 = vld [vmem:[%s18463_s5 + $0x2e0] ss:$8 sps:$4 sm:$0xff]   ;;  %6844 = vmatprep.subr.bf16.mxu0 %v11535_v58  ;;  %v11542_v15 = vld [vmem:[%s18463_s5 + $0x3f0] ss:$8 sps:$4 sm:$0xff]  }
 0x3ba   : > { %v5647_v7 = vsel %vm19458_vm10, %v19457_v49, %v18731_v29  ;;  %v5440_v39 = vsel %vm14248_vm14, %v19459_v33, 0.0  ;;  %v6165_v49 = vrot.slane %v6163_v61, 4  ;;  %v6156_v33 = vrot.slane %v6154_v14, 4  ;;  %v11550_v58 = vld [vmem:[%s18463_s5 + $0x3e4] ss:$8 sps:$4 sm:$0xff]  }
 0x3bb   : > { %5920 = vmatprep.mubr.bf16.mxu0 %v5647_v7  ;;  %5480 = vst [vmem:[#allocation2 + $0x90] sm:$0xff] %v5440_v39  ;;  %v16372_v29 = vpack.c.bf16 %v5440_v39, %v5438_v41  ;;  %v5441_v38 = vsel %vm14248_vm14, %v18734_v27, 0.0  ;;  %v18732_v30 = vmax.f32 %v16361_v28, 0.0  ;;  %v16380_v7 = vadd.f32 %v5303_v12, %v15955_v18  ;;  %v5307_v39 = vpop.f32.mrf.mxu1  ;;  %v11541_v18 = vld [vmem:[%s18463_s5 + $0x2d4] ss:$8 sps:$4 sm:$0xff]  }
 0x3bc   : > { %5921 = vmatmul.mubr.bf16.gmra.mxu0 %v5645_v62  ;;  %v16382_v54 = vor.u32 %v6165_v49, %v6162_v26  ;;  %5481 = vst [vmem:[#allocation2] sm:$0xff] %v5441_v38  ;;  %v16387_v22 = vor.u32 %v6156_v33, %v6153_v59  ;;  %v16389_v41 = vpack.c.bf16 %v5441_v38, %v5439_v50  ;;  %v11539_v12 = vld [vmem:[%s18463_s5 + $0x2d0] ss:$8 sps:$4 sm:$0xff]   ;;  %v4869_v33 = vpop.f32.mrf.mxu0 }
 0x3bd   : > { %v18735_v9 = vrot.slane %v16372_v29, 3  ;;  %v6169_v62 = vshrl.u32 %v16372_v29, 16  ;;  %7459 = vmatpush1.bf16.msra.mxu1 %v11536_v24  ;;  %v5442_v37 = vsel %vm14309_vm5, %v18732_v30, 0.0  ;;  %v18733_v50 = vmax.f32 %v16380_v7, 0.0  ;;  %v5309_v14 = vpop.f32.mrf.mxu1  ;;  %6845 = vmatpush2.bf16.msra.mxu0 %v11533_v34  ;;  %v11548_v34 = vld [vmem:[%s18463_s5 + $0x3e0] ss:$8 sps:$4 sm:$0xff]  }
 0x3be   : > { %v16405_v26 = vadd.f32 %v5307_v39, %v16018_v17  ;;  %v6167_v61 = vsel %vm19455_vm15, %v16290_v51, %v16382_v54  ;;  %7460 = vmatprep.subr.bf16.mxu1 %v11544_v8  ;;  %5482 = vst [vmem:[#allocation2 + $0x118] sm:$0xff] %v5442_v37  ;;  %v6158_v24 = vsel %vm19462_vm0, %v16295_v60, %v16387_v22  ;;  %v5650_v49 = vrot.slane %v16389_v41, 3  ;;  %vm19465_vm15 = vmmov %vm19458_vm10 }
 0x3bf   : > { %6510 = vmatprep.mubr.bf16.mxu1 %v6167_v61  ;;  %v19463_v17 = vrot.slane %v16280_v10, 3  ;;  %v6178_v8 = vshrl.u32 %v16389_v41, 16  ;;  %v5443_v60 = vsel %vm14309_vm5, %v18733_v50, 0.0  ;;  %v16432_v39 = vadd.f32 %v5309_v14, %v16093_v5  ;;  %v11547_v61 = vld [vmem:[%s18463_s5 + $0x2c4] ss:$8 sps:$4 sm:$0xff]   ;;  %6846 = vmatprep.subr.bf16.mxu0 %v11541_v18 }
 0x3c0   : > { %v18737_v38 = vmax.f32 %v16405_v26, 0.0  ;;  %6511 = vmatmul.mubr.bf16.gmra.mxu1 %v6158_v24  ;;  %v6181_v10 = vshll.u32 %v16389_v41, 16  ;;  %5483 = vst [vmem:[#allocation2 + $0x130] sm:$0xff] %v5443_v60  ;;  %v19464_v30 = vrot.slane %v16297_v6, 3  ;;  %v6172_v5 = vshll.u32 %v16372_v29, 16 }
 0x3c1   : > { %v5649_v51 = vsel %vm19458_vm10, %v19463_v17, %v18735_v9  ;;  %v5311_v17 = vpop.f32.mrf.mxu1  ;;  %v6180_v27 = vrot.slane %v6178_v8, 3  ;;  %v6171_v9 = vrot.slane %v6169_v62, 3  ;;  %7461 = vmatpush2.bf16.msra.mxu1 %v11542_v15  ;;  %v18739_v59 = vmax.f32 %v16432_v39, 0.0  ;;  %v11556_v62 = vld [vmem:[%s18463_s5 + $0x3d4] ss:$8 sps:$4 sm:$0xff]   ;;  %6847 = vmatpush2.bf16.msra.mxu0 %v11539_v12  ;;  %vm19468_vm10 = vmmov %vm19462_vm0 }
 0x3c2   : > { %v5651_v50 = vsel %vm19465_vm15, %v19464_v30, %v5650_v49  ;;  %v5444_v24 = vsel %vm14359_vm3, %v18737_v38, 0.0  ;;  %v16453_v6 = vadd.f32 %v5311_v17, %v16100_v57  ;;  %v6183_v30 = vrot.slane %v6181_v10, 4  ;;  %7462 = vmatprep.subr.bf16.mxu1 %v11550_v58  ;;  %6848 = vmatprep.subr.bf16.mxu0 %v11547_v61 }
 0x3c3   : > { %5930 = vmatprep.mubr.bf16.mxu0 %v5651_v50  ;;  %v16459_v18 = vadd.f32 %v4869_v33, %v15793_v23  ;;  %v16463_v15 = vadd.f32 %v15834_v25, %v15821_v55  ;;  %5484 = vst [vmem:[#allocation2 + $0x50] sm:$0xff] %v5444_v24  ;;  %v5313_v8 = vpop.f32.mrf.mxu1  ;;  %v6174_v38 = vrot.slane %v6172_v5, 4  ;;  %v16465_v57 = vpack.c.bf16 %v5444_v24, %v5442_v37  ;;  %v4871_v50 = vpop.f32.mrf.mxu0  ;;  %v11545_v55 = vld [vmem:[%s18463_s5 + $0x2c0] ss:$8 sps:$4 sm:$0xff]  }
 0x3c4   : > { %5931 = vmatmul.mubr.bf16.gmra.mxu0 %v5649_v51  ;;  %v5445_v58 = vsel %vm14359_vm3, %v18739_v59, 0.0  ;;  %v18738_v10 = vmax.f32 %v16453_v6, 0.0  ;;  %v16473_v23 = vadd.f32 %v5313_v8, %v16182_v52  ;;  %v16475_v33 = vor.u32 %v6183_v30, %v6180_v27  ;;  %v11553_v27 = vld [vmem:[%s18463_s5 + $0x2b4] ss:$8 sps:$4 sm:$0xff]   ;;  %v11554_v52 = vld [vmem:[%s18463_s5 + $0x3d0] ss:$8 sps:$4 sm:$0xff]  }
 0x3c5   : > { %5485 = vst [vmem:[#allocation2 + $0xb8] sm:$0xff] %v5445_v58  ;;  %v5317_v25 = vpop.f32.mrf.mxu1  ;;  %v16480_v37 = vor.u32 %v6174_v38, %v6171_v9  ;;  %v16482_v51 = vpack.c.bf16 %v5445_v58, %v5443_v60  ;;  %v18741_v17 = vrot.slane %v16465_v57, 3  ;;  %v6187_v5 = vshrl.u32 %v16465_v57, 16  ;;  %7463 = vmatpush2.bf16.msra.mxu1 %v11548_v34  ;;  %v11559_v34 = vld [vmem:[%s18463_s5 + $0x3c4] ss:$8 sps:$4 sm:$0xff]   ;;  %6849 = vmatpush2.bf16.msra.mxu0 %v11545_v55 }
 0x3c6   : > { %v5446_v12 = vsel %vm14419_vm13, %v18738_v10, 0.0  ;;  %v18740_v60 = vmax.f32 %v16473_v23, 0.0  ;;  %v16498_v38 = vadd.f32 %v5317_v25, %v16185_v20  ;;  %v6185_v61 = vsel %vm19462_vm0, %v16382_v54, %v16475_v33  ;;  %7464 = vmatprep.subr.bf16.mxu1 %v11556_v62  ;;  %v11551_v58 = vld [vmem:[%s18463_s5 + $0x2b0] ss:$8 sps:$4 sm:$0xff]   ;;  %v4873_v25 = vpop.f32.mrf.mxu0  ;;  %vm19470_vm0 = vmmov %vm19465_vm15  ;;  %6850 = vmatprep.subr.bf16.mxu0 %v11553_v27  ;;  %v11562_v55 = vld [vmem:[%s18463_s5 + $0x2a4] ss:$8 sps:$4 sm:$0xff]  }
 0x3c7   : > { %5486 = vst [vmem:[#allocation2 + $0xe0] sm:$0xff] %v5446_v12  ;;  %v5319_v24 = vpop.f32.mrf.mxu1  ;;  %6520 = vmatprep.mubr.bf16.mxu1 %v6185_v61  ;;  %v6176_v30 = vsel %vm19468_vm10, %v16387_v22, %v16480_v37  ;;  %v18744_v8 = vrot.slane %v16482_v51, 3  ;;  %v19469_v20 = vrot.slane %v16372_v29, 3  ;;  %v6196_v62 = vshrl.u32 %v16482_v51, 16 }
 0x3c8   : > { %v5447_v22 = vsel %vm14419_vm13, %v18740_v60, 0.0  ;;  %v16525_v10 = vadd.f32 %v5319_v24, %v16278_v48  ;;  %6521 = vmatmul.mubr.bf16.gmra.mxu1 %v6176_v30  ;;  %v6199_v29 = vshll.u32 %v16482_v51, 16  ;;  %v6189_v61 = vrot.slane %v6187_v5, 3  ;;  %v11565_v5 = vld [vmem:[%s18463_s5 + $0x3b4] ss:$8 sps:$4 sm:$0xff]  }
 0x3c9   : > { %v5653_v54 = vsel %vm19465_vm15, %v19469_v20, %v18741_v17  ;;  %v11557_v20 = vld [vmem:[%s18463_s5 + $0x3c0] ss:$8 sps:$4 sm:$0xff]   ;;  %5487 = vst [vmem:[#allocation2 + $0xa0] sm:$0xff] %v5447_v22  ;;  %v5321_v59 = vpop.f32.mrf.mxu1  ;;  %v5655_v60 = vsel %vm19470_vm0, %v5650_v49, %v18744_v8  ;;  %v6198_v17 = vrot.slane %v6196_v62, 3  ;;  %v6190_v48 = vshll.u32 %v16465_v57, 16  ;;  %7465 = vmatpush2.bf16.msra.mxu1 %v11554_v52  ;;  %6851 = vmatpush2.bf16.msra.mxu0 %v11551_v58  ;;  %vm19475_vm15 = vmmov %vm19468_vm10 }
 0x3ca   : > { %v19471_v24 = vmax.f32 %v16498_v38, 0.0  ;;  %v18746_v14 = vmax.f32 %v16525_v10, 0.0  ;;  %v16546_v41 = vadd.f32 %v5321_v59, %v16367_v11  ;;  %5940 = vmatprep.mubr.bf16.mxu0 %v5655_v60  ;;  %v6201_v49 = vrot.slane %v6199_v29, 4  ;;  %7466 = vmatprep.subr.bf16.mxu1 %v11559_v34  ;;  %v16710_v58 = vld [vmem:[#allocation2 + $0x120] sm:$0xff] }
 0x3cb   : > { %v4915_v27 = vadd.f32 %v4871_v50, %v15809_v45  ;;  %v4916_v52 = vadd.f32 %v4873_v25, %v15825_v44  ;;  %v5323_v62 = vpop.f32.mrf.mxu1  ;;  %v11560_v45 = vld [vmem:[%s18463_s5 + $0x2a0] ss:$8 sps:$4 sm:$0xff]   ;;  %v4875_v44 = vpop.f32.mrf.mxu0  ;;  %6852 = vmatprep.subr.bf16.mxu0 %v11562_v55  ;;  %19490 = vst [vmem:[#allocation78_spill] sm:$0xff] %v16710_v58 }
 0x3cc   : > { %v5448_v9 = vsel %vm14469_vm2, %v19471_v24, 0.0  ;;  %5941 = vmatmul.mubr.bf16.gmra.mxu0 %v5653_v54  ;;  %v6192_v24 = vrot.slane %v6190_v48, 4  ;;  %v5449_v11 = vsel %vm14469_vm2, %v18746_v14, 0.0  ;;  %v18745_v59 = vmax.f32 %v16546_v41, 0.0  ;;  %v11571_v48 = vld [vmem:[%s18463_s5 + $0x3a4] ss:$8 sps:$4 sm:$0xff]  }
 0x3cd   : > { %5488 = vst [vmem:[#allocation2 + $0x88] sm:$0xff] %v5448_v9  ;;  %v16553_v8 = vpack.c.bf16 %v5448_v9, %v5446_v12  ;;  %v16561_v60 = vadd.f32 %v5323_v62, %v16370_v42  ;;  %v16563_v34 = vor.u32 %v6201_v49, %v6198_v17  ;;  %5489 = vst [vmem:[#allocation2 + $0x60] sm:$0xff] %v5449_v11  ;;  %v5327_v50 = vpop.f32.mrf.mxu1  ;;  %7467 = vmatpush2.bf16.msra.mxu1 %v11557_v20  ;;  %v11563_v42 = vld [vmem:[%s18463_s5 + $0x3b0] ss:$8 sps:$4 sm:$0xff]   ;;  %v11568_v17 = vld [vmem:[%s18463_s5 + $0x294] ss:$8 sps:$4 sm:$0xff]  }
 0x3ce   : > { %v16568_v9 = vor.u32 %v6192_v24, %v6189_v61  ;;  %v16570_v12 = vpack.c.bf16 %v5449_v11, %v5447_v22  ;;  %v5450_v22 = vsel %vm14530_vm11, %v18745_v59, 0.0  ;;  %v16586_v29 = vadd.f32 %v5327_v50, %v16459_v18  ;;  %7468 = vmatprep.subr.bf16.mxu1 %v11565_v5  ;;  %6853 = vmatpush2.bf16.msra.mxu0 %v11560_v45  ;;  %v11574_v45 = vld [vmem:[%s18463_s5 + $0x284] ss:$8 sps:$4 sm:$0xff]  }
 0x3cf   : > { %v18747_v54 = vrot.slane %v16553_v8, 3  ;;  %v6205_v25 = vshrl.u32 %v16553_v8, 16  ;;  %v18751_v61 = vmax.f32 %v16561_v60, 0.0  ;;  %v6203_v20 = vsel %vm19468_vm10, %v16475_v33, %v16563_v34  ;;  %5490 = vst [vmem:[#allocation2 + $0x58] sm:$0xff] %v5450_v22  ;;  %v5329_v55 = vpop.f32.mrf.mxu1  ;;  %vm19478_vm10 = vmmov %vm19470_vm0  ;;  %6854 = vmatprep.subr.bf16.mxu0 %v11568_v17 }
 0x3d0   : > { %19474 = vst [vmem:[#allocation42_spill] sm:$0xff] %v16586_v29  ;;  %6530 = vmatprep.mubr.bf16.mxu1 %v6203_v20  ;;  %v6194_v49 = vsel %vm19475_vm15, %v16480_v37, %v16568_v9  ;;  %v18752_v62 = vrot.slane %v16570_v12, 3  ;;  %v19476_v18 = vrot.slane %v16465_v57, 3  ;;  %v6214_v5 = vshrl.u32 %v16570_v12, 16  ;;  %v11566_v37 = vld [vmem:[%s18463_s5 + $0x290] ss:$8 sps:$4 sm:$0xff]  }
 0x3d1   : > { %v4917_v24 = vadd.f32 %v4875_v44, %v16463_v15  ;;  %v18748_v11 = vmax.f32 %v16586_v29, 0.0  ;;  %v16606_v50 = vadd.f32 %v5329_v55, %v4915_v27  ;;  %6531 = vmatmul.mubr.bf16.gmra.mxu1 %v6194_v49  ;;  %v6217_v20 = vshll.u32 %v16570_v12, 16  ;;  %v11569_v57 = vld [vmem:[%s18463_s5 + $0x3a0] ss:$8 sps:$4 sm:$0xff]  }
 0x3d2   : > { %v5657_v33 = vsel %vm19470_vm0, %v19476_v18, %v18747_v54  ;;  %v5331_v18 = vpop.f32.mrf.mxu1  ;;  %v19477_v15 = vrot.slane %v16482_v51, 3  ;;  %v6216_v44 = vrot.slane %v6214_v5, 3  ;;  %v6207_v55 = vrot.slane %v6205_v25, 3  ;;  %7469 = vmatpush2.bf16.msra.mxu1 %v11563_v42  ;;  %v11577_v25 = vld [vmem:[%s18463_s5 + $0x394] ss:$8 sps:$4 sm:$0xff]   ;;  %6855 = vmatpush2.bf16.msra.mxu0 %v11566_v37  ;;  %vm19483_vm0 = vmmov %vm19475_vm15 }
 0x3d3   : > { %v6208_v49 = vshll.u32 %v16553_v8, 16  ;;  %v5452_v14 = vsel %vm14580_vm1, %v18748_v11, 0.0  ;;  %v18750_v54 = vmax.f32 %v16606_v50, 0.0  ;;  %v16629_v51 = vadd.f32 %v5331_v18, %v4916_v52  ;;  %7470 = vmatprep.subr.bf16.mxu1 %v11571_v48  ;;  %6856 = vmatprep.subr.bf16.mxu0 %v11574_v45  ;;  %v11583_v37 = vld [vmem:[%s18463_s5 + $0x474] ss:$8 sps:$4 sm:$0xff]  }
 0x3d4   : > { %v5659_v27 = vsel %vm19478_vm10, %v19477_v15, %v18752_v62  ;;  %v6219_v5 = vrot.slane %v6217_v20, 4  ;;  %v16638_v42 = vsel %vm14530_vm11, %v18751_v61, 0.0  ;;  %5492 = vst [vmem:[#allocation2 + $0x28] sm:$0xff] %v5452_v14  ;;  %v5333_v17 = vpop.f32.mrf.mxu1  ;;  %v16640_v11 = vpack.c.bf16 %v5452_v14, %v5450_v22 }
 0x3d5   : > { %19480 = vst [vmem:[#allocation38_spill] sm:$0xff] %v16629_v51  ;;  %5950 = vmatprep.mubr.bf16.mxu0 %v5659_v27  ;;  %v6210_v15 = vrot.slane %v6208_v49, 4  ;;  %v16646_v52 = vsel %vm14580_vm1, %v18750_v54, 0.0  ;;  %v18749_v48 = vmax.f32 %v16629_v51, 0.0  ;;  %v16649_v20 = vadd.f32 %v5333_v17, %v4917_v24  ;;  %v11572_v27 = vld [vmem:[%s18463_s5 + $0x280] ss:$8 sps:$4 sm:$0xff]  }
 0x3d6   : > { %5951 = vmatmul.mubr.bf16.gmra.mxu0 %v5657_v33  ;;  %v6220_v18 = vor.u32 %v6219_v5, %v6216_v44  ;;  %v16656_v14 = vpack.c.bf16 %v16646_v52, %v16638_v42  ;;  %v18753_v22 = vrot.slane %v16640_v11, 3  ;;  %v6223_v49 = vshrl.u32 %v16640_v11, 16  ;;  %7471 = vmatpush2.bf16.msra.mxu1 %v11569_v57  ;;  %v11575_v24 = vld [vmem:[%s18463_s5 + $0x390] ss:$8 sps:$4 sm:$0xff]   ;;  %v11580_v17 = vld [vmem:[%s18463_s5 + $0x384] ss:$8 sps:$4 sm:$0xff]  }
 0x3d7   : > { %19481 = vst [vmem:[#allocation44_spill] sm:$0xff] %v16649_v20  ;;  %v6211_v33 = vor.u32 %v6210_v15, %v6207_v55  ;;  %v16670_v55 = vsel %vm14723_vm7, %v18749_v48, 0.0  ;;  %v18755_v5 = vmax.f32 %v16649_v20, 0.0  ;;  %v6226_v45 = vshll.u32 %v16640_v11, 16  ;;  %7472 = vmatprep.subr.bf16.mxu1 %v11577_v25  ;;  %6857 = vmatpush2.bf16.msra.mxu0 %v11572_v27  ;;  %v11578_v44 = vld [vmem:[%s18463_s5 + $0x380] ss:$8 sps:$4 sm:$0xff]  }
 0x3d8   : > { %v6221_v57 = vsel %vm19475_vm15, %v16563_v34, %v6220_v18  ;;  %5494 = vst [vmem:[#allocation2 + $0x68] sm:$0xff] %v16670_v55  ;;  %v5662_v48 = vrot.slane %v16656_v14, 3  ;;  %v19484_v54 = vrot.slane %v16553_v8, 3  ;;  %v6232_v25 = vshrl.u32 %v16656_v14, 16  ;;  %vm19486_vm15 = vmmov %vm19478_vm10  ;;  %7902 = vmatprep.subr.bf16.mxu0 %v11583_v37  ;;  %v7004_v37 = vld [vmem:[#allocation2 + $0x100] sm:$0xff] }
 0x3d9   : > { %6540 = vmatprep.mubr.bf16.mxu1 %v6221_v57  ;;  %v6212_v15 = vsel %vm19483_vm0, %v16568_v9, %v6211_v33  ;;  %v16693_v61 = vsel %vm14723_vm7, %v18755_v5, 0.0  ;;  %v6235_v57 = vshll.u32 %v16656_v14, 16  ;;  %v6225_v9 = vrot.slane %v6223_v49, 3  ;;  %v16703_v14 = vld [vmem:[#allocation2 + $0x38] sm:$0xff] }
 0x3da   : > { %v5661_v34 = vsel %vm19478_vm10, %v19484_v54, %v18753_v22  ;;  %6541 = vmatmul.mubr.bf16.gmra.mxu1 %v6212_v15  ;;  %v6228_v62 = vrot.slane %v6226_v45, 4  ;;  %5495 = vst [vmem:[#allocation2 + $0x140] sm:$0xff] %v16693_v61  ;;  %v19485_v8 = vrot.slane %v16570_v12, 3  ;;  %v6234_v22 = vrot.slane %v6232_v25, 3  ;;  %19487 = vst [vmem:[#allocation58_spill] sm:$0xff] %v16703_v14  ;;  %v7006_v45 = vld [vmem:[#allocation2 + $0x108] sm:$0xff] }
 0x3db   : > { %7473 = vmatpush2.bf16.msra.mxu1 %v11575_v24  ;;  %v6237_v15 = vrot.slane %v6235_v57, 4  ;;  %v7000_v12 = vld [vmem:[#allocation2 + $0x48] sm:$0xfe]  ;;  %vm19488_vm10 = vmmov %vm19483_vm0  ;;  %vm19499_vm7 = vsmask.f32 7424 }
 0x3dc   : > { %v5663_v54 = vsel %vm19486_vm15, %v19485_v8, %v5662_v48  ;;  %v6229_v5 = vor.u32 %v6228_v62, %v6225_v9  ;;  %7474 = vmatprep.subr.bf16.mxu1 %v11580_v17  ;;  %v7042_v25 = vpack.c.bf16 %v16703_v14, %v7000_v12  ;;  %v16708_v9 = vpack.c.bf16 %v7006_v45, %v7004_v37  ;;  %v7010_v37 = vld [vmem:[#allocation2 + $0xc8] sm:$0xff]  ;;  %v7003_v14 = vld [vmem:[#allocation2 + $0xf8] sm:$0xff] }
 0x3dd   : > { %5960 = vmatprep.mubr.bf16.mxu0 %v5663_v54  ;;  %v6238_v27 = vor.u32 %v6237_v15, %v6234_v22 }
 0x3de   : > { %5961 = vmatmul.mubr.bf16.gmra.mxu0 %v5661_v34  ;;  %v6230_v49 = vsel %vm19483_vm0, %v6211_v33, %v6229_v5  ;;  %19489 = vst [vmem:[#allocation56_spill] sm:$0xff] %v16708_v9  ;;  %v7111_v15 = vshll.u32 %v7042_v25, 16  ;;  %vm19492_vm0 = vmmov %vm19486_vm15 }
 0x3df   : > { %7475 = vmatpush2.bf16.msra.mxu1 %v11578_v44  ;;  %v6239_v24 = vsel %vm19488_vm10, %v6220_v18, %v6238_v27  ;;  %v5548_v8 = vld [vmem:[#allocation2 + $0x68] sm:$0x3f]  ;;  %v6999_v18 = vld [vmem:[#allocation2 + $0x10] sm:$0xfe] }
 0x3e0   : > { %v6023_v59 = vld [vmem:[#allocation2 + $0x68] sm:$0x7f]  ;;  %6550 = vmatprep.mubr.bf16.mxu1 %v6239_v24  ;;  %v5570_v57 = vpack.c.bf16 %v5548_v8, %v5548_v8  ;;  %v7116_v24 = vshll.u32 %v16708_v9, 16  ;;  %v7113_v29 = vrot.slane %v7111_v15, 1 }
 0x3e1   : > { %v6027_v62 = vpack.c.bf16 %v6023_v59, %v6023_v59  ;;  %v5549_v17 = vld [vmem:[#allocation2 + $0x140] sm:$0x3f] }
 0x3e2   : > { %6551 = vmatmul.mubr.bf16.gmra.mxu1 %v6230_v49  ;;  %v6024_v22 = vld [vmem:[#allocation2 + $0x140] sm:$0x7f]  ;;  %v5571_v34 = vpack.c.bf16 %v5549_v17, %v5549_v17  ;;  %v5664_v44 = vrot.slane %v5570_v57, 3  ;;  %v7041_v49 = vpack.c.bf16 %v16710_v58, %v6999_v18  ;;  %v19491_v57 = vrot.slane %v16640_v11, 3 }
 0x3e3   : > { %v6028_v33 = vpack.c.bf16 %v6024_v22, %v6024_v22  ;;  %v6241_v54 = vshrl.u32 %v6027_v62, 16  ;;  %v6244_v12 = vshll.u32 %v6027_v62, 16  ;;  %v7005_v59 = vld [vmem:[#allocation2 + $0x80] sm:$0xff]  ;;  %v7118_v18 = vrot.slane %v7116_v24, 1 }
 0x3e4   : > { %v5666_v30 = vrot.slane %v5571_v34, 3  ;;  %v5665_v62 = vsel %vm19492_vm0, %v19491_v57, %v5664_v44  ;;  %v16718_v20 = vpack.c.bf16 %v7005_v59, %v7003_v14  ;;  %v7099_v11 = vshll.u32 %v7041_v49, 16  ;;  %v7009_v44 = vld [vmem:[#allocation2 + $0x18] sm:$0xff] }
 0x3e5   : > { %v6250_v0 = vshrl.u32 %v6028_v33, 16  ;;  %v6253_v21 = vshll.u32 %v6028_v33, 16  ;;  %v6243_v45 = vrot.slane %v6241_v54, 3  ;;  %v6246_v8 = vrot.slane %v6244_v12, 4  ;;  %v7008_v54 = vld [vmem:[#allocation2 + $0xf0] sm:$0xff] }
 0x3e6   : > { %v5667_v17 = vsel %vm19486_vm15, %v5662_v48, %v5666_v30  ;;  %v7109_v33 = vshrl.u32 %v7042_v25, 16  ;;  %v16720_v58 = vpack.c.bf16 %v7010_v37, %v7008_v54  ;;  %v19495_v48 = vld [vmem:[#allocation93_spill] sm:$0xff]  ;;  %vm19497_vm15 = vsmask.f32 4352 }
 0x3e7   : > { %v6252_v22 = vrot.slane %v6250_v0, 3  ;;  %v6255_v51 = vrot.slane %v6253_v21, 4  ;;  %5970 = vmatprep.mubr.bf16.mxu0 %v5667_v17  ;;  %v6247_v34 = vor.u32 %v6246_v8, %v6243_v45  ;;  %v19493_v0 = vmax.f32 %v15890_v63, 0.0  ;;  %vm19498_vm0 = vmmov %vm19497_vm15  ;;  %v7007_v45 = vld [vmem:[#allocation2 + $0x138] sm:$0xff]  ;;  %v7012_v17 = vld [vmem:[#allocation2 + $0x20] sm:$0xff] }
 0x3e8   : > { %5971 = vmatmul.mubr.bf16.gmra.mxu0 %v5665_v62  ;;  %v19494_v21 = vmax.f32 %v15934_v46, 0.0  ;;  %vm19496_vm10 = vnez %v19495_v48  ;;  %v7114_v25 = vor.u32 %v7113_v29, %v7109_v33  ;;  %v7132_v63 = vshll.u32 %v16720_v58, 16  ;;  %v11581_v46 = vld [vmem:[%s18463_s5 + $0x470] ss:$8 sps:$4 sm:$0xff]   ;;  %v11586_v29 = vld [vmem:[%s18463_s5 + $0x464] ss:$8 sps:$4 sm:$0xff]  }
 0x3e9   : > { %v6256_v12 = vor.u32 %v6255_v51, %v6252_v22  ;;  %v6248_v14 = vsel %vm19498_vm0, %v6229_v5, %v6247_v34  ;;  %v7104_v51 = vshll.u32 %v16718_v20, 16  ;;  %v7101_v59 = vrot.slane %v7099_v11, 1  ;;  %v7028_v48 = vld [vmem:[#allocation2 + $0xb8] sm:$0xff] }
 0x3ea   : > { %v11838_v30 = vpack.c.bf16 %v19494_v21, %v19493_v0  ;;  %v7119_v24 = vsel %vm19499_vm7, %v7114_v25, %v7118_v18  ;;  %v16739_v5 = vpack.c.bf16 %v7009_v44, %v7007_v45  ;;  %v7097_v8 = vshrl.u32 %v7041_v49, 16  ;;  %v7018_v0 = vld [vmem:[#allocation2 + $0x158] sm:$0xff]  ;;  %v19504_v49 = vld [vmem:[#allocation30_spill] sm:$0xff] }
 0x3eb   : > { %v6257_v15 = vsel %vm19497_vm15, %v6238_v27, %v6256_v12  ;;  %v7014_v27 = vld [vmem:[#allocation2 + $0x110] sm:$0xff]  ;;  %v7106_v37 = vrot.slane %v7104_v51, 1  ;;  %v19500_v22 = vmax.f32 %v15867_v56, 0.0  ;;  %v19501_v57 = vmax.f32 %v15913_v32, 0.0  ;;  %v7013_v12 = vld [vmem:[#allocation2 + $0x128] sm:$0xff]  ;;  %v19502_v21 = vld [vmem:[#allocation39_spill] sm:$0xff] }
 0x3ec   : > { %11839 = vmatprep.mubr.msk.bf16.mxu0 %vm19496_vm10, %v11838_v30  ;;  %6560 = vmatprep.mubr.bf16.mxu1 %v6257_v15  ;;  %v7128_v34 = vshrl.u32 %v16708_v9, 16  ;;  %v7134_v33 = vrot.slane %v7132_v63, 1  ;;  %v16748_v54 = vpack.c.bf16 %v7014_v27, %v7012_v17  ;;  %v19503_v30 = vmax.f32 %v19502_v21, 0.0  ;;  %v19506_v25 = vld [vmem:[#allocation90_spill] sm:$0xff]  ;;  %v11584_v32 = vld [vmem:[%s18463_s5 + $0x460] ss:$8 sps:$4 sm:$0xff]  }
 0x3ed   : > { %6561 = vmatmul.mubr.bf16.gmra.mxu1 %v6248_v14  ;;  %v11841_v62 = vpack.c.bf16 %v19501_v57, %v19500_v22  ;;  %v19505_v11 = vmax.f32 %v19504_v49, 0.0  ;;  %vm19507_vm7 = vnez %v19506_v25  ;;  %v7102_v56 = vor.u32 %v7101_v59, %v7097_v8  ;;  %v7032_v14 = vld [vmem:[#allocation2 + $0x60] sm:$0xff]  ;;  %v11589_v44 = vld [vmem:[%s18463_s5 + $0x454] ss:$8 sps:$4 sm:$0xff]   ;;  %v11587_v22 = vld [vmem:[%s18463_s5 + $0x450] ss:$8 sps:$4 sm:$0xff]  }
 0x3ee   : > { %7476 = vmatprep.mubr.bf16.mxu1 %v7119_v24  ;;  %v7130_v51 = vor.u32 %v7128_v34, %v7118_v18  ;;  %v7124_v24 = vshll.u32 %v16739_v5, 16  ;;  %v7011_v63 = vld [vmem:[#allocation2 + $0x70] sm:$0xff]  ;;  %v7016_v45 = vld [vmem:[#allocation2 + $0x98] sm:$0xff]  ;;  %vm19508_vm15 = vsmask.f32 7424  ;;  %v7120_v18 = vshrl.u32 %v16718_v20, 16 }
 0x3ef   : > { %v11844_v15 = vpack.c.bf16 %v19505_v11, %v19503_v30  ;;  %v7107_v27 = vsel %vm19508_vm15, %v7102_v56, %v7106_v37  ;;  %v16764_v17 = vpack.c.bf16 %v7013_v12, %v7011_v63  ;;  %vm19509_vm0 = vmmov %vm19508_vm15  ;;  %v16772_v8 = vpack.c.bf16 %v16638_v42, %v7032_v14  ;;  %v7017_v57 = vld [vmem:[#allocation2 + $0xa8] sm:$0xff]  ;;  %v11781_v34 = vld [vmem:[#allocation2 + $0x80] sm:$0xff] }
 0x3f0   : > { %11842 = vmatmul.mubr.msk.bf16.vlgmr.msra.gmra.mxu0 %vm19496_vm10, %v11841_v62  ;;  %v7135_v59 = vsel %vm19509_vm0, %v7130_v51, %v7134_v33  ;;  %v11780_v62 = vld [vmem:[#allocation2 + $0xf8] sm:$0xff]  ;;  %v7126_v21 = vrot.slane %v7124_v24, 1  ;;  %v11592_v30 = vld [vmem:[%s18463_s5 + $0x444] ss:$8 sps:$4 sm:$0xff]   ;;  %v7144_v49 = vshrl.u32 %v16720_v58, 16  ;;  %v19511_v24 = vmax.f32 %v16025_v13, 0.0  ;;  %vm19514_vm1 = vmmov %vm19509_vm0 }
 0x3f1   : > { %11845 = vmatprep.mubr.msk.bf16.mxu0 %vm19507_vm7, %v11844_v15  ;;  %7903 = vmatpush1.bf16.msra.mxu0 %v11581_v46  ;;  %v16766_v46 = vpack.c.bf16 %v7018_v0, %v7016_v45  ;;  %v6615_v12 = vpack.c.bf16 %v11781_v34, %v11780_v62  ;;  %v7122_v0 = vor.u32 %v7120_v18, %v7106_v37  ;;  %v7228_v42 = vshll.u32 %v16772_v8, 16  ;;  %v7015_v56 = vld [vmem:[#allocation2 + $0x8] sm:$0xff]  ;;  %v19512_v45 = vld [vmem:[#allocation84_spill] sm:$0xff]  ;;  %v11595_v13 = vld [vmem:[%s18463_s5 + $0x434] ss:$8 sps:$4 sm:$0xff]  }
 0x3f2   : > { %7904 = vmatprep.subr.bf16.mxu0 %v11586_v29  ;;  %v7148_v29 = vshll.u32 %v16748_v54, 16  ;;  %v7140_v11 = vshll.u32 %v16764_v17, 16  ;;  %v16788_v14 = vpack.c.bf16 %v7017_v57, %v7015_v56  ;;  %vm19513_vm15 = vnez %v19512_v45  ;;  %v7020_v34 = vld [vmem:[#allocation2 + $0xe8] sm:$0xff]  ;;  %v7021_v56 = vld [vmem:[#allocation2 + $0x150] sm:$0xff] }
 0x3f3   : > { %v7164_v15 = vshll.u32 %v16766_v46, 16  ;;  %v16790_v51 = vrot.slane %v7228_v42, 1  ;;  %v7127_v18 = vsel %vm19509_vm0, %v7122_v0, %v7126_v21  ;;  %v19517_v45 = vmax.f32 %v16107_v40, 0.0 }
 0x3f4   : > { %v7150_v37 = vrot.slane %v7148_v29, 1  ;;  %v7146_v29 = vor.u32 %v7144_v49, %v7134_v33  ;;  %v16809_v57 = vrot.slane %v7140_v11, 1  ;;  %v7156_v0 = vshll.u32 %v16788_v14, 16  ;;  %v11593_v11 = vld [vmem:[%s18463_s5 + $0x430] ss:$8 sps:$4 sm:$0xff]  }
 0x3f5   : > { %7477 = vmatmul.mubr.bf16.vlgmr.msra.gmra.mxu1 %v7107_v27  ;;  %7905 = vmatpush1.bf16.msra.mxu0 %v11584_v32  ;;  %v16786_v32 = vpack.c.bf16 %v16693_v61, %v16646_v52  ;;  %v11590_v61 = vld [vmem:[%s18463_s5 + $0x440] ss:$8 sps:$4 sm:$0xff]   ;;  %v7022_v52 = vld [vmem:[#allocation2 + $0x78] sm:$0xff]  ;;  %v7240_v27 = vshrl.u32 %v16772_v8, 16  ;;  %v16811_v62 = vrot.slane %v7164_v15, 1  ;;  %v18778_v9 = vrot.slane %v16718_v20, 1 }
 0x3f6   : > { %7486 = vmatprep.mubr.bf16.mxu1 %v7135_v59  ;;  %7906 = vmatprep.subr.bf16.mxu0 %v11589_v44  ;;  %v19510_v44 = vmax.f32 %v15996_v47, 0.0  ;;  %v7136_v47 = vshrl.u32 %v16739_v5, 16  ;;  %v7151_v33 = vsel %vm19509_vm0, %v7146_v29, %v7150_v37 }
 0x3f7   : > { %v7244_v59 = vshll.u32 %v16786_v32, 16 }
 0x3f8   : > { %6869 = vmatmul.mubr.bf16.gmra.mxu0 %v6615_v12  ;;  %v11847_v63 = vpack.c.bf16 %v19511_v24, %v19510_v44  ;;  %v7242_v12 = vor.u32 %v7240_v27, %v16790_v51  ;;  %v7138_v49 = vor.u32 %v7136_v47, %v7126_v21  ;;  %v7026_v44 = vld [vmem:[#allocation2 + $0x130] sm:$0xff]  ;;  %v11783_v27 = vld [vmem:[#allocation2 + $0x18] sm:$0xff] }
 0x3f9   : > { %7907 = vmatpush1.bf16.msra.mxu0 %v11587_v22  ;;  %v7160_v22 = vshrl.u32 %v16748_v54, 16  ;;  %v16814_v42 = vrot.slane %v7244_v59, 1 }
 0x3fa   : > { %11848 = vmatprep.mubr.msk.bf16.mxu0 %vm19513_vm15, %v11847_v63  ;;  %7908 = vmatprep.subr.bf16.mxu0 %v11592_v30  ;;  %v16818_v30 = vpack.c.bf16 %v7022_v52, %v7020_v34  ;;  %v11782_v63 = vld [vmem:[#allocation2 + $0x138] sm:$0xff]  ;;  %v16827_v52 = vld [vmem:[#allocation2 + $0x70] sm:$0xff]  ;;  %v7143_v29 = vsel %vm19509_vm0, %v7138_v49, %v16809_v57  ;;  %v7024_v34 = vld [vmem:[#allocation2] sm:$0xff] }
 0x3fb   : > { %v7162_v15 = vor.u32 %v7160_v22, %v7150_v37  ;;  %v16825_v24 = vsel %vm19514_vm1, %v7242_v12, %v16814_v42  ;;  %v6617_v59 = vpack.c.bf16 %v11783_v27, %v11782_v63  ;;  %v11598_v37 = vld [vmem:[%s18463_s5 + $0x424] ss:$8 sps:$4 sm:$0xff]   ;;  %vm19515_vm1 = vmmov %vm19509_vm0  ;;  %v7025_v12 = vld [vmem:[#allocation2 + $0x118] sm:$0xff]  ;;  %v16845_v27 = vrot.slane %v7156_v0, 1 }
 0x3fc   : > { %v11596_v63 = vld [vmem:[%s18463_s5 + $0x420] ss:$8 sps:$4 sm:$0xff]   ;;  %v19516_v22 = vmax.f32 %v16069_v35, 0.0  ;;  %v7033_v0 = vld [vmem:[#allocation2 + $0x58] sm:$0xff] }
 0x3fd   : > { %7487 = vmatmul.mubr.bf16.gmra.mxu1 %v7127_v18  ;;  %7909 = vmatpush1.bf16.msra.mxu0 %v11590_v61  ;;  %v16829_v18 = vld [vmem:[#allocation2 + $0x128] sm:$0xff]  ;;  %v7019_v61 = vld [vmem:[#allocation2 + $0xd8] sm:$0xff]  ;;  %v7167_v47 = vsel %vm19515_vm1, %v7162_v15, %v16811_v62  ;;  %v7023_v15 = vld [vmem:[#allocation2 + $0x90] sm:$0xff]  ;;  %vm19520_vm1 = vcmask 1046528  }
 0x3fe   : > { %7496 = vmatprep.mubr.bf16.mxu1 %v7151_v33  ;;  %7910 = vmatprep.subr.bf16.mxu0 %v11595_v13  ;;  %v6619_v21 = vpack.c.bf16 %v16829_v18, %v16827_v52  ;;  %v7030_v33 = vld [vmem:[#allocation2 + $0xa0] sm:$0xff]  ;;  %v7180_v52 = vshll.u32 %v16818_v30, 16  ;;  %v16848_v49 = vpack.c.bf16 %v7021_v56, %v7019_v61  ;;  %v16850_v18 = vpack.c.bf16 %v7026_v44, %v7024_v34  ;;  %v11601_v35 = vld [vmem:[%s18463_s5 + $0x414] ss:$8 sps:$4 sm:$0xff]   ;;  %vm19522_vm11 = vmmov %vm19520_vm1 }
 0x3ff   : > { %v7029_v13 = vld [vmem:[#allocation2 + $0xe0] sm:$0xff]  ;;  %v11850_v25 = vpack.c.bf16 %v19517_v45, %v19516_v22  ;;  %v7686_v44 = vrot.slane %v16739_v5, 1  ;;  %v7692_v61 = vrot.slane %v16748_v54, 1  ;;  %v16865_v40 = vpack.c.bf16 %v7025_v12, %v7023_v15  ;;  %v7031_v5 = vld [vmem:[#allocation2 + $0x88] sm:$0xff]  ;;  %vm19523_vm2 = vmmov %vm19520_vm1 }
 0x400   : > { %6879 = vmatmul.mubr.bf16.gmra.mxu0 %v6617_v59  ;;  %v19518_v59 = vld [vmem:[#allocation95_spill] sm:$0xff]  ;;  %v16867_v45 = vpack.c.bf16 %v7030_v33, %v7028_v48  ;;  %v7690_v22 = vrot.slane %v16764_v17, 1  ;;  %v7696_v34 = vrot.slane %v16766_v46, 1  ;;  %v7694_v48 = vrot.slane %v16788_v14, 1  ;;  %vm19524_vm13 = vmmov %vm19520_vm1 }
 0x401   : > { %vm19519_vm0 = vnez %v19518_v59  ;;  %7911 = vmatpush1.bf16.msra.mxu0 %v11593_v11  ;;  %v7035_v11 = vld [vmem:[#allocation2 + $0x28] sm:$0xff]  ;;  %v16876_v54 = vsel %vm19520_vm1, %v18778_v9, %v7686_v44  ;;  %v16884_v33 = vpack.c.bf16 %v7033_v0, %v7031_v5  ;;  %v7698_v0 = vrot.slane %v16848_v49, 1  ;;  %vm19543_vm3 = vmmov %vm19520_vm1 }
 0x402   : > { %11851 = vmatprep.mubr.msk.bf16.mxu0 %vm19519_vm0, %v11850_v25  ;;  %7912 = vmatprep.subr.bf16.mxu0 %v11598_v37  ;;  %v7027_v25 = vld [vmem:[#allocation2 + $0x50] sm:$0xff]  ;;  %v19521_v37 = vrot.slane %v16720_v58, 1  ;;  %v16887_v15 = vsel %vm19523_vm2, %v7686_v44, %v7690_v22  ;;  %v16897_v9 = vpack.c.bf16 %v16670_v55, %v7035_v11  ;;  %v7704_v44 = vrot.slane %v16850_v18, 1  ;;  %vm19529_vm2 = vmmov %vm19520_vm1 }
 0x403   : > { %v16871_v56 = vpack.c.bf16 %v7029_v13, %v7027_v25  ;;  %v16890_v13 = vsel %vm19524_vm13, %v7692_v61, %v7696_v34  ;;  %v7700_v25 = vrot.slane %v16818_v30, 1  ;;  %vm19527_vm13 = vmmov %vm19520_vm1  ;;  %v7702_v5 = vrot.slane %v16865_v40, 1 }
 0x404   : > { %v16881_v12 = vsel %vm19522_vm11, %v19521_v37, %v7692_v61  ;;  %v11599_v37 = vld [vmem:[%s18463_s5 + $0x410] ss:$8 sps:$4 sm:$0xff]   ;;  %vm19525_vm11 = vmmov %vm19520_vm1  ;;  %v7182_v61 = vrot.slane %v7180_v52, 1  ;;  %v7708_v55 = vrot.slane %v16867_v45, 1  ;;  %v16913_v11 = vsel %vm19529_vm2, %v7694_v48, %v7698_v0 }
 0x405   : > { %7497 = vmatmul.mubr.bf16.gmra.mxu1 %v7143_v29  ;;  %7913 = vmatpush1.bf16.msra.mxu0 %v11596_v63  ;;  %v16900_v29 = vsel %vm19525_vm11, %v7690_v22, %v7694_v48  ;;  %v16908_v63 = vsel %vm19527_vm13, %v7696_v34, %v7700_v25  ;;  %19530 = vst [vmem:[#allocation65_spill] sm:$0xff] %v16913_v11  ;;  %v7706_v52 = vrot.slane %v16871_v56, 1  ;;  %vm19532_vm11 = vmmov %vm19520_vm1  ;;  %v19534_v48 = vmax.f32 %v16155_v31, 0.0  ;;  %v19536_v11 = vld [vmem:[#allocation94_spill] sm:$0xff] }
 0x406   : > { %7506 = vmatprep.mubr.bf16.mxu1 %v7167_v47  ;;  %19526 = vst [vmem:[#allocation68_spill] sm:$0xff] %v16900_v29  ;;  %7914 = vmatprep.subr.bf16.mxu0 %v11601_v35  ;;  %v11604_v47 = vld [vmem:[%s18463_s5 + $0x404] ss:$8 sps:$4 sm:$0xff]   ;;  %19528 = vst [vmem:[#allocation59_spill] sm:$0xff] %v16908_v63  ;;  %v16916_v22 = vsel %vm19520_vm1, %v7700_v25, %v7704_v44  ;;  %v7712_v35 = vrot.slane %v16772_v8, 1  ;;  %v16921_v59 = vsel %vm19532_vm11, %v7698_v0, %v7702_v5 }
 0x407   : > { %19531 = vst [vmem:[#allocation60_spill] sm:$0xff] %v16916_v22  ;;  %vm19533_vm13 = vmmov %vm19520_vm1  ;;  %v7710_v63 = vrot.slane %v16884_v33, 1  ;;  %v7716_v29 = vrot.slane %v16786_v32, 1  ;;  %v19535_v25 = vmax.f32 %v16195_v43, 0.0  ;;  %vm19537_vm2 = vnez %v19536_v11  ;;  %v11602_v0 = vld [vmem:[%s18463_s5 + $0x400] ss:$8 sps:$4 sm:$0xff]  }
 0x408   : > { %6889 = vmatmul.mubr.bf16.gmra.mxu0 %v6619_v21  ;;  %v16924_v34 = vsel %vm19533_vm13, %v7704_v44, %v7708_v55  ;;  %v19538_v8 = vshrl.u32 %v16764_v17, 16  ;;  %v16941_v44 = vsel %vm19520_vm1, %v7702_v5, %v7706_v52  ;;  %vm19539_vm11 = vmmov %vm19520_vm1  ;;  %v18783_v43 = vrot.slane %v16897_v9, 1  ;;  %v11607_v17 = vld [vmem:[%s18463_s5 + $0x4f4] ss:$8 sps:$4 sm:$0xff]  }
 0x409   : > { %v11853_v22 = vpack.c.bf16 %v19535_v25, %v19534_v48  ;;  %7915 = vmatpush1.bf16.msra.mxu0 %v11599_v37  ;;  %v16944_v31 = vsel %vm19539_vm11, %v7708_v55, %v7712_v35  ;;  %vm19541_vm13 = vmmov %vm19520_vm1  ;;  %v16959_v37 = vsel %vm19520_vm1, %v7712_v35, %v7716_v29  ;;  %vm19542_vm11 = vsmask.f32 7424  ;;  %v11610_v35 = vld [vmem:[%s18463_s5 + $0x4e4] ss:$8 sps:$4 sm:$0xff]  }
 0x40a   : > { %v7154_v21 = vor.u32 %v19538_v8, %v16809_v57  ;;  %7916 = vmatprep.subr.bf16.mxu0 %v11604_v47  ;;  %v16954_v57 = vsel %vm19541_vm13, %v7706_v52, %v7710_v63  ;;  %v7172_v55 = vshll.u32 %v16848_v49, 16  ;;  %vm19544_vm5 = vmmov %vm19542_vm11  ;;  %v7196_v47 = vshll.u32 %v16850_v18, 16  ;;  %v11605_v52 = vld [vmem:[%s18463_s5 + $0x4f0] ss:$8 sps:$4 sm:$0xff]  }
 0x40b   : > { %11854 = vmatprep.mubr.msk.bf16.mxu0 %vm19537_vm2, %v11853_v22  ;;  %v19540_v22 = vshrl.u32 %v16766_v46, 16  ;;  %v16967_v46 = vsel %vm19543_vm3, %v7710_v63, %v18783_v43  ;;  %v7168_v25 = vshrl.u32 %v16788_v14, 16  ;;  %v19545_v8 = vmax.f32 %v16130_v3, 0.0  ;;  %v19549_v43 = vld [vmem:[#allocation86_spill] sm:$0xff]  ;;  %v11608_v3 = vld [vmem:[%s18463_s5 + $0x4e0] ss:$8 sps:$4 sm:$0xff]   ;;  %vm19551_vm13 = vmmov %vm19544_vm5 }
 0x40c   : > { %v7159_v5 = vsel %vm19542_vm11, %v7154_v21, %v16845_v27  ;;  %v7174_v63 = vrot.slane %v7172_v55, 1  ;;  %v19546_v21 = vmax.f32 %v16176_v2, 0.0  ;;  %vm19550_vm3 = vnez %v19549_v43  ;;  %vm19558_vm11 = vmmov %vm19544_vm5 }
 0x40d   : > { %v7178_v48 = vor.u32 %v19540_v22, %v16811_v62  ;;  %7507 = vmatmul.mubr.bf16.gmra.mxu1 %v7159_v5  ;;  %7917 = vmatpush1.bf16.msra.mxu0 %v11602_v0  ;;  %v7192_v0 = vshrl.u32 %v16818_v30, 16  ;;  %v19548_v5 = vmax.f32 %v16288_v19, 0.0  ;;  %v7170_v14 = vor.u32 %v7168_v25, %v16845_v27  ;;  %v11613_v30 = vld [vmem:[%s18463_s5 + $0x4d4] ss:$8 sps:$4 sm:$0xff]  }
 0x40e   : > { %7918 = vmatprep.subr.bf16.mxu0 %v11607_v17  ;;  %v11856_v22 = vpack.c.bf16 %v19546_v21, %v19545_v8  ;;  %v19547_v17 = vmax.f32 %v16247_v53, 0.0  ;;  %v7188_v19 = vshll.u32 %v16865_v40, 16  ;;  %v7212_v27 = vshll.u32 %v16867_v45, 16 }
 0x40f   : > { %v7183_v62 = vsel %vm19544_vm5, %v7178_v48, %v7182_v61  ;;  %v7198_v48 = vrot.slane %v7196_v47, 1  ;;  %v7194_v2 = vor.u32 %v7192_v0, %v7182_v61  ;;  %v7175_v53 = vsel %vm19544_vm5, %v7170_v14, %v7174_v63  ;;  %v11611_v61 = vld [vmem:[%s18463_s5 + $0x4d0] ss:$8 sps:$4 sm:$0xff]   ;;  %v11616_v47 = vld [vmem:[%s18463_s5 + $0x4c4] ss:$8 sps:$4 sm:$0xff]  }
 0x410   : > { %7516 = vmatprep.mubr.bf16.mxu1 %v7183_v62  ;;  %11857 = vmatmul.mubr.msk.bf16.gmra.mxu0 %vm19537_vm2, %v11856_v22  ;;  %v11859_v62 = vpack.c.bf16 %v19548_v5, %v19547_v17  ;;  %v19552_v25 = vmax.f32 %v16220_v1, 0.0  ;;  %v19553_v8 = vmax.f32 %v16268_v36, 0.0  ;;  %v7208_v22 = vshrl.u32 %v16850_v18, 16  ;;  %v19556_v14 = vld [vmem:[#allocation61_spill] sm:$0xff]  ;;  %v11619_v18 = vld [vmem:[%s18463_s5 + $0x4b4] ss:$8 sps:$4 sm:$0xff]  }
 0x411   : > { %7919 = vmatpush2.bf16.msra.mxu0 %v11605_v52  ;;  %v7199_v55 = vsel %vm19551_vm13, %v7194_v2, %v7198_v48  ;;  %v7184_v52 = vshrl.u32 %v16848_v49, 16  ;;  %v7214_v0 = vrot.slane %v7212_v27, 1  ;;  %v19554_v17 = vmax.f32 %v16340_v4, 0.0  ;;  %v11614_v1 = vld [vmem:[%s18463_s5 + $0x4c0] ss:$8 sps:$4 sm:$0xff]  }
 0x412   : > { %11860 = vmatprep.mubr.msk.bf16.mxu0 %vm19550_vm3, %v11859_v62  ;;  %7920 = vmatprep.subr.bf16.mxu0 %v11610_v35  ;;  %v7190_v35 = vrot.slane %v7188_v19, 1  ;;  %v11862_v21 = vpack.c.bf16 %v19553_v8, %v19552_v25  ;;  %v19555_v5 = vmax.f32 %v16380_v7, 0.0  ;;  %vm19557_vm1 = vnez %v19556_v14  ;;  %v19563_v25 = vld [vmem:[#allocation87_spill] sm:$0xff] }
 0x413   : > { %v7186_v49 = vor.u32 %v7184_v52, %v7174_v63  ;;  %v7210_v36 = vor.u32 %v7208_v22, %v7198_v48  ;;  %v7204_v7 = vshll.u32 %v16871_v56, 16  ;;  %v11617_v63 = vld [vmem:[%s18463_s5 + $0x4b0] ss:$8 sps:$4 sm:$0xff]   ;;  %v11622_v48 = vld [vmem:[%s18463_s5 + $0x4a4] ss:$8 sps:$4 sm:$0xff]   ;;  %v7200_v2 = vshrl.u32 %v16865_v40, 16 }
 0x414   : > { %v11865_v62 = vpack.c.bf16 %v19555_v5, %v19554_v17  ;;  %v19560_v19 = vmax.f32 %v16361_v28, 0.0  ;;  %v7224_v27 = vshrl.u32 %v16867_v45, 16  ;;  %vm19564_vm13 = vnez %v19563_v25  ;;  %v11625_v45 = vld [vmem:[%s18463_s5 + $0x494] ss:$8 sps:$4 sm:$0xff]   ;;  %v11628_v22 = vld [vmem:[%s18463_s5 + $0x484] ss:$8 sps:$4 sm:$0xff]  }
 0x415   : > { %7517 = vmatmul.mubr.bf16.gmra.mxu1 %v7175_v53  ;;  %7921 = vmatpush2.bf16.msra.mxu0 %v11608_v3  ;;  %v7191_v4 = vsel %vm19558_vm11, %v7186_v49, %v7190_v35  ;;  %v7215_v3 = vsel %vm19544_vm5, %v7210_v36, %v7214_v0  ;;  %v19559_v53 = vmax.f32 %v16313_v16, 0.0  ;;  %v7202_v40 = vor.u32 %v7200_v2, %v7190_v35  ;;  %v11620_v16 = vld [vmem:[%s18463_s5 + $0x4a0] ss:$8 sps:$4 sm:$0xff]   ;;  %vm19565_vm11 = vmmov %vm19544_vm5  ;;  %v7040_v35 = vld [vmem:[#allocation2 + $0x30] sm:$0x1] }
 0x416   : > { %7526 = vmatprep.mubr.bf16.mxu1 %v7199_v55  ;;  %7922 = vmatprep.subr.bf16.mxu0 %v11613_v30  ;;  %v7206_v30 = vrot.slane %v7204_v7, 1  ;;  %v7226_v28 = vor.u32 %v7224_v27, %v7214_v0  ;;  %v7216_v0 = vshrl.u32 %v16871_v56, 16  ;;  %v19566_v5 = vmax.f32 %v16405_v26, 0.0  ;;  %v11626_v26 = vld [vmem:[%s18463_s5 + $0x480] ss:$8 sps:$4 sm:$0xff]  }
 0x417   : > { %v11868_v55 = vpack.c.bf16 %v19560_v19, %v19559_v53  ;;  %v7062_v49 = vpack.c.bf16 %v7040_v35, %v7040_v35  ;;  %v19569_v36 = vmax.f32 %v16561_v60, 0.0  ;;  %v7236_v56 = vshll.u32 %v16897_v9, 16 }
 0x418   : > { %11863 = vmatmul.mubr.msk.bf16.gmra.mxu0 %vm19550_vm3, %v11862_v21  ;;  %v7231_v8 = vsel %vm19544_vm5, %v7226_v28, %v16790_v51  ;;  %v11623_v21 = vld [vmem:[%s18463_s5 + $0x490] ss:$8 sps:$4 sm:$0xff]   ;;  %v7218_v7 = vor.u32 %v7216_v0, %v7206_v30  ;;  %v7256_v60 = vshrl.u32 %v16786_v32, 16  ;;  %v19573_v53 = vmax.f32 %v16546_v41, 0.0 }
 0x419   : > { %11866 = vmatprep.mubr.msk.bf16.mxu0 %vm19557_vm1, %v11865_v62  ;;  %7923 = vmatpush2.bf16.msra.mxu0 %v11611_v61  ;;  %v19561_v61 = vmax.f32 %v16432_v39, 0.0  ;;  %v7207_v39 = vsel %vm19565_vm11, %v7202_v40, %v7206_v30  ;;  %v19567_v62 = vmax.f32 %v16453_v6, 0.0  ;;  %v19572_v30 = vmax.f32 %v16498_v38, 0.0  ;;  %v19578_v38 = vld [vmem:[#allocation58_spill] sm:$0xff] }
 0x41a   : > { %7924 = vmatprep.subr.bf16.mxu0 %v11616_v47  ;;  %v19562_v47 = vmax.f32 %v16473_v23, 0.0  ;;  %v7220_v23 = vshll.u32 %v16884_v33, 16 }
 0x41b   : > { %v11874_v51 = vpack.c.bf16 %v19567_v62, %v19566_v5  ;;  %v11880_v19 = vpack.c.bf16 %v19573_v53, %v19572_v30  ;;  %v11637_v30 = vld [vmem:[#allocation10 + $0x174] ss:$8 sps:$4 sm:$0xff]  }
 0x41c   : > { %v11871_v52 = vpack.c.bf16 %v19562_v47, %v19561_v61  ;;  %v7222_v17 = vrot.slane %v7220_v23, 1  ;;  %v19575_v61 = vld [vmem:[#allocation44_spill] sm:$0xff]  ;;  %v19592_v53 = vld [vmem:[#allocation59_spill] sm:$0xff] }
 0x41d   : > { %7527 = vmatmul.mubr.bf16.gmra.mxu1 %v7191_v4  ;;  %7925 = vmatpush2.bf16.msra.mxu0 %v11614_v1  ;;  %v19568_v1 = vmax.f32 %v16525_v10, 0.0  ;;  %v19570_v4 = vld [vmem:[#allocation19_spill] sm:$0xff]  ;;  %v7039_v10 = vld [vmem:[#allocation2 + $0xc0] sm:$0x1]  ;;  %v19576_v47 = vmax.f32 %v19575_v61, 0.0 }
 0x41e   : > { %7536 = vmatprep.mubr.bf16.mxu1 %v7215_v3  ;;  %7926 = vmatprep.subr.bf16.mxu0 %v11619_v18  ;;  %vm19571_vm11 = vnez %v19570_v4  ;;  %v7223_v6 = vsel %vm19544_vm5, %v7218_v7, %v7222_v17  ;;  %v7260_v3 = vshll.u32 %v7062_v49, 16  ;;  %v7061_v2 = vpack.c.bf16 %v7039_v10, %v7039_v10  ;;  %v7617_v49 = vld [vmem:[#allocation2 + $0x10] sm:$0xfc]  ;;  %v11643_v61 = vld [vmem:[#allocation10 + $0x54] ss:$8 sps:$4 sm:$0xff]  }
 0x41f   : > { %v11877_v18 = vpack.c.bf16 %v19569_v36, %v19568_v1  ;;  %v19586_v1 = vld [vmem:[#allocation78_spill] sm:$0xff] }
 0x420   : > { %11869 = vmatmul.mubr.msk.bf16.gmra.mxu0 %vm19557_vm1, %v11868_v55  ;;  %v7258_v55 = vor.u32 %v7256_v60, %v16814_v42  ;;  %v7262_v27 = vrot.slane %v7260_v3, 1  ;;  %v19580_v42 = vld [vmem:[#allocation56_spill] sm:$0xff]  ;;  %v7621_v36 = vpack.c.bf16 %v19586_v1, %v7617_v49 }
 0x421   : > { %11872 = vmatprep.mubr.msk.bf16.mxu0 %vm19564_vm13, %v11871_v52  ;;  %7927 = vmatpush2.bf16.msra.mxu0 %v11617_v63  ;;  %v7232_v63 = vshrl.u32 %v16884_v33, 16  ;;  %v7684_v23 = vrot.slane %v19580_v42, 1  ;;  %v11629_v10 = vld [vmem:[#allocation10 + $0x70] ss:$8 sps:$4 sm:$0xff]   ;;  %v11631_v60 = vld [vmem:[#allocation10 + $0x74] ss:$8 sps:$4 sm:$0xff]  }
 0x422   : > { %7928 = vmatprep.subr.bf16.mxu0 %v11622_v48  ;;  %v7238_v48 = vrot.slane %v7236_v56, 1  ;;  %v7680_v7 = vrot.slane %v7621_v36, 1  ;;  %v19589_v56 = vrot.slane %v16720_v58, 1  ;;  %8679 = vmatprep.subr.bf16.mxu1 %v11631_v60  ;;  %v5496_v58 = vld [vmem:[#allocation8] sm:$0x3] }
 0x423   : > { %v7234_v33 = vor.u32 %v7232_v63, %v7222_v17  ;;  %v19583_v17 = vld [vmem:[#allocation38_spill] sm:$0xff]  ;;  %8680 = vmatpush1.bf16.msra.mxu1 %v11629_v10 }
 0x424   : > { %v19584_v5 = vmax.f32 %v19583_v17, 0.0  ;;  %v11634_v63 = vld [vmem:[#allocation10 + $0x64] ss:$8 sps:$4 sm:$0xff]   ;;  %v11653_v36 = vld [vmem:[#allocation10 + $0x30] ss:$8 sps:$4 sm:$0xff]  }
 0x425   : > { %7537 = vmatmul.mubr.bf16.gmra.mxu1 %v7207_v39  ;;  %7929 = vmatpush2.bf16.msra.mxu0 %v11620_v16  ;;  %v7618_v16 = vld [vmem:[#allocation2 + $0x48] sm:$0xfc]  ;;  %v7239_v41 = vsel %vm19544_vm5, %v7234_v33, %v7238_v48  ;;  %v11644_v33 = vld [vmem:[#allocation10 + $0x150] ss:$8 sps:$4 sm:$0xff]  }
 0x426   : > { %7546 = vmatprep.mubr.bf16.mxu1 %v7231_v8  ;;  %7930 = vmatprep.subr.bf16.mxu0 %v11625_v45  ;;  %v7622_v28 = vpack.c.bf16 %v19578_v38, %v7618_v16  ;;  %v7252_v45 = vshll.u32 %v7061_v2, 16  ;;  %v19591_v2 = vld [vmem:[#allocation68_spill] sm:$0xff]  ;;  %v19595_v38 = vld [vmem:[#allocation65_spill] sm:$0xff] }
 0x427   : > { %8681 = vmatprep.subr.bf16.mxu1 %v11634_v63  ;;  %v11646_v16 = vld [vmem:[#allocation10 + $0x154] ss:$8 sps:$4 sm:$0xff]   ;;  %v11652_v17 = vld [vmem:[#allocation10 + $0x144] ss:$8 sps:$4 sm:$0xff]  }
 0x428   : > { %11875 = vmatmul.mubr.msk.bf16.gmra.mxu0 %vm19564_vm13, %v11874_v51  ;;  %v7683_v8 = vrot.slane %v7622_v28, 1 }
 0x429   : > { %11878 = vmatprep.mubr.msk.bf16.mxu0 %vm19571_vm11, %v11877_v18  ;;  %7931 = vmatpush2.bf16.msra.mxu0 %v11623_v21  ;;  %v7254_v21 = vrot.slane %v7252_v45, 1  ;;  %v19596_v45 = vld [vmem:[#allocation60_spill] sm:$0xff] }
 0x42a   : > { %7932 = vmatprep.subr.bf16.mxu0 %v11628_v22  ;;  %v19581_v22 = vld [vmem:[#allocation42_spill] sm:$0xff] }
 0x42b   : > { %v19582_v0 = vmax.f32 %v19581_v22, 0.0 }
 0x42d   : > { %7547 = vmatmul.mubr.bf16.gmra.mxu1 %v7223_v6  ;;  %7933 = vmatpush2.bf16.msra.mxu0 %v11626_v26  ;;  %v11886_v62 = vpack.c.bf16 %v19584_v5, %v19582_v0  ;;  %v19587_v26 = vrot.slane %v16718_v20, 1  ;;  %v11632_v20 = vld [vmem:[#allocation10 + $0x60] ss:$8 sps:$4 sm:$0xff]  }
 0x42e   : > { %7556 = vmatprep.mubr.bf16.mxu1 %v16825_v24  ;;  %v19574_v24 = vmax.f32 %v16606_v50, 0.0  ;;  %v7248_v50 = vshrl.u32 %v16897_v9, 16  ;;  %9067 = vmatprep.subr.bf16.mxu0 %v11637_v30  ;;  %v11650_v0 = vld [vmem:[#allocation10 + $0x140] ss:$8 sps:$4 sm:$0xff]  }
 0x42f   : > { %8682 = vmatpush1.bf16.msra.mxu1 %v11632_v20 }
 0x430   : > { %11881 = vmatmul.mubr.msk.bf16.gmra.mxu0 %vm19571_vm11, %v11880_v19  ;;  %v11883_v52 = vpack.c.bf16 %v19576_v47, %v19574_v24  ;;  %vm19579_vm11 = vmmov %vm19544_vm5  ;;  %v7250_v35 = vor.u32 %v7248_v50, %v7238_v48  ;;  %vm19585_vm5 = vcmask 1046528   ;;  %v11635_v48 = vld [vmem:[#allocation10 + $0x170] ss:$8 sps:$4 sm:$0xff]   ;;  %8683 = vmatprep.subr.bf16.mxu1 %v11643_v61  ;;  %v11649_v50 = vld [vmem:[#allocation10 + $0x44] ss:$8 sps:$4 sm:$0xff]  }
 0x431   : > { %v7263_v39 = vsel %vm19579_vm11, %v7258_v55, %v7262_v27  ;;  %v7685_v51 = vsel %vm19585_vm5, %v7683_v8, %v7684_v23  ;;  %vm19588_vm13 = vmmov %vm19585_vm5  ;;  %v19594_v55 = vld [vmem:[#allocation18_spill] sm:$0xff] }
 0x432   : > { %11884 = vmatprep.mubr.msk.bf16.mxu0 %vm15249_vm6, %v11883_v52  ;;  %v7255_v18 = vsel %vm19579_vm11, %v7250_v35, %v7254_v21  ;;  %v7682_v6 = vsel %vm19588_vm13, %v7680_v7, %v19587_v26  ;;  %vm19590_vm1 = vmmov %vm19585_vm5  ;;  %v17131_v27 = vrot.slane %v5496_v58, %v19594_v55  ;;  %v11641_v24 = vld [vmem:[#allocation10 + $0x50] ss:$8 sps:$4 sm:$0xff]  }
 0x433   : > { %v7689_v3 = vsel %vm19590_vm1, %v7684_v23, %v19589_v56  ;;  %8684 = vmatpush1.bf16.msra.mxu1 %v11641_v24  ;;  %v11647_v23 = vld [vmem:[#allocation10 + $0x40] ss:$8 sps:$4 sm:$0xff]   ;;  %v11656_v7 = vld [vmem:[#allocation10 + $0x130] ss:$8 sps:$4 sm:$0xff]   ;;  %v11658_v56 = vld [vmem:[#allocation10 + $0x134] ss:$8 sps:$4 sm:$0xff]  }
 0x434   : > { %8685 = vmatprep.subr.bf16.mxu1 %v11649_v50  ;;  %v11665_v61 = vld [vmem:[#allocation10 + $0x110] ss:$8 sps:$4 sm:$0xff]   ;;  %v11671_v50 = vld [vmem:[#allocation10 + $0x100] ss:$8 sps:$4 sm:$0xff]   ;;  %vm19598_vm13 = vmmov %vm19590_vm1 }
 0x435   : > { %7557 = vmatmul.mubr.bf16.gmra.mxu1 %v7239_v41 }
 0x436   : > { %7566 = vmatprep.mubr.bf16.mxu1 %v7263_v39 }
 0x437   : > { %8686 = vmatpush1.bf16.msra.mxu1 %v11647_v23 }
 0x438   : > { %11887 = vmatmul.mubr.msk.bf16.gmra.mxu0 %vm15249_vm6, %v11886_v62 }
 0x439   : > { %7934 = vmatprep.mubr.bf16.mxu0 %v7685_v51 }
 0x43d   : > { %7567 = vmatmul.mubr.bf16.gmra.mxu1 %v7255_v18  ;;  %v11655_v18 = vld [vmem:[#allocation10 + $0x34] ss:$8 sps:$4 sm:$0xff]  }
 0x43e   : > { %8687 = vmatprep.subr.bf16.mxu1 %v11655_v18 }
 0x43f   : > { %8688 = vmatpush1.bf16.msra.mxu1 %v11653_v36 }
 0x440   : > { %7935 = vmatmul.mubr.bf16.vlgmr.msra.gmra.mxu0 %v7682_v6 }
 0x441   : > { %7944 = vmatprep.mubr.bf16.mxu0 %v7689_v3  ;;  %9068 = vmatpush1.bf16.msra.mxu0 %v11635_v48  ;;  %v11659_v48 = vld [vmem:[#allocation10 + $0x20] ss:$8 sps:$4 sm:$0xff]  }
 0x448   : > { %7945 = vmatmul.mubr.bf16.gmra.mxu0 %v16876_v54  ;;  %v19593_v54 = vld [vmem:[#allocation17_spill] sm:$0xff] }
 0x449   : > { %7954 = vmatprep.mubr.bf16.mxu0 %v16881_v12  ;;  %v17128_v12 = vrot.slane %v5496_v58, %v19593_v54  ;;  %v11662_v58 = vld [vmem:[#allocation10 + $0x120] ss:$8 sps:$4 sm:$0xff]  }
 0x450   : > { %7955 = vmatmul.mubr.bf16.gmra.mxu0 %v16887_v15  ;;  %v11638_v15 = vld [vmem:[#allocation10 + $0x160] ss:$8 sps:$4 sm:$0xff]  }
 0x451   : > { %7964 = vmatprep.mubr.bf16.mxu0 %v16890_v13  ;;  %v11640_v13 = vld [vmem:[#allocation10 + $0x164] ss:$8 sps:$4 sm:$0xff]  }
 0x452   : > { %9069 = vmatprep.subr.bf16.mxu0 %v11640_v13 }
 0x453   : > { %9070 = vmatpush1.bf16.msra.mxu0 %v11638_v15 }
 0x454   : > { %9071 = vmatprep.subr.bf16.mxu0 %v11646_v16 }
 0x456   : > { %v5882_v19 = vpop.f32.mrf.mxu0 }
 0x457   : > { %v5981_v52 = vadd.f32 %v5882_v19, %v17128_v12  ;;  %9072 = vmatpush1.bf16.msra.mxu0 %v11644_v33 }
 0x458   : > { %7965 = vmatmul.mubr.bf16.gmra.mxu0 %v19591_v2  ;;  %v5884_v47 = vpop.f32.mrf.mxu0  ;;  %9073 = vmatprep.subr.bf16.mxu0 %v11652_v17  ;;  %v11661_v2 = vld [vmem:[#allocation10 + $0x24] ss:$8 sps:$4 sm:$0xff]   ;;  %v7620_v17 = vld [vmem:[#allocation2 + $0x30] sm:$0x3] }
 0x459   : > { %7974 = vmatprep.mubr.bf16.mxu0 %v19592_v53  ;;  %v5982_v39 = vadd.f32 %v5884_v47, %v17131_v27  ;;  %v11664_v53 = vld [vmem:[#allocation10 + $0x124] ss:$8 sps:$4 sm:$0xff]   ;;  %8689 = vmatprep.subr.bf16.mxu1 %v11661_v2  ;;  %v11667_v47 = vld [vmem:[#allocation10 + $0x114] ss:$8 sps:$4 sm:$0xff]  }
 0x45a   : > { %v5886_v28 = vpop.f32.mrf.mxu0  ;;  %v6472_v41 = vpop.f32.mrf.mxu1  ;;  %8690 = vmatpush1.bf16.msra.mxu1 %v11659_v48 }
 0x45b   : > { %v17137_v42 = vadd.f32 %v6472_v41, %v5981_v52  ;;  %v5983_v21 = vadd.f32 %v5886_v28, %v17128_v12  ;;  %9074 = vmatpush1.bf16.msra.mxu0 %v11650_v0  ;;  %v11670_v28 = vld [vmem:[#allocation10 + $0x14] ss:$8 sps:$4 sm:$0xff]  }
 0x45c   : > { %v17139_v8 = vpop.f32.mrf.mxu0  ;;  %v6474_v35 = vpop.f32.mrf.mxu1  ;;  %9075 = vmatprep.subr.bf16.mxu0 %v11658_v56  ;;  %8691 = vmatprep.subr.bf16.mxu1 %v11670_v28 }
 0x45d   : > { %v17142_v22 = vadd.f32 %v6474_v35, %v5982_v39  ;;  %v11673_v35 = vld [vmem:[#allocation10 + $0x104] ss:$8 sps:$4 sm:$0xff]  }
 0x45e   : > { %v6476_v62 = vpop.f32.mrf.mxu1 }
 0x45f   : > { %v17144_v51 = vadd.f32 %v6476_v62, %v5983_v21  ;;  %9076 = vmatpush1.bf16.msra.mxu0 %v11656_v7  ;;  %v11676_v62 = vld [vmem:[#allocation10 + $0x4] ss:$8 sps:$4 sm:$0xff]   ;;  %v11677_v7 = vld [vmem:[#allocation10 + $0x1f0] ss:$8 sps:$4 sm:$0xff]  }
 0x460   : > { %7975 = vmatmul.mubr.bf16.gmra.mxu0 %v19595_v38  ;;  %v17146_v1 = vpop.f32.mrf.mxu1  ;;  %9077 = vmatprep.subr.bf16.mxu0 %v11664_v53  ;;  %v11668_v38 = vld [vmem:[#allocation10 + $0x10] ss:$8 sps:$4 sm:$0xff]   ;;  %v11683_v53 = vld [vmem:[#allocation10 + $0x1e0] ss:$8 sps:$4 sm:$0xff]  }
 0x461   : > { %7984 = vmatprep.mubr.bf16.mxu0 %v19596_v45  ;;  %v5892_v5 = vpop.f32.mrf.mxu0  ;;  %8692 = vmatpush1.bf16.msra.mxu1 %v11668_v38 }
 0x462   : > { %v5985_v26 = vadd.f32 %v5892_v5, %v17128_v12  ;;  %v11674_v5 = vld [vmem:[#allocation10] ss:$8 sps:$4 sm:$0xff]   ;;  %8693 = vmatprep.subr.bf16.mxu1 %v11676_v62 }
 0x463   : > { %v5894_v49 = vpop.f32.mrf.mxu0  ;;  %9078 = vmatpush1.bf16.msra.mxu0 %v11662_v58 }
 0x464   : > { %v6482_v3 = vpop.f32.mrf.mxu1  ;;  %v5986_v10 = vadd.f32 %v5894_v49, %v17131_v27  ;;  %9079 = vmatprep.subr.bf16.mxu0 %v11667_v47  ;;  %v11685_v47 = vld [vmem:[#allocation10 + $0x1e4] ss:$8 sps:$4 sm:$0xff]  }
 0x465   : > { %v5896_v6 = vpop.f32.mrf.mxu0  ;;  %v17152_v60 = vadd.f32 %v6482_v3, %v5985_v26  ;;  %v11679_v26 = vld [vmem:[#allocation10 + $0x1f4] ss:$8 sps:$4 sm:$0xff]   ;;  %v7624_v3 = vpack.c.bf16 %v7620_v17, %v7620_v17  ;;  %8694 = vmatpush1.bf16.msra.mxu1 %v11674_v5 }
 0x466   : > { %v6484_v63 = vpop.f32.mrf.mxu1 }
 0x467   : > { %v17154_v20 = vpop.f32.mrf.mxu0  ;;  %v17157_v30 = vadd.f32 %v6484_v63, %v5986_v10  ;;  %9080 = vmatpush1.bf16.msra.mxu0 %v11665_v61  ;;  %v7720_v61 = vrot.slane %v7624_v3, 1 }
 0x468   : > { %7985 = vmatmul.mubr.bf16.gmra.mxu0 %v16921_v59  ;;  %v5987_v59 = vadd.f32 %v5896_v6, %v17128_v12  ;;  %v6486_v15 = vpop.f32.mrf.mxu1  ;;  %9081 = vmatprep.subr.bf16.mxu0 %v11673_v35 }
 0x469   : > { %7994 = vmatprep.mubr.bf16.mxu0 %v16924_v34 }
 0x46a   : > { %v5902_v34 = vpop.f32.mrf.mxu0  ;;  %v17159_v13 = vadd.f32 %v6486_v15, %v5987_v59  ;;  %v17161_v24 = vpop.f32.mrf.mxu1  ;;  %v11680_v59 = vld [vmem:[#allocation10 + $0xf0] ss:$8 sps:$4 sm:$0xff]  }
 0x46b   : > { %v5989_v52 = vadd.f32 %v5902_v34, %v17128_v12  ;;  %9082 = vmatpush1.bf16.msra.mxu0 %v11671_v50  ;;  %v11682_v34 = vld [vmem:[#allocation10 + $0xf4] ss:$8 sps:$4 sm:$0xff]   ;;  %v11689_v50 = vld [vmem:[#allocation10 + $0x1d0] ss:$8 sps:$4 sm:$0xff]  }
 0x46c   : > { %v5904_v19 = vpop.f32.mrf.mxu0  ;;  %9083 = vmatprep.subr.bf16.mxu0 %v11679_v26  ;;  %8695 = vmatprep.subr.bf16.mxu1 %v11682_v34 }
 0x46d   : > { %v5990_v41 = vadd.f32 %v5904_v19, %v17131_v27  ;;  %8696 = vmatpush2.bf16.msra.mxu1 %v11680_v59 }
 0x46e   : > { %v5906_v33 = vpop.f32.mrf.mxu0 }
 0x46f   : > { %v6492_v16 = vpop.f32.mrf.mxu1  ;;  %9084 = vmatpush2.bf16.msra.mxu0 %v11677_v7 }
 0x470   : > { %7995 = vmatmul.mubr.bf16.gmra.mxu0 %v16941_v44  ;;  %v17167_v45 = vadd.f32 %v6492_v16, %v5989_v52  ;;  %v17169_v39 = vpop.f32.mrf.mxu0  ;;  %v5991_v44 = vadd.f32 %v5906_v33, %v17128_v12  ;;  %9085 = vmatprep.subr.bf16.mxu0 %v11685_v47 }
 0x471   : > { %8004 = vmatprep.mubr.bf16.mxu0 %v16944_v31  ;;  %v6494_v23 = vpop.f32.mrf.mxu1 }
 0x472   : > { %v17172_v21 = vadd.f32 %v6494_v23, %v5990_v41  ;;  %v11686_v41 = vld [vmem:[#allocation10 + $0xe0] ss:$8 sps:$4 sm:$0xff]   ;;  %v11688_v23 = vld [vmem:[#allocation10 + $0xe4] ss:$8 sps:$4 sm:$0xff]  }
 0x473   : > { %v5912_v31 = vpop.f32.mrf.mxu0  ;;  %v6496_v0 = vpop.f32.mrf.mxu1  ;;  %9086 = vmatpush2.bf16.msra.mxu0 %v11683_v53  ;;  %8697 = vmatprep.subr.bf16.mxu1 %v11688_v23  ;;  %v11692_v53 = vld [vmem:[#allocation10 + $0x1c0] ss:$8 sps:$4 sm:$0xff]  }
 0x474   : > { %v17174_v49 = vadd.f32 %v6496_v0, %v5991_v44  ;;  %v5993_v6 = vadd.f32 %v5912_v31, %v17128_v12  ;;  %v7721_v44 = vsel %vm19590_vm1, %v7716_v29, %v7720_v61  ;;  %v11691_v0 = vld [vmem:[#allocation10 + $0x1d4] ss:$8 sps:$4 sm:$0xff]   ;;  %8698 = vmatpush2.bf16.msra.mxu1 %v11686_v41  ;;  %vm19656_vm1 = vsmask.f32 4352 }
 0x475   : > { %v5914_v36 = vpop.f32.mrf.mxu0  ;;  %v17176_v18 = vpop.f32.mrf.mxu1  ;;  %9087 = vmatprep.subr.bf16.mxu0 %v11691_v0 }
 0x476   : > { %v5994_v63 = vadd.f32 %v5914_v36, %v17131_v27 }
 0x477   : > { %v5916_v56 = vpop.f32.mrf.mxu0  ;;  %v6502_v10 = vpop.f32.mrf.mxu1  ;;  %9088 = vmatpush2.bf16.msra.mxu0 %v11689_v50  ;;  %v11698_v50 = vld [vmem:[#allocation10 + $0x1b0] ss:$8 sps:$4 sm:$0xff]  }
 0x478   : > { %8005 = vmatmul.mubr.bf16.gmra.mxu0 %v16954_v57  ;;  %v17182_v48 = vadd.f32 %v6502_v10, %v5993_v6  ;;  %v5995_v57 = vadd.f32 %v5916_v56, %v17128_v12  ;;  %v19597_v10 = vrot.slane %v16897_v9, 1  ;;  %v11697_v9 = vld [vmem:[#allocation10 + $0xd4] ss:$8 sps:$4 sm:$0xff]  }
 0x479   : > { %8014 = vmatprep.mubr.bf16.mxu0 %v16959_v37  ;;  %v17184_v2 = vpop.f32.mrf.mxu0  ;;  %v6504_v58 = vpop.f32.mrf.mxu1  ;;  %v7619_v37 = vld [vmem:[#allocation2 + $0xc0] sm:$0x3]  ;;  %8699 = vmatprep.subr.bf16.mxu1 %v11697_v9 }
 0x47a   : > { %v17187_v15 = vadd.f32 %v6504_v58, %v5994_v63  ;;  %v7623_v28 = vpack.c.bf16 %v7619_v37, %v7619_v37  ;;  %v11710_v9 = vld [vmem:[#allocation10 + $0x190] ss:$8 sps:$4 sm:$0xff]  }
 0x47b   : > { %v6506_v52 = vpop.f32.mrf.mxu1 }
 0x47c   : > { %v5922_v19 = vpop.f32.mrf.mxu0  ;;  %v17189_v33 = vadd.f32 %v6506_v52, %v5995_v57  ;;  %v7718_v26 = vrot.slane %v7623_v28, 1  ;;  %v11694_v57 = vld [vmem:[#allocation10 + $0x1c4] ss:$8 sps:$4 sm:$0xff]   ;;  %v11695_v52 = vld [vmem:[#allocation10 + $0xd0] ss:$8 sps:$4 sm:$0xff]  }
 0x47d   : > { %v17191_v38 = vpop.f32.mrf.mxu1  ;;  %v5997_v35 = vadd.f32 %v5922_v19, %v17128_v12  ;;  %9089 = vmatprep.subr.bf16.mxu0 %v11694_v57  ;;  %8700 = vmatpush2.bf16.msra.mxu1 %v11695_v52  ;;  %v11709_v52 = vld [vmem:[#allocation10 + $0xb4] ss:$8 sps:$4 sm:$0xff]  }
 0x47e   : > { %v5924_v16 = vpop.f32.mrf.mxu0  ;;  %v7719_v63 = vsel %vm19598_vm13, %v19597_v10, %v7718_v26  ;;  %9090 = vmatpush2.bf16.msra.mxu0 %v11692_v53  ;;  %vm19658_vm13 = vmmov %vm19656_vm1 }
 0x47f   : > { %v5998_v5 = vadd.f32 %v5924_v16, %v17131_v27 }
 0x480   : > { %8015 = vmatmul.mubr.bf16.gmra.mxu0 %v16967_v46  ;;  %v5926_v31 = vpop.f32.mrf.mxu0  ;;  %v6512_v17 = vpop.f32.mrf.mxu1 }
 0x481   : > { %8024 = vmatprep.mubr.bf16.mxu0 %v7721_v44  ;;  %v17199_v62 = vadd.f32 %v6512_v17, %v5997_v35  ;;  %v5999_v32 = vadd.f32 %v5926_v31, %v17128_v12  ;;  %v11700_v35 = vld [vmem:[#allocation10 + $0x1b4] ss:$8 sps:$4 sm:$0xff]   ;;  %v11701_v17 = vld [vmem:[#allocation10 + $0xc0] ss:$8 sps:$4 sm:$0xff]  }
 0x482   : > { %v17201_v36 = vpop.f32.mrf.mxu0  ;;  %v6514_v7 = vpop.f32.mrf.mxu1  ;;  %9091 = vmatprep.subr.bf16.mxu0 %v11700_v35 }
 0x483   : > { %v17204_v46 = vadd.f32 %v6514_v7, %v5998_v5  ;;  %v11703_v5 = vld [vmem:[#allocation10 + $0xc4] ss:$8 sps:$4 sm:$0xff]   ;;  %9092 = vmatpush2.bf16.msra.mxu0 %v11698_v50 }
 0x484   : > { %v5932_v29 = vpop.f32.mrf.mxu0  ;;  %v6516_v6 = vpop.f32.mrf.mxu1  ;;  %8701 = vmatprep.subr.bf16.mxu1 %v11703_v5  ;;  %v11715_v5 = vld [vmem:[#allocation10 + $0xa4] ss:$8 sps:$4 sm:$0xff]  }
 0x485   : > { %v17206_v56 = vadd.f32 %v6516_v6, %v5999_v32  ;;  %v6001_v59 = vadd.f32 %v5932_v29, %v17128_v12  ;;  %v11704_v29 = vld [vmem:[#allocation10 + $0x1a0] ss:$8 sps:$4 sm:$0xff]   ;;  %v11706_v6 = vld [vmem:[#allocation10 + $0x1a4] ss:$8 sps:$4 sm:$0xff]   ;;  %8702 = vmatpush2.bf16.msra.mxu1 %v11701_v17 }
 0x486   : > { %v5934_v3 = vpop.f32.mrf.mxu0  ;;  %v17211_v58 = vpop.f32.mrf.mxu1  ;;  %9093 = vmatprep.subr.bf16.mxu0 %v11706_v6  ;;  %8703 = vmatprep.subr.bf16.mxu1 %v11709_v52  ;;  %v11713_v17 = vld [vmem:[#allocation10 + $0xa0] ss:$8 sps:$4 sm:$0xff]  }
 0x487   : > { %v6002_v61 = vadd.f32 %v5934_v3, %v17131_v27  ;;  %9094 = vmatpush2.bf16.msra.mxu0 %v11704_v29  ;;  %v11718_v29 = vld [vmem:[#allocation10 + $0x184] ss:$8 sps:$4 sm:$0xff]  }
 0x488   : > { %8025 = vmatmul.mubr.bf16.gmra.mxu0 %v7719_v63  ;;  %v5936_v34 = vpop.f32.mrf.mxu0  ;;  %v6522_v19 = vpop.f32.mrf.mxu1 }
 0x489   : > { %v17215_v37 = vadd.f32 %v6522_v19, %v6001_v59  ;;  %v6003_v28 = vadd.f32 %v5936_v34, %v17128_v12 }
 0x48a   : > { %v17217_v47 = vpop.f32.mrf.mxu0  ;;  %v6524_v16 = vpop.f32.mrf.mxu1 }
 0x48b   : > { %v17220_v41 = vadd.f32 %v6524_v16, %v6002_v61  ;;  %v11707_v61 = vld [vmem:[#allocation10 + $0xb0] ss:$8 sps:$4 sm:$0xff]  }
 0x48c   : > { %v5942_v23 = vpop.f32.mrf.mxu0  ;;  %v6526_v44 = vpop.f32.mrf.mxu1  ;;  %8704 = vmatpush2.bf16.msra.mxu1 %v11707_v61 }
 0x48d   : > { %v17222_v31 = vadd.f32 %v6526_v44, %v6003_v28  ;;  %v6005_v26 = vadd.f32 %v5942_v23, %v17128_v12  ;;  %v11712_v28 = vld [vmem:[#allocation10 + $0x194] ss:$8 sps:$4 sm:$0xff]   ;;  %8705 = vmatprep.subr.bf16.mxu1 %v11715_v5 }
 0x48e   : > { %v5944_v0 = vpop.f32.mrf.mxu0  ;;  %v17224_v7 = vpop.f32.mrf.mxu1  ;;  %9095 = vmatprep.subr.bf16.mxu0 %v11712_v28  ;;  %v11719_v28 = vld [vmem:[#allocation10 + $0x90] ss:$8 sps:$4 sm:$0xff]  }
 0x48f   : > { %v6006_v10 = vadd.f32 %v5944_v0, %v17131_v27  ;;  %9096 = vmatpush2.bf16.msra.mxu0 %v11710_v9 }
 0x490   : > { %v5946_v32 = vpop.f32.mrf.mxu0  ;;  %9097 = vmatprep.subr.bf16.mxu0 %v11718_v29  ;;  %8706 = vmatpush2.bf16.msra.mxu1 %v11713_v17 }
 0x491   : > { %v6532_v3 = vpop.f32.mrf.mxu1  ;;  %v6007_v53 = vadd.f32 %v5946_v32, %v17128_v12 }
 0x492   : > { %v17228_v63 = vadd.f32 %v6532_v3, %v6005_v26  ;;  %v17230_v59 = vpop.f32.mrf.mxu0  ;;  %v11716_v26 = vld [vmem:[#allocation10 + $0x180] ss:$8 sps:$4 sm:$0xff]  }
 0x493   : > { %v6534_v34 = vpop.f32.mrf.mxu1  ;;  %9098 = vmatpush2.bf16.msra.mxu0 %v11716_v26  ;;  %v11724_v26 = vld [vmem:[#allocation10 + $0x84] ss:$8 sps:$4 sm:$0xff]  }
 0x494   : > { %v17233_v57 = vadd.f32 %v6534_v34, %v6006_v10 }
 0x495   : > { %v6536_v16 = vpop.f32.mrf.mxu1 }
 0x496   : > { %v5952_v19 = vpop.f32.mrf.mxu0  ;;  %v17235_v23 = vadd.f32 %v6536_v16, %v6007_v53 }
 0x497   : > { %v17237_v35 = vpop.f32.mrf.mxu1  ;;  %v6009_v44 = vadd.f32 %v5952_v19, %v17128_v12 }
 0x498   : > { %v5954_v50 = vpop.f32.mrf.mxu0 }
 0x499   : > { %v6010_v6 = vadd.f32 %v5954_v50, %v17131_v27  ;;  %v11721_v50 = vld [vmem:[#allocation10 + $0x94] ss:$8 sps:$4 sm:$0xff]  }
 0x49a   : > { %v5956_v0 = vpop.f32.mrf.mxu0  ;;  %v6542_v32 = vpop.f32.mrf.mxu1  ;;  %8707 = vmatprep.subr.bf16.mxu1 %v11721_v50 }
 0x49b   : > { %v17241_v3 = vadd.f32 %v6542_v32, %v6009_v44  ;;  %v6011_v53 = vadd.f32 %v5956_v0, %v17128_v12  ;;  %8708 = vmatpush2.bf16.msra.mxu1 %v11719_v28  ;;  %v11727_v28 = vld [vmem:[#allocation10 + $0x274] ss:$8 sps:$4 sm:$0xff]  }
 0x49c   : > { %v17243_v10 = vpop.f32.mrf.mxu0  ;;  %v6544_v34 = vpop.f32.mrf.mxu1  ;;  %8709 = vmatprep.subr.bf16.mxu1 %v11724_v26 }
 0x49d   : > { %v17246_v19 = vadd.f32 %v6544_v34, %v6010_v6  ;;  %v11722_v6 = vld [vmem:[#allocation10 + $0x80] ss:$8 sps:$4 sm:$0xff]  }
 0x49e   : > { %v5962_v61 = vpop.f32.mrf.mxu0  ;;  %v6546_v52 = vpop.f32.mrf.mxu1 }
 0x49f   : > { %v17248_v9 = vadd.f32 %v6546_v52, %v6011_v53  ;;  %v6013_v32 = vadd.f32 %v5962_v61, %v17128_v12  ;;  %8710 = vmatpush2.bf16.msra.mxu1 %v11722_v6 }
 0x4a0   : > { %v5964_v16 = vpop.f32.mrf.mxu0  ;;  %v17250_v44 = vpop.f32.mrf.mxu1  ;;  %9685 = vmatprep.subr.bf16.mxu1 %v11727_v28 }
 0x4a1   : > { %v6014_v0 = vadd.f32 %v5964_v16, %v17131_v27 }
 0x4a2   : > { %v5966_v5 = vpop.f32.mrf.mxu0  ;;  %v6552_v29 = vpop.f32.mrf.mxu1 }
 0x4a3   : > { %v17254_v17 = vadd.f32 %v6552_v29, %v6013_v32  ;;  %v6015_v53 = vadd.f32 %v5966_v5, %v17128_v12 }
 0x4a4   : > { %v6554_v34 = vpop.f32.mrf.mxu1  ;;  %v17259_v54 = vpop.f32.mrf.mxu0 }
 0x4a5   : > { %v17257_v52 = vadd.f32 %v6554_v34, %v6014_v0 }
 0x4a6   : > { %v6556_v55 = vpop.f32.mrf.mxu1 }
 0x4a7   : > { %v17261_v61 = vadd.f32 %v6556_v55, %v6015_v53 }
 0x4a8   : > { %v5972_v50 = vpop.f32.mrf.mxu0  ;;  %v17263_v16 = vpop.f32.mrf.mxu1 }
 0x4a9   : > { %v6017_v32 = vadd.f32 %v5972_v50, %v17128_v12 }
 0x4aa   : > { %v5974_v40 = vpop.f32.mrf.mxu0 }
 0x4ab   : > { %v6018_v5 = vadd.f32 %v5974_v40, %v17131_v27 }
 0x4ac   : > { %v5976_v29 = vpop.f32.mrf.mxu0 }
 0x4ad   : > { %v6562_v4 = vpop.f32.mrf.mxu1  ;;  %v6019_v55 = vadd.f32 %v5976_v29, %v17128_v12 }
 0x4ae   : > { %v17267_v0 = vadd.f32 %v6562_v4, %v6017_v32  ;;  %v17269_v26 = vpop.f32.mrf.mxu0 }
 0x4af   : > { %v6564_v6 = vpop.f32.mrf.mxu1 }
 0x4b0   : > { %v17272_v34 = vadd.f32 %v6564_v6, %v6018_v5  ;;  %v6860_v25 = vpop.f32.mrf.mxu0 }
 0x4b1   : > { %v6566_v53 = vpop.f32.mrf.mxu1  ;;  %v17277_v28 = vadd.f32 %v6860_v25, %v17137_v42 }
 0x4b2   : > { %v17274_v14 = vadd.f32 %v6566_v53, %v6019_v55  ;;  %v6862_v43 = vpop.f32.mrf.mxu0 }
 0x4b3   : > { %v17279_v50 = vpop.f32.mrf.mxu1  ;;  %v17282_v4 = vadd.f32 %v6862_v43, %v17142_v22 }
 0x4b4   : > { %19599 = vst [vmem:[#allocation72_spill] sm:$0xff] %v17279_v50  ;;  %v6864_v40 = vpop.f32.mrf.mxu0 }
 0x4b5   : > { %v17284_v32 = vpop.f32.mrf.mxu1  ;;  %v17287_v12 = vadd.f32 %v6864_v40, %v17144_v51 }
 0x4b6   : > { %v17289_v29 = vpop.f32.mrf.mxu0 }
 0x4b7   : > { %19600 = vst [vmem:[#allocation80_spill] sm:$0xff] %v17287_v12  ;;  %v17291_v5 = vpop.f32.mrf.mxu1 }
 0x4b8   : > { %v6870_v6 = vpop.f32.mrf.mxu0 }
 0x4b9   : > { %v17293_v55 = vpop.f32.mrf.mxu1  ;;  %v17296_v25 = vadd.f32 %v6870_v6, %v17152_v60 }
 0x4ba   : > { %19601 = vst [vmem:[#allocation76_spill] sm:$0xff] %v17293_v55  ;;  %v6872_v42 = vpop.f32.mrf.mxu0 }
 0x4bb   : > { %19602 = vst [vmem:[#allocation63_spill] sm:$0xff] %v17296_v25  ;;  %v17298_v53 = vpop.f32.mrf.mxu1  ;;  %v17301_v43 = vadd.f32 %v6872_v42, %v17157_v30 }
 0x4bc   : > { %v6874_v22 = vpop.f32.mrf.mxu0 }
 0x4bd   : > { %19603 = vst [vmem:[#allocation50_spill] sm:$0xff] %v17301_v43  ;;  %v17303_v11 = vpop.f32.mrf.mxu1  ;;  %v17306_v51 = vadd.f32 %v6874_v22, %v17159_v13 }
 0x4be   : > { %v17308_v40 = vpop.f32.mrf.mxu0 }
 0x4bf   : > { %19604 = vst [vmem:[#allocation79_spill] sm:$0xff] %v17306_v51  ;;  %v17310_v12 = vpop.f32.mrf.mxu1 }
 0x4c0   : > { %19605 = vst [vmem:[#allocation82_spill] sm:$0xff] %v17310_v12  ;;  %v6880_v55 = vpop.f32.mrf.mxu0 }
 0x4c1   : > { %v17312_v50 = vpop.f32.mrf.mxu1  ;;  %v17315_v60 = vadd.f32 %v6880_v55, %v17167_v45 }
 0x4c2   : > { %v6882_v6 = vpop.f32.mrf.mxu0 }
 0x4c3   : > { %19606 = vst [vmem:[#allocation67_spill] sm:$0xff] %v17315_v60  ;;  %v17317_v25 = vpop.f32.mrf.mxu1  ;;  %v17320_v30 = vadd.f32 %v6882_v6, %v17172_v21 }
 0x4c4   : > { %v6884_v42 = vpop.f32.mrf.mxu0 }
 0x4c5   : > { %19607 = vst [vmem:[#allocation85_spill] sm:$0xff] %v17320_v30  ;;  %v17323_v13 = vadd.f32 %v6884_v42, %v17174_v49  ;;  %v17325_v22 = vpop.f32.mrf.mxu1 }
 0x4c6   : > { %v17327_v51 = vpop.f32.mrf.mxu0 }
 0x4c7   : > { %19608 = vst [vmem:[#allocation77_spill] sm:$0xff] %v17323_v13  ;;  %v17329_v43 = vpop.f32.mrf.mxu1 }
 0x4c8   : > { %v6890_v12 = vpop.f32.mrf.mxu0  ;;  %19609 = vst [vmem:[#allocation69_spill] sm:$0xff] %v17329_v43 }
 0x4c9   : > { %v17332_v45 = vadd.f32 %v6890_v12, %v17182_v48  ;;  %v17337_v6 = vpop.f32.mrf.mxu1 }
 0x4ca   : > { %v6892_v55 = vpop.f32.mrf.mxu0 }
 0x4cb   : > { %v17335_v60 = vadd.f32 %v6892_v55, %v17187_v15  ;;  %v17344_v30 = vpop.f32.mrf.mxu1 }
 0x4cc   : > { %v6894_v21 = vpop.f32.mrf.mxu0 }
 0x4cd   : > { %19610 = vst [vmem:[#allocation57_spill] sm:$0xff] %v17335_v60  ;;  %v17340_v49 = vadd.f32 %v6894_v21, %v17189_v33  ;;  %v17352_v55 = vpop.f32.mrf.mxu1 }
 0x4ce   : > { %v17342_v42 = vpop.f32.mrf.mxu0 }
 0x4cf   : > { %19611 = vst [vmem:[#allocation92_spill] sm:$0xff] %v17340_v49  ;;  %19612 = vst [vmem:[#allocation23_spill] sm:$0xff] %v17342_v42  ;;  %v17359_v49 = vpop.f32.mrf.mxu1 }
 0x4d0   : > { %v6900_v13 = vpop.f32.mrf.mxu0 }
 0x4d1   : > { %v17347_v43 = vadd.f32 %v6900_v13, %v17199_v62 }
 0x4d2   : > { %v6902_v48 = vpop.f32.mrf.mxu0 }
 0x4d3   : > { %v17350_v12 = vadd.f32 %v6902_v48, %v17204_v46  ;;  %v17367_v48 = vpop.f32.mrf.mxu1 }
 0x4d4   : > { %v6904_v15 = vpop.f32.mrf.mxu0 }
 0x4d5   : > { %19613 = vst [vmem:[#allocation96_spill] sm:$0xff] %v17350_v12  ;;  %v17355_v60 = vadd.f32 %v6904_v15, %v17206_v56 }
 0x4d6   : > { %v17357_v33 = vpop.f32.mrf.mxu0 }
 0x4d7   : > { %19614 = vst [vmem:[#allocation43_spill] sm:$0xff] %v17355_v60  ;;  %19615 = vst [vmem:[#allocation88_spill] sm:$0xff] %v17357_v33  ;;  %v17374_v60 = vpop.f32.mrf.mxu1 }
 0x4d8   : > { %v6910_v21 = vpop.f32.mrf.mxu0 }
 0x4d9   : > { %v17362_v42 = vadd.f32 %v6910_v21, %v17215_v37 }
 0x4da   : > { %v6912_v62 = vpop.f32.mrf.mxu0 }
 0x4db   : > { %v17365_v13 = vadd.f32 %v6912_v62, %v17220_v41  ;;  %v17382_v62 = vpop.f32.mrf.mxu1 }
 0x4dc   : > { %v6914_v46 = vpop.f32.mrf.mxu0 }
 0x4dd   : > { %19616 = vst [vmem:[#allocation45_spill] sm:$0xff] %v17365_v13  ;;  %v17370_v12 = vadd.f32 %v6914_v46, %v17222_v31 }
 0x4de   : > { %v17372_v56 = vpop.f32.mrf.mxu0 }
 0x4df   : > { %19617 = vst [vmem:[#allocation97_spill] sm:$0xff] %v17370_v12  ;;  %19618 = vst [vmem:[#allocation25_spill] sm:$0xff] %v17372_v56  ;;  %v17389_v12 = vpop.f32.mrf.mxu1 }
 0x4e0   : > { %v6920_v15 = vpop.f32.mrf.mxu0 }
 0x4e1   : > { %v17377_v33 = vadd.f32 %v6920_v15, %v17228_v63 }
 0x4e2   : > { %v6922_v37 = vpop.f32.mrf.mxu0 }
 0x4e3   : > { %v17380_v21 = vadd.f32 %v6922_v37, %v17233_v57  ;;  %v17397_v37 = vpop.f32.mrf.mxu1 }
 0x4e4   : > { %v6924_v41 = vpop.f32.mrf.mxu0 }
 0x4e5   : > { %19619 = vst [vmem:[#allocation91_spill] sm:$0xff] %v17380_v21  ;;  %v17385_v13 = vadd.f32 %v6924_v41, %v17235_v23 }
 0x4e6   : > { %v17387_v31 = vpop.f32.mrf.mxu0 }
 0x4e7   : > { %19620 = vst [vmem:[#allocation49_spill] sm:$0xff] %v17385_v13  ;;  %19621 = vst [vmem:[#allocation47_spill] sm:$0xff] %v17387_v31  ;;  %v17404_v13 = vpop.f32.mrf.mxu1 }
 0x4e8   : > { %v6930_v46 = vpop.f32.mrf.mxu0 }
 0x4e9   : > { %v17392_v56 = vadd.f32 %v6930_v46, %v17241_v3 }
 0x4ea   : > { %v6932_v63 = vpop.f32.mrf.mxu0 }
 0x4eb   : > { %v17395_v15 = vadd.f32 %v6932_v63, %v17246_v19  ;;  %v17412_v63 = vpop.f32.mrf.mxu1 }
 0x4ec   : > { %v6934_v57 = vpop.f32.mrf.mxu0 }
 0x4ed   : > { %19622 = vst [vmem:[#allocation20_spill] sm:$0xff] %v17395_v15  ;;  %v17400_v21 = vadd.f32 %v6934_v57, %v17248_v9 }
 0x4ee   : > { %v17402_v23 = vpop.f32.mrf.mxu0 }
 0x4ef   : > { %19623 = vst [vmem:[#allocation28_spill] sm:$0xff] %v17400_v21  ;;  %19624 = vst [vmem:[#allocation34_spill] sm:$0xff] %v17402_v23  ;;  %v17419_v21 = vpop.f32.mrf.mxu1 }
 0x4f0   : > { %v6940_v41 = vpop.f32.mrf.mxu0 }
 0x4f1   : > { %v17407_v31 = vadd.f32 %v6940_v41, %v17254_v17  ;;  %v5984_v41 = vadd.f32 %v17139_v8, %v17131_v27  ;;  %v6000_v8 = vadd.f32 %v17201_v36, %v17131_v27  ;;  %v6012_v36 = vadd.f32 %v17243_v10, %v17131_v27 }
 0x4f2   : > { %v6942_v3 = vpop.f32.mrf.mxu0 }
 0x4f3   : > { %v17410_v46 = vadd.f32 %v6942_v3, %v17257_v52  ;;  %v5988_v52 = vadd.f32 %v17154_v20, %v17131_v27  ;;  %v17469_v10 = vadd.f32 %v17250_v44, %v6012_v36  ;;  %v19633_v36 = vld [vmem:[#allocation79_spill] sm:$0xff] }
 0x4f4   : > { %v6944_v19 = vpop.f32.mrf.mxu0 }
 0x4f5   : > { %v17415_v15 = vadd.f32 %v6944_v19, %v17261_v61  ;;  %v5992_v61 = vadd.f32 %v17169_v39, %v17131_v27  ;;  %v5996_v19 = vadd.f32 %v17184_v2, %v17131_v27  ;;  %v6004_v2 = vadd.f32 %v17217_v47, %v17131_v27 }
 0x4f6   : > { %v17417_v9 = vpop.f32.mrf.mxu0 }
 0x4f7   : > { %19625 = vst [vmem:[#allocation26_spill] sm:$0xff] %v17415_v15  ;;  %v6586_v39 = vadd.f32 %v17191_v38, %v5996_v19  ;;  %v17460_v38 = vadd.f32 %v17224_v7, %v6004_v2 }
 0x4f8   : > { %v6950_v57 = vpop.f32.mrf.mxu0 }
 0x4f9   : > { %v17422_v23 = vadd.f32 %v6950_v57, %v17267_v0  ;;  %v6574_v0 = vadd.f32 %v17146_v1, %v5984_v41  ;;  %v6578_v57 = vadd.f32 %v17161_v24, %v5988_v52  ;;  %v6008_v1 = vadd.f32 %v17230_v59, %v17131_v27 }
 0x4fa   : > { %v6952_v17 = vpop.f32.mrf.mxu0  ;;  %v6590_v24 = vadd.f32 %v17211_v58, %v6000_v8  ;;  %v6020_v59 = vadd.f32 %v17269_v26, %v17131_v27  ;;  %v19629_v26 = vld [vmem:[#allocation76_spill] sm:$0xff] }
 0x4fb   : > { %19626 = vst [vmem:[#allocation21_spill] sm:$0xff] %v17422_v23  ;;  %v17429_v3 = vadd.f32 %v6952_v17, %v17272_v34  ;;  %v17439_v23 = vpop.f32.mrf.mxu1  ;;  %v6582_v34 = vadd.f32 %v17176_v18, %v5992_v61  ;;  %v7577_v18 = vadd.f32 %v17284_v32, %v17277_v28  ;;  %v17463_v47 = vadd.f32 %v17237_v35, %v6008_v1  ;;  %v19627_v35 = vld [vmem:[#allocation72_spill] sm:$0xff]  ;;  %v8207_v1 = vld [vmem:[#allocation2 + $0xb0] sm:$0x80] }
 0x4fc   : > { %v6954_v15 = vpop.f32.mrf.mxu0  ;;  %v6962_v58 = vadd.f32 %v17289_v29, %v6574_v0  ;;  %v7578_v28 = vadd.f32 %v17291_v5, %v17282_v4  ;;  %v17481_v41 = vadd.f32 %v19627_v35, %v6020_v59  ;;  %v6966_v44 = vadd.f32 %v17308_v40, %v6578_v57  ;;  %v19631_v0 = vld [vmem:[#allocation50_spill] sm:$0xff]  ;;  %v19634_v59 = vld [vmem:[#allocation67_spill] sm:$0xff] }
 0x4fd   : > { %v17442_v20 = vadd.f32 %v6954_v15, %v17274_v14  ;;  %v6016_v14 = vadd.f32 %v17259_v54, %v17131_v27  ;;  %v17476_v7 = vpop.f32.mrf.mxu1  ;;  %v19628_v27 = vld [vmem:[#allocation80_spill] sm:$0xff]  ;;  %v19632_v4 = vld [vmem:[#allocation82_spill] sm:$0xff]  ;;  %v6970_v40 = vadd.f32 %v17327_v51, %v6582_v34  ;;  %v17519_v34 = vadd.f32 %v17352_v55, %v17332_v45 }
 0x4fe   : > { %v17450_v17 = vpop.f32.mrf.mxu0  ;;  %v7579_v29 = vadd.f32 %v19629_v26, %v19628_v27  ;;  %v7580_v52 = vadd.f32 %v17298_v53, %v6962_v58  ;;  %v7582_v5 = vadd.f32 %v19632_v4, %v19631_v0  ;;  %v17497_v53 = vadd.f32 %v17325_v22, %v19634_v59  ;;  %v19636_v58 = vld [vmem:[#allocation69_spill] sm:$0xff]  ;;  %v8208_v26 = vld [vmem:[#allocation2 + $0xd0] sm:$0x80]  ;;  %v19639_v0 = vld [vmem:[#allocation23_spill] sm:$0xff] }
 0x4ff   : > { %v17472_v54 = vadd.f32 %v17263_v16, %v6016_v14  ;;  %v19630_v16 = vld [vmem:[#allocation63_spill] sm:$0xff]  ;;  %v7583_v14 = vadd.f32 %v17312_v50, %v19633_v36  ;;  %v17504_v35 = vpop.f32.mrf.mxu1  ;;  %v17515_v51 = vadd.f32 %v17344_v30, %v6970_v40  ;;  %v6974_v4 = vadd.f32 %v19639_v0, %v6586_v39  ;;  %v19640_v59 = vld [vmem:[#allocation57_spill] sm:$0xff]  ;;  %v19641_v30 = vld [vmem:[#allocation92_spill] sm:$0xff] }
 0x500   : > { %v7936_v15 = vpop.f32.mrf.mxu0  ;;  %v7581_v19 = vadd.f32 %v17303_v11, %v19630_v16  ;;  %v19635_v11 = vld [vmem:[#allocation85_spill] sm:$0xff]  ;;  %v17530_v40 = vadd.f32 %v17367_v48, %v19641_v30  ;;  %v19642_v39 = vld [vmem:[#allocation22_spill] sm:$0xff]  ;;  %v17543_v48 = vadd.f32 %v17382_v62, %v17347_v43 }
 0x501   : > { %v17478_v32 = vadd.f32 %v7936_v15, %v7577_v18  ;;  %v7584_v18 = vadd.f32 %v17317_v25, %v6966_v44  ;;  %v17502_v15 = vadd.f32 %v19636_v58, %v19635_v11  ;;  %v19638_v44 = vld [vmem:[#allocation77_spill] sm:$0xff]  ;;  %vm19643_vm5 = vnez %v19642_v39 }
 0x502   : > { %v7938_v61 = vpop.f32.mrf.mxu0  ;;  %v17512_v22 = vadd.f32 %v17337_v6, %v19638_v44  ;;  %v17526_v6 = vadd.f32 %v17359_v49, %v19640_v59  ;;  %v17539_v49 = vadd.f32 %v17374_v60, %v6974_v4 }
 0x503   : > { %v8075_v8 = vmax.f32 %v17478_v32, 0.0  ;;  %v8036_v2 = vadd.f32 %v7938_v61, %v7578_v28 }
 0x504   : > { %v7940_v57 = vpop.f32.mrf.mxu0 }
 0x505   : > { %v8115_v50 = vsel %vm13650_vm4, %v8075_v8, 0.0  ;;  %v8076_v27 = vmax.f32 %v8036_v2, 0.0  ;;  %v8037_v25 = vadd.f32 %v7940_v57, %v7579_v29 }
 0x506   : > { %8155 = vst [vmem:[#allocation2 + $0x10] sm:$0xff] %v8115_v50  ;;  %v7942_v61 = vpop.f32.mrf.mxu0  ;;  %v8249_v16 = vpack.c.bf16 %v8115_v50, %v8207_v1  ;;  %v17532_v1 = vpop.f32.mrf.mxu1  ;;  %v19644_v50 = vld [vmem:[#allocation88_spill] sm:$0xff] }
 0x507   : > { %v8116_v29 = vsel %vm13650_vm4, %v8076_v27, 0.0  ;;  %v8077_v2 = vmax.f32 %v8037_v25, 0.0  ;;  %v8038_v36 = vadd.f32 %v7942_v61, %v7580_v52  ;;  %v6978_v25 = vadd.f32 %v19644_v50, %v6590_v24  ;;  %v19646_v24 = vld [vmem:[#allocation40_spill] sm:$0xff] }
 0x508   : > { %8156 = vst [vmem:[#allocation2 + $0x48] sm:$0xff] %v8116_v29  ;;  %v7946_v45 = vpop.f32.mrf.mxu0  ;;  %v8250_v55 = vpack.c.bf16 %v8116_v29, %v8208_v26  ;;  %v8304_v57 = vshrl.u32 %v8249_v16, 16  ;;  %v8307_v52 = vshll.u32 %v8249_v16, 16  ;;  %v19645_v29 = vld [vmem:[#allocation96_spill] sm:$0xff]  ;;  %v17553_v62 = vpop.f32.mrf.mxu1  ;;  %vm19647_vm4 = vnez %v19646_v24 }
 0x509   : > { %v8117_v11 = vsel %vm19643_vm5, %v8077_v2, 0.0  ;;  %v8078_v58 = vmax.f32 %v8038_v36, 0.0  ;;  %v17536_v28 = vadd.f32 %v7946_v45, %v7581_v19  ;;  %v17551_v16 = vadd.f32 %v17389_v12, %v19645_v29 }
 0x50a   : > { %8157 = vst [vmem:[#allocation2 + $0x120] sm:$0xff] %v8117_v11  ;;  %v7948_v26 = vpop.f32.mrf.mxu0  ;;  %v8321_v19 = vshrl.u32 %v8250_v55, 16  ;;  %v8324_v4 = vshll.u32 %v8250_v55, 16  ;;  %v8306_v43 = vrot.slane %v8304_v57, 3  ;;  %v8309_v45 = vrot.slane %v8307_v52, 4 }
 0x50b   : > { %v8118_v44 = vsel %vm19643_vm5, %v8078_v58, 0.0  ;;  %v8079_v61 = vmax.f32 %v17536_v28, 0.0  ;;  %v8040_v0 = vadd.f32 %v7948_v26, %v7582_v5  ;;  %v19648_v5 = vld [vmem:[#allocation43_spill] sm:$0xff]  ;;  %v17564_v12 = vadd.f32 %v17404_v13, %v6978_v25  ;;  %v19660_v28 = vld [vmem:[#allocation73_spill] sm:$0xff] }
 0x50c   : > { %8158 = vst [vmem:[#allocation2 + $0x38] sm:$0xff] %v8118_v44  ;;  %v7950_v60 = vpop.f32.mrf.mxu0  ;;  %v17561_v39 = vadd.f32 %v17397_v37, %v19648_v5  ;;  %v17568_v55 = vadd.f32 %v17412_v63, %v17362_v42  ;;  %v11889_v50 = vpack.c.bf16 %v8078_v58, %v8076_v27  ;;  %v11892_v13 = vpack.c.bf16 %v8077_v2, %v8075_v8 }
 0x50d   : > { %v8119_v36 = vsel %vm19647_vm4, %v8079_v61, 0.0  ;;  %v8080_v59 = vmax.f32 %v8040_v0, 0.0  ;;  %v8041_v30 = vadd.f32 %v7950_v60, %v7583_v14  ;;  %v8323_v42 = vrot.slane %v8321_v19, 3  ;;  %v17578_v60 = vpop.f32.mrf.mxu1 }
 0x50e   : > { %8159 = vst [vmem:[#allocation2 + $0xf8] sm:$0xff] %v8119_v36  ;;  %v7952_v57 = vpop.f32.mrf.mxu0  ;;  %11890 = vmatprep.mubr.msk.bf16.mxu0 %vm19496_vm10, %v11889_v50  ;;  %v8251_v0 = vpack.c.bf16 %v8119_v36, %v8117_v11  ;;  %v8326_v29 = vrot.slane %v8324_v4, 4  ;;  %v19650_v11 = vld [vmem:[#allocation46_spill] sm:$0xff]  ;;  %v8310_v32 = vor.u32 %v8309_v45, %v8306_v43  ;;  %v19652_v43 = vld [vmem:[#allocation25_spill] sm:$0xff]  ;;  %vm19661_vm5 = vnez %v19660_v28 }
 0x50f   : > { %v8120_v14 = vsel %vm19647_vm4, %v8080_v59, 0.0  ;;  %v8081_v52 = vmax.f32 %v8041_v30, 0.0  ;;  %v8042_v37 = vadd.f32 %v7952_v57, %v7584_v18  ;;  %11893 = vmatmul.mubr.msk.bf16.vlgmr.msra.gmra.mxu0 %vm19496_vm10, %v11892_v13  ;;  %vm19651_vm11 = vnez %v19650_v11  ;;  %vm19666_vm4 = vmmov %vm19656_vm1 }
 0x510   : > { %8160 = vst [vmem:[#allocation2 + $0x100] sm:$0xff] %v8120_v14  ;;  %v7956_v63 = vpop.f32.mrf.mxu0  ;;  %v8252_v25 = vpack.c.bf16 %v8120_v14, %v8118_v44  ;;  %v8312_v27 = vshrl.u32 %v8251_v0, 16  ;;  %v8315_v58 = vshll.u32 %v8251_v0, 16  ;;  %v6982_v45 = vadd.f32 %v19652_v43, %v17460_v38  ;;  %v17595_v14 = vpop.f32.mrf.mxu1 }
 0x511   : > { %v8121_v24 = vsel %vm19651_vm11, %v8081_v52, 0.0  ;;  %v8082_v36 = vmax.f32 %v8042_v37, 0.0  ;;  %v17583_v18 = vadd.f32 %v7956_v63, %v17497_v53  ;;  %v19653_v37 = vld [vmem:[#allocation51_spill] sm:$0xff]  ;;  %v8327_v11 = vor.u32 %v8326_v29, %v8323_v42 }
 0x512   : > { %8161 = vst [vmem:[#allocation2 + $0x80] sm:$0xff] %v8121_v24  ;;  %v7958_v8 = vpop.f32.mrf.mxu0  ;;  %v8329_v2 = vshrl.u32 %v8252_v25, 16  ;;  %v8332_v19 = vshll.u32 %v8252_v25, 16  ;;  %v8314_v30 = vrot.slane %v8312_v27, 3  ;;  %v8317_v5 = vrot.slane %v8315_v58, 4 }
 0x513   : > { %v8122_v44 = vsel %vm19651_vm11, %v8082_v36, 0.0  ;;  %v8083_v4 = vmax.f32 %v17583_v18, 0.0  ;;  %v17589_v57 = vadd.f32 %v7958_v8, %v17502_v15  ;;  %vm19654_vm10 = vnez %v19653_v37  ;;  %v11725_v29 = vld [vmem:[#allocation10 + $0x270] ss:$8 sps:$4 sm:$0xff]   ;;  %v11728_v58 = vld [vmem:[#allocation10 + $0x260] ss:$8 sps:$4 sm:$0xff]   ;;  %vm19667_vm11 = vmmov %vm19656_vm1 }
 0x514   : > { %8162 = vst [vmem:[#allocation2 + $0x108] sm:$0xff] %v8122_v44  ;;  %v7960_v50 = vpop.f32.mrf.mxu0  ;;  %v8331_v26 = vrot.slane %v8329_v2, 3  ;;  %v8334_v53 = vrot.slane %v8332_v19, 4  ;;  %v17591_v0 = vor.u32 %v8317_v5, %v8314_v30  ;;  %v11895_v27 = vpack.c.bf16 %v8082_v36, %v8080_v59  ;;  %v19657_v19 = vld [vmem:[#allocation45_spill] sm:$0xff] }
 0x515   : > { %v8123_v13 = vsel %vm19654_vm10, %v8083_v4, 0.0  ;;  %v8084_v63 = vmax.f32 %v17589_v57, 0.0  ;;  %v17603_v15 = vadd.f32 %v7960_v50, %v17512_v22  ;;  %v17613_v30 = vadd.f32 %v17419_v21, %v19657_v19 }
 0x516   : > { %8163 = vst [vmem:[#allocation2 + $0x138] sm:$0xff] %v8123_v13  ;;  %v7962_v25 = vpop.f32.mrf.mxu0  ;;  %11896 = vmatprep.mubr.msk.bf16.mxu0 %vm19507_vm7, %v11895_v27  ;;  %v17607_v38 = vor.u32 %v8334_v53, %v8331_v26  ;;  %v8319_v8 = vsel %vm19656_vm1, %v8310_v32, %v17591_v0  ;;  %v8253_v2 = vpack.c.bf16 %v8123_v13, %v8121_v24  ;;  %v11730_v32 = vld [vmem:[#allocation10 + $0x264] ss:$8 sps:$4 sm:$0xff]  }
 0x517   : > { %v8124_v22 = vsel %vm19654_vm10, %v8084_v63, 0.0  ;;  %v8085_v5 = vmax.f32 %v17603_v15, 0.0  ;;  %v8046_v59 = vadd.f32 %v7962_v25, %v17515_v51  ;;  %v11898_v42 = vpack.c.bf16 %v8081_v52, %v8079_v61  ;;  %v19659_v26 = vld [vmem:[#allocation97_spill] sm:$0xff]  ;;  %v17629_v51 = vpop.f32.mrf.mxu1 }
 0x518   : > { %8164 = vst [vmem:[#allocation2 + $0xf0] sm:$0xff] %v8124_v22  ;;  %v7966_v24 = vpop.f32.mrf.mxu0  ;;  %v8336_v21 = vsel %vm19658_vm13, %v8327_v11, %v17607_v38  ;;  %v8254_v36 = vpack.c.bf16 %v8124_v22, %v8122_v44  ;;  %v8338_v57 = vshrl.u32 %v8253_v2, 16  ;;  %v8341_v50 = vshll.u32 %v8253_v2, 16  ;;  %v11733_v22 = vld [vmem:[#allocation10 + $0x254] ss:$8 sps:$4 sm:$0xff]   ;;  %vm19675_vm13 = vmmov %vm19656_vm1 }
 0x519   : > { %11899 = vmatmul.mubr.msk.bf16.gmra.mxu0 %vm19507_vm7, %v11898_v42  ;;  %v17627_v53 = vadd.f32 %v17439_v23, %v19659_v26  ;;  %v8125_v61 = vsel %vm19661_vm5, %v8085_v5, 0.0  ;;  %v8086_v52 = vmax.f32 %v8046_v59, 0.0  ;;  %v17634_v43 = vadd.f32 %v7966_v24, %v17519_v34  ;;  %8711 = vmatprep.mubr.bf16.mxu1 %v8336_v21  ;;  %v17645_v59 = vpop.f32.mrf.mxu1  ;;  %v19662_v42 = vld [vmem:[#allocation53_spill] sm:$0xff]  ;;  %v19664_v21 = vld [vmem:[#allocation47_spill] sm:$0xff] }
 0x51a   : > { %8165 = vst [vmem:[#allocation2 + $0x18] sm:$0xff] %v8125_v61  ;;  %v7968_v37 = vpop.f32.mrf.mxu0  ;;  %8712 = vmatmul.mubr.bf16.vlgmr.msra.gmra.mxu1 %v8319_v8  ;;  %v8347_v44 = vshrl.u32 %v8254_v36, 16  ;;  %v8350_v13 = vshll.u32 %v8254_v36, 16  ;;  %v8340_v15 = vrot.slane %v8338_v57, 3  ;;  %v8343_v11 = vrot.slane %v8341_v50, 4 }
 0x51b   : > { %v8126_v23 = vsel %vm19661_vm5, %v8086_v52, 0.0  ;;  %v8087_v25 = vmax.f32 %v17634_v43, 0.0  ;;  %v17640_v27 = vadd.f32 %v7968_v37, %v17526_v6  ;;  %9686 = vmatpush1.bf16.msra.mxu1 %v11725_v29  ;;  %v17643_v34 = vadd.f32 %v17476_v7, %v6982_v45  ;;  %v11739_v50 = vld [vmem:[#allocation10 + $0x234] ss:$8 sps:$4 sm:$0xff]   ;;  %vm19697_vm5 = vmmov %vm19656_vm1 }
 0x51c   : > { %8166 = vst [vmem:[#allocation2 + $0xc8] sm:$0xff] %v8126_v23  ;;  %v7970_v2 = vpop.f32.mrf.mxu0  ;;  %9687 = vmatprep.subr.bf16.mxu1 %v11730_v32  ;;  %v8349_v8 = vrot.slane %v8347_v44, 3  ;;  %v8352_v19 = vrot.slane %v8350_v13, 4  ;;  %vm19663_vm7 = vnez %v19662_v42  ;;  %v17655_v7 = vor.u32 %v8343_v11, %v8340_v15  ;;  %v11736_v44 = vld [vmem:[#allocation10 + $0x244] ss:$8 sps:$4 sm:$0xff]   ;;  %v17685_v15 = vpop.f32.mrf.mxu1 }
 0x51d   : > { %v8127_v6 = vsel %vm19663_vm7, %v8087_v25, 0.0  ;;  %v8088_v29 = vmax.f32 %v17640_v27, 0.0  ;;  %v17653_v24 = vadd.f32 %v7970_v2, %v17530_v40  ;;  %v17659_v45 = vadd.f32 %v17504_v35, %v17377_v33  ;;  %v19669_v27 = vld [vmem:[#allocation48_spill] sm:$0xff] }
 0x51e   : > { %v6986_v36 = vadd.f32 %v19664_v21, %v17463_v47  ;;  %8167 = vst [vmem:[#allocation2 + $0x70] sm:$0xff] %v8127_v6  ;;  %v7972_v32 = vpop.f32.mrf.mxu0  ;;  %v11901_v57 = vpack.c.bf16 %v8086_v52, %v8084_v63  ;;  %v17665_v26 = vor.u32 %v8352_v19, %v8349_v8  ;;  %v8255_v28 = vpack.c.bf16 %v8127_v6, %v8125_v61  ;;  %v11731_v63 = vld [vmem:[#allocation10 + $0x250] ss:$8 sps:$4 sm:$0xff]   ;;  %v11734_v42 = vld [vmem:[#allocation10 + $0x240] ss:$8 sps:$4 sm:$0xff]  }
 0x51f   : > { %v8128_v40 = vsel %vm19663_vm7, %v8088_v29, 0.0  ;;  %v8089_v37 = vmax.f32 %v17653_v24, 0.0  ;;  %v8050_v33 = vadd.f32 %v7972_v32, %v17539_v49  ;;  %v11904_v35 = vpack.c.bf16 %v8085_v5, %v8083_v4  ;;  %9688 = vmatpush1.bf16.msra.mxu1 %v11728_v58  ;;  %v19668_v5 = vld [vmem:[#allocation91_spill] sm:$0xff]  ;;  %v19671_v6 = vld [vmem:[#allocation49_spill] sm:$0xff]  ;;  %vm19698_vm7 = vmmov %vm19656_vm1 }
 0x520   : > { %11902 = vmatprep.mubr.msk.bf16.mxu0 %vm19513_vm15, %v11901_v57  ;;  %v8345_v47 = vsel %vm19666_vm4, %v17591_v0, %v17655_v7  ;;  %8168 = vst [vmem:[#allocation2 + $0x20] sm:$0xff] %v8128_v40  ;;  %v7976_v61 = vpop.f32.mrf.mxu0  ;;  %v8354_v52 = vsel %vm19667_vm11, %v17607_v38, %v17665_v26  ;;  %9689 = vmatprep.subr.bf16.mxu1 %v11733_v22  ;;  %v8356_v18 = vshrl.u32 %v8255_v28, 16  ;;  %v8359_v4 = vshll.u32 %v8255_v28, 16  ;;  %v17705_v28 = vpop.f32.mrf.mxu1 }
 0x521   : > { %11905 = vmatmul.mubr.msk.bf16.gmra.mxu0 %vm19513_vm15, %v11904_v35  ;;  %v8256_v49 = vpack.c.bf16 %v8128_v40, %v8126_v23  ;;  %v17683_v13 = vadd.f32 %v17532_v1, %v19668_v5  ;;  %vm19670_vm15 = vnez %v19669_v27  ;;  %v8090_v58 = vmax.f32 %v8050_v33, 0.0  ;;  %8721 = vmatprep.mubr.bf16.mxu1 %v8354_v52  ;;  %v19676_v27 = vld [vmem:[#allocation34_spill] sm:$0xff] }
 0x522   : > { %v8129_v0 = vsel %vm19670_vm15, %v8089_v37, 0.0  ;;  %v17690_v11 = vadd.f32 %v7976_v61, %v17543_v48  ;;  %v7978_v38 = vpop.f32.mrf.mxu0  ;;  %8722 = vmatmul.mubr.bf16.gmra.mxu1 %v8345_v47  ;;  %v8358_v8 = vrot.slane %v8356_v18, 3  ;;  %v8361_v48 = vrot.slane %v8359_v4, 4 }
 0x523   : > { %8169 = vst [vmem:[#allocation2 + $0x128] sm:$0xff] %v8129_v0  ;;  %v8365_v23 = vshrl.u32 %v8256_v49, 16  ;;  %v8368_v2 = vshll.u32 %v8256_v49, 16  ;;  %v17694_v1 = vsel %vm19670_vm15, %v8090_v58, 0.0  ;;  %v17698_v22 = vadd.f32 %v7978_v38, %v17551_v16  ;;  %9690 = vmatpush1.bf16.msra.mxu1 %v11731_v63  ;;  %v19672_v16 = vld [vmem:[#allocation52_spill] sm:$0xff] }
 0x524   : > { %v8091_v19 = vmax.f32 %v17690_v11, 0.0  ;;  %v17702_v24 = vadd.f32 %v17553_v62, %v19671_v6  ;;  %8170 = vst [vmem:[#allocation2 + $0x110] sm:$0xff] %v17694_v1  ;;  %v7980_v21 = vpop.f32.mrf.mxu0  ;;  %9691 = vmatprep.subr.bf16.mxu1 %v11736_v44  ;;  %vm19673_vm10 = vnez %v19672_v16  ;;  %v17715_v62 = vor.u32 %v8361_v48, %v8358_v8 }
 0x525   : > { %v8367_v32 = vrot.slane %v8365_v23, 3  ;;  %v8370_v57 = vrot.slane %v8368_v2, 4  ;;  %v8092_v33 = vmax.f32 %v17698_v22, 0.0  ;;  %v17713_v35 = vadd.f32 %v7980_v21, %v17561_v39 }
 0x526   : > { %v8131_v40 = vsel %vm19673_vm10, %v8091_v19, 0.0  ;;  %v17718_v47 = vadd.f32 %v17578_v60, %v6986_v36  ;;  %v17722_v63 = vadd.f32 %v17595_v14, %v17392_v56  ;;  %v7982_v61 = vpop.f32.mrf.mxu0  ;;  %v11907_v52 = vpack.c.bf16 %v8090_v58, %v8088_v29  ;;  %v11737_v29 = vld [vmem:[#allocation10 + $0x230] ss:$8 sps:$4 sm:$0xff]   ;;  %v17745_v58 = vpop.f32.mrf.mxu1 }
 0x527   : > { %8171 = vst [vmem:[#allocation2 + $0x8] sm:$0xff] %v8131_v40  ;;  %v17726_v44 = vor.u32 %v8370_v57, %v8367_v32  ;;  %v8257_v18 = vpack.c.bf16 %v8131_v40, %v8129_v0  ;;  %v8132_v39 = vsel %vm19673_vm10, %v8092_v33, 0.0  ;;  %v8093_v4 = vmax.f32 %v17713_v35, 0.0  ;;  %9692 = vmatpush1.bf16.msra.mxu1 %v11734_v42  ;;  %v19678_v32 = vld [vmem:[#allocation20_spill] sm:$0xff]  ;;  %vm19705_vm10 = vmmov %vm19656_vm1 }
 0x528   : > { %11908 = vmatprep.mubr.msk.bf16.mxu0 %vm19519_vm0, %v11907_v52  ;;  %v8054_v60 = vadd.f32 %v7982_v61, %v17564_v12  ;;  %v11910_v56 = vpack.c.bf16 %v8089_v37, %v8087_v25  ;;  %v8363_v14 = vsel %vm19656_vm1, %v17655_v7, %v17715_v62  ;;  %8172 = vst [vmem:[#allocation2 + $0x98] sm:$0xff] %v8132_v39  ;;  %v7986_v36 = vpop.f32.mrf.mxu0  ;;  %v11742_v37 = vld [vmem:[#allocation10 + $0x224] ss:$8 sps:$4 sm:$0xff]   ;;  %v11745_v61 = vld [vmem:[#allocation10 + $0x214] ss:$8 sps:$4 sm:$0xff]   ;;  %v7562_v52 = vpop.f32.mrf.mxu1 }
 0x529   : > { %v8372_v5 = vsel %vm19675_vm13, %v17665_v26, %v17726_v44  ;;  %v8258_v12 = vpack.c.bf16 %v8132_v39, %v17694_v1  ;;  %9693 = vmatprep.subr.bf16.mxu1 %v11739_v50  ;;  %v8374_v43 = vshrl.u32 %v8257_v18, 16  ;;  %v8377_v25 = vshll.u32 %v8257_v18, 16 }
 0x52a   : > { %11911 = vmatmul.mubr.msk.bf16.gmra.mxu0 %vm19519_vm0, %v11910_v56  ;;  %v6990_v0 = vadd.f32 %v19676_v27, %v17469_v10  ;;  %v17749_v38 = vsel %vm19446_vm8, %v8093_v4, 0.0  ;;  %v8094_v23 = vmax.f32 %v8054_v60, 0.0  ;;  %v17752_v2 = vadd.f32 %v7986_v36, %v17568_v55  ;;  %8731 = vmatprep.mubr.bf16.mxu1 %v8372_v5  ;;  %v7988_v26 = vpop.f32.mrf.mxu0  ;;  %v11740_v55 = vld [vmem:[#allocation10 + $0x220] ss:$8 sps:$4 sm:$0xff]  }
 0x52b   : > { %8173 = vst [vmem:[#allocation2 + $0xa8] sm:$0xff] %v17749_v38  ;;  %8732 = vmatmul.mubr.bf16.gmra.mxu1 %v8363_v14  ;;  %v8383_v8 = vshrl.u32 %v8258_v12, 16  ;;  %v8386_v22 = vshll.u32 %v8258_v12, 16  ;;  %v8376_v42 = vrot.slane %v8374_v43, 3  ;;  %v17759_v6 = vadd.f32 %v7988_v26, %v17613_v30  ;;  %v19680_v56 = vld [vmem:[#allocation28_spill] sm:$0xff] }
 0x52c   : > { %v8134_v10 = vsel %vm19446_vm8, %v8094_v23, 0.0  ;;  %v8095_v48 = vmax.f32 %v17752_v2, 0.0  ;;  %9694 = vmatpush1.bf16.msra.mxu1 %v11737_v29  ;;  %v8379_v21 = vrot.slane %v8377_v25, 4  ;;  %v17763_v57 = vadd.f32 %v17629_v51, %v19678_v32  ;;  %v7990_v50 = vpop.f32.mrf.mxu0  ;;  %vm19682_vm8 = vmmov %vm19656_vm1  ;;  %v11754_v2 = vld [vmem:[#allocation10 + $0x2e4] ss:$8 sps:$4 sm:$0xff]  }
 0x52d   : > { %8174 = vst [vmem:[#allocation2 + $0x158] sm:$0xff] %v8134_v10  ;;  %v17765_v16 = vpack.c.bf16 %v8134_v10, %v8132_v39  ;;  %v8385_v40 = vrot.slane %v8383_v8, 3  ;;  %v8388_v35 = vrot.slane %v8386_v22, 4  ;;  %9695 = vmatprep.subr.bf16.mxu1 %v11742_v37  ;;  %v8096_v18 = vmax.f32 %v17759_v6, 0.0  ;;  %v11743_v37 = vld [vmem:[#allocation10 + $0x210] ss:$8 sps:$4 sm:$0xff]  }
 0x52e   : > { %v8135_v49 = vsel %vm19287_vm9, %v8095_v48, 0.0  ;;  %v17773_v60 = vadd.f32 %v7990_v50, %v17627_v53  ;;  %v17775_v51 = vor.u32 %v8379_v21, %v8376_v42  ;;  %v17779_v39 = vadd.f32 %v17645_v59, %v19680_v56  ;;  %v7992_v29 = vpop.f32.mrf.mxu0  ;;  %v11746_v50 = vld [vmem:[#allocation10 + $0x200] ss:$8 sps:$4 sm:$0xff]  }
 0x52f   : > { %v17782_v14 = vadd.f32 %v17685_v15, %v6990_v0  ;;  %8175 = vst [vmem:[#allocation2 + $0xd8] sm:$0xff] %v8135_v49  ;;  %v11913_v36 = vpack.c.bf16 %v8094_v23, %v8092_v33  ;;  %v17786_v12 = vor.u32 %v8388_v35, %v8385_v40  ;;  %v8259_v53 = vpack.c.bf16 %v8135_v49, %v17749_v38  ;;  %v7564_v23 = vpop.f32.mrf.mxu1 }
 0x530   : > { %v8136_v43 = vsel %vm19287_vm9, %v8096_v18, 0.0  ;;  %v8097_v59 = vmax.f32 %v17773_v60, 0.0  ;;  %v8058_v15 = vadd.f32 %v7992_v29, %v17643_v34  ;;  %v11916_v25 = vpack.c.bf16 %v8093_v4, %v8091_v19  ;;  %9696 = vmatpush1.bf16.msra.mxu1 %v11740_v55  ;;  %v7996_v27 = vpop.f32.mrf.mxu0  ;;  %vm19683_vm9 = vmmov %vm19656_vm1  ;;  %v11748_v19 = vld [vmem:[#allocation10 + $0x204] ss:$8 sps:$4 sm:$0xff]   ;;  %v11751_v60 = vld [vmem:[#allocation10 + $0x2f4] ss:$8 sps:$4 sm:$0xff]  }
 0x531   : > { %11914 = vmatprep.mubr.msk.bf16.mxu0 %vm19537_vm2, %v11913_v36  ;;  %v8381_v33 = vsel %vm19682_vm8, %v17715_v62, %v17775_v51  ;;  %8176 = vst [vmem:[#allocation2 + $0xe8] sm:$0xff] %v8136_v43  ;;  %v8390_v0 = vsel %vm19683_vm9, %v17726_v44, %v17786_v12  ;;  %v8260_v7 = vpack.c.bf16 %v8136_v43, %v8134_v10  ;;  %v8392_v34 = vshrl.u32 %v8259_v53, 16  ;;  %v7568_v56 = vpop.f32.mrf.mxu1  ;;  %v11757_v29 = vld [vmem:[#allocation10 + $0x2d4] ss:$8 sps:$4 sm:$0xff]  }
 0x532   : > { %11917 = vmatmul.mubr.msk.bf16.gmra.mxu0 %vm19537_vm2, %v11916_v25  ;;  %9697 = vmatprep.subr.bf16.mxu1 %v11745_v61  ;;  %v8395_v11 = vshll.u32 %v8259_v53, 16  ;;  %v17807_v4 = vadd.f32 %v17705_v28, %v17407_v31  ;;  %v8137_v62 = vsel %vm14198_vm12, %v8097_v59, 0.0  ;;  %v8098_v8 = vmax.f32 %v8058_v15, 0.0  ;;  %v7998_v44 = vpop.f32.mrf.mxu0  ;;  %v19686_v53 = vld [vmem:[#allocation26_spill] sm:$0xff] }
 0x533   : > { %v17812_v22 = vadd.f32 %v7996_v27, %v17659_v45  ;;  %8741 = vmatprep.mubr.bf16.mxu1 %v8390_v0  ;;  %8177 = vst [vmem:[#allocation2 + $0x150] sm:$0xff] %v8137_v62  ;;  %v8401_v42 = vshrl.u32 %v8260_v7, 16  ;;  %v8404_v10 = vshll.u32 %v8260_v7, 16  ;;  %v17814_v21 = vpack.c.bf16 %v8137_v62, %v8135_v49 }
 0x534   : > { %8742 = vmatmul.mubr.bf16.gmra.mxu1 %v8381_v33  ;;  %v8394_v55 = vrot.slane %v8392_v34, 3  ;;  %v8138_v31 = vsel %vm14198_vm12, %v8098_v8, 0.0  ;;  %v17820_v32 = vadd.f32 %v7998_v44, %v17683_v13  ;;  %v8397_v45 = vrot.slane %v8395_v11, 4  ;;  %v8000_v35 = vpop.f32.mrf.mxu0  ;;  %vm19688_vm12 = vmmov %vm19656_vm1 }
 0x535   : > { %v8099_v28 = vmax.f32 %v17812_v22, 0.0  ;;  %9698 = vmatpush1.bf16.msra.mxu1 %v11743_v37  ;;  %v6994_v40 = vadd.f32 %v17417_v9, %v17472_v54  ;;  %8178 = vst [vmem:[#allocation2 + $0x78] sm:$0xff] %v8138_v31  ;;  %v17824_v61 = vpack.c.bf16 %v8138_v31, %v8136_v43  ;;  %v8403_v30 = vrot.slane %v8401_v42, 3  ;;  %v11760_v22 = vld [vmem:[#allocation10 + $0x2c4] ss:$8 sps:$4 sm:$0xff]  }
 0x536   : > { %v8406_v49 = vrot.slane %v8404_v10, 4  ;;  %9699 = vmatprep.subr.bf16.mxu1 %v11748_v19  ;;  %v8100_v36 = vmax.f32 %v17820_v32, 0.0  ;;  %v17832_v5 = vadd.f32 %v8000_v35, %v17702_v24  ;;  %v17834_v9 = vor.u32 %v8397_v45, %v8394_v55  ;;  %v8002_v15 = vpop.f32.mrf.mxu0  ;;  %v19690_v19 = vld [vmem:[#allocation81_spill] sm:$0xff] }
 0x537   : > { %v8139_v13 = vsel %vm14248_vm14, %v8099_v28, 0.0  ;;  %v17838_v54 = vadd.f32 %v17745_v58, %v17410_v46  ;;  %v17841_v43 = vadd.f32 %v7562_v52, %v19686_v53  ;;  %v11919_v25 = vpack.c.bf16 %v8098_v8, %v8096_v18  ;;  %v11749_v18 = vld [vmem:[#allocation10 + $0x2f0] ss:$8 sps:$4 sm:$0xff]  }
 0x538   : > { %8179 = vst [vmem:[#allocation2 + $0x90] sm:$0xff] %v8139_v13  ;;  %v17847_v37 = vor.u32 %v8406_v49, %v8403_v30  ;;  %v8261_v24 = vpack.c.bf16 %v8139_v13, %v8137_v62  ;;  %v8140_v46 = vsel %vm14248_vm14, %v8100_v36, 0.0  ;;  %v8101_v58 = vmax.f32 %v17832_v5, 0.0  ;;  %v8006_v0 = vpop.f32.mrf.mxu0  ;;  %vm19689_vm14 = vmmov %vm19656_vm1  ;;  %v19693_v5 = vld [vmem:[#allocation70_spill] sm:$0xff] }
 0x539   : > { %11920 = vmatprep.mubr.msk.bf16.mxu0 %vm19550_vm3, %v11919_v25  ;;  %v8062_v52 = vadd.f32 %v8002_v15, %v17718_v47  ;;  %v11922_v27 = vpack.c.bf16 %v8097_v59, %v8095_v48  ;;  %v8399_v6 = vsel %vm19688_vm12, %v17775_v51, %v17834_v9  ;;  %9700 = vmatpush1.bf16.msra.mxu1 %v11746_v50  ;;  %v7570_v59 = vpop.f32.mrf.mxu1  ;;  %v19692_v50 = vld [vmem:[#allocation21_spill] sm:$0xff]  ;;  %vm19712_vm12 = vmmov %vm19656_vm1 }
 0x53a   : > { %8180 = vst [vmem:[#allocation2] sm:$0xff] %v8140_v46  ;;  %v8408_v7 = vsel %vm19689_vm14, %v17786_v12, %v17847_v37  ;;  %v8262_v34 = vpack.c.bf16 %v8140_v46, %v8138_v31  ;;  %v8410_v47 = vshrl.u32 %v8261_v24, 16  ;;  %v8413_v11 = vshll.u32 %v8261_v24, 16  ;;  %9701 = vmatprep.subr.bf16.mxu1 %v11751_v60  ;;  %v8008_v8 = vpop.f32.mrf.mxu0  ;;  %vm19713_vm14 = vmmov %vm19656_vm1 }
 0x53b   : > { %11923 = vmatmul.mubr.msk.bf16.gmra.mxu0 %vm19550_vm3, %v11922_v27  ;;  %v17865_v48 = vadd.f32 %v7564_v23, %v6994_v40  ;;  %vm19691_vm0 = vnez %v19690_v19  ;;  %v8102_v51 = vmax.f32 %v8062_v52, 0.0  ;;  %v17870_v62 = vadd.f32 %v8006_v0, %v17722_v63  ;;  %8751 = vmatprep.mubr.bf16.mxu1 %v8408_v7  ;;  %v11752_v63 = vld [vmem:[#allocation10 + $0x2e0] ss:$8 sps:$4 sm:$0xff]  }
 0x53c   : > { %v8141_v26 = vsel %vm19691_vm0, %v8101_v58, 0.0  ;;  %8752 = vmatmul.mubr.bf16.gmra.mxu1 %v8399_v6  ;;  %v8419_v12 = vshrl.u32 %v8262_v34, 16  ;;  %v8422_v44 = vshll.u32 %v8262_v34, 16  ;;  %v8412_v10 = vrot.slane %v8410_v47, 3  ;;  %v8010_v35 = vpop.f32.mrf.mxu0  ;;  %v19695_v52 = vld [vmem:[#allocation61_spill] sm:$0xff]  ;;  %v19699_v47 = vld [vmem:[#allocation62_spill] sm:$0xff] }
 0x53d   : > { %8181 = vst [vmem:[#allocation2 + $0x118] sm:$0xff] %v8141_v26  ;;  %v17872_v42 = vpack.c.bf16 %v8141_v26, %v8139_v13  ;;  %v8142_v23 = vsel %vm19691_vm0, %v8102_v51, 0.0  ;;  %v8103_v55 = vmax.f32 %v17870_v62, 0.0  ;;  %v17878_v31 = vadd.f32 %v8008_v8, %v17763_v57  ;;  %9702 = vmatpush2.bf16.msra.mxu1 %v11749_v18  ;;  %v7572_v13 = vpop.f32.mrf.mxu1  ;;  %v11758_v8 = vld [vmem:[#allocation10 + $0x2c0] ss:$8 sps:$4 sm:$0xff]  }
 0x53e   : > { %v8415_v45 = vrot.slane %v8413_v11, 4  ;;  %v17881_v40 = vadd.f32 %v7568_v56, %v19692_v50  ;;  %8182 = vst [vmem:[#allocation2 + $0x130] sm:$0xff] %v8142_v23  ;;  %v17883_v30 = vpack.c.bf16 %v8142_v23, %v8140_v46  ;;  %v8421_v49 = vrot.slane %v8419_v12, 3  ;;  %9703 = vmatprep.subr.bf16.mxu1 %v11754_v2  ;;  %v8012_v24 = vpop.f32.mrf.mxu0  ;;  %v11766_v62 = vld [vmem:[#allocation10 + $0x2a4] ss:$8 sps:$4 sm:$0xff]  }
 0x53f   : > { %v8424_v60 = vrot.slane %v8422_v44, 4  ;;  %vm19694_vm2 = vnez %v19693_v5  ;;  %v8104_v53 = vmax.f32 %v17878_v31, 0.0  ;;  %v17891_v15 = vadd.f32 %v8010_v35, %v17779_v39 }
 0x540   : > { %v8143_v57 = vsel %vm19694_vm2, %v8103_v55, 0.0  ;;  %v17893_v56 = vor.u32 %v8415_v45, %v8412_v10  ;;  %v6998_v25 = vadd.f32 %v17450_v17, %v17481_v41  ;;  %v17898_v33 = vadd.f32 %v7570_v59, %v17429_v3  ;;  %v8016_v18 = vpop.f32.mrf.mxu0  ;;  %v9243_v10 = vld [vmem:[#allocation2 + $0x38] sm:$0xff] }
 0x541   : > { %8183 = vst [vmem:[#allocation2 + $0x50] sm:$0xff] %v8143_v57  ;;  %v11925_v46 = vpack.c.bf16 %v8102_v51, %v8100_v36  ;;  %vm19696_vm3 = vnez %v19695_v52  ;;  %v17904_v27 = vor.u32 %v8424_v60, %v8421_v49  ;;  %v8263_v39 = vpack.c.bf16 %v8143_v57, %v8141_v26  ;;  %9704 = vmatpush2.bf16.msra.mxu1 %v11752_v63  ;;  %v11755_v36 = vld [vmem:[#allocation10 + $0x2d0] ss:$8 sps:$4 sm:$0xff]   ;;  %v11763_v60 = vld [vmem:[#allocation10 + $0x2b4] ss:$8 sps:$4 sm:$0xff]  }
 0x542   : > { %v8144_v6 = vsel %vm19694_vm2, %v8104_v53, 0.0  ;;  %v8105_v17 = vmax.f32 %v17891_v15, 0.0  ;;  %v8066_v3 = vadd.f32 %v8012_v24, %v17782_v14  ;;  %v11928_v41 = vpack.c.bf16 %v8101_v58, %v8099_v28  ;;  %9705 = vmatprep.subr.bf16.mxu1 %v11757_v29  ;;  %v7574_v58 = vpop.f32.mrf.mxu1  ;;  %v8018_v59 = vpop.f32.mrf.mxu0  ;;  %v19701_v29 = vld [vmem:[#allocation75_spill] sm:$0xff]  ;;  %v9241_v15 = vld [vmem:[#allocation2 + $0x48] sm:$0xfe]  ;;  %vm19717_vm2 = vmmov %vm19656_vm1 }
 0x543   : > { %11926 = vmatprep.mubr.msk.bf16.mxu0 %vm19696_vm3, %v11925_v46  ;;  %v8417_v32 = vsel %vm19697_vm5, %v17834_v9, %v17893_v56  ;;  %8184 = vst [vmem:[#allocation2 + $0xb8] sm:$0xff] %v8144_v6  ;;  %v8426_v0 = vsel %vm19698_vm7, %v17847_v37, %v17904_v27  ;;  %v8264_v7 = vpack.c.bf16 %v8144_v6, %v8142_v23  ;;  %v8428_v14 = vshrl.u32 %v8263_v39, 16  ;;  %v9242_v23 = vld [vmem:[#allocation2 + $0x120] sm:$0xff]  ;;  %v19703_v52 = vld [vmem:[#allocation87_spill] sm:$0xff]  ;;  %vm19719_vm5 = vmmov %vm19656_vm1 }
 0x544   : > { %11929 = vmatmul.mubr.msk.bf16.gmra.mxu0 %vm19696_vm3, %v11928_v41  ;;  %v8431_v34 = vshll.u32 %v8263_v39, 16  ;;  %v17923_v28 = vadd.f32 %v7572_v13, %v17442_v20  ;;  %vm19700_vm4 = vnez %v19699_v47  ;;  %v8106_v11 = vmax.f32 %v8066_v3, 0.0  ;;  %8761 = vmatprep.mubr.bf16.mxu1 %v8426_v0  ;;  %v8020_v63 = vpop.f32.mrf.mxu0  ;;  %v9247_v3 = vld [vmem:[#allocation2 + $0x108] sm:$0xff]  ;;  %v11761_v0 = vld [vmem:[#allocation10 + $0x2b0] ss:$8 sps:$4 sm:$0xff]  }
 0x545   : > { %v8145_v9 = vsel %vm19700_vm4, %v8105_v17, 0.0  ;;  %v17928_v2 = vadd.f32 %v8016_v18, %v17807_v4  ;;  %8762 = vmatmul.mubr.bf16.gmra.mxu1 %v8417_v32  ;;  %v8437_v37 = vshrl.u32 %v8264_v7, 16  ;;  %v8440_v19 = vshll.u32 %v8264_v7, 16 }
 0x546   : > { %8185 = vst [vmem:[#allocation2 + $0xe0] sm:$0xff] %v8145_v9  ;;  %v17930_v26 = vpack.c.bf16 %v8145_v9, %v8143_v57  ;;  %v8430_v51 = vrot.slane %v8428_v14, 3  ;;  %v8146_v20 = vsel %vm19700_vm4, %v8106_v11, 0.0  ;;  %v17936_v44 = vadd.f32 %v8018_v59, %v17838_v54  ;;  %9706 = vmatpush2.bf16.msra.mxu1 %v11755_v36  ;;  %v8022_v24 = vpop.f32.mrf.mxu0 }
 0x547   : > { %v8107_v12 = vmax.f32 %v17928_v2, 0.0  ;;  %v8433_v4 = vrot.slane %v8431_v34, 4  ;;  %v17938_v45 = vadd.f32 %v7574_v58, %v6998_v25  ;;  %8186 = vst [vmem:[#allocation2 + $0xa0] sm:$0xff] %v8146_v20  ;;  %v17940_v50 = vpack.c.bf16 %v8146_v20, %v8144_v6  ;;  %9707 = vmatprep.subr.bf16.mxu1 %v11760_v22  ;;  %v9240_v25 = vld [vmem:[#allocation2 + $0x10] sm:$0xfe]  ;;  %v19714_v2 = vld [vmem:[#allocation83_spill] sm:$0xff] }
 0x548   : > { %v8439_v35 = vrot.slane %v8437_v37, 3  ;;  %v8442_v49 = vrot.slane %v8440_v19, 4  ;;  %vm19702_vm11 = vnez %v19701_v29  ;;  %v8108_v13 = vmax.f32 %v17936_v44, 0.0  ;;  %v8026_v7 = vpop.f32.mrf.mxu0 }
 0x549   : > { %v8147_v54 = vsel %vm19702_vm11, %v8107_v12, 0.0  ;;  %v17948_v5 = vadd.f32 %v8020_v63, %v17841_v43  ;;  %v17950_v57 = vor.u32 %v8433_v4, %v8430_v51  ;;  %v11931_v46 = vpack.c.bf16 %v8106_v11, %v8104_v53  ;;  %v11764_v4 = vld [vmem:[#allocation10 + $0x2a0] ss:$8 sps:$4 sm:$0xff]  }
 0x54a   : > { %8187 = vst [vmem:[#allocation2 + $0x88] sm:$0xff] %v8147_v54  ;;  %vm19704_vm15 = vnez %v19703_v52  ;;  %v17956_v39 = vor.u32 %v8442_v49, %v8439_v35  ;;  %v8265_v6 = vpack.c.bf16 %v8147_v54, %v8145_v9  ;;  %v17958_v41 = vpack.c.bf16 %v9243_v10, %v9241_v15  ;;  %9708 = vmatpush2.bf16.msra.mxu1 %v11758_v8  ;;  %v8028_v11 = vpop.f32.mrf.mxu0  ;;  %v9253_v10 = vld [vmem:[#allocation2 + $0x20] sm:$0xff]  ;;  %v19710_v52 = vld [vmem:[#allocation19_spill] sm:$0xff] }
 0x54b   : > { %11932 = vmatprep.mubr.msk.bf16.mxu0 %vm19704_vm15, %v11931_v46  ;;  %v17960_v43 = vpack.c.bf16 %v9242_v23, %v9240_v25  ;;  %v8148_v32 = vsel %vm19702_vm11, %v8108_v13, 0.0  ;;  %v8109_v36 = vmax.f32 %v17948_v5, 0.0  ;;  %v8070_v31 = vadd.f32 %v8022_v24, %v17865_v48  ;;  %9709 = vmatprep.subr.bf16.mxu1 %v11763_v60  ;;  %v11769_v60 = vld [vmem:[#allocation10 + $0x294] ss:$8 sps:$4 sm:$0xff]  }
 0x54c   : > { %v11934_v53 = vpack.c.bf16 %v8105_v17, %v8103_v55  ;;  %v8435_v18 = vsel %vm19705_vm10, %v17893_v56, %v17950_v57  ;;  %8188 = vst [vmem:[#allocation2 + $0x60] sm:$0xff] %v8148_v32  ;;  %v8444_v14 = vsel %vm19656_vm1, %v17904_v27, %v17956_v39  ;;  %v8266_v34 = vpack.c.bf16 %v8148_v32, %v8146_v20  ;;  %v9245_v55 = vld [vmem:[#allocation2 + $0x100] sm:$0xff]  ;;  %v19706_v17 = vld [vmem:[#allocation66_spill] sm:$0xff]  ;;  %v8030_v23 = vpop.f32.mrf.mxu0  ;;  %vm19725_vm10 = vmmov %vm19656_vm1 }
 0x54d   : > { %v8446_v48 = vshrl.u32 %v8265_v6, 16  ;;  %v8449_v22 = vshll.u32 %v8265_v6, 16  ;;  %vm19707_vm13 = vnez %v19706_v17  ;;  %v8110_v47 = vmax.f32 %v8070_v31, 0.0  ;;  %8771 = vmatprep.mubr.bf16.mxu1 %v8444_v14 }
 0x54e   : > { %11935 = vmatmul.mubr.msk.bf16.gmra.mxu0 %vm19704_vm15, %v11934_v53  ;;  %v8149_v58 = vsel %vm19707_vm13, %v8109_v36, 0.0  ;;  %v17981_v56 = vadd.f32 %v8026_v7, %v17881_v40  ;;  %v17983_v9 = vpack.c.bf16 %v9247_v3, %v9245_v55  ;;  %8772 = vmatmul.mubr.bf16.gmra.mxu1 %v8435_v18  ;;  %v8455_v27 = vshrl.u32 %v8266_v34, 16  ;;  %v8032_v24 = vpop.f32.mrf.mxu0  ;;  %vm19724_vm15 = vmmov %vm19656_vm1 }
 0x54f   : > { %8189 = vst [vmem:[#allocation2 + $0x58] sm:$0xff] %v8149_v58  ;;  %v8458_v59 = vshll.u32 %v8266_v34, 16  ;;  %v17985_v37 = vpack.c.bf16 %v8149_v58, %v8147_v54  ;;  %v8448_v19 = vrot.slane %v8446_v48, 3  ;;  %v8150_v51 = vsel %vm19707_vm13, %v8110_v47, 0.0  ;;  %9710 = vmatpush2.bf16.msra.mxu1 %v11761_v0  ;;  %v19708_v54 = vld [vmem:[#allocation54_spill] sm:$0xff] }
 0x550   : > { %v8111_v8 = vmax.f32 %v17981_v56, 0.0  ;;  %v17991_v20 = vadd.f32 %v8028_v11, %v17898_v33  ;;  %v8451_v40 = vrot.slane %v8449_v22, 4  ;;  %8190 = vst [vmem:[#allocation2 + $0x148] sm:$0xff] %v8150_v51  ;;  %v17993_v63 = vpack.c.bf16 %v8150_v51, %v8148_v32  ;;  %9711 = vmatprep.subr.bf16.mxu1 %v11766_v62  ;;  %v11767_v0 = vld [vmem:[#allocation10 + $0x290] ss:$8 sps:$4 sm:$0xff]  }
 0x551   : > { %v8457_v35 = vrot.slane %v8455_v27, 3  ;;  %v8460_v49 = vrot.slane %v8458_v59, 4  ;;  %v9352_v29 = vshll.u32 %v17958_v41, 16  ;;  %vm19709_vm8 = vnez %v19708_v54 }
 0x552   : > { %v8151_v33 = vsel %vm19709_vm8, %v8111_v8, 0.0  ;;  %v8112_v5 = vmax.f32 %v17991_v20, 0.0  ;;  %v18002_v15 = vadd.f32 %v8030_v23, %v17923_v28  ;;  %v18004_v25 = vor.u32 %v8451_v40, %v8448_v19  ;;  %v9256_v19 = vld [vmem:[#allocation2 + $0x8] sm:$0xff] }
 0x553   : > { %8191 = vst [vmem:[#allocation2 + $0x28] sm:$0xff] %v8151_v33  ;;  %v11937_v46 = vpack.c.bf16 %v8110_v47, %v8108_v13  ;;  %vm19711_vm9 = vnez %v19710_v52  ;;  %v18010_v6 = vor.u32 %v8460_v49, %v8457_v35  ;;  %v8267_v3 = vpack.c.bf16 %v8151_v33, %v8149_v58  ;;  %9712 = vmatpush2.bf16.msra.mxu1 %v11764_v4  ;;  %v9246_v58 = vld [vmem:[#allocation2 + $0x80] sm:$0xff]  ;;  %v9244_v4 = vld [vmem:[#allocation2 + $0xf8] sm:$0xff] }
 0x554   : > { %v9357_v32 = vshll.u32 %v17983_v9, 16  ;;  %v9289_v31 = vpack.c.bf16 %v17694_v1, %v9253_v10  ;;  %v8152_v28 = vsel %vm19709_vm8, %v8112_v5, 0.0  ;;  %v8113_v53 = vmax.f32 %v18002_v15, 0.0  ;;  %9713 = vmatprep.subr.bf16.mxu1 %v11769_v60  ;;  %v9251_v10 = vld [vmem:[#allocation2 + $0xc8] sm:$0xff]  ;;  %v9249_v15 = vld [vmem:[#allocation2 + $0xf0] sm:$0xff] }
 0x555   : > { %11938 = vmatprep.mubr.msk.bf16.mxu0 %vm19711_vm9, %v11937_v46  ;;  %v8074_v18 = vadd.f32 %v8032_v24, %v17938_v45  ;;  %v11940_v44 = vpack.c.bf16 %v8109_v36, %v8107_v12  ;;  %v8453_v13 = vsel %vm19712_vm12, %v17950_v57, %v18004_v25  ;;  %v8462_v1 = vsel %vm19713_vm14, %v17956_v39, %v18010_v6  ;;  %v11772_v45 = vld [vmem:[#allocation10 + $0x284] ss:$8 sps:$4 sm:$0xff]   ;;  %v11770_v39 = vld [vmem:[#allocation10 + $0x280] ss:$8 sps:$4 sm:$0xff]  }
 0x556   : > { %v8268_v7 = vpack.c.bf16 %v8152_v28, %v8150_v51  ;;  %v8464_v14 = vshrl.u32 %v8267_v3, 16  ;;  %v8467_v34 = vshll.u32 %v8267_v3, 16  ;;  %vm19715_vm0 = vnez %v19714_v2  ;;  %8781 = vmatprep.mubr.bf16.mxu1 %v8462_v1 }
 0x557   : > { %11941 = vmatmul.mubr.msk.bf16.gmra.mxu0 %vm19711_vm9, %v11940_v44  ;;  %v8153_v12 = vsel %vm19715_vm0, %v8113_v53, 0.0  ;;  %v8114_v36 = vmax.f32 %v8074_v18, 0.0  ;;  %v9354_v48 = vrot.slane %v9352_v29, 1  ;;  %v9389_v22 = vshll.u32 %v9289_v31, 16  ;;  %8782 = vmatmul.mubr.bf16.gmra.mxu1 %v8453_v13 }
 0x558   : > { %8193 = vst [vmem:[#allocation2 + $0x68] sm:$0xff] %v8153_v12  ;;  %v8473_v57 = vshrl.u32 %v8268_v7, 16  ;;  %v8476_v62 = vshll.u32 %v8268_v7, 16  ;;  %v18030_v55 = vpack.c.bf16 %v8153_v12, %v8151_v33  ;;  %v8466_v17 = vrot.slane %v8464_v14, 3  ;;  %9714 = vmatpush2.bf16.msra.mxu1 %v11767_v0 }
 0x559   : > { %v8154_v47 = vsel %vm19715_vm0, %v8114_v36, 0.0  ;;  %v8469_v11 = vrot.slane %v8467_v34, 4  ;;  %v9350_v27 = vshrl.u32 %v17958_v41, 16  ;;  %v18035_v59 = vrot.slane %v9357_v32, 1  ;;  %9715 = vmatprep.subr.bf16.mxu1 %v11772_v45 }
 0x55a   : > { %8194 = vst [vmem:[#allocation2 + $0x140] sm:$0xff] %v8154_v47  ;;  %v18037_v51 = vpack.c.bf16 %v8154_v47, %v8152_v28  ;;  %v8475_v20 = vrot.slane %v8473_v57, 3  ;;  %v8478_v40 = vrot.slane %v8476_v62, 4  ;;  %v18039_v23 = vrot.slane %v9389_v22, 1 }
 0x55b   : > { %v18041_v35 = vor.u32 %v8469_v11, %v8466_v17  ;;  %v9355_v49 = vor.u32 %v9354_v48, %v9350_v27  ;;  %v18043_v60 = vpack.c.bf16 %v9246_v58, %v9244_v4  ;;  %v9340_v41 = vshll.u32 %v17960_v43, 16 }
 0x55c   : > { %v11943_v29 = vpack.c.bf16 %v8114_v36, %v8112_v5  ;;  %v18048_v33 = vor.u32 %v8478_v40, %v8475_v20  ;;  %v9401_v24 = vshrl.u32 %v9289_v31, 16  ;;  %v9405_v46 = vshll.u32 %v17765_v16, 16  ;;  %9716 = vmatpush2.bf16.msra.mxu1 %v11770_v39 }
 0x55d   : > { %v9290_v52 = vpack.c.bf16 %v17749_v38, %v9256_v19  ;;  %v11946_v3 = vpack.c.bf16 %v8113_v53, %v8111_v8  ;;  %v8471_v5 = vsel %vm19717_vm2, %v18004_v25, %v18041_v35  ;;  %vm19718_vm3 = vsmask.f32 7424 }
 0x55e   : > { %11944 = vmatprep.mubr.msk.bf16.mxu0 %vm15249_vm6, %v11943_v29  ;;  %v18061_v32 = vsel %vm19718_vm3, %v9355_v49, %v18035_v59  ;;  %v9338_v31 = vshrl.u32 %v17960_v43, 16  ;;  %v18064_v28 = vpack.c.bf16 %v9251_v10, %v9249_v15  ;;  %v8480_v38 = vsel %vm19719_vm5, %v18010_v6, %v18048_v33  ;;  %vm19721_vm7 = vmmov %vm19718_vm3 }
 0x55f   : > { %11947 = vmatmul.mubr.msk.bf16.gmra.mxu0 %vm15249_vm6, %v11946_v3  ;;  %v9403_v56 = vor.u32 %v9401_v24, %v18039_v23  ;;  %v9407_v8 = vrot.slane %v9405_v46, 1  ;;  %v9397_v53 = vshll.u32 %v9290_v52, 16  ;;  %8791 = vmatprep.mubr.bf16.mxu1 %v8480_v38  ;;  %v8247_v18 = vld [vmem:[#allocation2 + $0x68] sm:$0x7f]  ;;  %v18070_v25 = vrot.slane %v9340_v41, 1  ;;  %vm19720_vm6 = vmmov %vm19718_vm3 }
 0x560   : > { %v9417_v44 = vshrl.u32 %v17765_v16, 16  ;;  %v9421_v13 = vshll.u32 %v17824_v61, 16  ;;  %v9413_v0 = vshll.u32 %v17814_v21, 16  ;;  %8792 = vmatmul.mubr.bf16.gmra.mxu1 %v8471_v5  ;;  %v8269_v1 = vpack.c.bf16 %v8247_v18, %v8247_v18  ;;  %vm19722_vm4 = vmmov %vm19718_vm3 }
 0x561   : > { %v9345_v7 = vshll.u32 %v18043_v60, 16  ;;  %v18077_v6 = vsel %vm19720_vm6, %v9403_v56, %v9407_v8  ;;  %v9409_v14 = vshrl.u32 %v9290_v52, 16  ;;  %v8248_v34 = vld [vmem:[#allocation2 + $0x140] sm:$0x7f]  ;;  %v18079_v45 = vrot.slane %v9397_v53, 1  ;;  %vm19723_vm11 = vmmov %vm19718_vm3 }
 0x562   : > { %v9419_v2 = vor.u32 %v9417_v44, %v9407_v8  ;;  %v9423_v12 = vrot.slane %v9421_v13, 1  ;;  %v9415_v36 = vrot.slane %v9413_v0, 1  ;;  %v8270_v48 = vpack.c.bf16 %v8248_v34, %v8248_v34  ;;  %vm19726_vm1 = vmmov %vm19718_vm3 }
 0x563   : > { %v8482_v16 = vshrl.u32 %v8269_v1, 16  ;;  %v8485_v22 = vshll.u32 %v8269_v1, 16  ;;  %v9373_v57 = vshll.u32 %v18064_v28, 16  ;;  %v9411_v17 = vor.u32 %v9409_v14, %v18079_v45  ;;  %vm19727_vm13 = vmmov %vm19726_vm1  ;;  %v9250_v14 = vld [vmem:[#allocation2 + $0x18] sm:$0xff] }
 0x564   : > { %v18083_v62 = vsel %vm19721_vm7, %v9419_v2, %v9423_v12  ;;  %v9433_v39 = vshrl.u32 %v17824_v61, 16  ;;  %v9437_v58 = vshll.u32 %v17883_v30, 16  ;;  %v8491_v47 = vshrl.u32 %v8270_v48, 16  ;;  %vm19728_vm8 = vmmov %vm19726_vm1 }
 0x565   : > { %v8494_v11 = vshll.u32 %v8270_v48, 16  ;;  %v8484_v27 = vrot.slane %v8482_v16, 3  ;;  %v8487_v19 = vrot.slane %v8485_v22, 4  ;;  %v18089_v20 = vsel %vm19722_vm4, %v9411_v17, %v9415_v36  ;;  %v9248_v22 = vld [vmem:[#allocation2 + $0x138] sm:$0xff]  ;;  %vm19729_vm9 = vmmov %vm19726_vm1 }
 0x566   : > { %v9435_v40 = vor.u32 %v9433_v39, %v9423_v12  ;;  %v9439_v4 = vrot.slane %v9437_v58, 1  ;;  %v9425_v10 = vshrl.u32 %v17814_v21, 16  ;;  %v8493_v49 = vrot.slane %v8491_v47, 3  ;;  %vm19730_vm12 = vmmov %vm19726_vm1 }
 0x567   : > { %v8496_v41 = vrot.slane %v8494_v11, 4  ;;  %v8488_v29 = vor.u32 %v8487_v19, %v8484_v27  ;;  %v9429_v54 = vshll.u32 %v17872_v42, 16  ;;  %v9449_v24 = vshrl.u32 %v17883_v30, 16  ;;  %vm19731_vm14 = vmmov %vm19726_vm1 }
 0x568   : > { %v18094_v61 = vsel %vm19723_vm11, %v9435_v40, %v9439_v4  ;;  %v9427_v15 = vor.u32 %v9425_v10, %v9415_v36  ;;  %v9453_v46 = vshll.u32 %v17940_v50, 16  ;;  %v9441_v21 = vshrl.u32 %v17872_v42, 16  ;;  %vm19732_vm0 = vmmov %vm19726_vm1 }
 0x569   : > { %v8497_v52 = vor.u32 %v8496_v41, %v8493_v49  ;;  %v8489_v3 = vsel %vm19724_vm15, %v18041_v35, %v8488_v29  ;;  %v9431_v5 = vrot.slane %v9429_v54, 1  ;;  %v9451_v38 = vor.u32 %v9449_v24, %v9439_v4  ;;  %vm19733_vm2 = vmmov %vm19732_vm0  ;;  %v9252_v29 = vld [vmem:[#allocation2 + $0x70] sm:$0xff] }
 0x56a   : > { %v9455_v56 = vrot.slane %v9453_v46, 1  ;;  %v9445_v8 = vshll.u32 %v17930_v26, 16  ;;  %v9465_v53 = vshrl.u32 %v17940_v50, 16  ;;  %v9469_v13 = vshll.u32 %v17993_v63, 16  ;;  %vm19734_vm3 = vmmov %vm19732_vm0 }
 0x56b   : > { %v8498_v18 = vsel %vm19725_vm10, %v18048_v33, %v8497_v52  ;;  %v18106_v30 = vsel %vm19726_vm1, %v9427_v15, %v9431_v5  ;;  %v9443_v44 = vor.u32 %v9441_v21, %v9431_v5  ;;  %v9457_v1 = vshrl.u32 %v17930_v26, 16  ;;  %vm19735_vm5 = vmmov %vm19732_vm0 }
 0x56c   : > { %8801 = vmatprep.mubr.bf16.mxu1 %v8498_v18  ;;  %v9456_v35 = vsel %vm19727_vm13, %v9451_v38, %v9455_v56  ;;  %v9447_v0 = vrot.slane %v9445_v8, 1  ;;  %v9467_v42 = vor.u32 %v9465_v53, %v9455_v56  ;;  %v9471_v34 = vrot.slane %v9469_v13, 1  ;;  %vm19736_vm6 = vmmov %vm19732_vm0  ;;  %v9280_v53 = vld [vmem:[#allocation2 + $0xc0] sm:$0x1] }
 0x56d   : > { %8802 = vmatmul.mubr.bf16.gmra.mxu1 %v8489_v3  ;;  %v9461_v50 = vshll.u32 %v17985_v37, 16  ;;  %v9481_v33 = vshrl.u32 %v17993_v63, 16  ;;  %v9485_v2 = vshll.u32 %v18037_v51, 16  ;;  %v9473_v48 = vshrl.u32 %v17985_v37, 16  ;;  %vm19737_vm7 = vmmov %vm19732_vm0 }
 0x56e   : > { %9717 = vmatprep.mubr.bf16.mxu1 %v18061_v32  ;;  %v9448_v12 = vsel %vm19728_vm8, %v9443_v44, %v9447_v0  ;;  %v9459_v36 = vor.u32 %v9457_v1, %v9447_v0  ;;  %v9477_v16 = vshll.u32 %v18030_v55, 16  ;;  %v9472_v26 = vsel %vm19729_vm9, %v9467_v42, %v9471_v34  ;;  %vm19738_vm4 = vmmov %vm19732_vm0 }
 0x56f   : > { %v9463_v17 = vrot.slane %v9461_v50, 1  ;;  %v9483_v39 = vor.u32 %v9481_v33, %v9471_v34  ;;  %v9487_v58 = vrot.slane %v9485_v2, 1  ;;  %v9347_v63 = vrot.slane %v9345_v7, 1  ;;  %vm19739_vm11 = vmmov %vm19732_vm0 }
 0x570   : > { %v9369_v47 = vshrl.u32 %v17983_v9, 16  ;;  %v9286_v11 = vpack.c.bf16 %v9250_v14, %v9248_v22  ;;  %v9479_v32 = vrot.slane %v9477_v16, 1  ;;  %v9375_v27 = vrot.slane %v9373_v57, 1  ;;  %v9254_v57 = vld [vmem:[#allocation2 + $0x128] sm:$0xff]  ;;  %vm19740_vm15 = vmmov %vm19732_vm0 }
 0x571   : > { %v9464_v19 = vsel %vm19730_vm12, %v9459_v36, %v9463_v17  ;;  %v9488_v37 = vsel %vm19731_vm14, %v9483_v39, %v9487_v58  ;;  %v9475_v40 = vor.u32 %v9473_v48, %v9463_v17  ;;  %v9343_v4 = vor.u32 %v18070_v25, %v9338_v31 }
 0x572   : > { %v9371_v10 = vor.u32 %v9369_v47, %v18035_v59  ;;  %v9365_v41 = vshll.u32 %v9286_v11, 16  ;;  %v9361_v54 = vshrl.u32 %v18043_v60, 16  ;;  %v9288_v24 = vpack.c.bf16 %v9254_v57, %v9252_v29 }
 0x573   : > { %v9480_v49 = vsel %vm19732_vm0, %v9475_v40, %v9479_v32  ;;  %v9348_v7 = vsel %vm19733_vm2, %v9343_v4, %v9347_v63  ;;  %v9385_v43 = vshrl.u32 %v18064_v28, 16  ;;  %v9377_v3 = vshrl.u32 %v9286_v11, 16 }
 0x574   : > { %v9376_v9 = vsel %vm19734_vm3, %v9371_v10, %v9375_v27  ;;  %v9367_v15 = vrot.slane %v9365_v41, 1  ;;  %v9363_v31 = vor.u32 %v9361_v54, %v9347_v63  ;;  %v9381_v46 = vshll.u32 %v9288_v24, 16 }
 0x575   : > { %9718 = vmatmul.mubr.bf16.vlgmr.msra.gmra.mxu1 %v9348_v7  ;;  %v9387_v25 = vor.u32 %v9385_v43, %v9375_v27  ;;  %v9393_v60 = vshrl.u32 %v9288_v24, 16  ;;  %v9302_v18 = vpack.c.bf16 %v9280_v53, %v9280_v53  ;;  %v8195_v53 = vld [vmem:[#allocation11] sm:$0x3]  ;;  %vm19752_vm10 = vcmask 1043456  }
 0x576   : > { %9727 = vmatprep.mubr.bf16.mxu1 %v9376_v9  ;;  %v9368_v59 = vsel %vm19735_vm5, %v9363_v31, %v9367_v15  ;;  %v9383_v5 = vrot.slane %v9381_v46, 1  ;;  %v9379_v21 = vor.u32 %v9377_v3, %v9367_v15  ;;  %vm19753_vm1 = vmmov %vm19752_vm10 }
 0x577   : > { %v9392_v52 = vsel %vm19736_vm6, %v9387_v25, %v18039_v23  ;;  %v9281_v23 = vld [vmem:[#allocation2 + $0x30] sm:$0x1]  ;;  %v9493_v13 = vshll.u32 %v9302_v18, 16  ;;  %v19746_v18 = vld [vmem:[#allocation17_spill] sm:$0xff]  ;;  %vm19754_vm13 = vmmov %vm19753_vm1 }
 0x578   : > { %v9384_v38 = vsel %vm19737_vm7, %v9379_v21, %v9383_v5  ;;  %v9395_v28 = vor.u32 %v9393_v60, %v9383_v5  ;;  %v9303_v8 = vpack.c.bf16 %v9281_v23, %v9281_v23  ;;  %vm19755_vm8 = vmmov %vm19753_vm1 }
 0x579   : > { %vm19756_vm9 = vmmov %vm19753_vm1 }
 0x57a   : > { %v9400_v56 = vsel %vm19738_vm4, %v9395_v28, %v18079_v45  ;;  %v9497_v45 = vshrl.u32 %v18037_v51, 16  ;;  %vm19757_vm12 = vmmov %vm19753_vm1 }
 0x57b   : > { %vm19758_vm14 = vmmov %vm19753_vm1 }
 0x57c   : > { %v9499_v44 = vor.u32 %v9497_v45, %v9487_v58  ;;  %vm19759_vm0 = vmmov %vm19753_vm1 }
 0x57d   : > { %9728 = vmatmul.mubr.bf16.gmra.mxu1 %v9368_v59  ;;  %vm19761_vm2 = vmmov %vm19759_vm0 }
 0x57e   : > { %9737 = vmatprep.mubr.bf16.mxu1 %v9392_v52  ;;  %vm19763_vm3 = vmmov %vm19759_vm0 }
 0x57f   : > { %vm19765_vm5 = vmmov %vm19759_vm0 }
 0x580   : > { %vm19766_vm6 = vmmov %vm19759_vm0 }
 0x581   : > { %vm19773_vm7 = vmmov %vm19759_vm0 }
 0x582   : > { %vm19774_vm4 = vmmov %vm19759_vm0 }
 0x585   : > { %9738 = vmatmul.mubr.bf16.gmra.mxu1 %v9384_v38 }
 0x586   : > { %9747 = vmatprep.mubr.bf16.mxu1 %v18077_v6  ;;  %v9501_v6 = vshll.u32 %v9303_v8, 16 }
 0x58d   : > { %9748 = vmatmul.mubr.bf16.gmra.mxu1 %v9400_v56 }
 0x58e   : > { %9757 = vmatprep.mubr.bf16.mxu1 %v18083_v62  ;;  %v9503_v62 = vrot.slane %v9501_v6, 1 }
 0x595   : > { %9758 = vmatmul.mubr.bf16.gmra.mxu1 %v18089_v20  ;;  %v9504_v20 = vsel %vm19739_vm11, %v9499_v44, %v9503_v62  ;;  %v18255_v44 = vrot.slane %v8195_v53, %v19746_v18  ;;  %vm19775_vm11 = vmmov %vm19759_vm0 }
 0x596   : > { %9767 = vmatprep.mubr.bf16.mxu1 %v18094_v61  ;;  %v9489_v61 = vshrl.u32 %v18030_v55, 16 }
 0x59d   : > { %9768 = vmatmul.mubr.bf16.gmra.mxu1 %v18106_v30  ;;  %v9491_v30 = vor.u32 %v9489_v61, %v9479_v32 }
 0x59e   : > { %9777 = vmatprep.mubr.bf16.mxu1 %v9456_v35  ;;  %v9495_v35 = vrot.slane %v9493_v13, 1 }
 0x5a0   : > { %v9496_v0 = vsel %vm19740_vm15, %v9491_v30, %v9495_v35  ;;  %vm19776_vm15 = vmmov %vm19759_vm0 }
 0x5a5   : > { %9778 = vmatmul.mubr.bf16.gmra.mxu1 %v9448_v12 }
 0x5a6   : > { %9787 = vmatprep.mubr.bf16.mxu1 %v9472_v26 }
 0x5ad   : > { %9788 = vmatmul.mubr.bf16.gmra.mxu1 %v9464_v19 }
 0x5ae   : > { %9797 = vmatprep.mubr.bf16.mxu1 %v9488_v37 }
 0x5b5   : > { %9798 = vmatmul.mubr.bf16.gmra.mxu1 %v9480_v49 }
 0x5b6   : > { %9807 = vmatprep.mubr.bf16.mxu1 %v9504_v20  ;;  %v19748_v20 = vld [vmem:[#allocation18_spill] sm:$0xff] }
 0x5b7   : > { %v18262_v61 = vrot.slane %v8195_v53, %v19748_v20 }
 0x5bd   : > { %9808 = vmatmul.mubr.bf16.gmra.mxu1 %v9496_v0 }
 0x5cf   : > { %v18150_v14 = vpop.f32.mrf.mxu0 }
 0x5d1   : > { %v18156_v50 = vpop.f32.mrf.mxu0 }
 0x5d3   : > { %v18162_v55 = vpop.f32.mrf.mxu0 }
 0x5d5   : > { %v18168_v48 = vpop.f32.mrf.mxu0 }
 0x5d9   : > { %v18174_v26 = vpop.f32.mrf.mxu0 }
 0x5da   : > { %v8713_v42 = vpop.f32.mrf.mxu1 }
 0x5db   : > { %v18180_v58 = vpop.f32.mrf.mxu0  ;;  %v8812_v35 = vadd.f32 %v8713_v42, %v18255_v44 }
 0x5dc   : > { %v18148_v1 = vpop.f32.mrf.mxu1 }
 0x5dd   : > { %v18186_v11 = vpop.f32.mrf.mxu0  ;;  %v8813_v18 = vadd.f32 %v18148_v1, %v18262_v61  ;;  %v9200_v53 = vadd.f32 %v18150_v14, %v8812_v35 }
 0x5de   : > { %v18152_v51 = vpop.f32.mrf.mxu1 }
 0x5df   : > { %v18192_v19 = vpop.f32.mrf.mxu0 }
 0x5e0   : > { %v18154_v34 = vpop.f32.mrf.mxu1 }
 0x5e1   : > { %v18198_v4 = vpop.f32.mrf.mxu0  ;;  %v8815_v1 = vadd.f32 %v18154_v34, %v18262_v61 }
 0x5e2   : > { %v18158_v33 = vpop.f32.mrf.mxu1 }
 0x5e3   : > { %v18204_v7 = vpop.f32.mrf.mxu0  ;;  %v9203_v34 = vadd.f32 %v18168_v48, %v8815_v1 }
 0x5e4   : > { %v18160_v2 = vpop.f32.mrf.mxu1 }
 0x5e5   : > { %v18210_v57 = vpop.f32.mrf.mxu0 }
 0x5e6   : > { %v18164_v12 = vpop.f32.mrf.mxu1 }
 0x5e7   : > { %v18216_v15 = vpop.f32.mrf.mxu0 }
 0x5e8   : > { %v18166_v36 = vpop.f32.mrf.mxu1 }
 0x5ea   : > { %v18222_v31 = vpop.f32.mrf.mxu0 }
 0x5eb   : > { %v18170_v16 = vpop.f32.mrf.mxu1 }
 0x5ec   : > { %v18228_v46 = vpop.f32.mrf.mxu0  ;;  %v8820_v48 = vadd.f32 %v18170_v16, %v18255_v44 }
 0x5ed   : > { %v18172_v22 = vpop.f32.mrf.mxu1 }
 0x5ee   : > { %v18234_v5 = vpop.f32.mrf.mxu0 }
 0x5ef   : > { %v18176_v17 = vpop.f32.mrf.mxu1 }
 0x5f0   : > { %v18240_v60 = vpop.f32.mrf.mxu0 }
 0x5f1   : > { %v18178_v39 = vpop.f32.mrf.mxu1 }
 0x5f2   : > { %v18246_v23 = vpop.f32.mrf.mxu0 }
 0x5f4   : > { %v18182_v63 = vpop.f32.mrf.mxu1  ;;  %v18250_v6 = vpop.f32.mrf.mxu0 }
 0x5f6   : > { %v18184_v47 = vpop.f32.mrf.mxu1  ;;  %v18257_v62 = vpop.f32.mrf.mxu0 }
 0x5f8   : > { %v18188_v32 = vpop.f32.mrf.mxu1  ;;  %v18267_v0 = vpop.f32.mrf.mxu0 }
 0x5fa   : > { %v18190_v27 = vpop.f32.mrf.mxu1 }
 0x5fc   : > { %v18194_v37 = vpop.f32.mrf.mxu1 }
 0x5fe   : > { %v18196_v40 = vpop.f32.mrf.mxu1 }
 0x600   : > { %v18200_v10 = vpop.f32.mrf.mxu1 }
 0x602   : > { %v18202_v49 = vpop.f32.mrf.mxu1 }
 0x605   : > { %v18206_v41 = vpop.f32.mrf.mxu1 }
 0x607   : > { %v18208_v9 = vpop.f32.mrf.mxu1 }
 0x609   : > { %v18212_v29 = vpop.f32.mrf.mxu1 }
 0x60b   : > { %v18214_v54 = vpop.f32.mrf.mxu1 }
 0x60e   : > { %v18218_v24 = vpop.f32.mrf.mxu1 }
 0x610   : > { %v18220_v43 = vpop.f32.mrf.mxu1 }
 0x612   : > { %v18224_v25 = vpop.f32.mrf.mxu1 }
 0x614   : > { %v18226_v59 = vpop.f32.mrf.mxu1 }
 0x617   : > { %v18230_v52 = vpop.f32.mrf.mxu1 }
 0x619   : > { %v18232_v3 = vpop.f32.mrf.mxu1 }
 0x61b   : > { %v18236_v21 = vpop.f32.mrf.mxu1 }
 0x61d   : > { %v18238_v38 = vpop.f32.mrf.mxu1 }
 0x61e   : > { %19741 = vst [vmem:[#allocation35_spill] sm:$0xff] %v18238_v38 }
 0x620   : > { %v18242_v28 = vpop.f32.mrf.mxu1 }
 0x621   : > { %19742 = vst [vmem:[#allocation98_spill] sm:$0xff] %v18242_v28  ;;  %v8816_v28 = vadd.f32 %v18158_v33, %v18255_v44 }
 0x622   : > { %v18244_v56 = vpop.f32.mrf.mxu1 }
 0x623   : > { %19743 = vst [vmem:[#allocation33_spill] sm:$0xff] %v18244_v56  ;;  %v18278_v56 = vpop.f32.mrf.mxu0  ;;  %v9204_v33 = vadd.f32 %v18174_v26, %v8816_v28  ;;  %v8822_v28 = vadd.f32 %v18176_v17, %v18255_v44 }
 0x624   : > { %v18248_v8 = vpop.f32.mrf.mxu1 }
 0x625   : > { %19744 = vst [vmem:[#allocation89_spill] sm:$0xff] %v18248_v8 }
 0x626   : > { %v18252_v45 = vpop.f32.mrf.mxu1 }
 0x627   : > { %19745 = vst [vmem:[#allocation37_spill] sm:$0xff] %v18252_v45 }
 0x62d   : > { %v18259_v13 = vpop.f32.mrf.mxu1 }
 0x62e   : > { %19747 = vst [vmem:[#allocation99_spill] sm:$0xff] %v18259_v13  ;;  %v8814_v13 = vadd.f32 %v18152_v51, %v18255_v44 }
 0x62f   : > { %v18264_v30 = vpop.f32.mrf.mxu1 }
 0x630   : > { %19749 = vst [vmem:[#allocation100_spill] sm:$0xff] %v18264_v30  ;;  %v9202_v35 = vadd.f32 %v18162_v55, %v8814_v13  ;;  %v8819_v13 = vadd.f32 %v18166_v36, %v18262_v61 }
 0x631   : > { %v18269_v8 = vpop.f32.mrf.mxu1 }
 0x632   : > { %19750 = vst [vmem:[#allocation101_spill] sm:$0xff] %v18269_v8  ;;  %v18289_v8 = vpop.f32.mrf.mxu0  ;;  %v9207_v26 = vadd.f32 %v18192_v19, %v8819_v13 }
 0x633   : > { %v18274_v45 = vpop.f32.mrf.mxu1 }
 0x634   : > { %19751 = vst [vmem:[#allocation27_spill] sm:$0xff] %v18274_v45  ;;  %v9201_v45 = vadd.f32 %v18156_v50, %v8813_v18  ;;  %v8817_v50 = vadd.f32 %v18160_v2, %v18262_v61  ;;  %v8818_v18 = vadd.f32 %v18164_v12, %v18255_v44 }
 0x635   : > { %v9719_v42 = vpop.f32.mrf.mxu1 }
 0x636   : > { %v9818_v20 = vadd.f32 %v9719_v42, %v9200_v53  ;;  %v18301_v42 = vpop.f32.mrf.mxu0  ;;  %v9205_v12 = vadd.f32 %v18180_v58, %v8817_v50 }
 0x637   : > { %v9721_v51 = vpop.f32.mrf.mxu1 }
 0x638   : > { %9858 = vst [vmem:[%s18284_s14] sm:$0xff] %v9818_v20  ;;  %v9819_v14 = vadd.f32 %v9721_v51, %v9201_v45  ;;  %v18310_v1 = vpop.f32.mrf.mxu0  ;;  %v9206_v20 = vadd.f32 %v18186_v11, %v8818_v18  ;;  %v9208_v11 = vadd.f32 %v18198_v4, %v8820_v48  ;;  %v8824_v4 = vadd.f32 %v18182_v63, %v18255_v44 }
 0x639   : > { %v9723_v30 = vpop.f32.mrf.mxu1 }
 0x63a   : > { %9859 = vst [vmem:[%s18284_s14 + $0x8] sm:$0xff] %v9819_v14  ;;  %v9820_v38 = vadd.f32 %v9723_v30, %v9202_v35  ;;  %v18319_v35 = vpop.f32.mrf.mxu0 }
 0x63b   : > { %v9725_v53 = vpop.f32.mrf.mxu1 }
 0x63c   : > { %9860 = vst [vmem:[%s18284_s14 + $0x10] sm:$0xff] %v9820_v38  ;;  %v9821_v45 = vadd.f32 %v9725_v53, %v9203_v34  ;;  %v8821_v38 = vadd.f32 %v18172_v22, %v18262_v61  ;;  %v8823_v22 = vadd.f32 %v18178_v39, %v18262_v61 }
 0x63d   : > { %v9729_v55 = vpop.f32.mrf.mxu1 }
 0x63e   : > { %9861 = vst [vmem:[%s18284_s14 + $0x18] sm:$0xff] %v9821_v45  ;;  %v9822_v2 = vadd.f32 %v9729_v55, %v9204_v33  ;;  %v9209_v18 = vadd.f32 %v18204_v7, %v8821_v38  ;;  %v9210_v33 = vadd.f32 %v18210_v57, %v8822_v28  ;;  %v9212_v28 = vadd.f32 %v18222_v31, %v8824_v4 }
 0x63f   : > { %v9731_v30 = vpop.f32.mrf.mxu1  ;;  %v8832_v4 = vadd.f32 %v18206_v41, %v18255_v44 }
 0x640   : > { %v9823_v14 = vadd.f32 %v9731_v30, %v9205_v12  ;;  %v9868_v34 = vrot.slane %v9822_v2, 4  ;;  %v18330_v30 = vpop.f32.mrf.mxu0  ;;  %v9211_v12 = vadd.f32 %v18216_v15, %v8823_v22 }
 0x641   : > { %v9733_v51 = vpop.f32.mrf.mxu1 }
 0x642   : > { %v9824_v36 = vadd.f32 %v9733_v51, %v9206_v20  ;;  %v9871_v45 = vrot.slane %v9823_v14, 4  ;;  %v8825_v20 = vadd.f32 %v18184_v47, %v18262_v61  ;;  %v18339_v14 = vpop.f32.mrf.mxu0  ;;  %v8826_v47 = vadd.f32 %v18188_v32, %v18255_v44 }
 0x643   : > { %v9735_v16 = vpop.f32.mrf.mxu1 }
 0x644   : > { %v9869_v53 = vrot.slane %v9824_v36, 4  ;;  %v9825_v58 = vadd.f32 %v9735_v16, %v9207_v26  ;;  %v18353_v22 = vpop.f32.mrf.mxu0  ;;  %v9214_v32 = vadd.f32 %v18234_v5, %v8826_v47 }
 0x645   : > { %v9739_v50 = vpop.f32.mrf.mxu1 }
 0x646   : > { %v9870_v19 = vsel %vm19752_vm10, %v9868_v34, %v9869_v53  ;;  %v9872_v55 = vrot.slane %v9825_v58, 4  ;;  %v9826_v17 = vadd.f32 %v9739_v50, %v9208_v11  ;;  %v9213_v34 = vadd.f32 %v18228_v46, %v8825_v20 }
 0x647   : > { %10884 = vst [vmem:[%s18284_s14 + $0x20] sm:$0xff] %v9870_v19  ;;  %v9741_v13 = vpop.f32.mrf.mxu1  ;;  %v8827_v58 = vadd.f32 %v18190_v27, %v18262_v61  ;;  %v8828_v11 = vadd.f32 %v18194_v37, %v18255_v44  ;;  %v8830_v46 = vadd.f32 %v18200_v10, %v18255_v44  ;;  %v18362_v19 = vpop.f32.mrf.mxu0 }
 0x648   : > { %v9873_v39 = vsel %vm19753_vm1, %v9871_v45, %v9872_v55  ;;  %v9874_v48 = vrot.slane %v9826_v17, 4  ;;  %v9827_v7 = vadd.f32 %v9741_v13, %v9209_v18  ;;  %v8829_v18 = vadd.f32 %v18196_v40, %v18262_v61 }
 0x649   : > { %10885 = vst [vmem:[%s18284_s14 + $0x28] sm:$0xff] %v9873_v39  ;;  %v9743_v2 = vpop.f32.mrf.mxu1  ;;  %v9215_v37 = vadd.f32 %v18240_v60, %v8827_v58  ;;  %v8831_v17 = vadd.f32 %v18202_v49, %v18262_v61  ;;  %v18371_v39 = vpop.f32.mrf.mxu0  ;;  %v8833_v49 = vadd.f32 %v18208_v9, %v18262_v61 }
 0x64a   : > { %v9875_v57 = vsel %vm19754_vm13, %v9869_v53, %v9874_v48  ;;  %v9876_v38 = vrot.slane %v9827_v7, 4  ;;  %v9828_v63 = vadd.f32 %v9743_v2, %v9210_v33  ;;  %v9217_v5 = vadd.f32 %v18250_v6, %v8829_v18 }
 0x64b   : > { %10886 = vst [vmem:[%s18284_s14 + $0x30] sm:$0xff] %v9875_v57  ;;  %v9745_v51 = vpop.f32.mrf.mxu1 }
 0x64c   : > { %v9877_v36 = vsel %vm19755_vm8, %v9872_v55, %v9876_v38  ;;  %10888 = vst [vmem:[%s18284_s14 + $0x40] sm:$0xff] %v9828_v63  ;;  %v9829_v26 = vadd.f32 %v9745_v51, %v9211_v12  ;;  %v9216_v55 = vadd.f32 %v18246_v23, %v8828_v11  ;;  %v9218_v23 = vadd.f32 %v18257_v62, %v8830_v46  ;;  %v9175_v51 = vpop.f32.mrf.mxu0 }
 0x64d   : > { %10887 = vst [vmem:[%s18284_s14 + $0x38] sm:$0xff] %v9877_v36  ;;  %v9749_v15 = vpop.f32.mrf.mxu1  ;;  %v9219_v12 = vadd.f32 %v18267_v0, %v8831_v17  ;;  %v9220_v63 = vadd.f32 %v18278_v56, %v8832_v4  ;;  %v8834_v62 = vadd.f32 %v18212_v29, %v18255_v44 }
 0x64e   : > { %10889 = vst [vmem:[%s18284_s14 + $0x48] sm:$0xff] %v9829_v26  ;;  %v9830_v16 = vadd.f32 %v9749_v15, %v9212_v28  ;;  %v9221_v28 = vadd.f32 %v18289_v8, %v8833_v49  ;;  %v8835_v15 = vadd.f32 %v18214_v54, %v18262_v61  ;;  %v8836_v54 = vadd.f32 %v18218_v24, %v18255_v44 }
 0x64f   : > { %v9751_v53 = vpop.f32.mrf.mxu1  ;;  %v9222_v11 = vadd.f32 %v18301_v42, %v8834_v62 }
 0x650   : > { %10890 = vst [vmem:[%s18284_s14 + $0x50] sm:$0xff] %v9830_v16  ;;  %v9831_v31 = vadd.f32 %v9751_v53, %v9213_v34  ;;  %v9177_v34 = vpop.f32.mrf.mxu0  ;;  %v9224_v24 = vadd.f32 %v18319_v35, %v8836_v54  ;;  %v8842_v35 = vadd.f32 %v18236_v21, %v18255_v44 }
 0x651   : > { %v9753_v50 = vpop.f32.mrf.mxu1 }
 0x652   : > { %10891 = vst [vmem:[%s18284_s14 + $0x58] sm:$0xff] %v9831_v31  ;;  %v9832_v27 = vadd.f32 %v9753_v50, %v9214_v32  ;;  %v9223_v50 = vadd.f32 %v18310_v1, %v8835_v15  ;;  %v8837_v32 = vadd.f32 %v18220_v43, %v18262_v61  ;;  %v9181_v46 = vpop.f32.mrf.mxu0  ;;  %v8840_v1 = vadd.f32 %v18230_v52, %v18255_v44 }
 0x653   : > { %v9755_v45 = vpop.f32.mrf.mxu1 }
 0x654   : > { %v9833_v33 = vadd.f32 %v9755_v45, %v9215_v37  ;;  %v9898_v48 = vrot.slane %v9832_v27, 4  ;;  %v8838_v45 = vadd.f32 %v18224_v25, %v18255_v44  ;;  %v8839_v37 = vadd.f32 %v18226_v59, %v18262_v61  ;;  %v9183_v17 = vpop.f32.mrf.mxu0 }
 0x655   : > { %v9759_v13 = vpop.f32.mrf.mxu1  ;;  %v9225_v43 = vadd.f32 %v18330_v30, %v8837_v32  ;;  %v9228_v30 = vadd.f32 %v18362_v19, %v8840_v1  ;;  %v19769_v32 = vld [vmem:[#allocation99_spill] sm:$0xff] }
 0x656   : > { %v9834_v40 = vadd.f32 %v9759_v13, %v9216_v55  ;;  %v9901_v20 = vrot.slane %v9833_v33, 4  ;;  %v9226_v25 = vadd.f32 %v18339_v14, %v8838_v45  ;;  %v8841_v33 = vadd.f32 %v18232_v3, %v18262_v61  ;;  %v19760_v14 = vld [vmem:[#allocation35_spill] sm:$0xff] }
 0x657   : > { %v9761_v10 = vpop.f32.mrf.mxu1  ;;  %v9227_v59 = vadd.f32 %v18353_v22, %v8839_v37  ;;  %v8843_v3 = vadd.f32 %v19760_v14, %v18262_v61  ;;  %v8848_v45 = vadd.f32 %v19769_v32, %v18255_v44 }
 0x658   : > { %v9899_v7 = vrot.slane %v9834_v40, 4  ;;  %v9835_v60 = vadd.f32 %v9761_v10, %v9217_v5  ;;  %v9229_v49 = vadd.f32 %v18371_v39, %v8841_v33 }
 0x659   : > { %v9763_v2 = vpop.f32.mrf.mxu1 }
 0x65a   : > { %v9900_v6 = vsel %vm19756_vm9, %v9898_v48, %v9899_v7  ;;  %v9902_v57 = vrot.slane %v9835_v60, 4  ;;  %v9836_v41 = vadd.f32 %v9763_v2, %v9218_v23  ;;  %v9185_v48 = vpop.f32.mrf.mxu0 }
 0x65b   : > { %10892 = vst [vmem:[%s18284_s14 + $0x60] sm:$0xff] %v9900_v6  ;;  %v9765_v38 = vpop.f32.mrf.mxu1  ;;  %v9230_v6 = vadd.f32 %v9175_v51, %v8842_v35 }
 0x65c   : > { %v9903_v9 = vsel %vm19757_vm12, %v9901_v20, %v9902_v57  ;;  %v9904_v36 = vrot.slane %v9836_v41, 4  ;;  %v9837_v0 = vadd.f32 %v9765_v38, %v9219_v12  ;;  %v19762_v41 = vld [vmem:[#allocation98_spill] sm:$0xff] }
 0x65d   : > { %10893 = vst [vmem:[%s18284_s14 + $0x68] sm:$0xff] %v9903_v9  ;;  %v9769_v26 = vpop.f32.mrf.mxu1  ;;  %v8844_v19 = vadd.f32 %v19762_v41, %v18255_v44  ;;  %v9231_v9 = vadd.f32 %v9177_v34, %v8843_v3  ;;  %v19767_v34 = vld [vmem:[#allocation89_spill] sm:$0xff] }
 0x65e   : > { %v9905_v56 = vsel %vm19758_vm14, %v9899_v7, %v9904_v36  ;;  %v9906_v47 = vrot.slane %v9837_v0, 4  ;;  %v9838_v16 = vadd.f32 %v9769_v26, %v9220_v63  ;;  %v19764_v36 = vld [vmem:[#allocation33_spill] sm:$0xff] }
 0x65f   : > { %10894 = vst [vmem:[%s18284_s14 + $0x70] sm:$0xff] %v9905_v56  ;;  %v9771_v29 = vpop.f32.mrf.mxu1  ;;  %v8845_v0 = vadd.f32 %v19764_v36, %v18262_v61 }
 0x660   : > { %v9907_v53 = vsel %vm19759_vm0, %v9902_v57, %v9906_v47  ;;  %10896 = vst [vmem:[%s18284_s14 + $0x80] sm:$0xff] %v9838_v16  ;;  %v9839_v58 = vadd.f32 %v9771_v29, %v9221_v28  ;;  %v9187_v57 = vpop.f32.mrf.mxu0  ;;  %v9232_v29 = vadd.f32 %v9181_v46, %v8844_v19  ;;  %v19770_v46 = vld [vmem:[#allocation100_spill] sm:$0xff] }
 0x661   : > { %10895 = vst [vmem:[%s18284_s14 + $0x78] sm:$0xff] %v9907_v53  ;;  %v9773_v8 = vpop.f32.mrf.mxu1  ;;  %v8849_v37 = vadd.f32 %v19770_v46, %v18262_v61 }
 0x662   : > { %10897 = vst [vmem:[%s18284_s14 + $0x88] sm:$0xff] %v9839_v58  ;;  %v9840_v31 = vadd.f32 %v9773_v8, %v9222_v11  ;;  %v9191_v56 = vpop.f32.mrf.mxu0  ;;  %v8846_v58 = vadd.f32 %v19767_v34, %v18255_v44  ;;  %v9233_v8 = vadd.f32 %v9183_v17, %v8845_v0  ;;  %v19771_v17 = vld [vmem:[#allocation101_spill] sm:$0xff] }
 0x663   : > { %v9775_v18 = vpop.f32.mrf.mxu1  ;;  %v9236_v33 = vadd.f32 %v9191_v56, %v8848_v45 }
 0x664   : > { %10898 = vst [vmem:[%s18284_s14 + $0x90] sm:$0xff] %v9840_v31  ;;  %v9841_v27 = vadd.f32 %v9775_v18, %v9223_v50  ;;  %v9193_v31 = vpop.f32.mrf.mxu0  ;;  %v19768_v50 = vld [vmem:[#allocation37_spill] sm:$0xff] }
 0x665   : > { %v9779_v42 = vpop.f32.mrf.mxu1  ;;  %v8847_v18 = vadd.f32 %v19768_v50, %v18262_v61 }
 0x666   : > { %10899 = vst [vmem:[%s18284_s14 + $0x98] sm:$0xff] %v9841_v27  ;;  %v9842_v13 = vadd.f32 %v9779_v42, %v9224_v24  ;;  %v9234_v24 = vadd.f32 %v9185_v48, %v8846_v58  ;;  %v9195_v1 = vpop.f32.mrf.mxu0 }
 0x667   : > { %v9781_v55 = vpop.f32.mrf.mxu1 }
 0x668   : > { %v9843_v5 = vadd.f32 %v9781_v55, %v9225_v43  ;;  %v9928_v52 = vrot.slane %v9842_v13, 4  ;;  %v8850_v13 = vadd.f32 %v19771_v17, %v18255_v44 }
 0x669   : > { %v9783_v40 = vpop.f32.mrf.mxu1 }
 0x66a   : > { %v9844_v4 = vadd.f32 %v9783_v40, %v9226_v25  ;;  %v9931_v2 = vrot.slane %v9843_v5, 4  ;;  %v9235_v25 = vadd.f32 %v9187_v57, %v8847_v18  ;;  %v19772_v40 = vld [vmem:[#allocation27_spill] sm:$0xff]  ;;  %v9238_v14 = vadd.f32 %v9195_v1, %v8850_v13 }
 0x66b   : > { %v9785_v10 = vpop.f32.mrf.mxu1  ;;  %v8851_v5 = vadd.f32 %v19772_v40, %v18262_v61 }
 0x66c   : > { %v9929_v7 = vrot.slane %v9844_v4, 4  ;;  %v9845_v60 = vadd.f32 %v9785_v10, %v9227_v59  ;;  %v9237_v10 = vadd.f32 %v9193_v31, %v8849_v37 }
 0x66d   : > { %v9789_v23 = vpop.f32.mrf.mxu1 }
 0x66e   : > { %v9930_v22 = vsel %vm19761_vm2, %v9928_v52, %v9929_v7  ;;  %v9932_v12 = vrot.slane %v9845_v60, 4  ;;  %v9846_v20 = vadd.f32 %v9789_v23, %v9228_v30 }
 0x66f   : > { %10900 = vst [vmem:[%s18284_s14 + $0xa0] sm:$0xff] %v9930_v22  ;;  %v9791_v21 = vpop.f32.mrf.mxu1 }
 0x670   : > { %v9933_v38 = vsel %vm19763_vm3, %v9931_v2, %v9932_v12  ;;  %v9934_v63 = vrot.slane %v9846_v20, 4  ;;  %v9847_v62 = vadd.f32 %v9791_v21, %v9229_v49 }
 0x671   : > { %10901 = vst [vmem:[%s18284_s14 + $0xa8] sm:$0xff] %v9933_v38  ;;  %v9793_v39 = vpop.f32.mrf.mxu1 }
 0x672   : > { %v9935_v26 = vsel %vm19765_vm5, %v9929_v7, %v9934_v63  ;;  %v9936_v51 = vrot.slane %v9847_v62, 4  ;;  %v9848_v28 = vadd.f32 %v9793_v39, %v9230_v6  ;;  %v9197_v7 = vpop.f32.mrf.mxu0 }
 0x673   : > { %10902 = vst [vmem:[%s18284_s14 + $0xb0] sm:$0xff] %v9935_v26  ;;  %v9795_v15 = vpop.f32.mrf.mxu1  ;;  %v9239_v3 = vadd.f32 %v9197_v7, %v8851_v5 }
 0x674   : > { %v9937_v47 = vsel %vm19766_vm6, %v9932_v12, %v9936_v51  ;;  %10904 = vst [vmem:[%s18284_s14 + $0xc0] sm:$0xff] %v9848_v28  ;;  %v9849_v16 = vadd.f32 %v9795_v15, %v9231_v9 }
 0x675   : > { %10903 = vst [vmem:[%s18284_s14 + $0xb8] sm:$0xff] %v9937_v47  ;;  %v9799_v53 = vpop.f32.mrf.mxu1 }
 0x676   : > { %10905 = vst [vmem:[%s18284_s14 + $0xc8] sm:$0xff] %v9849_v16  ;;  %v9850_v11 = vadd.f32 %v9799_v53, %v9232_v29 }
 0x677   : > { %v9801_v54 = vpop.f32.mrf.mxu1 }
 0x678   : > { %10906 = vst [vmem:[%s18284_s14 + $0xd0] sm:$0xff] %v9850_v11  ;;  %v9851_v27 = vadd.f32 %v9801_v54, %v9233_v8 }
 0x679   : > { %v9803_v42 = vpop.f32.mrf.mxu1 }
 0x67a   : > { %10907 = vst [vmem:[%s18284_s14 + $0xd8] sm:$0xff] %v9851_v27  ;;  %v9852_v43 = vadd.f32 %v9803_v42, %v9234_v24 }
 0x67b   : > { %v9805_v55 = vpop.f32.mrf.mxu1 }
 0x67c   : > { %v9853_v59 = vadd.f32 %v9805_v55, %v9235_v25  ;;  %v9958_v48 = vrot.slane %v9852_v43, 4 }
 0x67d   : > { %v9809_v4 = vpop.f32.mrf.mxu1 }
 0x67e   : > { %v9854_v35 = vadd.f32 %v9809_v4, %v9236_v33  ;;  %v9961_v23 = vrot.slane %v9853_v59, 4 }
 0x67f   : > { %v9811_v52 = vpop.f32.mrf.mxu1 }
 0x680   : > { %v9959_v60 = vrot.slane %v9854_v35, 4  ;;  %v9855_v30 = vadd.f32 %v9811_v52, %v9237_v10 }
 0x681   : > { %v9813_v44 = vpop.f32.mrf.mxu1 }
 0x682   : > { %v9960_v49 = vsel %vm19773_vm7, %v9958_v48, %v9959_v60  ;;  %v9962_v61 = vrot.slane %v9855_v30, 4  ;;  %v9856_v2 = vadd.f32 %v9813_v44, %v9238_v14 }
 0x683   : > { %10908 = vst [vmem:[%s18284_s14 + $0xe0] sm:$0xff] %v9960_v49  ;;  %v9815_v22 = vpop.f32.mrf.mxu1 }
 0x684   : > { %v9963_v12 = vsel %vm19774_vm4, %v9961_v23, %v9962_v61  ;;  %v9964_v20 = vrot.slane %v9856_v2, 4  ;;  %v9857_v21 = vadd.f32 %v9815_v22, %v9239_v3 }
 0x685   : > { %10909 = vst [vmem:[%s18284_s14 + $0xe8] sm:$0xff] %v9963_v12 }
 0x686   : > { %v9965_v6 = vsel %vm19775_vm11, %v9959_v60, %v9964_v20  ;;  %v9966_v57 = vrot.slane %v9857_v21, 4 }
 0x687   : > { %10910 = vst [vmem:[%s18284_s14 + $0xf0] sm:$0xff] %v9965_v6 }
 0x688   : > { %v9967_v41 = vsel %vm19776_vm15, %v9962_v61, %v9966_v57 }
 0x689   : > { %10911 = vst [vmem:[%s18284_s14 + $0xf8] sm:$0xff] %v9967_v41 }
 0x68a PF: > { %s23_s30 = sadd.s32 1, %s12126_s30  }
 0x68b   : > { %p20_p6 = scmp.ge.s32.totalorder %s23_s30, 4  }
 0x68d   :  { %22 = sbr.rel (!%p20_p6) target bundleno = 4 (0x4), region = 139 }
 0x692   :  { %10001 = vsyncpa [#allocation4], 1 }
 0x693   :  { %10003 = vsyncpa [#allocation4 + $0x1], 1 }
 0x694   :  { %10004 = vsyncpa [#allocation6], 1 }
 0x695   :  { %10005 = vsyncpa [#allocation9], 1 }
 0x696   :  { %10006 = vsyncpa [#allocation12], 1 }

</bundles_post_ra>
